<compile_context>
chip_gen: v7x
topology: tpu7x:2x2x1
jax: 0.10.0
libtpu: 0.0.40
codegen_flags: <defaults>
</compile_context>

<pallas_src>
import functools

import jax
import jax.numpy as jnp
from jax.experimental import pallas as pl
from jax.experimental.pallas import tpu as pltpu


# ------------------------------- helpers -------------------------------------

def _round_up(x, m):
    return (x + m - 1) // m * m


def _tile_and_pad(dim, max_tile, align):
    """Pick a tile (multiple of `align`, <= max_tile-ish) and the padded dim."""
    t = min(max_tile, _round_up(dim, align))
    t = _round_up(t, align)
    return _round_up(dim, t), t


def _pad_axes(x, targets):
    pads = [(0, 0)] * x.ndim
    need = False
    for ax, tgt in targets.items():
        if x.shape[ax] != tgt:
            pads[ax] = (0, tgt - x.shape[ax])
            need = True
    return jnp.pad(x, pads) if need else x


def _im2col(x_nhwc, kh, kw, stride, pad):
    """(B,H,W,C) -> patches (B, Ho*Wo, kh*kw*C), plus (Ho, Wo)."""
    xp = jnp.pad(x_nhwc, ((0, 0), (pad, pad), (pad, pad), (0, 0)))
    B, Hp, Wp, C = xp.shape
    Ho = (Hp - kh) // stride + 1
    Wo = (Wp - kw) // stride + 1
    cols = []
    for i in range(kh):
        for j in range(kw):
            cols.append(xp[:, i:i + Ho * stride:stride, j:j + Wo * stride:stride, :])
    patches = jnp.stack(cols, axis=3)                    # (B, Ho, Wo, kh*kw, C)
    return patches.reshape(B, Ho * Wo, kh * kw * C), Ho, Wo


# ----------------------------- Pallas kernels --------------------------------

def _conv_gemm_kernel(x_ref, w_ref, b_ref, y_ref, sum_ref, sq_ref,
                      acc_ref, ssum_ref, ssq_ref,
                      *, add_bias, fuse_lrelu, slope):
    """Tiled matmul y = x @ w (+ bias, + LeakyReLU) with fused per-channel
    sum / sum-of-squares (InstanceNorm statistics) accumulated over M tiles.

    grid = (batch, n_tiles, m_tiles, k_tiles); K is the innermost axis.
    """
    m = pl.program_id(2)
    k = pl.program_id(3)
    nm = pl.num_programs(2)
    nk = pl.num_programs(3)

    @pl.when(k == 0)
    def _():
        acc_ref[...] = jnp.zeros_like(acc_ref)

    @pl.when((m == 0) & (k == 0))
    def _():
        ssum_ref[...] = jnp.zeros_like(ssum_ref)
        ssq_ref[...] = jnp.zeros_like(ssq_ref)

    acc_ref[...] += jnp.dot(x_ref[0], w_ref[...],
                            preferred_element_type=jnp.float32)

    @pl.when(k == nk - 1)
    def _():
        acc = acc_ref[...]
        if add_bias:
            acc = acc + b_ref[...]
        if fuse_lrelu:
            acc = jnp.where(acc >= 0, acc, slope * acc)
        y_ref[0] = acc.astype(y_ref.dtype)
        # Per-channel partial sums for the following InstanceNorm (padded
        # M rows are exactly zero since the bias is skipped for norm layers).
        ssum_ref[...] += jnp.sum(acc, axis=0, keepdims=True)
        ssq_ref[...] += jnp.sum(acc * acc, axis=0, keepdims=True)

    @pl.when((m == nm - 1) & (k == nk - 1))
    def _():
        sum_ref[0] = ssum_ref[...]
        sq_ref[0] = ssq_ref[...]


def _inorm_lrelu_apply_kernel(y_ref, sum_ref, sq_ref, o_ref, *, count, eps, slope):
    """Apply InstanceNorm (stats precomputed by the GEMM) + LeakyReLU."""
    inv_n = 1.0 / count
    mean = sum_ref[0] * inv_n                                   # (1, tn)
    var = jnp.maximum(sq_ref[0] * inv_n - mean * mean, 0.0)     # biased var
    inv_std = jax.lax.rsqrt(var + eps)
    z = (y_ref[0].astype(jnp.float32) - mean) * inv_std
    o_ref[0] = jnp.where(z >= 0, z, slope * z).astype(o_ref.dtype)


def _head_conv_pool_kernel(x_ref, a_ref, b_ref, o_ref, *, inv_count):
    """Fused final Conv2d(C->1) + global average pool for one batch element.

    avgpool(conv(x)) == sum(x_pad * A) / (Ho*Wo) + bias, with A a weight-only
    effective-kernel map (exact identity by linearity of conv + mean).
    """
    prod = x_ref[0].astype(jnp.float32) * a_ref[...]            # (Hp, Wp, C)
    per_ch = jnp.sum(prod, axis=(0, 1))                         # (C,)
    val = jnp.sum(per_ch) * inv_count                           # scalar
    o_ref[0] = val + b_ref[...]                                 # lane-dense store


# ------------------------------ layer wrappers --------------------------------

def conv2d_block(x_nhwc, w_oihw, bias, *, stride, pad, norm,
                 tm_max=256, tk_max=512, tn_max=256, slope=0.2, eps=1e-5):
    """Conv2d (PyTorch OIHW weights) as a tiled bf16 Pallas GEMM.

    norm=False: bias + LeakyReLU fused into the GEMM epilogue.
    norm=True : bias skipped (cancelled exactly by InstanceNorm's mean
                subtraction); per-channel sum/sum^2 emitted by the GEMM and
                InstanceNorm+LeakyReLU applied by a second Pallas kernel.
    Returns NHWC bfloat16.
    """
    cout, cin, kh, kw = w_oihw.shape
    B = x_nhwc.shape[0]
    patches, Ho, Wo = _im2col(x_nhwc, kh, kw, stride, pad)
    M, K = patches.shape[1], patches.shape[2]

    Mp, tm = _tile_and_pad(M, tm_max, 8)
    Kp, tk = _tile_and_pad(K, tk_max, 128)
    Np, tn = _tile_and_pad(cout, tn_max, 128)

    patches = _pad_axes(patches, {1: Mp, 2: Kp}).astype(jnp.bfloat16)
    w_mat = jnp.transpose(w_oihw, (2, 3, 1, 0)).reshape(K, cout)
    w_mat = _pad_axes(w_mat, {0: Kp, 1: Np}).astype(jnp.bfloat16)
    b_row = _pad_axes(bias.reshape(1, cout).astype(jnp.float32), {1: Np})

    kernel = functools.partial(_conv_gemm_kernel,
                               add_bias=not norm, fuse_lrelu=not norm,
                               slope=slope)
    y, ssum, ssq = pl.pallas_call(
        kernel,
        out_shape=(jax.ShapeDtypeStruct((B, Mp, Np), jnp.bfloat16),
                   jax.ShapeDtypeStruct((B, 1, Np), jnp.float32),
                   jax.ShapeDtypeStruct((B, 1, Np), jnp.float32)),
        grid=(B, Np // tn, Mp // tm, Kp // tk),
        in_specs=[pl.BlockSpec((1, tm, tk), lambda b, n, m, k: (b, m, k)),
                  pl.BlockSpec((tk, tn), lambda b, n, m, k: (k, n)),
                  pl.BlockSpec((1, tn), lambda b, n, m, k: (0, n))],
        out_specs=(pl.BlockSpec((1, tm, tn), lambda b, n, m, k: (b, m, n)),
                   pl.BlockSpec((1, 1, tn), lambda b, n, m, k: (b, 0, n)),
                   pl.BlockSpec((1, 1, tn), lambda b, n, m, k: (b, 0, n))),
        scratch_shapes=[pltpu.VMEM((tm, tn), jnp.float32),
                        pltpu.VMEM((1, tn), jnp.float32),
                        pltpu.VMEM((1, tn), jnp.float32)],
        compiler_params=pltpu.CompilerParams(
            dimension_semantics=("parallel", "parallel", "arbitrary", "arbitrary")),
    )(patches, w_mat, b_row)

    if norm:
        y = pl.pallas_call(
            functools.partial(_inorm_lrelu_apply_kernel,
                              count=float(M), eps=eps, slope=slope),
            out_shape=jax.ShapeDtypeStruct((B, Mp, Np), jnp.bfloat16),
            grid=(B, Np // tn, Mp // tm),
            in_specs=[pl.BlockSpec((1, tm, tn), lambda b, n, m: (b, m, n)),
                      pl.BlockSpec((1, 1, tn), lambda b, n, m: (b, 0, n)),
                      pl.BlockSpec((1, 1, tn), lambda b, n, m: (b, 0, n))],
            out_specs=pl.BlockSpec((1, tm, tn), lambda b, n, m: (b, m, n)),
            compiler_params=pltpu.CompilerParams(
                dimension_semantics=("parallel", "parallel", "parallel")),
        )(y, ssum, ssq)

    return y[:, :M, :cout].reshape(B, Ho, Wo, cout)


def head_conv_avgpool(x_nhwc, w_oihw, bias, *, pad=1):
    """Fused final Conv2d(C, 1, 4, stride=1, padding=1) + global average pool."""
    B, H, W, C = x_nhwc.shape
    _, cin, kh, kw = w_oihw.shape
    Hp, Wp = H + 2 * pad, W + 2 * pad
    Ho, Wo = Hp - kh + 1, Wp - kw + 1

    xp = jnp.pad(x_nhwc, ((0, 0), (pad, pad), (pad, pad), (0, 0))).astype(jnp.bfloat16)
    # Effective per-position weight map A (built from weights only).
    wt = jnp.transpose(w_oihw[0], (1, 2, 0)).astype(jnp.float32)    # (kh, kw, C)
    amap = jnp.zeros((Hp, Wp, cin), jnp.float32)
    for i in range(kh):
        for j in range(kw):
            amap = amap.at[i:i + Ho, j:j + Wo, :].add(wt[i, j][None, None, :])
    b_row = jnp.full((1, 128), bias[0], jnp.float32)

    out = pl.pallas_call(
        functools.partial(_head_conv_pool_kernel, inv_count=1.0 / (Ho * Wo)),
        out_shape=jax.ShapeDtypeStruct((B, 1, 128), jnp.float32),
        grid=(B,),
        in_specs=[pl.BlockSpec((1, Hp, Wp, cin), lambda b: (b, 0, 0, 0)),
                  pl.BlockSpec((Hp, Wp, cin), lambda b: (0, 0, 0)),
                  pl.BlockSpec((1, 128), lambda b: (0, 0))],
        out_specs=pl.BlockSpec((1, 1, 128), lambda b: (b, 0, 0)),
        compiler_params=pltpu.CompilerParams(dimension_semantics=("parallel",)),
    )(xp, amap, b_row)
    return out[:, 0, :1]                                            # (B, 1)


def discriminator_forward(x_nchw, params):
    x = jnp.transpose(x_nchw, (0, 2, 3, 1))                         # NCHW -> NHWC
    # block 1: Conv(s2) + LeakyReLU (fused in GEMM epilogue)
    x = conv2d_block(x, params['w1'], params['b1'], stride=2, pad=1, norm=False)
    # blocks 2-4: Conv + InstanceNorm + LeakyReLU (stats fused into GEMM)
    x = conv2d_block(x, params['w2'], params['b2'], stride=2, pad=1, norm=True)
    x = conv2d_block(x, params['w3'], params['b3'], stride=2, pad=1, norm=True)
    x = conv2d_block(x, params['w4'], params['b4'], stride=1, pad=1, norm=True)
    # head: Conv -> 1 channel fused with global average pool + flatten
    return head_conv_avgpool(x, params['w5'], params['b5'], pad=1)  # (B, 1)


# --------------------------- params & reference -------------------------------

def init_params(key, input_nc):
    layer_io = [(64, input_nc), (128, 64), (256, 128), (512, 256), (1, 512)]
    keys = jax.random.split(key, 2 * len(layer_io))
    params = {}
    for idx, (cout, cin) in enumerate(layer_io):
        fan_in = cin * 4 * 4
        params[f'w{idx + 1}'] = (jax.random.normal(keys[2 * idx], (cout, cin, 4, 4),
                                                   jnp.float32) / jnp.sqrt(fan_in))
        params[f'b{idx + 1}'] = 0.01 * jax.random.normal(keys[2 * idx + 1], (cout,),
                                                         jnp.float32)
    return params


def reference_forward(x_nchw, params):
    def conv(x, w, b, stride, pad):
        y = jax.lax.conv_general_dilated(
            x, w, window_strides=(stride, stride),
            padding=[(pad, pad), (pad, pad)],
            dimension_numbers=('NCHW', 'OIHW', 'NCHW'),
            precision=jax.lax.Precision.HIGHEST)
        return y + b[None, :, None, None]

    def lrelu(x, slope=0.2):
        return jnp.where(x >= 0, x, slope * x)

    def inorm_lrelu(x, eps=1e-5, slope=0.2):
        mean = jnp.mean(x, axis=(2, 3), keepdims=True)
        var = jnp.mean((x - mean) ** 2, axis=(2, 3), keepdims=True)
        y = (x - mean) * jax.lax.rsqrt(var + eps)
        return lrelu(y, slope)

    x = lrelu(conv(x_nchw, params['w1'], params['b1'], 2, 1))
    x = inorm_lrelu(conv(x, params['w2'], params['b2'], 2, 1))
    x = inorm_lrelu(conv(x, params['w3'], params['b3'], 2, 1))
    x = inorm_lrelu(conv(x, params['w4'], params['b4'], 1, 1))
    x = conv(x, params['w5'], params['b5'], 1, 1)
    return jnp.mean(x, axis=(2, 3)).reshape(x.shape[0], -1)


# ---------------------------------- main ---------------------------------------

if __name__ == "__main__":
    key = jax.random.PRNGKey(0)
    pkey, xkey = jax.random.split(key)

    input_nc = 3
    # 96x96 keeps the test small but exercises multi-tile M (stat accumulation
    # across M tiles), multi-tile N (layer 4) and multi-tile K (layers 2-4).
    x = jax.random.normal(xkey, (2, input_nc, 96, 96), jnp.float32)
    params = init_params(pkey, input_nc)

    out = jax.jit(discriminator_forward)(x, params)
    out = jax.block_until_ready(out)

    ref = reference_forward(x, params)
    assert out.shape == (2, 1), out.shape
    assert bool(jnp.all(jnp.isfinite(out)))
    # bf16 MXU operands (vs the f32 HIGHEST reference) account for ~1e-2-level
    # differences; 2e-2 still catches any structural error (stride/pad/norm).
    assert jnp.allclose(out, ref, rtol=2e-2, atol=2e-2), (out, ref)

    print("KERNEL_OK")
</pallas_src>

<mosaic_0001>
module attributes {stable_mosaic.version = 11 : i64} {
  func.func @_conv_gemm_kernel(%arg0: i32, %arg1: i32, %arg2: i32, %arg3: i32, %arg4: memref<1x256x128xbf16, #tpu.memory_space<vmem>>, %arg5: memref<128x128xbf16, #tpu.memory_space<vmem>>, %arg6: memref<1x128xf32, #tpu.memory_space<vmem>>, %arg7: memref<1x256x128xbf16, #tpu.memory_space<vmem>>, %arg8: memref<1x1x128xf32, #tpu.memory_space<vmem>>, %arg9: memref<1x1x128xf32, #tpu.memory_space<vmem>>, %arg10: memref<256x128xf32, #tpu.memory_space<vmem>>, %arg11: memref<1x128xf32, #tpu.memory_space<vmem>>, %arg12: memref<1x128xf32, #tpu.memory_space<vmem>>) attributes {dimension_semantics = [#tpu.dimension_semantics<parallel>, #tpu.dimension_semantics<parallel>, #tpu.dimension_semantics<arbitrary>, #tpu.dimension_semantics<arbitrary>], iteration_bounds = array<i64: 2, 1, 9, 1>, scalar_prefetch = 0 : i64, scratch_operands = 3 : i64, tpu.core_type = #tpu.core_type<tc>, window_params = [{transform_indices = @transform_0, window_bounds = array<i64: 1, 256, 128>}, {transform_indices = @transform_1, window_bounds = array<i64: 128, 128>}, {transform_indices = @transform_2, window_bounds = array<i64: 1, 128>}, {transform_indices = @transform_3, window_bounds = array<i64: 1, 256, 128>}, {transform_indices = @transform_4, window_bounds = array<i64: 1, 1, 128>}, {transform_indices = @transform_5, window_bounds = array<i64: 1, 1, 128>}]} {
    %c0_i32 = arith.constant 0 : i32
    %0 = arith.cmpi eq, %arg3, %c0_i32 : i32
    %1 = arith.extui %0 : i1 to i32
    %c0_i32_0 = arith.constant 0 : i32
    %2 = arith.cmpi ne, %1, %c0_i32_0 : i32
    scf.if %2 {
      %cst_16 = arith.constant 0.000000e+00 : f32
      %23 = vector.broadcast %cst_16 : f32 to vector<256x128xf32>
      %c0_17 = arith.constant 0 : index
      %c0_18 = arith.constant 0 : index
      %24 = vector.load %arg10[%c0_17, %c0_18] : memref<256x128xf32, #tpu.memory_space<vmem>>, vector<256x128xf32>
      tpu.vector_store %arg10[%c0_17, %c0_18], %23 {strides = array<i32>} : memref<256x128xf32, #tpu.memory_space<vmem>>, vector<256x128xf32>,
    } else {
    }
    %c0_i32_1 = arith.constant 0 : i32
    %3 = arith.cmpi eq, %arg2, %c0_i32_1 : i32
    %c0_i32_2 = arith.constant 0 : i32
    %4 = arith.cmpi eq, %arg3, %c0_i32_2 : i32
    %5 = arith.andi %3, %4 : i1
    %6 = arith.extui %5 : i1 to i32
    %c0_i32_3 = arith.constant 0 : i32
    %7 = arith.cmpi ne, %6, %c0_i32_3 : i32
    scf.if %7 {
      %cst_16 = arith.constant 0.000000e+00 : f32
      %23 = vector.broadcast %cst_16 : f32 to vector<1x128xf32>
      %c0_17 = arith.constant 0 : index
      %c0_18 = arith.constant 0 : index
      %24 = vector.load %arg11[%c0_17, %c0_18] : memref<1x128xf32, #tpu.memory_space<vmem>>, vector<1x128xf32>
      tpu.vector_store %arg11[%c0_17, %c0_18], %23 {strides = array<i32>} : memref<1x128xf32, #tpu.memory_space<vmem>>, vector<1x128xf32>,
      %cst_19 = arith.constant 0.000000e+00 : f32
      %25 = vector.broadcast %cst_19 : f32 to vector<1x128xf32>
      %c0_20 = arith.constant 0 : index
      %c0_21 = arith.constant 0 : index
      %26 = vector.load %arg12[%c0_20, %c0_21] : memref<1x128xf32, #tpu.memory_space<vmem>>, vector<1x128xf32>
      tpu.vector_store %arg12[%c0_20, %c0_21], %25 {strides = array<i32>} : memref<1x128xf32, #tpu.memory_space<vmem>>, vector<1x128xf32>,
    } else {
    }
    %c0 = arith.constant 0 : index
    %c0_4 = arith.constant 0 : index
    %8 = vector.load %arg10[%c0, %c0_4] : memref<256x128xf32, #tpu.memory_space<vmem>>, vector<256x128xf32>
    %c0_5 = arith.constant 0 : index
    %c0_6 = arith.constant 0 : index
    %c0_7 = arith.constant 0 : index
    %9 = vector.load %arg4[%c0_5, %c0_6, %c0_7] : memref<1x256x128xbf16, #tpu.memory_space<vmem>>, vector<1x256x128xbf16>
    %10 = vector.shape_cast %9 : vector<1x256x128xbf16> to vector<256x128xbf16>
    %c0_8 = arith.constant 0 : index
    %c0_9 = arith.constant 0 : index
    %11 = vector.load %arg5[%c0_8, %c0_9] : memref<128x128xbf16, #tpu.memory_space<vmem>>, vector<128x128xbf16>
    %cst = arith.constant dense<0.000000e+00> : vector<256x128xf32>
    %12 = tpu.matmul %10, %11, %cst {dimension_numbers = #tpu.dot_dimension_numbers<[1], [0], [0], [1], [0, 0, 1, 1], [], []>} : vector<256x128xbf16>, vector<128x128xbf16>, vector<256x128xf32> -> vector<256x128xf32>
    %13 = arith.addf %8, %12 : vector<256x128xf32>
    %c0_10 = arith.constant 0 : index
    %c0_11 = arith.constant 0 : index
    %14 = vector.load %arg10[%c0_10, %c0_11] : memref<256x128xf32, #tpu.memory_space<vmem>>, vector<256x128xf32>
    tpu.vector_store %arg10[%c0_10, %c0_11], %13 {strides = array<i32>} : memref<256x128xf32, #tpu.memory_space<vmem>>, vector<256x128xf32>,
    %c0_i32_12 = arith.constant 0 : i32
    %15 = arith.cmpi eq, %arg3, %c0_i32_12 : i32
    %16 = arith.extui %15 : i1 to i32
    %c0_i32_13 = arith.constant 0 : i32
    %17 = arith.cmpi ne, %16, %c0_i32_13 : i32
    scf.if %17 {
      %c0_16 = arith.constant 0 : index
      %c0_17 = arith.constant 0 : index
      %23 = vector.load %arg10[%c0_16, %c0_17] : memref<256x128xf32, #tpu.memory_space<vmem>>, vector<256x128xf32>
      %c0_18 = arith.constant 0 : index
      %c0_19 = arith.constant 0 : index
      %24 = vector.load %arg6[%c0_18, %c0_19] : memref<1x128xf32, #tpu.memory_space<vmem>>, vector<1x128xf32>
      %25 = vector.broadcast %24 : vector<1x128xf32> to vector<256x128xf32>
      %26 = arith.addf %23, %25 : vector<256x128xf32>
      %cst_20 = arith.constant 0.000000e+00 : f32
      %27 = vector.broadcast %cst_20 : f32 to vector<256x128xf32>
      %28 = arith.cmpf oge, %26, %27 : vector<256x128xf32>
      %cst_21 = arith.constant 2.000000e-01 : f32
      %29 = vector.broadcast %cst_21 : f32 to vector<256x128xf32>
      %30 = arith.mulf %29, %26 : vector<256x128xf32>
      %31 = arith.select %28, %26, %30 : vector<256x128xi1>, vector<256x128xf32>
      %32 = arith.truncf %31 : vector<256x128xf32> to vector<256x128xbf16>
      %c0_22 = arith.constant 0 : index
      %c0_23 = arith.constant 0 : index
      %c0_24 = arith.constant 0 : index
      %33 = vector.load %arg7[%c0_22, %c0_23, %c0_24] : memref<1x256x128xbf16, #tpu.memory_space<vmem>>, vector<1x256x128xbf16>
      %34 = vector.shape_cast %33 : vector<1x256x128xbf16> to vector<256x128xbf16>
      %35 = vector.shape_cast %32 : vector<256x128xbf16> to vector<1x256x128xbf16>
      tpu.vector_store %arg7[%c0_22, %c0_23, %c0_24], %35 {strides = array<i32>} : memref<1x256x128xbf16, #tpu.memory_space<vmem>>, vector<1x256x128xbf16>,
      %c0_25 = arith.constant 0 : index
      %c0_26 = arith.constant 0 : index
      %36 = vector.load %arg11[%c0_25, %c0_26] : memref<1x128xf32, #tpu.memory_space<vmem>>, vector<1x128xf32>
      %cst_27 = arith.constant dense<0.000000e+00> : vector<128xf32>
      %37 = vector.multi_reduction <add>, %31, %cst_27 [0] : vector<256x128xf32> to vector<128xf32>
      %38 = vector.shape_cast %37 : vector<128xf32> to vector<1x128xf32>
      %39 = arith.addf %36, %38 : vector<1x128xf32>
      %c0_28 = arith.constant 0 : index
      %c0_29 = arith.constant 0 : index
      %40 = vector.load %arg11[%c0_28, %c0_29] : memref<1x128xf32, #tpu.memory_space<vmem>>, vector<1x128xf32>
      tpu.vector_store %arg11[%c0_28, %c0_29], %39 {strides = array<i32>} : memref<1x128xf32, #tpu.memory_space<vmem>>, vector<1x128xf32>,
      %c0_30 = arith.constant 0 : index
      %c0_31 = arith.constant 0 : index
      %41 = vector.load %arg12[%c0_30, %c0_31] : memref<1x128xf32, #tpu.memory_space<vmem>>, vector<1x128xf32>
      %42 = arith.mulf %31, %31 : vector<256x128xf32>
      %cst_32 = arith.constant dense<0.000000e+00> : vector<128xf32>
      %43 = vector.multi_reduction <add>, %42, %cst_32 [0] : vector<256x128xf32> to vector<128xf32>
      %44 = vector.shape_cast %43 : vector<128xf32> to vector<1x128xf32>
      %45 = arith.addf %41, %44 : vector<1x128xf32>
      %c0_33 = arith.constant 0 : index
      %c0_34 = arith.constant 0 : index
      %46 = vector.load %arg12[%c0_33, %c0_34] : memref<1x128xf32, #tpu.memory_space<vmem>>, vector<1x128xf32>
      tpu.vector_store %arg12[%c0_33, %c0_34], %45 {strides = array<i32>} : memref<1x128xf32, #tpu.memory_space<vmem>>, vector<1x128xf32>,
    } else {
    }
    %c8_i32 = arith.constant 8 : i32
    %18 = arith.cmpi eq, %arg2, %c8_i32 : i32
    %c0_i32_14 = arith.constant 0 : i32
    %19 = arith.cmpi eq, %arg3, %c0_i32_14 : i32
    %20 = arith.andi %18, %19 : i1
    %21 = arith.extui %20 : i1 to i32
    %c0_i32_15 = arith.constant 0 : i32
    %22 = arith.cmpi ne, %21, %c0_i32_15 : i32
    scf.if %22 {
      %c0_16 = arith.constant 0 : index
      %c0_17 = arith.constant 0 : index
      %23 = vector.load %arg11[%c0_16, %c0_17] : memref<1x128xf32, #tpu.memory_space<vmem>>, vector<1x128xf32>
      %c0_18 = arith.constant 0 : index
      %c0_19 = arith.constant 0 : index
      %c0_20 = arith.constant 0 : index
      %24 = vector.load %arg8[%c0_18, %c0_19, %c0_20] : memref<1x1x128xf32, #tpu.memory_space<vmem>>, vector<1x1x128xf32>
      %25 = vector.shape_cast %24 : vector<1x1x128xf32> to vector<1x128xf32>
      %26 = vector.shape_cast %23 : vector<1x128xf32> to vector<1x1x128xf32>
      tpu.vector_store %arg8[%c0_18, %c0_19, %c0_20], %26 {strides = array<i32>} : memref<1x1x128xf32, #tpu.memory_space<vmem>>, vector<1x1x128xf32>,
      %c0_21 = arith.constant 0 : index
      %c0_22 = arith.constant 0 : index
      %27 = vector.load %arg12[%c0_21, %c0_22] : memref<1x128xf32, #tpu.memory_space<vmem>>, vector<1x128xf32>
      %c0_23 = arith.constant 0 : index
      %c0_24 = arith.constant 0 : index
      %c0_25 = arith.constant 0 : index
      %28 = vector.load %arg9[%c0_23, %c0_24, %c0_25] : memref<1x1x128xf32, #tpu.memory_space<vmem>>, vector<1x1x128xf32>
      %29 = vector.shape_cast %28 : vector<1x1x128xf32> to vector<1x128xf32>
      %30 = vector.shape_cast %27 : vector<1x128xf32> to vector<1x1x128xf32>
      tpu.vector_store %arg9[%c0_23, %c0_24, %c0_25], %30 {strides = array<i32>} : memref<1x1x128xf32, #tpu.memory_space<vmem>>, vector<1x1x128xf32>,
    } else {
    }
    return
  }
  func.func @transform_0(%arg0: i32, %arg1: i32, %arg2: i32, %arg3: i32) -> (i32, i32, i32) {
    %c0_i32 = arith.constant 0 : i32
    return %arg0, %arg2, %arg3 : i32, i32, i32
  }
  func.func @transform_1(%arg0: i32, %arg1: i32, %arg2: i32, %arg3: i32) -> (i32, i32) {
    %c0_i32 = arith.constant 0 : i32
    return %arg3, %arg1 : i32, i32
  }
  func.func @transform_2(%arg0: i32, %arg1: i32, %arg2: i32, %arg3: i32) -> (i32, i32) {
    %c0_i32 = arith.constant 0 : i32
    %c0_i32_0 = arith.constant 0 : i32
    return %c0_i32, %arg1 : i32, i32
  }
  func.func @transform_3(%arg0: i32, %arg1: i32, %arg2: i32, %arg3: i32) -> (i32, i32, i32) {
    %c0_i32 = arith.constant 0 : i32
    return %arg0, %arg2, %arg1 : i32, i32, i32
  }
  func.func @transform_4(%arg0: i32, %arg1: i32, %arg2: i32, %arg3: i32) -> (i32, i32, i32) {
    %c0_i32 = arith.constant 0 : i32
    %c0_i32_0 = arith.constant 0 : i32
    return %arg0, %c0_i32, %arg1 : i32, i32, i32
  }
  func.func @transform_5(%arg0: i32, %arg1: i32, %arg2: i32, %arg3: i32) -> (i32, i32, i32) {
    %c0_i32 = arith.constant 0 : i32
    %c0_i32_0 = arith.constant 0 : i32
    return %arg0, %c0_i32, %arg1 : i32, i32, i32
  }
}

module attributes {stable_mosaic.version = 11 : i64} {
  func.func @_conv_gemm_kernel(%arg0: i32, %arg1: i32, %arg2: i32, %arg3: i32, %arg4: memref<1x256x512xbf16, #tpu.memory_space<vmem>>, %arg5: memref<512x128xbf16, #tpu.memory_space<vmem>>, %arg6: memref<1x128xf32, #tpu.memory_space<vmem>>, %arg7: memref<1x256x128xbf16, #tpu.memory_space<vmem>>, %arg8: memref<1x1x128xf32, #tpu.memory_space<vmem>>, %arg9: memref<1x1x128xf32, #tpu.memory_space<vmem>>, %arg10: memref<256x128xf32, #tpu.memory_space<vmem>>, %arg11: memref<1x128xf32, #tpu.memory_space<vmem>>, %arg12: memref<1x128xf32, #tpu.memory_space<vmem>>) attributes {dimension_semantics = [#tpu.dimension_semantics<parallel>, #tpu.dimension_semantics<parallel>, #tpu.dimension_semantics<arbitrary>, #tpu.dimension_semantics<arbitrary>], iteration_bounds = array<i64: 2, 1, 3, 2>, scalar_prefetch = 0 : i64, scratch_operands = 3 : i64, tpu.core_type = #tpu.core_type<tc>, window_params = [{transform_indices = @transform_0, window_bounds = array<i64: 1, 256, 512>}, {transform_indices = @transform_1, window_bounds = array<i64: 512, 128>}, {transform_indices = @transform_2, window_bounds = array<i64: 1, 128>}, {transform_indices = @transform_3, window_bounds = array<i64: 1, 256, 128>}, {transform_indices = @transform_4, window_bounds = array<i64: 1, 1, 128>}, {transform_indices = @transform_5, window_bounds = array<i64: 1, 1, 128>}]} {
    %c0_i32 = arith.constant 0 : i32
    %0 = arith.cmpi eq, %arg3, %c0_i32 : i32
    %1 = arith.extui %0 : i1 to i32
    %c0_i32_0 = arith.constant 0 : i32
    %2 = arith.cmpi ne, %1, %c0_i32_0 : i32
    scf.if %2 {
      %cst_15 = arith.constant 0.000000e+00 : f32
      %23 = vector.broadcast %cst_15 : f32 to vector<256x128xf32>
      %c0_16 = arith.constant 0 : index
      %c0_17 = arith.constant 0 : index
      %24 = vector.load %arg10[%c0_16, %c0_17] : memref<256x128xf32, #tpu.memory_space<vmem>>, vector<256x128xf32>
      tpu.vector_store %arg10[%c0_16, %c0_17], %23 {strides = array<i32>} : memref<256x128xf32, #tpu.memory_space<vmem>>, vector<256x128xf32>,
    } else {
    }
    %c0_i32_1 = arith.constant 0 : i32
    %3 = arith.cmpi eq, %arg2, %c0_i32_1 : i32
    %c0_i32_2 = arith.constant 0 : i32
    %4 = arith.cmpi eq, %arg3, %c0_i32_2 : i32
    %5 = arith.andi %3, %4 : i1
    %6 = arith.extui %5 : i1 to i32
    %c0_i32_3 = arith.constant 0 : i32
    %7 = arith.cmpi ne, %6, %c0_i32_3 : i32
    scf.if %7 {
      %cst_15 = arith.constant 0.000000e+00 : f32
      %23 = vector.broadcast %cst_15 : f32 to vector<1x128xf32>
      %c0_16 = arith.constant 0 : index
      %c0_17 = arith.constant 0 : index
      %24 = vector.load %arg11[%c0_16, %c0_17] : memref<1x128xf32, #tpu.memory_space<vmem>>, vector<1x128xf32>
      tpu.vector_store %arg11[%c0_16, %c0_17], %23 {strides = array<i32>} : memref<1x128xf32, #tpu.memory_space<vmem>>, vector<1x128xf32>,
      %cst_18 = arith.constant 0.000000e+00 : f32
      %25 = vector.broadcast %cst_18 : f32 to vector<1x128xf32>
      %c0_19 = arith.constant 0 : index
      %c0_20 = arith.constant 0 : index
      %26 = vector.load %arg12[%c0_19, %c0_20] : memref<1x128xf32, #tpu.memory_space<vmem>>, vector<1x128xf32>
      tpu.vector_store %arg12[%c0_19, %c0_20], %25 {strides = array<i32>} : memref<1x128xf32, #tpu.memory_space<vmem>>, vector<1x128xf32>,
    } else {
    }
    %c0 = arith.constant 0 : index
    %c0_4 = arith.constant 0 : index
    %8 = vector.load %arg10[%c0, %c0_4] : memref<256x128xf32, #tpu.memory_space<vmem>>, vector<256x128xf32>
    %c0_5 = arith.constant 0 : index
    %c0_6 = arith.constant 0 : index
    %c0_7 = arith.constant 0 : index
    %9 = vector.load %arg4[%c0_5, %c0_6, %c0_7] : memref<1x256x512xbf16, #tpu.memory_space<vmem>>, vector<1x256x512xbf16>
    %10 = vector.shape_cast %9 : vector<1x256x512xbf16> to vector<256x512xbf16>
    %c0_8 = arith.constant 0 : index
    %c0_9 = arith.constant 0 : index
    %11 = vector.load %arg5[%c0_8, %c0_9] : memref<512x128xbf16, #tpu.memory_space<vmem>>, vector<512x128xbf16>
    %cst = arith.constant dense<0.000000e+00> : vector<256x128xf32>
    %12 = tpu.matmul %10, %11, %cst {dimension_numbers = #tpu.dot_dimension_numbers<[1], [0], [0], [1], [0, 0, 1, 1], [], []>} : vector<256x512xbf16>, vector<512x128xbf16>, vector<256x128xf32> -> vector<256x128xf32>
    %13 = arith.addf %8, %12 : vector<256x128xf32>
    %c0_10 = arith.constant 0 : index
    %c0_11 = arith.constant 0 : index
    %14 = vector.load %arg10[%c0_10, %c0_11] : memref<256x128xf32, #tpu.memory_space<vmem>>, vector<256x128xf32>
    tpu.vector_store %arg10[%c0_10, %c0_11], %13 {strides = array<i32>} : memref<256x128xf32, #tpu.memory_space<vmem>>, vector<256x128xf32>,
    %c1_i32 = arith.constant 1 : i32
    %15 = arith.cmpi eq, %arg3, %c1_i32 : i32
    %16 = arith.extui %15 : i1 to i32
    %c0_i32_12 = arith.constant 0 : i32
    %17 = arith.cmpi ne, %16, %c0_i32_12 : i32
    scf.if %17 {
      %c0_15 = arith.constant 0 : index
      %c0_16 = arith.constant 0 : index
      %23 = vector.load %arg10[%c0_15, %c0_16] : memref<256x128xf32, #tpu.memory_space<vmem>>, vector<256x128xf32>
      %24 = arith.truncf %23 : vector<256x128xf32> to vector<256x128xbf16>
      %c0_17 = arith.constant 0 : index
      %c0_18 = arith.constant 0 : index
      %c0_19 = arith.constant 0 : index
      %25 = vector.load %arg7[%c0_17, %c0_18, %c0_19] : memref<1x256x128xbf16, #tpu.memory_space<vmem>>, vector<1x256x128xbf16>
      %26 = vector.shape_cast %25 : vector<1x256x128xbf16> to vector<256x128xbf16>
      %27 = vector.shape_cast %24 : vector<256x128xbf16> to vector<1x256x128xbf16>
      tpu.vector_store %arg7[%c0_17, %c0_18, %c0_19], %27 {strides = array<i32>} : memref<1x256x128xbf16, #tpu.memory_space<vmem>>, vector<1x256x128xbf16>,
      %c0_20 = arith.constant 0 : index
      %c0_21 = arith.constant 0 : index
      %28 = vector.load %arg11[%c0_20, %c0_21] : memref<1x128xf32, #tpu.memory_space<vmem>>, vector<1x128xf32>
      %cst_22 = arith.constant dense<0.000000e+00> : vector<128xf32>
      %29 = vector.multi_reduction <add>, %23, %cst_22 [0] : vector<256x128xf32> to vector<128xf32>
      %30 = vector.shape_cast %29 : vector<128xf32> to vector<1x128xf32>
      %31 = arith.addf %28, %30 : vector<1x128xf32>
      %c0_23 = arith.constant 0 : index
      %c0_24 = arith.constant 0 : index
      %32 = vector.load %arg11[%c0_23, %c0_24] : memref<1x128xf32, #tpu.memory_space<vmem>>, vector<1x128xf32>
      tpu.vector_store %arg11[%c0_23, %c0_24], %31 {strides = array<i32>} : memref<1x128xf32, #tpu.memory_space<vmem>>, vector<1x128xf32>,
      %c0_25 = arith.constant 0 : index
      %c0_26 = arith.constant 0 : index
      %33 = vector.load %arg12[%c0_25, %c0_26] : memref<1x128xf32, #tpu.memory_space<vmem>>, vector<1x128xf32>
      %34 = arith.mulf %23, %23 : vector<256x128xf32>
      %cst_27 = arith.constant dense<0.000000e+00> : vector<128xf32>
      %35 = vector.multi_reduction <add>, %34, %cst_27 [0] : vector<256x128xf32> to vector<128xf32>
      %36 = vector.shape_cast %35 : vector<128xf32> to vector<1x128xf32>
      %37 = arith.addf %33, %36 : vector<1x128xf32>
      %c0_28 = arith.constant 0 : index
      %c0_29 = arith.constant 0 : index
      %38 = vector.load %arg12[%c0_28, %c0_29] : memref<1x128xf32, #tpu.memory_space<vmem>>, vector<1x128xf32>
      tpu.vector_store %arg12[%c0_28, %c0_29], %37 {strides = array<i32>} : memref<1x128xf32, #tpu.memory_space<vmem>>, vector<1x128xf32>,
    } else {
    }
    %c2_i32 = arith.constant 2 : i32
    %18 = arith.cmpi eq, %arg2, %c2_i32 : i32
    %c1_i32_13 = arith.constant 1 : i32
    %19 = arith.cmpi eq, %arg3, %c1_i32_13 : i32
    %20 = arith.andi %18, %19 : i1
    %21 = arith.extui %20 : i1 to i32
    %c0_i32_14 = arith.constant 0 : i32
    %22 = arith.cmpi ne, %21, %c0_i32_14 : i32
    scf.if %22 {
      %c0_15 = arith.constant 0 : index
      %c0_16 = arith.constant 0 : index
      %23 = vector.load %arg11[%c0_15, %c0_16] : memref<1x128xf32, #tpu.memory_space<vmem>>, vector<1x128xf32>
      %c0_17 = arith.constant 0 : index
      %c0_18 = arith.constant 0 : index
      %c0_19 = arith.constant 0 : index
      %24 = vector.load %arg8[%c0_17, %c0_18, %c0_19] : memref<1x1x128xf32, #tpu.memory_space<vmem>>, vector<1x1x128xf32>
      %25 = vector.shape_cast %24 : vector<1x1x128xf32> to vector<1x128xf32>
      %26 = vector.shape_cast %23 : vector<1x128xf32> to vector<1x1x128xf32>
      tpu.vector_store %arg8[%c0_17, %c0_18, %c0_19], %26 {strides = array<i32>} : memref<1x1x128xf32, #tpu.memory_space<vmem>>, vector<1x1x128xf32>,
      %c0_20 = arith.constant 0 : index
      %c0_21 = arith.constant 0 : index
      %27 = vector.load %arg12[%c0_20, %c0_21] : memref<1x128xf32, #tpu.memory_space<vmem>>, vector<1x128xf32>
      %c0_22 = arith.constant 0 : index
      %c0_23 = arith.constant 0 : index
      %c0_24 = arith.constant 0 : index
      %28 = vector.load %arg9[%c0_22, %c0_23, %c0_24] : memref<1x1x128xf32, #tpu.memory_space<vmem>>, vector<1x1x128xf32>
      %29 = vector.shape_cast %28 : vector<1x1x128xf32> to vector<1x128xf32>
      %30 = vector.shape_cast %27 : vector<1x128xf32> to vector<1x1x128xf32>
      tpu.vector_store %arg9[%c0_22, %c0_23, %c0_24], %30 {strides = array<i32>} : memref<1x1x128xf32, #tpu.memory_space<vmem>>, vector<1x1x128xf32>,
    } else {
    }
    return
  }
  func.func @transform_0(%arg0: i32, %arg1: i32, %arg2: i32, %arg3: i32) -> (i32, i32, i32) {
    %c0_i32 = arith.constant 0 : i32
    return %arg0, %arg2, %arg3 : i32, i32, i32
  }
  func.func @transform_1(%arg0: i32, %arg1: i32, %arg2: i32, %arg3: i32) -> (i32, i32) {
    %c0_i32 = arith.constant 0 : i32
    return %arg3, %arg1 : i32, i32
  }
  func.func @transform_2(%arg0: i32, %arg1: i32, %arg2: i32, %arg3: i32) -> (i32, i32) {
    %c0_i32 = arith.constant 0 : i32
    %c0_i32_0 = arith.constant 0 : i32
    return %c0_i32, %arg1 : i32, i32
  }
  func.func @transform_3(%arg0: i32, %arg1: i32, %arg2: i32, %arg3: i32) -> (i32, i32, i32) {
    %c0_i32 = arith.constant 0 : i32
    return %arg0, %arg2, %arg1 : i32, i32, i32
  }
  func.func @transform_4(%arg0: i32, %arg1: i32, %arg2: i32, %arg3: i32) -> (i32, i32, i32) {
    %c0_i32 = arith.constant 0 : i32
    %c0_i32_0 = arith.constant 0 : i32
    return %arg0, %c0_i32, %arg1 : i32, i32, i32
  }
  func.func @transform_5(%arg0: i32, %arg1: i32, %arg2: i32, %arg3: i32) -> (i32, i32, i32) {
    %c0_i32 = arith.constant 0 : i32
    %c0_i32_0 = arith.constant 0 : i32
    return %arg0, %c0_i32, %arg1 : i32, i32, i32
  }
}

module attributes {stable_mosaic.version = 11 : i64} {
  func.func @_inorm_lrelu_apply_kernel(%arg0: i32, %arg1: i32, %arg2: i32, %arg3: memref<1x256x128xbf16, #tpu.memory_space<vmem>>, %arg4: memref<1x1x128xf32, #tpu.memory_space<vmem>>, %arg5: memref<1x1x128xf32, #tpu.memory_space<vmem>>, %arg6: memref<1x256x128xbf16, #tpu.memory_space<vmem>>) attributes {dimension_semantics = [#tpu.dimension_semantics<parallel>, #tpu.dimension_semantics<parallel>, #tpu.dimension_semantics<parallel>], iteration_bounds = array<i64: 2, 1, 3>, scalar_prefetch = 0 : i64, scratch_operands = 0 : i64, tpu.core_type = #tpu.core_type<tc>, window_params = [{transform_indices = @transform_0, window_bounds = array<i64: 1, 256, 128>}, {transform_indices = @transform_1, window_bounds = array<i64: 1, 1, 128>}, {transform_indices = @transform_2, window_bounds = array<i64: 1, 1, 128>}, {transform_indices = @transform_3, window_bounds = array<i64: 1, 256, 128>}]} {
    %c0 = arith.constant 0 : index
    %c0_0 = arith.constant 0 : index
    %c0_1 = arith.constant 0 : index
    %0 = vector.load %arg4[%c0, %c0_0, %c0_1] : memref<1x1x128xf32, #tpu.memory_space<vmem>>, vector<1x1x128xf32>
    %1 = vector.shape_cast %0 : vector<1x1x128xf32> to vector<1x128xf32>
    %cst = arith.constant 0.00173611112 : f32
    %2 = vector.broadcast %cst : f32 to vector<1x128xf32>
    %3 = arith.mulf %1, %2 : vector<1x128xf32>
    %c0_2 = arith.constant 0 : index
    %c0_3 = arith.constant 0 : index
    %c0_4 = arith.constant 0 : index
    %4 = vector.load %arg5[%c0_2, %c0_3, %c0_4] : memref<1x1x128xf32, #tpu.memory_space<vmem>>, vector<1x1x128xf32>
    %5 = vector.shape_cast %4 : vector<1x1x128xf32> to vector<1x128xf32>
    %cst_5 = arith.constant 0.00173611112 : f32
    %6 = vector.broadcast %cst_5 : f32 to vector<1x128xf32>
    %7 = arith.mulf %5, %6 : vector<1x128xf32>
    %8 = arith.mulf %3, %3 : vector<1x128xf32>
    %9 = arith.subf %7, %8 : vector<1x128xf32>
    %cst_6 = arith.constant 0.000000e+00 : f32
    %10 = vector.broadcast %cst_6 : f32 to vector<1x128xf32>
    %11 = arith.maximumf %9, %10 : vector<1x128xf32>
    %cst_7 = arith.constant 9.99999974E-6 : f32
    %12 = vector.broadcast %cst_7 : f32 to vector<1x128xf32>
    %13 = arith.addf %11, %12 : vector<1x128xf32>
    %14 = math.rsqrt %13 : vector<1x128xf32>
    %c0_8 = arith.constant 0 : index
    %c0_9 = arith.constant 0 : index
    %c0_10 = arith.constant 0 : index
    %15 = vector.load %arg3[%c0_8, %c0_9, %c0_10] : memref<1x256x128xbf16, #tpu.memory_space<vmem>>, vector<1x256x128xbf16>
    %16 = vector.shape_cast %15 : vector<1x256x128xbf16> to vector<256x128xbf16>
    %17 = arith.extf %16 : vector<256x128xbf16> to vector<256x128xf32>
    %18 = vector.broadcast %3 : vector<1x128xf32> to vector<256x128xf32>
    %19 = arith.subf %17, %18 : vector<256x128xf32>
    %20 = vector.broadcast %14 : vector<1x128xf32> to vector<256x128xf32>
    %21 = arith.mulf %19, %20 : vector<256x128xf32>
    %cst_11 = arith.constant 0.000000e+00 : f32
    %22 = vector.broadcast %cst_11 : f32 to vector<256x128xf32>
    %23 = arith.cmpf oge, %21, %22 : vector<256x128xf32>
    %cst_12 = arith.constant 2.000000e-01 : f32
    %24 = vector.broadcast %cst_12 : f32 to vector<256x128xf32>
    %25 = arith.mulf %24, %21 : vector<256x128xf32>
    %26 = arith.select %23, %21, %25 : vector<256x128xi1>, vector<256x128xf32>
    %27 = arith.truncf %26 : vector<256x128xf32> to vector<256x128xbf16>
    %c0_13 = arith.constant 0 : index
    %c0_14 = arith.constant 0 : index
    %c0_15 = arith.constant 0 : index
    %28 = vector.load %arg6[%c0_13, %c0_14, %c0_15] : memref<1x256x128xbf16, #tpu.memory_space<vmem>>, vector<1x256x128xbf16>
    %29 = vector.shape_cast %28 : vector<1x256x128xbf16> to vector<256x128xbf16>
    %30 = vector.shape_cast %27 : vector<256x128xbf16> to vector<1x256x128xbf16>
    tpu.vector_store %arg6[%c0_13, %c0_14, %c0_15], %30 {strides = array<i32>} : memref<1x256x128xbf16, #tpu.memory_space<vmem>>, vector<1x256x128xbf16>,
    return
  }
  func.func @transform_0(%arg0: i32, %arg1: i32, %arg2: i32) -> (i32, i32, i32) {
    %c0_i32 = arith.constant 0 : i32
    return %arg0, %arg2, %arg1 : i32, i32, i32
  }
  func.func @transform_1(%arg0: i32, %arg1: i32, %arg2: i32) -> (i32, i32, i32) {
    %c0_i32 = arith.constant 0 : i32
    %c0_i32_0 = arith.constant 0 : i32
    return %arg0, %c0_i32, %arg1 : i32, i32, i32
  }
  func.func @transform_2(%arg0: i32, %arg1: i32, %arg2: i32) -> (i32, i32, i32) {
    %c0_i32 = arith.constant 0 : i32
    %c0_i32_0 = arith.constant 0 : i32
    return %arg0, %c0_i32, %arg1 : i32, i32, i32
  }
  func.func @transform_3(%arg0: i32, %arg1: i32, %arg2: i32) -> (i32, i32, i32) {
    %c0_i32 = arith.constant 0 : i32
    return %arg0, %arg2, %arg1 : i32, i32, i32
  }
}

module attributes {stable_mosaic.version = 11 : i64} {
  func.func @_conv_gemm_kernel(%arg0: i32, %arg1: i32, %arg2: i32, %arg3: i32, %arg4: memref<1x144x512xbf16, #tpu.memory_space<vmem>>, %arg5: memref<512x256xbf16, #tpu.memory_space<vmem>>, %arg6: memref<1x256xf32, #tpu.memory_space<vmem>>, %arg7: memref<1x144x256xbf16, #tpu.memory_space<vmem>>, %arg8: memref<1x1x256xf32, #tpu.memory_space<vmem>>, %arg9: memref<1x1x256xf32, #tpu.memory_space<vmem>>, %arg10: memref<144x256xf32, #tpu.memory_space<vmem>>, %arg11: memref<1x256xf32, #tpu.memory_space<vmem>>, %arg12: memref<1x256xf32, #tpu.memory_space<vmem>>) attributes {dimension_semantics = [#tpu.dimension_semantics<parallel>, #tpu.dimension_semantics<parallel>, #tpu.dimension_semantics<arbitrary>, #tpu.dimension_semantics<arbitrary>], iteration_bounds = array<i64: 2, 1, 1, 4>, scalar_prefetch = 0 : i64, scratch_operands = 3 : i64, tpu.core_type = #tpu.core_type<tc>, window_params = [{transform_indices = @transform_0, window_bounds = array<i64: 1, 144, 512>}, {transform_indices = @transform_1, window_bounds = array<i64: 512, 256>}, {transform_indices = @transform_2, window_bounds = array<i64: 1, 256>}, {transform_indices = @transform_3, window_bounds = array<i64: 1, 144, 256>}, {transform_indices = @transform_4, window_bounds = array<i64: 1, 1, 256>}, {transform_indices = @transform_5, window_bounds = array<i64: 1, 1, 256>}]} {
    %c0_i32 = arith.constant 0 : i32
    %0 = arith.cmpi eq, %arg3, %c0_i32 : i32
    %1 = arith.extui %0 : i1 to i32
    %c0_i32_0 = arith.constant 0 : i32
    %2 = arith.cmpi ne, %1, %c0_i32_0 : i32
    scf.if %2 {
      %cst_16 = arith.constant 0.000000e+00 : f32
      %23 = vector.broadcast %cst_16 : f32 to vector<144x256xf32>
      %c0_17 = arith.constant 0 : index
      %c0_18 = arith.constant 0 : index
      %24 = vector.load %arg10[%c0_17, %c0_18] : memref<144x256xf32, #tpu.memory_space<vmem>>, vector<144x256xf32>
      tpu.vector_store %arg10[%c0_17, %c0_18], %23 {strides = array<i32>} : memref<144x256xf32, #tpu.memory_space<vmem>>, vector<144x256xf32>,
    } else {
    }
    %c0_i32_1 = arith.constant 0 : i32
    %3 = arith.cmpi eq, %arg2, %c0_i32_1 : i32
    %c0_i32_2 = arith.constant 0 : i32
    %4 = arith.cmpi eq, %arg3, %c0_i32_2 : i32
    %5 = arith.andi %3, %4 : i1
    %6 = arith.extui %5 : i1 to i32
    %c0_i32_3 = arith.constant 0 : i32
    %7 = arith.cmpi ne, %6, %c0_i32_3 : i32
    scf.if %7 {
      %cst_16 = arith.constant 0.000000e+00 : f32
      %23 = vector.broadcast %cst_16 : f32 to vector<1x256xf32>
      %c0_17 = arith.constant 0 : index
      %c0_18 = arith.constant 0 : index
      %24 = vector.load %arg11[%c0_17, %c0_18] : memref<1x256xf32, #tpu.memory_space<vmem>>, vector<1x256xf32>
      tpu.vector_store %arg11[%c0_17, %c0_18], %23 {strides = array<i32>} : memref<1x256xf32, #tpu.memory_space<vmem>>, vector<1x256xf32>,
      %cst_19 = arith.constant 0.000000e+00 : f32
      %25 = vector.broadcast %cst_19 : f32 to vector<1x256xf32>
      %c0_20 = arith.constant 0 : index
      %c0_21 = arith.constant 0 : index
      %26 = vector.load %arg12[%c0_20, %c0_21] : memref<1x256xf32, #tpu.memory_space<vmem>>, vector<1x256xf32>
      tpu.vector_store %arg12[%c0_20, %c0_21], %25 {strides = array<i32>} : memref<1x256xf32, #tpu.memory_space<vmem>>, vector<1x256xf32>,
    } else {
    }
    %c0 = arith.constant 0 : index
    %c0_4 = arith.constant 0 : index
    %8 = vector.load %arg10[%c0, %c0_4] : memref<144x256xf32, #tpu.memory_space<vmem>>, vector<144x256xf32>
    %c0_5 = arith.constant 0 : index
    %c0_6 = arith.constant 0 : index
    %c0_7 = arith.constant 0 : index
    %9 = vector.load %arg4[%c0_5, %c0_6, %c0_7] : memref<1x144x512xbf16, #tpu.memory_space<vmem>>, vector<1x144x512xbf16>
    %10 = vector.shape_cast %9 : vector<1x144x512xbf16> to vector<144x512xbf16>
    %c0_8 = arith.constant 0 : index
    %c0_9 = arith.constant 0 : index
    %11 = vector.load %arg5[%c0_8, %c0_9] : memref<512x256xbf16, #tpu.memory_space<vmem>>, vector<512x256xbf16>
    %cst = arith.constant dense<0.000000e+00> : vector<144x256xf32>
    %12 = tpu.matmul %10, %11, %cst {dimension_numbers = #tpu.dot_dimension_numbers<[1], [0], [0], [1], [0, 0, 1, 1], [], []>} : vector<144x512xbf16>, vector<512x256xbf16>, vector<144x256xf32> -> vector<144x256xf32>
    %13 = arith.addf %8, %12 : vector<144x256xf32>
    %c0_10 = arith.constant 0 : index
    %c0_11 = arith.constant 0 : index
    %14 = vector.load %arg10[%c0_10, %c0_11] : memref<144x256xf32, #tpu.memory_space<vmem>>, vector<144x256xf32>
    tpu.vector_store %arg10[%c0_10, %c0_11], %13 {strides = array<i32>} : memref<144x256xf32, #tpu.memory_space<vmem>>, vector<144x256xf32>,
    %c3_i32 = arith.constant 3 : i32
    %15 = arith.cmpi eq, %arg3, %c3_i32 : i32
    %16 = arith.extui %15 : i1 to i32
    %c0_i32_12 = arith.constant 0 : i32
    %17 = arith.cmpi ne, %16, %c0_i32_12 : i32
    scf.if %17 {
      %c0_16 = arith.constant 0 : index
      %c0_17 = arith.constant 0 : index
      %23 = vector.load %arg10[%c0_16, %c0_17] : memref<144x256xf32, #tpu.memory_space<vmem>>, vector<144x256xf32>
      %24 = arith.truncf %23 : vector<144x256xf32> to vector<144x256xbf16>
      %c0_18 = arith.constant 0 : index
      %c0_19 = arith.constant 0 : index
      %c0_20 = arith.constant 0 : index
      %25 = vector.load %arg7[%c0_18, %c0_19, %c0_20] : memref<1x144x256xbf16, #tpu.memory_space<vmem>>, vector<1x144x256xbf16>
      %26 = vector.shape_cast %25 : vector<1x144x256xbf16> to vector<144x256xbf16>
      %27 = vector.shape_cast %24 : vector<144x256xbf16> to vector<1x144x256xbf16>
      tpu.vector_store %arg7[%c0_18, %c0_19, %c0_20], %27 {strides = array<i32>} : memref<1x144x256xbf16, #tpu.memory_space<vmem>>, vector<1x144x256xbf16>,
      %c0_21 = arith.constant 0 : index
      %c0_22 = arith.constant 0 : index
      %28 = vector.load %arg11[%c0_21, %c0_22] : memref<1x256xf32, #tpu.memory_space<vmem>>, vector<1x256xf32>
      %cst_23 = arith.constant dense<0.000000e+00> : vector<256xf32>
      %29 = vector.multi_reduction <add>, %23, %cst_23 [0] : vector<144x256xf32> to vector<256xf32>
      %30 = vector.shape_cast %29 : vector<256xf32> to vector<1x256xf32>
      %31 = arith.addf %28, %30 : vector<1x256xf32>
      %c0_24 = arith.constant 0 : index
      %c0_25 = arith.constant 0 : index
      %32 = vector.load %arg11[%c0_24, %c0_25] : memref<1x256xf32, #tpu.memory_space<vmem>>, vector<1x256xf32>
      tpu.vector_store %arg11[%c0_24, %c0_25], %31 {strides = array<i32>} : memref<1x256xf32, #tpu.memory_space<vmem>>, vector<1x256xf32>,
      %c0_26 = arith.constant 0 : index
      %c0_27 = arith.constant 0 : index
      %33 = vector.load %arg12[%c0_26, %c0_27] : memref<1x256xf32, #tpu.memory_space<vmem>>, vector<1x256xf32>
      %34 = arith.mulf %23, %23 : vector<144x256xf32>
      %cst_28 = arith.constant dense<0.000000e+00> : vector<256xf32>
      %35 = vector.multi_reduction <add>, %34, %cst_28 [0] : vector<144x256xf32> to vector<256xf32>
      %36 = vector.shape_cast %35 : vector<256xf32> to vector<1x256xf32>
      %37 = arith.addf %33, %36 : vector<1x256xf32>
      %c0_29 = arith.constant 0 : index
      %c0_30 = arith.constant 0 : index
      %38 = vector.load %arg12[%c0_29, %c0_30] : memref<1x256xf32, #tpu.memory_space<vmem>>, vector<1x256xf32>
      tpu.vector_store %arg12[%c0_29, %c0_30], %37 {strides = array<i32>} : memref<1x256xf32, #tpu.memory_space<vmem>>, vector<1x256xf32>,
    } else {
    }
    %c0_i32_13 = arith.constant 0 : i32
    %18 = arith.cmpi eq, %arg2, %c0_i32_13 : i32
    %c3_i32_14 = arith.constant 3 : i32
    %19 = arith.cmpi eq, %arg3, %c3_i32_14 : i32
    %20 = arith.andi %18, %19 : i1
    %21 = arith.extui %20 : i1 to i32
    %c0_i32_15 = arith.constant 0 : i32
    %22 = arith.cmpi ne, %21, %c0_i32_15 : i32
    scf.if %22 {
      %c0_16 = arith.constant 0 : index
      %c0_17 = arith.constant 0 : index
      %23 = vector.load %arg11[%c0_16, %c0_17] : memref<1x256xf32, #tpu.memory_space<vmem>>, vector<1x256xf32>
      %c0_18 = arith.constant 0 : index
      %c0_19 = arith.constant 0 : index
      %c0_20 = arith.constant 0 : index
      %24 = vector.load %arg8[%c0_18, %c0_19, %c0_20] : memref<1x1x256xf32, #tpu.memory_space<vmem>>, vector<1x1x256xf32>
      %25 = vector.shape_cast %24 : vector<1x1x256xf32> to vector<1x256xf32>
      %26 = vector.shape_cast %23 : vector<1x256xf32> to vector<1x1x256xf32>
      tpu.vector_store %arg8[%c0_18, %c0_19, %c0_20], %26 {strides = array<i32>} : memref<1x1x256xf32, #tpu.memory_space<vmem>>, vector<1x1x256xf32>,
      %c0_21 = arith.constant 0 : index
      %c0_22 = arith.constant 0 : index
      %27 = vector.load %arg12[%c0_21, %c0_22] : memref<1x256xf32, #tpu.memory_space<vmem>>, vector<1x256xf32>
      %c0_23 = arith.constant 0 : index
      %c0_24 = arith.constant 0 : index
      %c0_25 = arith.constant 0 : index
      %28 = vector.load %arg9[%c0_23, %c0_24, %c0_25] : memref<1x1x256xf32, #tpu.memory_space<vmem>>, vector<1x1x256xf32>
      %29 = vector.shape_cast %28 : vector<1x1x256xf32> to vector<1x256xf32>
      %30 = vector.shape_cast %27 : vector<1x256xf32> to vector<1x1x256xf32>
      tpu.vector_store %arg9[%c0_23, %c0_24, %c0_25], %30 {strides = array<i32>} : memref<1x1x256xf32, #tpu.memory_space<vmem>>, vector<1x1x256xf32>,
    } else {
    }
    return
  }
  func.func @transform_0(%arg0: i32, %arg1: i32, %arg2: i32, %arg3: i32) -> (i32, i32, i32) {
    %c0_i32 = arith.constant 0 : i32
    return %arg0, %arg2, %arg3 : i32, i32, i32
  }
  func.func @transform_1(%arg0: i32, %arg1: i32, %arg2: i32, %arg3: i32) -> (i32, i32) {
    %c0_i32 = arith.constant 0 : i32
    return %arg3, %arg1 : i32, i32
  }
  func.func @transform_2(%arg0: i32, %arg1: i32, %arg2: i32, %arg3: i32) -> (i32, i32) {
    %c0_i32 = arith.constant 0 : i32
    %c0_i32_0 = arith.constant 0 : i32
    return %c0_i32, %arg1 : i32, i32
  }
  func.func @transform_3(%arg0: i32, %arg1: i32, %arg2: i32, %arg3: i32) -> (i32, i32, i32) {
    %c0_i32 = arith.constant 0 : i32
    return %arg0, %arg2, %arg1 : i32, i32, i32
  }
  func.func @transform_4(%arg0: i32, %arg1: i32, %arg2: i32, %arg3: i32) -> (i32, i32, i32) {
    %c0_i32 = arith.constant 0 : i32
    %c0_i32_0 = arith.constant 0 : i32
    return %arg0, %c0_i32, %arg1 : i32, i32, i32
  }
  func.func @transform_5(%arg0: i32, %arg1: i32, %arg2: i32, %arg3: i32) -> (i32, i32, i32) {
    %c0_i32 = arith.constant 0 : i32
    %c0_i32_0 = arith.constant 0 : i32
    return %arg0, %c0_i32, %arg1 : i32, i32, i32
  }
}

module attributes {stable_mosaic.version = 11 : i64} {
  func.func @_inorm_lrelu_apply_kernel(%arg0: i32, %arg1: i32, %arg2: i32, %arg3: memref<1x144x256xbf16, #tpu.memory_space<vmem>>, %arg4: memref<1x1x256xf32, #tpu.memory_space<vmem>>, %arg5: memref<1x1x256xf32, #tpu.memory_space<vmem>>, %arg6: memref<1x144x256xbf16, #tpu.memory_space<vmem>>) attributes {dimension_semantics = [#tpu.dimension_semantics<parallel>, #tpu.dimension_semantics<parallel>, #tpu.dimension_semantics<parallel>], iteration_bounds = array<i64: 2, 1, 1>, scalar_prefetch = 0 : i64, scratch_operands = 0 : i64, tpu.core_type = #tpu.core_type<tc>, window_params = [{transform_indices = @transform_0, window_bounds = array<i64: 1, 144, 256>}, {transform_indices = @transform_1, window_bounds = array<i64: 1, 1, 256>}, {transform_indices = @transform_2, window_bounds = array<i64: 1, 1, 256>}, {transform_indices = @transform_3, window_bounds = array<i64: 1, 144, 256>}]} {
    %c0 = arith.constant 0 : index
    %c0_0 = arith.constant 0 : index
    %c0_1 = arith.constant 0 : index
    %0 = vector.load %arg4[%c0, %c0_0, %c0_1] : memref<1x1x256xf32, #tpu.memory_space<vmem>>, vector<1x1x256xf32>
    %1 = vector.shape_cast %0 : vector<1x1x256xf32> to vector<1x256xf32>
    %cst = arith.constant 0.0069444445 : f32
    %2 = vector.broadcast %cst : f32 to vector<1x256xf32>
    %3 = arith.mulf %1, %2 : vector<1x256xf32>
    %c0_2 = arith.constant 0 : index
    %c0_3 = arith.constant 0 : index
    %c0_4 = arith.constant 0 : index
    %4 = vector.load %arg5[%c0_2, %c0_3, %c0_4] : memref<1x1x256xf32, #tpu.memory_space<vmem>>, vector<1x1x256xf32>
    %5 = vector.shape_cast %4 : vector<1x1x256xf32> to vector<1x256xf32>
    %cst_5 = arith.constant 0.0069444445 : f32
    %6 = vector.broadcast %cst_5 : f32 to vector<1x256xf32>
    %7 = arith.mulf %5, %6 : vector<1x256xf32>
    %8 = arith.mulf %3, %3 : vector<1x256xf32>
    %9 = arith.subf %7, %8 : vector<1x256xf32>
    %cst_6 = arith.constant 0.000000e+00 : f32
    %10 = vector.broadcast %cst_6 : f32 to vector<1x256xf32>
    %11 = arith.maximumf %9, %10 : vector<1x256xf32>
    %cst_7 = arith.constant 9.99999974E-6 : f32
    %12 = vector.broadcast %cst_7 : f32 to vector<1x256xf32>
    %13 = arith.addf %11, %12 : vector<1x256xf32>
    %14 = math.rsqrt %13 : vector<1x256xf32>
    %c0_8 = arith.constant 0 : index
    %c0_9 = arith.constant 0 : index
    %c0_10 = arith.constant 0 : index
    %15 = vector.load %arg3[%c0_8, %c0_9, %c0_10] : memref<1x144x256xbf16, #tpu.memory_space<vmem>>, vector<1x144x256xbf16>
    %16 = vector.shape_cast %15 : vector<1x144x256xbf16> to vector<144x256xbf16>
    %17 = arith.extf %16 : vector<144x256xbf16> to vector<144x256xf32>
    %18 = vector.broadcast %3 : vector<1x256xf32> to vector<144x256xf32>
    %19 = arith.subf %17, %18 : vector<144x256xf32>
    %20 = vector.broadcast %14 : vector<1x256xf32> to vector<144x256xf32>
    %21 = arith.mulf %19, %20 : vector<144x256xf32>
    %cst_11 = arith.constant 0.000000e+00 : f32
    %22 = vector.broadcast %cst_11 : f32 to vector<144x256xf32>
    %23 = arith.cmpf oge, %21, %22 : vector<144x256xf32>
    %cst_12 = arith.constant 2.000000e-01 : f32
    %24 = vector.broadcast %cst_12 : f32 to vector<144x256xf32>
    %25 = arith.mulf %24, %21 : vector<144x256xf32>
    %26 = arith.select %23, %21, %25 : vector<144x256xi1>, vector<144x256xf32>
    %27 = arith.truncf %26 : vector<144x256xf32> to vector<144x256xbf16>
    %c0_13 = arith.constant 0 : index
    %c0_14 = arith.constant 0 : index
    %c0_15 = arith.constant 0 : index
    %28 = vector.load %arg6[%c0_13, %c0_14, %c0_15] : memref<1x144x256xbf16, #tpu.memory_space<vmem>>, vector<1x144x256xbf16>
    %29 = vector.shape_cast %28 : vector<1x144x256xbf16> to vector<144x256xbf16>
    %30 = vector.shape_cast %27 : vector<144x256xbf16> to vector<1x144x256xbf16>
    tpu.vector_store %arg6[%c0_13, %c0_14, %c0_15], %30 {strides = array<i32>} : memref<1x144x256xbf16, #tpu.memory_space<vmem>>, vector<1x144x256xbf16>,
    return
  }
  func.func @transform_0(%arg0: i32, %arg1: i32, %arg2: i32) -> (i32, i32, i32) {
    %c0_i32 = arith.constant 0 : i32
    return %arg0, %arg2, %arg1 : i32, i32, i32
  }
  func.func @transform_1(%arg0: i32, %arg1: i32, %arg2: i32) -> (i32, i32, i32) {
    %c0_i32 = arith.constant 0 : i32
    %c0_i32_0 = arith.constant 0 : i32
    return %arg0, %c0_i32, %arg1 : i32, i32, i32
  }
  func.func @transform_2(%arg0: i32, %arg1: i32, %arg2: i32) -> (i32, i32, i32) {
    %c0_i32 = arith.constant 0 : i32
    %c0_i32_0 = arith.constant 0 : i32
    return %arg0, %c0_i32, %arg1 : i32, i32, i32
  }
  func.func @transform_3(%arg0: i32, %arg1: i32, %arg2: i32) -> (i32, i32, i32) {
    %c0_i32 = arith.constant 0 : i32
    return %arg0, %arg2, %arg1 : i32, i32, i32
  }
}

module attributes {stable_mosaic.version = 11 : i64} {
  func.func @_conv_gemm_kernel(%arg0: i32, %arg1: i32, %arg2: i32, %arg3: i32, %arg4: memref<1x128x512xbf16, #tpu.memory_space<vmem>>, %arg5: memref<512x256xbf16, #tpu.memory_space<vmem>>, %arg6: memref<1x256xf32, #tpu.memory_space<vmem>>, %arg7: memref<1x128x256xbf16, #tpu.memory_space<vmem>>, %arg8: memref<1x1x256xf32, #tpu.memory_space<vmem>>, %arg9: memref<1x1x256xf32, #tpu.memory_space<vmem>>, %arg10: memref<128x256xf32, #tpu.memory_space<vmem>>, %arg11: memref<1x256xf32, #tpu.memory_space<vmem>>, %arg12: memref<1x256xf32, #tpu.memory_space<vmem>>) attributes {dimension_semantics = [#tpu.dimension_semantics<parallel>, #tpu.dimension_semantics<parallel>, #tpu.dimension_semantics<arbitrary>, #tpu.dimension_semantics<arbitrary>], iteration_bounds = array<i64: 2, 2, 1, 8>, scalar_prefetch = 0 : i64, scratch_operands = 3 : i64, tpu.core_type = #tpu.core_type<tc>, window_params = [{transform_indices = @transform_0, window_bounds = array<i64: 1, 128, 512>}, {transform_indices = @transform_1, window_bounds = array<i64: 512, 256>}, {transform_indices = @transform_2, window_bounds = array<i64: 1, 256>}, {transform_indices = @transform_3, window_bounds = array<i64: 1, 128, 256>}, {transform_indices = @transform_4, window_bounds = array<i64: 1, 1, 256>}, {transform_indices = @transform_5, window_bounds = array<i64: 1, 1, 256>}]} {
    %c0_i32 = arith.constant 0 : i32
    %0 = arith.cmpi eq, %arg3, %c0_i32 : i32
    %1 = arith.extui %0 : i1 to i32
    %c0_i32_0 = arith.constant 0 : i32
    %2 = arith.cmpi ne, %1, %c0_i32_0 : i32
    scf.if %2 {
      %cst_16 = arith.constant 0.000000e+00 : f32
      %23 = vector.broadcast %cst_16 : f32 to vector<128x256xf32>
      %c0_17 = arith.constant 0 : index
      %c0_18 = arith.constant 0 : index
      %24 = vector.load %arg10[%c0_17, %c0_18] : memref<128x256xf32, #tpu.memory_space<vmem>>, vector<128x256xf32>
      tpu.vector_store %arg10[%c0_17, %c0_18], %23 {strides = array<i32>} : memref<128x256xf32, #tpu.memory_space<vmem>>, vector<128x256xf32>,
    } else {
    }
    %c0_i32_1 = arith.constant 0 : i32
    %3 = arith.cmpi eq, %arg2, %c0_i32_1 : i32
    %c0_i32_2 = arith.constant 0 : i32
    %4 = arith.cmpi eq, %arg3, %c0_i32_2 : i32
    %5 = arith.andi %3, %4 : i1
    %6 = arith.extui %5 : i1 to i32
    %c0_i32_3 = arith.constant 0 : i32
    %7 = arith.cmpi ne, %6, %c0_i32_3 : i32
    scf.if %7 {
      %cst_16 = arith.constant 0.000000e+00 : f32
      %23 = vector.broadcast %cst_16 : f32 to vector<1x256xf32>
      %c0_17 = arith.constant 0 : index
      %c0_18 = arith.constant 0 : index
      %24 = vector.load %arg11[%c0_17, %c0_18] : memref<1x256xf32, #tpu.memory_space<vmem>>, vector<1x256xf32>
      tpu.vector_store %arg11[%c0_17, %c0_18], %23 {strides = array<i32>} : memref<1x256xf32, #tpu.memory_space<vmem>>, vector<1x256xf32>,
      %cst_19 = arith.constant 0.000000e+00 : f32
      %25 = vector.broadcast %cst_19 : f32 to vector<1x256xf32>
      %c0_20 = arith.constant 0 : index
      %c0_21 = arith.constant 0 : index
      %26 = vector.load %arg12[%c0_20, %c0_21] : memref<1x256xf32, #tpu.memory_space<vmem>>, vector<1x256xf32>
      tpu.vector_store %arg12[%c0_20, %c0_21], %25 {strides = array<i32>} : memref<1x256xf32, #tpu.memory_space<vmem>>, vector<1x256xf32>,
    } else {
    }
    %c0 = arith.constant 0 : index
    %c0_4 = arith.constant 0 : index
    %8 = vector.load %arg10[%c0, %c0_4] : memref<128x256xf32, #tpu.memory_space<vmem>>, vector<128x256xf32>
    %c0_5 = arith.constant 0 : index
    %c0_6 = arith.constant 0 : index
    %c0_7 = arith.constant 0 : index
    %9 = vector.load %arg4[%c0_5, %c0_6, %c0_7] : memref<1x128x512xbf16, #tpu.memory_space<vmem>>, vector<1x128x512xbf16>
    %10 = vector.shape_cast %9 : vector<1x128x512xbf16> to vector<128x512xbf16>
    %c0_8 = arith.constant 0 : index
    %c0_9 = arith.constant 0 : index
    %11 = vector.load %arg5[%c0_8, %c0_9] : memref<512x256xbf16, #tpu.memory_space<vmem>>, vector<512x256xbf16>
    %cst = arith.constant dense<0.000000e+00> : vector<128x256xf32>
    %12 = tpu.matmul %10, %11, %cst {dimension_numbers = #tpu.dot_dimension_numbers<[1], [0], [0], [1], [0, 0, 1, 1], [], []>} : vector<128x512xbf16>, vector<512x256xbf16>, vector<128x256xf32> -> vector<128x256xf32>
    %13 = arith.addf %8, %12 : vector<128x256xf32>
    %c0_10 = arith.constant 0 : index
    %c0_11 = arith.constant 0 : index
    %14 = vector.load %arg10[%c0_10, %c0_11] : memref<128x256xf32, #tpu.memory_space<vmem>>, vector<128x256xf32>
    tpu.vector_store %arg10[%c0_10, %c0_11], %13 {strides = array<i32>} : memref<128x256xf32, #tpu.memory_space<vmem>>, vector<128x256xf32>,
    %c7_i32 = arith.constant 7 : i32
    %15 = arith.cmpi eq, %arg3, %c7_i32 : i32
    %16 = arith.extui %15 : i1 to i32
    %c0_i32_12 = arith.constant 0 : i32
    %17 = arith.cmpi ne, %16, %c0_i32_12 : i32
    scf.if %17 {
      %c0_16 = arith.constant 0 : index
      %c0_17 = arith.constant 0 : index
      %23 = vector.load %arg10[%c0_16, %c0_17] : memref<128x256xf32, #tpu.memory_space<vmem>>, vector<128x256xf32>
      %24 = arith.truncf %23 : vector<128x256xf32> to vector<128x256xbf16>
      %c0_18 = arith.constant 0 : index
      %c0_19 = arith.constant 0 : index
      %c0_20 = arith.constant 0 : index
      %25 = vector.load %arg7[%c0_18, %c0_19, %c0_20] : memref<1x128x256xbf16, #tpu.memory_space<vmem>>, vector<1x128x256xbf16>
      %26 = vector.shape_cast %25 : vector<1x128x256xbf16> to vector<128x256xbf16>
      %27 = vector.shape_cast %24 : vector<128x256xbf16> to vector<1x128x256xbf16>
      tpu.vector_store %arg7[%c0_18, %c0_19, %c0_20], %27 {strides = array<i32>} : memref<1x128x256xbf16, #tpu.memory_space<vmem>>, vector<1x128x256xbf16>,
      %c0_21 = arith.constant 0 : index
      %c0_22 = arith.constant 0 : index
      %28 = vector.load %arg11[%c0_21, %c0_22] : memref<1x256xf32, #tpu.memory_space<vmem>>, vector<1x256xf32>
      %cst_23 = arith.constant dense<0.000000e+00> : vector<256xf32>
      %29 = vector.multi_reduction <add>, %23, %cst_23 [0] : vector<128x256xf32> to vector<256xf32>
      %30 = vector.shape_cast %29 : vector<256xf32> to vector<1x256xf32>
      %31 = arith.addf %28, %30 : vector<1x256xf32>
      %c0_24 = arith.constant 0 : index
      %c0_25 = arith.constant 0 : index
      %32 = vector.load %arg11[%c0_24, %c0_25] : memref<1x256xf32, #tpu.memory_space<vmem>>, vector<1x256xf32>
      tpu.vector_store %arg11[%c0_24, %c0_25], %31 {strides = array<i32>} : memref<1x256xf32, #tpu.memory_space<vmem>>, vector<1x256xf32>,
      %c0_26 = arith.constant 0 : index
      %c0_27 = arith.constant 0 : index
      %33 = vector.load %arg12[%c0_26, %c0_27] : memref<1x256xf32, #tpu.memory_space<vmem>>, vector<1x256xf32>
      %34 = arith.mulf %23, %23 : vector<128x256xf32>
      %cst_28 = arith.constant dense<0.000000e+00> : vector<256xf32>
      %35 = vector.multi_reduction <add>, %34, %cst_28 [0] : vector<128x256xf32> to vector<256xf32>
      %36 = vector.shape_cast %35 : vector<256xf32> to vector<1x256xf32>
      %37 = arith.addf %33, %36 : vector<1x256xf32>
      %c0_29 = arith.constant 0 : index
      %c0_30 = arith.constant 0 : index
      %38 = vector.load %arg12[%c0_29, %c0_30] : memref<1x256xf32, #tpu.memory_space<vmem>>, vector<1x256xf32>
      tpu.vector_store %arg12[%c0_29, %c0_30], %37 {strides = array<i32>} : memref<1x256xf32, #tpu.memory_space<vmem>>, vector<1x256xf32>,
    } else {
    }
    %c0_i32_13 = arith.constant 0 : i32
    %18 = arith.cmpi eq, %arg2, %c0_i32_13 : i32
    %c7_i32_14 = arith.constant 7 : i32
    %19 = arith.cmpi eq, %arg3, %c7_i32_14 : i32
    %20 = arith.andi %18, %19 : i1
    %21 = arith.extui %20 : i1 to i32
    %c0_i32_15 = arith.constant 0 : i32
    %22 = arith.cmpi ne, %21, %c0_i32_15 : i32
    scf.if %22 {
      %c0_16 = arith.constant 0 : index
      %c0_17 = arith.constant 0 : index
      %23 = vector.load %arg11[%c0_16, %c0_17] : memref<1x256xf32, #tpu.memory_space<vmem>>, vector<1x256xf32>
      %c0_18 = arith.constant 0 : index
      %c0_19 = arith.constant 0 : index
      %c0_20 = arith.constant 0 : index
      %24 = vector.load %arg8[%c0_18, %c0_19, %c0_20] : memref<1x1x256xf32, #tpu.memory_space<vmem>>, vector<1x1x256xf32>
      %25 = vector.shape_cast %24 : vector<1x1x256xf32> to vector<1x256xf32>
      %26 = vector.shape_cast %23 : vector<1x256xf32> to vector<1x1x256xf32>
      tpu.vector_store %arg8[%c0_18, %c0_19, %c0_20], %26 {strides = array<i32>} : memref<1x1x256xf32, #tpu.memory_space<vmem>>, vector<1x1x256xf32>,
      %c0_21 = arith.constant 0 : index
      %c0_22 = arith.constant 0 : index
      %27 = vector.load %arg12[%c0_21, %c0_22] : memref<1x256xf32, #tpu.memory_space<vmem>>, vector<1x256xf32>
      %c0_23 = arith.constant 0 : index
      %c0_24 = arith.constant 0 : index
      %c0_25 = arith.constant 0 : index
      %28 = vector.load %arg9[%c0_23, %c0_24, %c0_25] : memref<1x1x256xf32, #tpu.memory_space<vmem>>, vector<1x1x256xf32>
      %29 = vector.shape_cast %28 : vector<1x1x256xf32> to vector<1x256xf32>
      %30 = vector.shape_cast %27 : vector<1x256xf32> to vector<1x1x256xf32>
      tpu.vector_store %arg9[%c0_23, %c0_24, %c0_25], %30 {strides = array<i32>} : memref<1x1x256xf32, #tpu.memory_space<vmem>>, vector<1x1x256xf32>,
    } else {
    }
    return
  }
  func.func @transform_0(%arg0: i32, %arg1: i32, %arg2: i32, %arg3: i32) -> (i32, i32, i32) {
    %c0_i32 = arith.constant 0 : i32
    return %arg0, %arg2, %arg3 : i32, i32, i32
  }
  func.func @transform_1(%arg0: i32, %arg1: i32, %arg2: i32, %arg3: i32) -> (i32, i32) {
    %c0_i32 = arith.constant 0 : i32
    return %arg3, %arg1 : i32, i32
  }
  func.func @transform_2(%arg0: i32, %arg1: i32, %arg2: i32, %arg3: i32) -> (i32, i32) {
    %c0_i32 = arith.constant 0 : i32
    %c0_i32_0 = arith.constant 0 : i32
    return %c0_i32, %arg1 : i32, i32
  }
  func.func @transform_3(%arg0: i32, %arg1: i32, %arg2: i32, %arg3: i32) -> (i32, i32, i32) {
    %c0_i32 = arith.constant 0 : i32
    return %arg0, %arg2, %arg1 : i32, i32, i32
  }
  func.func @transform_4(%arg0: i32, %arg1: i32, %arg2: i32, %arg3: i32) -> (i32, i32, i32) {
    %c0_i32 = arith.constant 0 : i32
    %c0_i32_0 = arith.constant 0 : i32
    return %arg0, %c0_i32, %arg1 : i32, i32, i32
  }
  func.func @transform_5(%arg0: i32, %arg1: i32, %arg2: i32, %arg3: i32) -> (i32, i32, i32) {
    %c0_i32 = arith.constant 0 : i32
    %c0_i32_0 = arith.constant 0 : i32
    return %arg0, %c0_i32, %arg1 : i32, i32, i32
  }
}

module attributes {stable_mosaic.version = 11 : i64} {
  func.func @_inorm_lrelu_apply_kernel(%arg0: i32, %arg1: i32, %arg2: i32, %arg3: memref<1x128x256xbf16, #tpu.memory_space<vmem>>, %arg4: memref<1x1x256xf32, #tpu.memory_space<vmem>>, %arg5: memref<1x1x256xf32, #tpu.memory_space<vmem>>, %arg6: memref<1x128x256xbf16, #tpu.memory_space<vmem>>) attributes {dimension_semantics = [#tpu.dimension_semantics<parallel>, #tpu.dimension_semantics<parallel>, #tpu.dimension_semantics<parallel>], iteration_bounds = array<i64: 2, 2, 1>, scalar_prefetch = 0 : i64, scratch_operands = 0 : i64, tpu.core_type = #tpu.core_type<tc>, window_params = [{transform_indices = @transform_0, window_bounds = array<i64: 1, 128, 256>}, {transform_indices = @transform_1, window_bounds = array<i64: 1, 1, 256>}, {transform_indices = @transform_2, window_bounds = array<i64: 1, 1, 256>}, {transform_indices = @transform_3, window_bounds = array<i64: 1, 128, 256>}]} {
    %c0 = arith.constant 0 : index
    %c0_0 = arith.constant 0 : index
    %c0_1 = arith.constant 0 : index
    %0 = vector.load %arg4[%c0, %c0_0, %c0_1] : memref<1x1x256xf32, #tpu.memory_space<vmem>>, vector<1x1x256xf32>
    %1 = vector.shape_cast %0 : vector<1x1x256xf32> to vector<1x256xf32>
    %cst = arith.constant 0.00826446246 : f32
    %2 = vector.broadcast %cst : f32 to vector<1x256xf32>
    %3 = arith.mulf %1, %2 : vector<1x256xf32>
    %c0_2 = arith.constant 0 : index
    %c0_3 = arith.constant 0 : index
    %c0_4 = arith.constant 0 : index
    %4 = vector.load %arg5[%c0_2, %c0_3, %c0_4] : memref<1x1x256xf32, #tpu.memory_space<vmem>>, vector<1x1x256xf32>
    %5 = vector.shape_cast %4 : vector<1x1x256xf32> to vector<1x256xf32>
    %cst_5 = arith.constant 0.00826446246 : f32
    %6 = vector.broadcast %cst_5 : f32 to vector<1x256xf32>
    %7 = arith.mulf %5, %6 : vector<1x256xf32>
    %8 = arith.mulf %3, %3 : vector<1x256xf32>
    %9 = arith.subf %7, %8 : vector<1x256xf32>
    %cst_6 = arith.constant 0.000000e+00 : f32
    %10 = vector.broadcast %cst_6 : f32 to vector<1x256xf32>
    %11 = arith.maximumf %9, %10 : vector<1x256xf32>
    %cst_7 = arith.constant 9.99999974E-6 : f32
    %12 = vector.broadcast %cst_7 : f32 to vector<1x256xf32>
    %13 = arith.addf %11, %12 : vector<1x256xf32>
    %14 = math.rsqrt %13 : vector<1x256xf32>
    %c0_8 = arith.constant 0 : index
    %c0_9 = arith.constant 0 : index
    %c0_10 = arith.constant 0 : index
    %15 = vector.load %arg3[%c0_8, %c0_9, %c0_10] : memref<1x128x256xbf16, #tpu.memory_space<vmem>>, vector<1x128x256xbf16>
    %16 = vector.shape_cast %15 : vector<1x128x256xbf16> to vector<128x256xbf16>
    %17 = arith.extf %16 : vector<128x256xbf16> to vector<128x256xf32>
    %18 = vector.broadcast %3 : vector<1x256xf32> to vector<128x256xf32>
    %19 = arith.subf %17, %18 : vector<128x256xf32>
    %20 = vector.broadcast %14 : vector<1x256xf32> to vector<128x256xf32>
    %21 = arith.mulf %19, %20 : vector<128x256xf32>
    %cst_11 = arith.constant 0.000000e+00 : f32
    %22 = vector.broadcast %cst_11 : f32 to vector<128x256xf32>
    %23 = arith.cmpf oge, %21, %22 : vector<128x256xf32>
    %cst_12 = arith.constant 2.000000e-01 : f32
    %24 = vector.broadcast %cst_12 : f32 to vector<128x256xf32>
    %25 = arith.mulf %24, %21 : vector<128x256xf32>
    %26 = arith.select %23, %21, %25 : vector<128x256xi1>, vector<128x256xf32>
    %27 = arith.truncf %26 : vector<128x256xf32> to vector<128x256xbf16>
    %c0_13 = arith.constant 0 : index
    %c0_14 = arith.constant 0 : index
    %c0_15 = arith.constant 0 : index
    %28 = vector.load %arg6[%c0_13, %c0_14, %c0_15] : memref<1x128x256xbf16, #tpu.memory_space<vmem>>, vector<1x128x256xbf16>
    %29 = vector.shape_cast %28 : vector<1x128x256xbf16> to vector<128x256xbf16>
    %30 = vector.shape_cast %27 : vector<128x256xbf16> to vector<1x128x256xbf16>
    tpu.vector_store %arg6[%c0_13, %c0_14, %c0_15], %30 {strides = array<i32>} : memref<1x128x256xbf16, #tpu.memory_space<vmem>>, vector<1x128x256xbf16>,
    return
  }
  func.func @transform_0(%arg0: i32, %arg1: i32, %arg2: i32) -> (i32, i32, i32) {
    %c0_i32 = arith.constant 0 : i32
    return %arg0, %arg2, %arg1 : i32, i32, i32
  }
  func.func @transform_1(%arg0: i32, %arg1: i32, %arg2: i32) -> (i32, i32, i32) {
    %c0_i32 = arith.constant 0 : i32
    %c0_i32_0 = arith.constant 0 : i32
    return %arg0, %c0_i32, %arg1 : i32, i32, i32
  }
  func.func @transform_2(%arg0: i32, %arg1: i32, %arg2: i32) -> (i32, i32, i32) {
    %c0_i32 = arith.constant 0 : i32
    %c0_i32_0 = arith.constant 0 : i32
    return %arg0, %c0_i32, %arg1 : i32, i32, i32
  }
  func.func @transform_3(%arg0: i32, %arg1: i32, %arg2: i32) -> (i32, i32, i32) {
    %c0_i32 = arith.constant 0 : i32
    return %arg0, %arg2, %arg1 : i32, i32, i32
  }
}

module attributes {stable_mosaic.version = 11 : i64} {
  func.func @_head_conv_pool_kernel(%arg0: i32, %arg1: memref<1x13x13x512xbf16, #tpu.memory_space<vmem>>, %arg2: memref<13x13x512xf32, #tpu.memory_space<vmem>>, %arg3: memref<1x128xf32, #tpu.memory_space<vmem>>, %arg4: memref<1x1x128xf32, #tpu.memory_space<vmem>>) attributes {dimension_semantics = [#tpu.dimension_semantics<parallel>], iteration_bounds = array<i64: 2>, scalar_prefetch = 0 : i64, scratch_operands = 0 : i64, tpu.core_type = #tpu.core_type<tc>, window_params = [{transform_indices = @transform_0, window_bounds = array<i64: 1, 13, 13, 512>}, {pipeline_mode = #tpu.pipeline_mode<synchronous>, transform_indices = @transform_1, window_bounds = array<i64: 13, 13, 512>}, {pipeline_mode = #tpu.pipeline_mode<synchronous>, transform_indices = @transform_2, window_bounds = array<i64: 1, 128>}, {transform_indices = @transform_3, window_bounds = array<i64: 1, 1, 128>}]} {
    %c0 = arith.constant 0 : index
    %c0_0 = arith.constant 0 : index
    %c0_1 = arith.constant 0 : index
    %c0_2 = arith.constant 0 : index
    %0 = vector.load %arg1[%c0, %c0_0, %c0_1, %c0_2] : memref<1x13x13x512xbf16, #tpu.memory_space<vmem>>, vector<1x13x13x512xbf16>
    %1 = vector.shape_cast %0 : vector<1x13x13x512xbf16> to vector<13x13x512xbf16>
    %2 = arith.extf %1 : vector<13x13x512xbf16> to vector<13x13x512xf32>
    %c0_3 = arith.constant 0 : index
    %c0_4 = arith.constant 0 : index
    %c0_5 = arith.constant 0 : index
    %3 = vector.load %arg2[%c0_3, %c0_4, %c0_5] : memref<13x13x512xf32, #tpu.memory_space<vmem>>, vector<13x13x512xf32>
    %4 = arith.mulf %2, %3 : vector<13x13x512xf32>
    %cst = arith.constant dense<0.000000e+00> : vector<512xf32>
    %5 = vector.multi_reduction <add>, %4, %cst [0, 1] : vector<13x13x512xf32> to vector<512xf32>
    %6 = vector.shape_cast %5 : vector<512xf32> to vector<1x512xf32>
    %cst_6 = arith.constant dense<0.000000e+00> : vector<1xf32>
    %7 = vector.multi_reduction <add>, %6, %cst_6 [1] : vector<1x512xf32> to vector<1xf32>
    %8 = vector.shape_cast %7 : vector<1xf32> to vector<1x1xf32>
    %9 = vector.extract %8[0, 0] : f32 from vector<1x1xf32>
    %cst_7 = arith.constant 0.00999999977 : f32
    %10 = arith.mulf %9, %cst_7 : f32
    %c0_8 = arith.constant 0 : index
    %c0_9 = arith.constant 0 : index
    %11 = vector.load %arg3[%c0_8, %c0_9] : memref<1x128xf32, #tpu.memory_space<vmem>>, vector<1x128xf32>
    %12 = vector.broadcast %10 : f32 to vector<1x128xf32>
    %13 = arith.addf %12, %11 : vector<1x128xf32>
    %c0_10 = arith.constant 0 : index
    %c0_11 = arith.constant 0 : index
    %c0_12 = arith.constant 0 : index
    %14 = vector.load %arg4[%c0_10, %c0_11, %c0_12] : memref<1x1x128xf32, #tpu.memory_space<vmem>>, vector<1x1x128xf32>
    %15 = vector.shape_cast %14 : vector<1x1x128xf32> to vector<1x128xf32>
    %16 = vector.shape_cast %13 : vector<1x128xf32> to vector<1x1x128xf32>
    tpu.vector_store %arg4[%c0_10, %c0_11, %c0_12], %16 {strides = array<i32>} : memref<1x1x128xf32, #tpu.memory_space<vmem>>, vector<1x1x128xf32>,
    return
  }
  func.func @transform_0(%arg0: i32) -> (i32, i32, i32, i32) {
    %c0_i32 = arith.constant 0 : i32
    %c0_i32_0 = arith.constant 0 : i32
    %c0_i32_1 = arith.constant 0 : i32
    %c0_i32_2 = arith.constant 0 : i32
    return %arg0, %c0_i32, %c0_i32_0, %c0_i32_1 : i32, i32, i32, i32
  }
  func.func @transform_1(%arg0: i32) -> (i32, i32, i32) {
    %c0_i32 = arith.constant 0 : i32
    %c0_i32_0 = arith.constant 0 : i32
    %c0_i32_1 = arith.constant 0 : i32
    %c0_i32_2 = arith.constant 0 : i32
    return %c0_i32, %c0_i32_0, %c0_i32_1 : i32, i32, i32
  }
  func.func @transform_2(%arg0: i32) -> (i32, i32) {
    %c0_i32 = arith.constant 0 : i32
    %c0_i32_0 = arith.constant 0 : i32
    %c0_i32_1 = arith.constant 0 : i32
    return %c0_i32, %c0_i32_0 : i32, i32
  }
  func.func @transform_3(%arg0: i32) -> (i32, i32, i32) {
    %c0_i32 = arith.constant 0 : i32
    %c0_i32_0 = arith.constant 0 : i32
    %c0_i32_1 = arith.constant 0 : i32
    return %arg0, %c0_i32, %c0_i32_0 : i32, i32, i32
  }
}

</mosaic_0001>

<bundles_post_ra>
// kernel: discriminator_forward.8
= control target key start
LH: loop header
LB: loop body
LE: loop exit
PB: predicated region body
PF: predicated region fallthrough
CT: control target
= control target key end

     0   :  { %11 = vsyncpa [#allocation6], 0  ;;  %s2451_s0 = inlined_call_operand.vmem [shape: bf16[2,2304,128], index: 0, kind: input, shape index: {}]   ;;  %s2452_s1 = inlined_call_operand.vmem [shape: bf16[128,128], index: 1, kind: input, shape index: {}]   ;;  %s2453_s2 = inlined_call_operand.vmem [shape: f32[1,128], index: 2, kind: input, shape index: {}]   ;;  %s2454_s3 = inlined_call_operand.vmem [shape: bf16[2,2304,128], index: 3, kind: output, shape index: {0}]   ;;  %s2455_s4 = inlined_call_operand.hbm [shape: f32[2,1,128], index: 4, kind: output, shape index: {1}]   ;;  %s2456_s5 = inlined_call_operand.hbm [shape: f32[2,1,128], index: 5, kind: output, shape index: {2}]  }
   0x1   :  { %13 = vsyncpa [#allocation6 + $0x1], 0 }
   0x2   :  { %14 = vsyncpa [#allocation8], 0 }
   0x3   :  { %16 = vsyncpa [#allocation8 + $0x1], 0  ;;  %s2100_s18 = smov 0   ;;  %s2102_s19 = smov 0  }
   0x4   :  { %s2104_s20 = smov 0   ;;  %s2106_s21 = smov 0  }
   0x5   :  { %s2108_s22 = smov 0   ;;  %s2110_s23 = smov 0  }
   0x6   :  { %s2112_s24 = smov 0   ;;  %s2114_s25 = smov 0  }
   0x7 LB: > { %s1544_s26 = sadd.s32 4294967295, %s2064_s25   ;;  %s1545_s27 = sadd.s32 4294967294, %s2064_s25   ;;  %s2064_s25 = sphi %s2114_s25, %s22_s25   ;;  %s2060_s24 = sphi %s2112_s24, %s2470_s24   ;;  %s2056_s23 = sphi %s2110_s23, %s2469_s23   ;;  %s2052_s22 = sphi %s2108_s22, %s2468_s22   ;;  %s2048_s21 = sphi %s2106_s21, %s2467_s21   ;;  %s2044_s20 = sphi %s2104_s20, %s2466_s20   ;;  %s2040_s19 = sphi %s2102_s19, %s2465_s19   ;;  %s2036_s18 = sphi %s2100_s18, %s2464_s18  }
   0x8   : > { %s40_s28 = sadd.s32 1, %s2056_s23  ;;  %s48_s29 = sadd.s32 1, %s2060_s24 }
   0x9   : > { %p42_p0 = scmp.ge.s32.totalorder %s40_s28, 9  ;;  %p181_p1 = scmp.ne.s32.totalorder %s2044_s20, %s2040_s19 }
   0xa   : > { %p182_p2 = scmp.eq.s32.totalorder %s1544_s26, 17  ;;  %p187_p4 = scmp.ne.s32.totalorder %s2040_s19, %s2036_s18 }
   0xb   : > { %s2472_s28 = smov (%p42_p0, %s40_s28), 0  ;;  %s2474_s29 = smov (!%p42_p0, %s48_s29), %s2060_s24 }
   0xc   : > { %2458 = sst [smem:[#allocation11_spill]] %s2472_s28  ;;  %p2149_p3 = por %p182_p2, %p181_p1 }
   0xd   : > { %p50_p5 = scmp.ge.s32.totalorder %s2474_s29, 2  ;;  %p188_p6 = scmp.eq.s32.totalorder %s1545_s27, 17 }
   0xe   : > { %p1550_p7 = scmp.ge.s32.totalorder %s2064_s25, 1  ;;  %p268_p8 = scmp.lt.s32.totalorder %s2064_s25, 19 }
   0xf   : > { %s2476_s29 = smov (%p50_p5, %s2474_s29), 0  ;;  %p2159_p9 = por %p188_p6, %p187_p4 }
  0x10   : > { %2460 = sst [smem:[#allocation12_spill]] %s2476_s29  ;;  %p269_p10 = pnand %p1550_p7, %p268_p8 }
  0x11   : > { %s166_s7 = ssub.s32 %s2060_s24, %s2476_s29  ;;  %s171_s8 = sadd.s32 1, %s2044_s20  ;;  %v2066_v0 = vmov (!%p269_p10), 0.0  }
  0x12   : > { %p169_p11 = scmp.eq.s32.totalorder %s166_s7, 0  ;;  %272 = sbr.rel (%p269_p10) target bundleno = 431 (0x1af), region = 32  ;;  %372 = vst [vmem:[#allocation2] sm:$0xff] (!%p269_p10), %v2066_v0  ;;  %373 = vst [vmem:[#allocation2 + $0x8] sm:$0xff] (!%p269_p10), %v2066_v0 }
  0x13   : > { %s2170_s10 = sand.u32 (!%p269_p10), 1, %s2040_s19   ;;  %s1551_s11 = sshll.u32 (!%p269_p10), %s2048_s21, 5  ;;  %374 = vst [vmem:[#allocation2 + $0x10] sm:$0xff] (!%p269_p10), %v2066_v0  ;;  %375 = vst [vmem:[#allocation2 + $0x18] sm:$0xff] (!%p269_p10), %v2066_v0 }
  0x14   : > { %s2167_s9 = scalar_select %p169_p11, %s2044_s20, %s171_s8  }
  0x15   : > { %376 = vst [vmem:[#allocation2 + $0x20] sm:$0xff] (!%p269_p10), %v2066_v0  ;;  %377 = vst [vmem:[#allocation2 + $0x28] sm:$0xff] (!%p269_p10), %v2066_v0  ;;  %p330_p12 = scmp.lt.s32.totalorder (!%p269_p10), %s2052_s22, 1  ;;  %p332_p13 = scmp.lt.s32.totalorder (!%p269_p10), %s1551_s11, 287 }
  0x16   : > { %378 = vst [vmem:[#allocation2 + $0x30] sm:$0xff] (!%p269_p10), %v2066_v0  ;;  %379 = vst [vmem:[#allocation2 + $0x38] sm:$0xff] (!%p269_p10), %v2066_v0  ;;  %p404_p0 = scmp.eq.s32.totalorder (!%p269_p10), %s2048_s21, 0  ;;  %s322_s29 = scalar_lea.vmem (!%p269_p10), [#allocation5], %s2170_s10 }
  0x17   : > { %380 = vst [vmem:[#allocation2 + $0x40] sm:$0xff] (!%p269_p10), %v2066_v0  ;;  %381 = vst [vmem:[#allocation2 + $0x48] sm:$0xff] (!%p269_p10), %v2066_v0  ;;  %s328_s28 = scalar_lea.vmem (!%p269_p10), [#allocation7], %s2170_s10 }
  0x18   : > { %382 = vst [vmem:[#allocation2 + $0x50] sm:$0xff] (!%p269_p10), %v2066_v0  ;;  %383 = vst [vmem:[#allocation2 + $0x58] sm:$0xff] (!%p269_p10), %v2066_v0 }
  0x19   : > { %384 = vst [vmem:[#allocation2 + $0x60] sm:$0xff] %v2066_v0  ;;  %385 = vst [vmem:[#allocation2 + $0x68] sm:$0xff] %v2066_v0  ;;  %s331_s12 = scalar_select %p330_p12, %s2052_s22, 1 }
  0x1a   : > { %386 = vst [vmem:[#allocation2 + $0x70] sm:$0xff] %v2066_v0  ;;  %387 = vst [vmem:[#allocation2 + $0x78] sm:$0xff] %v2066_v0  ;;  %s2478_s11 = smov (!%p332_p13, %s1551_s11), 287  ;;  %v2067_v1 = vmov (%p404_p0), 0.0  }
  0x1b   : > { %388 = vst [vmem:[#allocation2 + $0x80] sm:$0xff] %v2066_v0  ;;  %389 = vst [vmem:[#allocation2 + $0x88] sm:$0xff] %v2066_v0  ;;  %s1835_s13 = smul.u32 288, %s331_s12 }
  0x1c   : > { %390 = vst [vmem:[#allocation2 + $0x90] sm:$0xff] %v2066_v0  ;;  %391 = vst [vmem:[#allocation2 + $0x98] sm:$0xff] %v2066_v0  ;;  %408 = sbr.rel (!%p404_p0) target bundleno = 36 (0x24), region = 40 }
  0x1d   : > { %392 = vst [vmem:[#allocation2 + $0xa0] sm:$0xff] %v2066_v0  ;;  %393 = vst [vmem:[#allocation2 + $0xa8] sm:$0xff] %v2066_v0  ;;  %s338_s14 = sadd.s32 %s1835_s13, %s2478_s11 }
  0x1e   : > { %394 = vst [vmem:[#allocation2 + $0xb0] sm:$0xff] %v2066_v0  ;;  %395 = vst [vmem:[#allocation2 + $0xb8] sm:$0xff] %v2066_v0  ;;  %s1552_s15 = sshll.u32 %s338_s14, 2 }
  0x1f   : > { %396 = vst [vmem:[#allocation2 + $0xc0] sm:$0xff] %v2066_v0  ;;  %397 = vst [vmem:[#allocation2 + $0xc8] sm:$0xff] %v2066_v0  ;;  %s2183_s26 = scalar_lea.vmem %s2451_s0, %s1552_s15  ;;  %s2188_s8 = scalar_lea.vmem %s2454_s3, %s1552_s15 }
  0x20   : > { %398 = vst [vmem:[#allocation2 + $0xd0] sm:$0xff] %v2066_v0  ;;  %399 = vst [vmem:[#allocation2 + $0xd8] sm:$0xff] %v2066_v0 }
  0x21   : > { %400 = vst [vmem:[#allocation2 + $0xe0] sm:$0xff] %v2066_v0  ;;  %401 = vst [vmem:[#allocation2 + $0xe8] sm:$0xff] %v2066_v0 }
  0x22   : > { %402 = vst [vmem:[#allocation2 + $0xf0] sm:$0xff] %v2066_v0  ;;  %403 = vst [vmem:[#allocation2 + $0xf8] sm:$0xff] %v2066_v0 }
  0x23   : > { %409 = vst [vmem:[#allocation3] sm:$0x1] %v2067_v1  ;;  %410 = vst [vmem:[#allocation4] sm:$0x1] %v2067_v1 }
  0x24 PF: > { %v1914_v2 = vld [vmem:[%s2452_s1] sm:$0xff]   ;;  %v1915_v3 = vld [vmem:[%s2452_s1 + $0x8] sm:$0xff]   ;;  %v1916_v4 = vld [vmem:[%s2452_s1 + $0x10] sm:$0xff]   ;;  %p1302_p1 = scmp.eq.s32.totalorder %s2048_s21, 8 }
  0x25   : > { %1771 = vmatprep.subr.bf16.mxu0 %v1914_v2  ;;  %1819 = vmatprep.subr.bf16.mxu1 %v1914_v2  ;;  %v1917_v5 = vld [vmem:[%s2452_s1 + $0x18] sm:$0xff]   ;;  %v1922_v6 = vld [vmem:[%s2183_s26] sm:$0xff]   ;;  %v1919_v8 = vld [vmem:[%s2452_s1 + $0x28] sm:$0xff]  }
  0x26   : > { %1772 = vmatpush3.bf16.msra.mxu0 %v1914_v2  ;;  %1827 = vmatpush3.bf16.msra.mxu1 %v1914_v2  ;;  %v1918_v7 = vld [vmem:[%s2452_s1 + $0x20] sm:$0xff]   ;;  %v1920_v10 = vld [vmem:[%s2452_s1 + $0x30] sm:$0xff]   ;;  %v1921_v11 = vld [vmem:[%s2452_s1 + $0x38] sm:$0xff]  }
  0x27   : > { %1773 = vmatprep.subr.bf16.mxu0 %v1915_v3  ;;  %1820 = vmatprep.subr.bf16.mxu1 %v1915_v3  ;;  %v1930_v9 = vld [vmem:[%s2183_s26 + $0x40] sm:$0xff]   ;;  %v1923_v12 = vld [vmem:[%s2183_s26 + $0x8] sm:$0xff]   ;;  %v1924_v14 = vld [vmem:[%s2183_s26 + $0x10] sm:$0xff]  }
  0x28   : > { %1787 = vmatprep.mubr.bf16.mxu0 %v1922_v6  ;;  %1803 = vmatprep.mubr.bf16.mxu1 %v1930_v9  ;;  %v1931_v13 = vld [vmem:[%s2183_s26 + $0x48] sm:$0xff]   ;;  %v1932_v15 = vld [vmem:[%s2183_s26 + $0x50] sm:$0xff]   ;;  %v1925_v16 = vld [vmem:[%s2183_s26 + $0x18] sm:$0xff]  }
  0x29   : > { %v1933_v17 = vld [vmem:[%s2183_s26 + $0x58] sm:$0xff]   ;;  %v1926_v18 = vld [vmem:[%s2183_s26 + $0x20] sm:$0xff]   ;;  %v1927_v20 = vld [vmem:[%s2183_s26 + $0x28] sm:$0xff]  }
  0x2a   : > { %1774 = vmatpush3.bf16.msra.mxu0 %v1915_v3  ;;  %1828 = vmatpush3.bf16.msra.mxu1 %v1915_v3  ;;  %v1934_v19 = vld [vmem:[%s2183_s26 + $0x60] sm:$0xff]   ;;  %v1935_v21 = vld [vmem:[%s2183_s26 + $0x68] sm:$0xff]   ;;  %v1928_v22 = vld [vmem:[%s2183_s26 + $0x30] sm:$0xff]  }
  0x2b   : > { %1775 = vmatprep.subr.bf16.mxu0 %v1916_v4  ;;  %1821 = vmatprep.subr.bf16.mxu1 %v1916_v4  ;;  %v1936_v23 = vld [vmem:[%s2183_s26 + $0x70] sm:$0xff]   ;;  %v1929_v24 = vld [vmem:[%s2183_s26 + $0x38] sm:$0xff]   ;;  %v411_v28 = vld [vmem:[#allocation2] sm:$0xff] }
  0x2c   : > { %v1937_v25 = vld [vmem:[%s2183_s26 + $0x78] sm:$0xff]   ;;  %v413_v26 = vld [vmem:[#allocation2 + $0x10] sm:$0xff]  ;;  %v427_v29 = vld [vmem:[#allocation2 + $0x80] sm:$0xff] }
  0x2d   : > { %v429_v27 = vld [vmem:[#allocation2 + $0x90] sm:$0xff]  ;;  %v2236_v31 = vld [vmem:[%s2453_s2] ss:$0 sm:$0xff]  ;;  %v414_v32 = vld [vmem:[#allocation2 + $0x18] sm:$0xff] }
  0x2e   : > { %1776 = vmatpush3.bf16.msra.mxu0 %v1916_v4  ;;  %1829 = vmatpush3.bf16.msra.mxu1 %v1916_v4  ;;  %v430_v34 = vld [vmem:[#allocation2 + $0x98] sm:$0xff]  ;;  %v412_v37 = vld [vmem:[#allocation2 + $0x8] sm:$0xff]  ;;  %v417_v58 = vld [vmem:[#allocation2 + $0x30] sm:$0xff] }
  0x2f   : > { %1777 = vmatprep.subr.bf16.mxu0 %v1917_v5  ;;  %1822 = vmatprep.subr.bf16.mxu1 %v1917_v5  ;;  %v428_v40 = vld [vmem:[#allocation2 + $0x88] sm:$0xff]  ;;  %v415_v60 = vld [vmem:[#allocation2 + $0x20] sm:$0xff]  ;;  %v418_v6 = vld [vmem:[#allocation2 + $0x38] sm:$0xff] }
  0x32   : > { %1778 = vmatpush3.bf16.msra.mxu0 %v1917_v5  ;;  %1830 = vmatpush3.bf16.msra.mxu1 %v1917_v5 }
  0x33   : > { %1779 = vmatprep.subr.bf16.mxu0 %v1918_v7  ;;  %1823 = vmatprep.subr.bf16.mxu1 %v1918_v7 }
  0x36   : > { %1780 = vmatpush3.bf16.msra.mxu0 %v1918_v7  ;;  %1831 = vmatpush3.bf16.msra.mxu1 %v1918_v7  ;;  %v416_v7 = vld [vmem:[#allocation2 + $0x28] sm:$0xff] }
  0x37   : > { %1781 = vmatprep.subr.bf16.mxu0 %v1919_v8  ;;  %1824 = vmatprep.subr.bf16.mxu1 %v1919_v8 }
  0x3a   : > { %1782 = vmatpush3.bf16.msra.mxu0 %v1919_v8  ;;  %1832 = vmatpush3.bf16.msra.mxu1 %v1919_v8 }
  0x3b   : > { %1783 = vmatprep.subr.bf16.mxu0 %v1920_v10  ;;  %1825 = vmatprep.subr.bf16.mxu1 %v1920_v10 }
  0x3e   : > { %1784 = vmatpush3.bf16.msra.mxu0 %v1920_v10  ;;  %1833 = vmatpush3.bf16.msra.mxu1 %v1920_v10 }
  0x3f   : > { %1785 = vmatprep.subr.bf16.mxu0 %v1921_v11  ;;  %1826 = vmatprep.subr.bf16.mxu1 %v1921_v11 }
  0x42   : > { %1786 = vmatpush3.bf16.msra.mxu0 %v1921_v11  ;;  %1834 = vmatpush3.bf16.msra.mxu1 %v1921_v11 }
  0x45   : > { %1788 = vmatmul.mubr.bf16.vlgmr.msra.gmra.mrb[0].mxu0 %v1923_v12  ;;  %1804 = vmatmul.mubr.bf16.vlgmr.msra.gmra.mrb[0].mxu1 %v1931_v13 }
  0x46   : > { %1791 = vmatprep.mubr.bf16.mxu0 %v1924_v14  ;;  %1807 = vmatprep.mubr.bf16.mxu1 %v1932_v15 }
  0x4d   : > { %1792 = vmatmul.mubr.bf16.gmra.mrb[4].mxu0 %v1925_v16  ;;  %1808 = vmatmul.mubr.bf16.gmra.mrb[4].mxu1 %v1933_v17 }
  0x4e   : > { %1795 = vmatprep.mubr.bf16.mxu0 %v1926_v18  ;;  %1811 = vmatprep.mubr.bf16.mxu1 %v1934_v19 }
  0x55   : > { %1796 = vmatmul.mubr.bf16.gmra.mrb[8].mxu0 %v1927_v20  ;;  %1812 = vmatmul.mubr.bf16.gmra.mrb[8].mxu1 %v1935_v21 }
  0x56   : > { %1799 = vmatprep.mubr.bf16.mxu0 %v1928_v22  ;;  %1815 = vmatprep.mubr.bf16.mxu1 %v1936_v23 }
  0x5d   : > { %1800 = vmatmul.mubr.bf16.gmra.mrb[12].mxu0 %v1929_v24  ;;  %1816 = vmatmul.mubr.bf16.gmra.mrb[12].mxu1 %v1937_v25 }
 0x118   : > { %v1789_v30 = vpop.f32.mrb[0].mxu0  ;;  %v1805_v33 = vpop.f32.mrb[0].mxu1 }
 0x119   : > { %v798_v35 = vadd.f32 %v1789_v30, %v413_v26  ;;  %v669_v36 = vpop.f32.mrb[1].mxu0  ;;  %v814_v38 = vadd.f32 %v1805_v33, %v429_v27  ;;  %v733_v39 = vpop.f32.mrb[1].mxu1 }
 0x11a   : > { %v796_v41 = vadd.f32 %v669_v36, %v411_v28  ;;  %v1790_v42 = vpop.f32.mrb[2].mxu0  ;;  %v812_v43 = vadd.f32 %v733_v39, %v427_v29  ;;  %v1806_v44 = vpop.f32.mrb[2].mxu1  ;;  %v421_v36 = vld [vmem:[#allocation2 + $0x50] sm:$0xff] }
 0x11b   : > { %830 = vst [vmem:[#allocation2 + $0x10] sm:$0xff] %v798_v35  ;;  %v904_v45 = vadd.f32 %v2236_v31, %v798_v35  ;;  %v799_v46 = vadd.f32 %v1790_v42, %v414_v32  ;;  %v672_v47 = vpop.f32.mrb[3].mxu0  ;;  %846 = vst [vmem:[#allocation2 + $0x90] sm:$0xff] %v814_v38  ;;  %v2239_v48 = vadd.f32 %v1806_v44, %v430_v34  ;;  %v736_v49 = vpop.f32.mrb[3].mxu1 }
 0x11c   : > { %828 = vst [vmem:[#allocation2] sm:$0xff] %v796_v41  ;;  %v902_v50 = vadd.f32 %v2236_v31, %v796_v41  ;;  %v797_v51 = vadd.f32 %v672_v47, %v412_v37  ;;  %v2243_v52 = vadd.f32 %v2236_v31, %v814_v38  ;;  %844 = vst [vmem:[#allocation2 + $0x80] sm:$0xff] %v812_v43  ;;  %v419_v37 = vld [vmem:[#allocation2 + $0x40] sm:$0xff] }
 0x11d   : > { %v2245_v53 = vadd.f32 %v736_v49, %v428_v40  ;;  %v968_v54 = vmul.f32 0.2, %v904_v45  ;;  %831 = vst [vmem:[#allocation2 + $0x18] sm:$0xff] %v799_v46  ;;  %v905_v55 = vadd.f32 %v2236_v31, %v799_v46  ;;  %847 = vst [vmem:[#allocation2 + $0x98] sm:$0xff] %v2239_v48  ;;  %vm936_vm0 = vcmp.ge.f32.partialorder %v904_v45, 0.0 }
 0x11e   : > { %vm934_vm1 = vcmp.ge.f32.partialorder %v902_v50, 0.0  ;;  %v966_v56 = vmul.f32 0.2, %v902_v50  ;;  %829 = vst [vmem:[#allocation2 + $0x8] sm:$0xff] %v797_v51  ;;  %v903_v57 = vadd.f32 %v2236_v31, %v797_v51  ;;  %v2252_v61 = vadd.f32 %v2236_v31, %v812_v43  ;;  %v422_v43 = vld [vmem:[#allocation2 + $0x58] sm:$0xff] }
 0x11f   : > { %845 = vst [vmem:[#allocation2 + $0x88] sm:$0xff] %v2245_v53  ;;  %vm937_vm2 = vcmp.ge.f32.partialorder %v905_v55, 0.0  ;;  %v969_v59 = vmul.f32 0.2, %v905_v55  ;;  %vm952_vm4 = vcmp.ge.f32.partialorder %v2243_v52, 0.0  ;;  %v1000_v2 = vsel %vm936_vm0, %v904_v45, %v968_v54 }
 0x120   : > { %v998_v62 = vsel %vm934_vm1, %v902_v50, %v966_v56  ;;  %vm935_vm3 = vcmp.ge.f32.partialorder %v903_v57, 0.0  ;;  %v967_v63 = vmul.f32 0.2, %v903_v57  ;;  %v1793_v0 = vpop.f32.mrb[4].mxu0  ;;  %v2255_v1 = vpop.f32.mrb[4].mxu1  ;;  %v1233_v22 = vmul.f32 %v1000_v2, %v1000_v2  ;;  %v420_v50 = vld [vmem:[#allocation2 + $0x48] sm:$0xff] }
 0x121   : > { %v1001_v3 = vsel %vm937_vm2, %v905_v55, %v969_v59  ;;  %v802_v4 = vadd.f32 %v1793_v0, %v417_v58  ;;  %v685_v5 = vpop.f32.mrb[5].mxu0  ;;  %v984_v8 = vmul.f32 0.2, %v2243_v52  ;;  %v2259_v9 = vpop.f32.mrb[5].mxu1  ;;  %v1231_v10 = vmul.f32 %v998_v62, %v998_v62 }
 0x122   : > { %v1660_v11 = vpack.c.bf16 %v1001_v3, %v1000_v2  ;;  %v999_v12 = vsel %vm935_vm3, %v903_v57, %v967_v63  ;;  %v800_v13 = vadd.f32 %v685_v5, %v415_v60  ;;  %v1794_v14 = vpop.f32.mrb[6].mxu0  ;;  %v2261_v15 = vpop.f32.mrb[6].mxu1  ;;  %v1234_v33 = vmul.f32 %v1001_v3, %v1001_v3 }
 0x123   : > { %v1655_v16 = vpack.c.bf16 %v999_v12, %v998_v62  ;;  %v1191_v17 = vadd.f32 %v999_v12, %v998_v62  ;;  %v1232_v18 = vmul.f32 %v999_v12, %v999_v12  ;;  %834 = vst [vmem:[#allocation2 + $0x30] sm:$0xff] %v802_v4  ;;  %v908_v19 = vadd.f32 %v2236_v31, %v802_v4  ;;  %v688_v20 = vpop.f32.mrb[7].mxu0  ;;  %v2264_v21 = vpop.f32.mrb[7].mxu1 }
 0x124   : > { %1732 = vst [vmem:[%s2188_s8 + $0x8] sm:$0xff] %v1660_v11   ;;  %832 = vst [vmem:[#allocation2 + $0x20] sm:$0xff] %v800_v13  ;;  %v906_v23 = vadd.f32 %v2236_v31, %v800_v13  ;;  %v803_v24 = vadd.f32 %v1794_v14, %v418_v6  ;;  %v801_v25 = vadd.f32 %v688_v20, %v416_v7  ;;  %vm950_vm12 = vcmp.ge.f32.partialorder %v2252_v61, 0.0 }
 0x125   : > { %1656 = vst [vmem:[%s2188_s8] sm:$0xff] %v1655_v16   ;;  %v1192_v26 = vadd.f32 %v1191_v17, %v1000_v2  ;;  %v1263_v27 = vadd.f32 %v1232_v18, %v1231_v10  ;;  %vm940_vm5 = vcmp.ge.f32.partialorder %v908_v19, 0.0  ;;  %v972_v28 = vmul.f32 0.2, %v908_v19  ;;  %v425_v18 = vld [vmem:[#allocation2 + $0x70] sm:$0xff] }
 0x126   : > { %vm938_vm6 = vcmp.ge.f32.partialorder %v906_v23, 0.0  ;;  %v970_v29 = vmul.f32 0.2, %v906_v23  ;;  %835 = vst [vmem:[#allocation2 + $0x38] sm:$0xff] %v803_v24  ;;  %v909_v30 = vadd.f32 %v2236_v31, %v803_v24  ;;  %833 = vst [vmem:[#allocation2 + $0x28] sm:$0xff] %v801_v25  ;;  %v907_v32 = vadd.f32 %v2236_v31, %v801_v25 }
 0x127   : > { %v1264_v34 = vadd.f32 %v1263_v27, %v1233_v22  ;;  %v1193_v35 = vadd.f32 %v1192_v26, %v1001_v3  ;;  %v2274_v38 = vsel %vm952_vm4, %v2243_v52, %v984_v8  ;;  %v1004_v39 = vsel %vm940_vm5, %v908_v19, %v972_v28 }
 0x128   : > { %v1002_v40 = vsel %vm938_vm6, %v906_v23, %v970_v29  ;;  %vm941_vm7 = vcmp.ge.f32.partialorder %v909_v30, 0.0  ;;  %v973_v41 = vmul.f32 0.2, %v909_v30  ;;  %v1797_v42 = vpop.f32.mrb[8].mxu0  ;;  %v2276_v44 = vpop.f32.mrb[8].mxu1  ;;  %vm939_vm8 = vcmp.ge.f32.partialorder %v907_v32, 0.0 }
 0x129   : > { %v1194_v45 = vadd.f32 %v1193_v35, %v1002_v40  ;;  %v1235_v46 = vmul.f32 %v1002_v40, %v1002_v40  ;;  %v1265_v47 = vadd.f32 %v1264_v34, %v1234_v33  ;;  %v701_v49 = vpop.f32.mrb[9].mxu0  ;;  %v2278_v51 = vpop.f32.mrb[9].mxu1  ;;  %v971_v55 = vmul.f32 0.2, %v907_v32  ;;  %v426_v33 = vld [vmem:[#allocation2 + $0x78] sm:$0xff] }
 0x12a   : > { %v1005_v54 = vsel %vm941_vm7, %v909_v30, %v973_v41  ;;  %v806_v52 = vadd.f32 %v1797_v42, %v421_v36  ;;  %v804_v56 = vadd.f32 %v701_v49, %v419_v37  ;;  %v1798_v57 = vpop.f32.mrb[10].mxu0  ;;  %v2280_v58 = vpop.f32.mrb[10].mxu1  ;;  %v1237_v59 = vmul.f32 %v1004_v39, %v1004_v39  ;;  %v423_v30 = vld [vmem:[#allocation2 + $0x60] sm:$0xff] }
 0x12b   : > { %v1266_v60 = vadd.f32 %v1265_v47, %v1235_v46  ;;  %v1670_v62 = vpack.c.bf16 %v1005_v54, %v1004_v39  ;;  %v807_v63 = vadd.f32 %v1798_v57, %v422_v43  ;;  %v704_v0 = vpop.f32.mrb[11].mxu0  ;;  %v2282_v2 = vpop.f32.mrb[11].mxu1  ;;  %v1003_v3 = vsel %vm939_vm8, %v907_v32, %v971_v55 }
 0x12c   : > { %838 = vst [vmem:[#allocation2 + $0x50] sm:$0xff] %v806_v52  ;;  %v912_v4 = vadd.f32 %v2236_v31, %v806_v52  ;;  %836 = vst [vmem:[#allocation2 + $0x40] sm:$0xff] %v804_v56  ;;  %v910_v5 = vadd.f32 %v2236_v31, %v804_v56  ;;  %v805_v6 = vadd.f32 %v704_v0, %v420_v50  ;;  %v982_v46 = vmul.f32 0.2, %v2252_v61  ;;  %v424_v52 = vld [vmem:[#allocation2 + $0x68] sm:$0xff] }
 0x12d   : > { %1734 = vst [vmem:[%s2188_s8 + $0x18] sm:$0xff] %v1670_v62   ;;  %v1665_v7 = vpack.c.bf16 %v1003_v3, %v1002_v40  ;;  %v1195_v8 = vadd.f32 %v1194_v45, %v1003_v3  ;;  %v1236_v10 = vmul.f32 %v1003_v3, %v1003_v3  ;;  %839 = vst [vmem:[#allocation2 + $0x58] sm:$0xff] %v807_v63 }
 0x12e   : > { %v913_v11 = vadd.f32 %v2236_v31, %v807_v63  ;;  %vm944_vm9 = vcmp.ge.f32.partialorder %v912_v4, 0.0  ;;  %v976_v12 = vmul.f32 0.2, %v912_v4  ;;  %vm942_vm10 = vcmp.ge.f32.partialorder %v910_v5, 0.0  ;;  %837 = vst [vmem:[#allocation2 + $0x48] sm:$0xff] %v805_v6 }
 0x12f   : > { %v974_v13 = vmul.f32 0.2, %v910_v5  ;;  %1733 = vst [vmem:[%s2188_s8 + $0x10] sm:$0xff] %v1665_v7   ;;  %v1196_v14 = vadd.f32 %v1195_v8, %v1004_v39  ;;  %v1267_v16 = vadd.f32 %v1266_v60, %v1236_v10  ;;  %v1238_v19 = vmul.f32 %v1005_v54, %v1005_v54 }
 0x130   : > { %vm945_vm11 = vcmp.ge.f32.partialorder %v913_v11, 0.0  ;;  %v977_v17 = vmul.f32 0.2, %v913_v11  ;;  %v911_v22 = vadd.f32 %v2236_v31, %v805_v6  ;;  %v1801_v23 = vpop.f32.mrb[12].mxu0  ;;  %v2293_v24 = vmul.f32 %v2274_v38, %v2274_v38  ;;  %v2295_v25 = vpop.f32.mrb[12].mxu1 }
 0x131   : > { %v1006_v20 = vsel %vm942_vm10, %v910_v5, %v974_v13  ;;  %v1268_v26 = vadd.f32 %v1267_v16, %v1237_v59  ;;  %v1008_v27 = vsel %vm944_vm9, %v912_v4, %v976_v12  ;;  %v1197_v28 = vadd.f32 %v1196_v14, %v1005_v54  ;;  %v717_v32 = vpop.f32.mrb[13].mxu0  ;;  %v2299_v34 = vpop.f32.mrb[13].mxu1 }
 0x132   : > { %v1239_v29 = vmul.f32 %v1006_v20, %v1006_v20  ;;  %v1009_v35 = vsel %vm945_vm11, %v913_v11, %v977_v17  ;;  %vm943_vm13 = vcmp.ge.f32.partialorder %v911_v22, 0.0  ;;  %v975_v36 = vmul.f32 0.2, %v911_v22  ;;  %v1802_v39 = vpop.f32.mrb[14].mxu0  ;;  %v2302_v40 = vpop.f32.mrb[14].mxu1 }
 0x133   : > { %v810_v37 = vadd.f32 %v1801_v23, %v425_v18  ;;  %v1198_v41 = vadd.f32 %v1197_v28, %v1006_v20  ;;  %v1269_v42 = vadd.f32 %v1268_v26, %v1238_v19  ;;  %v1680_v43 = vpack.c.bf16 %v1009_v35, %v1008_v27  ;;  %v720_v45 = vpop.f32.mrb[15].mxu0  ;;  %v2305_v47 = vpop.f32.mrb[15].mxu1  ;;  %v433_v26 = vld [vmem:[#allocation2 + $0xb0] sm:$0xff] }
 0x134   : > { %v1007_v49 = vsel %vm943_vm13, %v911_v22, %v975_v36  ;;  %v808_v54 = vadd.f32 %v717_v32, %v423_v30  ;;  %v811_v55 = vadd.f32 %v1802_v39, %v426_v33  ;;  %v1241_v3 = vmul.f32 %v1008_v27, %v1008_v27 }
 0x135   : > { %842 = vst [vmem:[#allocation2 + $0x70] sm:$0xff] %v810_v37  ;;  %v916_v50 = vadd.f32 %v2236_v31, %v810_v37  ;;  %v1270_v56 = vadd.f32 %v1269_v42, %v1239_v29  ;;  %1736 = vst [vmem:[%s2188_s8 + $0x28] sm:$0xff] %v1680_v43   ;;  %v1675_v57 = vpack.c.bf16 %v1007_v49, %v1006_v20  ;;  %v434_v43 = vld [vmem:[#allocation2 + $0xb8] sm:$0xff] }
 0x136   : > { %v1199_v59 = vadd.f32 %v1198_v41, %v1007_v49  ;;  %v1240_v60 = vmul.f32 %v1007_v49, %v1007_v49  ;;  %840 = vst [vmem:[#allocation2 + $0x60] sm:$0xff] %v808_v54  ;;  %v914_v63 = vadd.f32 %v2236_v31, %v808_v54  ;;  %843 = vst [vmem:[#allocation2 + $0x78] sm:$0xff] %v811_v55 }
 0x137   : > { %vm948_vm14 = vcmp.ge.f32.partialorder %v916_v50, 0.0  ;;  %v980_v62 = vmul.f32 0.2, %v916_v50  ;;  %v917_v0 = vadd.f32 %v2236_v31, %v811_v55  ;;  %1735 = vst [vmem:[%s2188_s8 + $0x20] sm:$0xff] %v1675_v57   ;;  %v809_v6 = vadd.f32 %v720_v45, %v424_v52 }
 0x138   : > { %v1200_v4 = vadd.f32 %v1199_v59, %v1008_v27  ;;  %v1271_v5 = vadd.f32 %v1270_v56, %v1240_v60  ;;  %v1242_v7 = vmul.f32 %v1009_v35, %v1009_v35  ;;  %vm946_vm15 = vcmp.ge.f32.partialorder %v914_v63, 0.0  ;;  %v431_v27 = vld [vmem:[#allocation2 + $0xa0] sm:$0xff] }
 0x139   : > { %v978_v8 = vmul.f32 0.2, %v914_v63  ;;  %vm949_vm0 = vcmp.ge.f32.partialorder %v917_v0, 0.0  ;;  %v1012_v11 = vsel %vm948_vm14, %v916_v50, %v980_v62  ;;  %v981_v13 = vmul.f32 0.2, %v917_v0  ;;  %841 = vst [vmem:[#allocation2 + $0x68] sm:$0xff] %v809_v6 }
 0x13a   : > { %v1272_v10 = vadd.f32 %v1271_v5, %v1241_v3  ;;  %v1201_v12 = vadd.f32 %v1200_v4, %v1009_v35  ;;  %v915_v16 = vadd.f32 %v2236_v31, %v809_v6  ;;  %v921_v17 = vadd.f32 %v2236_v31, %v2239_v48  ;;  %v432_v50 = vld [vmem:[#allocation2 + $0xa8] sm:$0xff] }
 0x13b   : > { %v1010_v14 = vsel %vm946_vm15, %v914_v63, %v978_v8  ;;  %v919_v18 = vadd.f32 %v2236_v31, %v2245_v53  ;;  %v1013_v23 = vsel %vm949_vm0, %v917_v0, %v981_v13  ;;  %v1014_v30 = vsel %vm950_vm12, %v2252_v61, %v982_v46 }
 0x13c   : > { %v1202_v19 = vadd.f32 %v1201_v12, %v1010_v14  ;;  %v1243_v20 = vmul.f32 %v1010_v14, %v1010_v14  ;;  %v1273_v22 = vadd.f32 %v1272_v10, %v1242_v7  ;;  %v1690_v28 = vpack.c.bf16 %v1013_v23, %v1012_v11 }
 0x13d   : > { %vm947_vm1 = vcmp.ge.f32.partialorder %v915_v16, 0.0  ;;  %v979_v29 = vmul.f32 0.2, %v915_v16  ;;  %vm953_vm2 = vcmp.ge.f32.partialorder %v921_v17, 0.0  ;;  %v985_v48 = vmul.f32 0.2, %v921_v17 }
 0x13e   : > { %v1274_v32 = vadd.f32 %v1273_v22, %v1243_v20  ;;  %vm951_vm3 = vcmp.ge.f32.partialorder %v919_v18, 0.0  ;;  %1738 = vst [vmem:[%s2188_s8 + $0x38] sm:$0xff] %v1690_v28   ;;  %v983_v53 = vmul.f32 0.2, %v919_v18  ;;  %v818_v35 = vadd.f32 %v2255_v1, %v433_v26  ;;  %v437_v1 = vld [vmem:[#allocation2 + $0xd0] sm:$0xff] }
 0x13f   : > { %v1011_v33 = vsel %vm947_vm1, %v915_v16, %v979_v29  ;;  %v816_v36 = vadd.f32 %v2259_v9, %v431_v27  ;;  %v1017_v42 = vsel %vm953_vm2, %v921_v17, %v985_v48  ;;  %v1245_v45 = vmul.f32 %v1012_v11, %v1012_v11  ;;  %v438_v16 = vld [vmem:[#allocation2 + $0xd8] sm:$0xff]  ;;  %v436_v27 = vld [vmem:[#allocation2 + $0xc8] sm:$0xff]  ;;  %v441_v48 = vld [vmem:[#allocation2 + $0xf0] sm:$0xff] }
 0x140   : > { %v1685_v37 = vpack.c.bf16 %v1011_v33, %v1010_v14  ;;  %v1203_v39 = vadd.f32 %v1202_v19, %v1011_v33  ;;  %v1244_v41 = vmul.f32 %v1011_v33, %v1011_v33  ;;  %v1700_v61 = vpack.c.bf16 %v1017_v42, %v2274_v38  ;;  %850 = vst [vmem:[#allocation2 + $0xb0] sm:$0xff] %v818_v35  ;;  %v435_v14 = vld [vmem:[#allocation2 + $0xc0] sm:$0xff] }
 0x141   : > { %v1015_v46 = vsel %vm951_vm3, %v919_v18, %v983_v53  ;;  %v924_v49 = vadd.f32 %v2236_v31, %v818_v35  ;;  %848 = vst [vmem:[#allocation2 + $0xa0] sm:$0xff] %v816_v36  ;;  %v1246_v54 = vmul.f32 %v1013_v23, %v1013_v23  ;;  %v922_v57 = vadd.f32 %v2236_v31, %v816_v36  ;;  %v439_v33 = vld [vmem:[#allocation2 + $0xe0] sm:$0xff] }
 0x142   : > { %1737 = vst [vmem:[%s2188_s8 + $0x30] sm:$0xff] %v1685_v37   ;;  %v1204_v9 = vadd.f32 %v1203_v39, %v1012_v11  ;;  %v1275_v55 = vadd.f32 %v1274_v32, %v1244_v41  ;;  %v1695_v52 = vpack.c.bf16 %v1015_v46, %v1014_v30  ;;  %1740 = vst [vmem:[%s2188_s8 + $0x48] sm:$0xff] %v1700_v61  }
 0x143   : > { %vm956_vm4 = vcmp.ge.f32.partialorder %v924_v49, 0.0  ;;  %v988_v56 = vmul.f32 0.2, %v924_v49  ;;  %v819_v59 = vadd.f32 %v2261_v15, %v434_v43  ;;  %v817_v63 = vadd.f32 %v2264_v21, %v432_v50 }
 0x144   : > { %v1276_v60 = vadd.f32 %v1275_v55, %v1245_v45  ;;  %v1205_v62 = vadd.f32 %v1204_v9, %v1013_v23  ;;  %1739 = vst [vmem:[%s2188_s8 + $0x40] sm:$0xff] %v1695_v52   ;;  %v822_v0 = vadd.f32 %v2276_v44, %v437_v1  ;;  %v1247_v3 = vmul.f32 %v1014_v30, %v1014_v30 }
 0x145   : > { %vm954_vm5 = vcmp.ge.f32.partialorder %v922_v57, 0.0  ;;  %v986_v4 = vmul.f32 0.2, %v922_v57  ;;  %851 = vst [vmem:[#allocation2 + $0xb8] sm:$0xff] %v819_v59  ;;  %v925_v5 = vadd.f32 %v2236_v31, %v819_v59  ;;  %v1248_v8 = vmul.f32 %v1015_v46, %v1015_v46  ;;  %849 = vst [vmem:[#allocation2 + $0xa8] sm:$0xff] %v817_v63 }
 0x146   : > { %v1206_v6 = vadd.f32 %v1205_v62, %v1014_v30  ;;  %v1277_v7 = vadd.f32 %v1276_v60, %v1246_v54  ;;  %v923_v10 = vadd.f32 %v2236_v31, %v817_v63  ;;  %854 = vst [vmem:[#allocation2 + $0xd0] sm:$0xff] %v822_v0  ;;  %v1020_v15 = vsel %vm956_vm4, %v924_v49, %v988_v56 }
 0x147   : > { %vm957_vm6 = vcmp.ge.f32.partialorder %v925_v5, 0.0  ;;  %v989_v11 = vmul.f32 0.2, %v925_v5  ;;  %v928_v21 = vadd.f32 %v2236_v31, %v822_v0  ;;  %v1018_v13 = vsel %vm954_vm5, %v922_v57, %v986_v4  ;;  %v440_v57 = vld [vmem:[#allocation2 + $0xe8] sm:$0xff] }
 0x148   : > { %v1278_v44 = vadd.f32 %v1277_v7, %v1247_v3  ;;  %v1207_v12 = vadd.f32 %v1206_v6, %v1015_v46  ;;  %vm955_vm7 = vcmp.ge.f32.partialorder %v923_v10, 0.0  ;;  %v987_v18 = vmul.f32 0.2, %v923_v10 }
 0x149   : > { %v1021_v17 = vsel %vm957_vm6, %v925_v5, %v989_v11  ;;  %vm960_vm8 = vcmp.ge.f32.partialorder %v928_v21, 0.0  ;;  %v992_v19 = vmul.f32 0.2, %v928_v21  ;;  %v1250_v20 = vmul.f32 %v1017_v42, %v1017_v42 }
 0x14a   : > { %v1208_v22 = vadd.f32 %v1207_v12, %v2274_v38  ;;  %v1279_v23 = vadd.f32 %v1278_v44, %v1248_v8  ;;  %v1710_v26 = vpack.c.bf16 %v1021_v17, %v1020_v15  ;;  %v1251_v28 = vmul.f32 %v1018_v13, %v1018_v13 }
 0x14b   : > { %v1019_v29 = vsel %vm955_vm7, %v923_v10, %v987_v18  ;;  %v820_v30 = vadd.f32 %v2278_v51, %v435_v14  ;;  %v823_v32 = vadd.f32 %v2280_v58, %v438_v16  ;;  %v1024_v37 = vsel %vm960_vm8, %v928_v21, %v992_v19 }
 0x14c   : > { %v1280_v53 = vadd.f32 %v1279_v23, %v2293_v24  ;;  %v1209_v35 = vadd.f32 %v1208_v22, %v1017_v42  ;;  %1742 = vst [vmem:[%s2188_s8 + $0x58] sm:$0xff] %v1710_v26   ;;  %v1705_v36 = vpack.c.bf16 %v1019_v29, %v1018_v13  ;;  %v1252_v38 = vmul.f32 %v1019_v29, %v1019_v29  ;;  %v442_v42 = vld [vmem:[#allocation2 + $0xf8] sm:$0xff] }
 0x14d   : > { %852 = vst [vmem:[#allocation2 + $0xc0] sm:$0xff] %v820_v30  ;;  %v926_v39 = vadd.f32 %v2236_v31, %v820_v30  ;;  %855 = vst [vmem:[#allocation2 + $0xd8] sm:$0xff] %v823_v32  ;;  %v929_v41 = vadd.f32 %v2236_v31, %v823_v32  ;;  %v821_v51 = vadd.f32 %v2282_v2, %v436_v27 }
 0x14e   : > { %v1210_v58 = vadd.f32 %v1209_v35, %v1018_v13  ;;  %v1281_v43 = vadd.f32 %v1280_v53, %v1250_v20  ;;  %1741 = vst [vmem:[%s2188_s8 + $0x50] sm:$0xff] %v1705_v36   ;;  %v826_v45 = vadd.f32 %v2295_v25, %v441_v48  ;;  %v824_v24 = vadd.f32 %v2299_v34, %v439_v33 }
 0x14f   : > { %vm958_vm9 = vcmp.ge.f32.partialorder %v926_v39, 0.0  ;;  %v990_v61 = vmul.f32 0.2, %v926_v39  ;;  %vm961_vm10 = vcmp.ge.f32.partialorder %v929_v41, 0.0  ;;  %v993_v46 = vmul.f32 0.2, %v929_v41 }
 0x150   : > { %853 = vst [vmem:[#allocation2 + $0xc8] sm:$0xff] %v821_v51  ;;  %v1282_v49 = vadd.f32 %v1281_v43, %v1251_v28  ;;  %v1211_v50 = vadd.f32 %v1210_v58, %v1019_v29  ;;  %v927_v1 = vadd.f32 %v2236_v31, %v821_v51  ;;  %858 = vst [vmem:[#allocation2 + $0xf0] sm:$0xff] %v826_v45 }
 0x151   : > { %v932_v2 = vadd.f32 %v2236_v31, %v826_v45  ;;  %856 = vst [vmem:[#allocation2 + $0xe0] sm:$0xff] %v824_v24  ;;  %v1253_v54 = vmul.f32 %v1020_v15, %v1020_v15  ;;  %v1025_v9 = vsel %vm961_vm10, %v929_v41, %v993_v46  ;;  %v827_v25 = vadd.f32 %v2302_v40, %v442_v42 }
 0x152   : > { %v1254_v34 = vmul.f32 %v1021_v17, %v1021_v17  ;;  %v1212_v55 = vadd.f32 %v1211_v50, %v1020_v15  ;;  %v1283_v52 = vadd.f32 %v1282_v49, %v1252_v38  ;;  %v1720_v56 = vpack.c.bf16 %v1025_v9, %v1024_v37 }
 0x153   : > { %v1022_v59 = vsel %vm958_vm9, %v926_v39, %v990_v61  ;;  %vm959_vm11 = vcmp.ge.f32.partialorder %v927_v1, 0.0  ;;  %v991_v60 = vmul.f32 0.2, %v927_v1  ;;  %v930_v62 = vadd.f32 %v2236_v31, %v824_v24  ;;  %859 = vst [vmem:[#allocation2 + $0xf8] sm:$0xff] %v827_v25 }
 0x154   : > { %v1284_v63 = vadd.f32 %v1283_v52, %v1253_v54  ;;  %v1213_v0 = vadd.f32 %v1212_v55, %v1021_v17  ;;  %1744 = vst [vmem:[%s2188_s8 + $0x68] sm:$0xff] %v1720_v56   ;;  %vm964_vm12 = vcmp.ge.f32.partialorder %v932_v2, 0.0  ;;  %v996_v3 = vmul.f32 0.2, %v932_v2 }
 0x155   : > { %v1023_v4 = vsel %vm959_vm11, %v927_v1, %v991_v60  ;;  %v933_v40 = vadd.f32 %v2236_v31, %v827_v25  ;;  %v825_v5 = vadd.f32 %v2305_v47, %v440_v57  ;;  %v1255_v7 = vmul.f32 %v1022_v59, %v1022_v59  ;;  %v1190_v1 = vld [vmem:[#allocation3] sm:$0x1] }
 0x156   : > { %v1214_v6 = vadd.f32 %v1213_v0, %v1022_v59  ;;  %v1285_v8 = vadd.f32 %v1284_v63, %v1254_v34  ;;  %v1715_v10 = vpack.c.bf16 %v1023_v4, %v1022_v59  ;;  %v1028_v15 = vsel %vm964_vm12, %v932_v2, %v996_v3 }
 0x157   : > { %v994_v11 = vmul.f32 0.2, %v930_v62  ;;  %vm965_vm13 = vcmp.ge.f32.partialorder %v933_v40, 0.0  ;;  %v997_v21 = vmul.f32 0.2, %v933_v40  ;;  %857 = vst [vmem:[#allocation2 + $0xe8] sm:$0xff] %v825_v5  ;;  %v1256_v13 = vmul.f32 %v1023_v4, %v1023_v4 }
 0x158   : > { %v1286_v44 = vadd.f32 %v1285_v8, %v1255_v7  ;;  %1743 = vst [vmem:[%s2188_s8 + $0x60] sm:$0xff] %v1715_v10   ;;  %v1215_v12 = vadd.f32 %v1214_v6, %v1023_v4  ;;  %vm962_vm14 = vcmp.ge.f32.partialorder %v930_v62, 0.0  ;;  %v931_v16 = vadd.f32 %v2236_v31, %v825_v5 }
 0x159   : > { %v1029_v14 = vsel %vm965_vm13, %v933_v40, %v997_v21  ;;  %v1257_v17 = vmul.f32 %v1024_v37, %v1024_v37  ;;  %v1026_v20 = vsel %vm962_vm14, %v930_v62, %v994_v11  ;;  %v1258_v23 = vmul.f32 %v1025_v9, %v1025_v9 }
 0x15a   : > { %v1216_v47 = vadd.f32 %v1215_v12, %v1024_v37  ;;  %v1287_v18 = vadd.f32 %v1286_v44, %v1256_v13  ;;  %v1730_v19 = vpack.c.bf16 %v1029_v14, %v1028_v15  ;;  %vm963_vm15 = vcmp.ge.f32.partialorder %v931_v16, 0.0 }
 0x15b   : > { %v995_v22 = vmul.f32 0.2, %v931_v16  ;;  %v1259_v30 = vmul.f32 %v1026_v20, %v1026_v20  ;;  %v1261_v35 = vmul.f32 %v1028_v15, %v1028_v15  ;;  %v1262_v38 = vmul.f32 %v1029_v14, %v1029_v14 }
 0x15c   : > { %v1288_v26 = vadd.f32 %v1287_v18, %v1257_v17  ;;  %v1217_v27 = vadd.f32 %v1216_v47, %v1025_v9  ;;  %1746 = vst [vmem:[%s2188_s8 + $0x78] sm:$0xff] %v1730_v19   ;;  %v1230_v9 = vld [vmem:[#allocation4] sm:$0x1] }
 0x15d   : > { %v1027_v28 = vsel %vm963_vm15, %v931_v16, %v995_v22 }
 0x15e   : > { %v1218_v29 = vadd.f32 %v1217_v27, %v1026_v20  ;;  %v1289_v32 = vadd.f32 %v1288_v26, %v1258_v23  ;;  %v1725_v48 = vpack.c.bf16 %v1027_v28, %v1026_v20  ;;  %v1260_v53 = vmul.f32 %v1027_v28, %v1027_v28 }
 0x160   : > { %v1290_v33 = vadd.f32 %v1289_v32, %v1259_v30  ;;  %1745 = vst [vmem:[%s2188_s8 + $0x70] sm:$0xff] %v1725_v48   ;;  %v1219_v31 = vadd.f32 %v1218_v29, %v1027_v28 }
 0x162   : > { %v1220_v36 = vadd.f32 %v1219_v31, %v1028_v15  ;;  %v1291_v37 = vadd.f32 %v1290_v33, %v1260_v53 }
 0x164   : > { %v1221_v39 = vadd.f32 %v1220_v36, %v1029_v14  ;;  %v1292_v41 = vadd.f32 %v1291_v37, %v1261_v35 }
 0x166   : > { %v1222_v51 = vrot.slane %v1221_v39, 4  ;;  %v1293_v58 = vadd.f32 %v1292_v41, %v1262_v38 }
 0x168   : > { %v1223_v43 = vadd.f32 %v1222_v51, %v1221_v39  ;;  %v1294_v45 = vrot.slane %v1293_v58, 4 }
 0x16a   : > { %v1224_v24 = vrot.slane %v1223_v43, 2  ;;  %v1295_v42 = vadd.f32 %v1294_v45, %v1293_v58 }
 0x16c   : > { %v1225_v61 = vadd.f32 %v1224_v24, %v1223_v43  ;;  %v1296_v46 = vrot.slane %v1295_v42, 2 }
 0x16e   : > { %v1226_v49 = vrot.slane %v1225_v61, 1  ;;  %v1297_v50 = vadd.f32 %v1296_v46, %v1295_v42 }
 0x170   : > { %v1227_v2 = vadd.f32 %v1226_v49, %v1225_v61  ;;  %v1298_v54 = vrot.slane %v1297_v50, 1  ;;  %1306 = sbr.rel (!%p1302_p1) target bundleno = 383 (0x17f), region = 48 }
 0x172   : > { %v1228_v25 = vadd.f32 %v1227_v2, %v1190_v1  ;;  %v1299_v34 = vadd.f32 %v1298_v54, %v1297_v50 }
 0x174   : > { %1229 = vst [vmem:[#allocation3] sm:$0x1] %v1228_v25  ;;  %v1300_v55 = vadd.f32 %v1299_v34, %v1230_v9 }
 0x176   : > { %1301 = vst [vmem:[#allocation4] sm:$0x1] %v1300_v55 }
 0x17b   : > { %v1307_v52 = vld [vmem:[#allocation3] sm:$0x1] }
 0x17c   : > { %1308 = vst [vmem:[%s322_s29] sm:$0x1] %v1307_v52 }
 0x17d   : > { %v1309_v56 = vld [vmem:[#allocation4] sm:$0x1] }
 0x17e   : > { %1310 = vst [vmem:[%s328_s28] sm:$0x1] %v1309_v56 }
 0x17f PF: > { %s1614_s26 = sshll.u32 %s2052_s22, 4  ;;  %s1345_s11 = sshll.u32 %s322_s29, 4  ;;  %s1346_s11 = int_to_ptr.vmem [resolvable:$true] %s1345_s11 }
 0x180   : > { %s2374_s21 = scalar_lea.hbm %s2455_s4, %s1614_s26  ;;  %s1324_s13 = scalar_lea.sflag [#allocation6], %s2170_s10 }
 0x181   : > { %s1938_s14 = scalar_lea.vmem %s1346_s11, 16  ;;  %s2068_s15 = smov [#allocation5]  }
 0x182   : > { %p1939_p2 = scmp.ne.s32.totalorder %s1346_s11, %s1938_s14  ;;  %s1942_s16 = sshll.u32 %s2068_s15, 4  ;;  %s1943_s16 = int_to_ptr.vmem [resolvable:$false] %s1942_s16 }
 0x183   : > { %s1944_s17 = scalar_lea.vmem %s1943_s16, 32  ;;  %p1945_p6 = scmp.lt.s32.totalorder %s1346_s11, %s1943_s16 }
 0x184   : > { %p1940_p4 = pnand %p1939_p2, %p2149_p3  ;;  %p1946_p7 = scmp.lt.s32.totalorder %s1944_s17, %s1938_s14 }
 0x186   : > { %p1941_p5 = pneg %p1940_p4  ;;  %p1947_p8 = por %p1946_p7, %p1945_p6 }
 0x188   : > { %p1948_p10 = pnand %p1947_p8, %p1941_p5 }
 0x18a   : > { %1951 = shalt.err (!%p1948_p10)
}
 0x18b   : > { %s1952_s29 = scalar_lea.hbm %s2374_s21, 16  ;;  %s1956_s8 = scalar_lea.hbm %s2455_s4, 32 }
 0x18c   : > { %p1953_p11 = scmp.ne.s32.totalorder %s2374_s21, %s1952_s29  ;;  %p1957_p0 = scmp.lt.u32.totalorder %s2374_s21, %s2455_s4 }
 0x18d   : > { %p1958_p1 = scmp.lt.u32.totalorder %s1956_s8, %s1952_s29  ;;  %p1960_p4 = scmp.lt.u32.totalorder %s1952_s29, %s2374_s21 }
 0x18e   : > { %p1954_p12 = pnand %p1953_p11, %p2149_p3 }
 0x18f   : > { %p1959_p2 = por %p1958_p1, %p1957_p0 }
 0x190   : > { %p1955_p13 = pneg %p1954_p12 }
 0x191   : > { %p1961_p5 = por %p1960_p4, %p1959_p2 }
 0x193   : > { %p1962_p6 = pnand %p1961_p5, %p1955_p13 }
 0x195   : > { %1965 = shalt.err (!%p1962_p6)
}
 0x196   : > { %1836 = dma.vmem_to_hbm [thread:$0]  (%p2149_p3), %s1346_s11, 16, %s2374_s21, %s1324_s13  }
 0x197   : > { %s2401_s17 = scalar_lea.hbm %s2456_s5, %s1614_s26  ;;  %s1359_s27 = sshll.u32 %s328_s28, 4  ;;  %s1360_s27 = int_to_ptr.vmem [resolvable:$true] %s1359_s27 }
 0x198   : > { %s1328_s29 = scalar_lea.sflag [#allocation8], %s2170_s10  ;;  %s1966_s7 = scalar_lea.vmem %s1360_s27, 16 }
 0x199   : > { %p1967_p7 = scmp.ne.s32.totalorder %s1360_s27, %s1966_s7  ;;  %s2069_s8 = smov [#allocation7]  }
 0x19a   : > { %s1970_s12 = sshll.u32 %s2069_s8, 4  ;;  %s1971_s12 = int_to_ptr.vmem [resolvable:$false] %s1970_s12 }
 0x19b   : > { %p1968_p8 = pnand %p1967_p7, %p2149_p3  ;;  %s1972_s15 = scalar_lea.vmem %s1971_s12, 32 }
 0x19c   : > { %p1973_p11 = scmp.lt.s32.totalorder %s1360_s27, %s1971_s12  ;;  %p1974_p12 = scmp.lt.s32.totalorder %s1972_s15, %s1966_s7 }
 0x19d   : > { %p1969_p10 = pneg %p1968_p8 }
 0x19e   : > { %p1975_p13 = por %p1974_p12, %p1973_p11 }
 0x1a0   : > { %p1976_p0 = pnand %p1975_p13, %p1969_p10 }
 0x1a2   : > { %1979 = shalt.err (!%p1976_p0)
}
 0x1a3   : > { %s1980_s22 = scalar_lea.hbm %s2401_s17, 16  ;;  %s1984_s26 = scalar_lea.hbm %s2456_s5, 32 }
 0x1a4   : > { %p1981_p1 = scmp.ne.s32.totalorder %s2401_s17, %s1980_s22  ;;  %p1985_p5 = scmp.lt.u32.totalorder %s2401_s17, %s2456_s5 }
 0x1a5   : > { %p1986_p6 = scmp.lt.u32.totalorder %s1984_s26, %s1980_s22  ;;  %p1988_p8 = scmp.lt.u32.totalorder %s1980_s22, %s2401_s17 }
 0x1a6   : > { %p1982_p2 = pnand %p1981_p1, %p2149_p3 }
 0x1a7   : > { %p1987_p7 = por %p1986_p6, %p1985_p5 }
 0x1a8   : > { %p1983_p4 = pneg %p1982_p2 }
 0x1a9   : > { %p1989_p10 = por %p1988_p8, %p1987_p7 }
 0x1ab   : > { %p1990_p11 = pnand %p1989_p10, %p1983_p4 }
 0x1ad   : > { %1993 = shalt.err (!%p1990_p11)
}
 0x1ae   : > { %1837 = dma.vmem_to_hbm [thread:$0]  (%p2149_p3), %s1360_s27, 16, %s2401_s17, %s1328_s29  }
 0x1af PF: > { %p1847_p12 = scmp.ge.s32.totalorder %s2064_s25, 2  ;;  %s1386_s13 = sand.u32 1, %s2036_s18  }
 0x1b0   : > { %s1387_s14 = scalar_lea.sflag [#allocation6], %s1386_s13 }
 0x1b1   : > { %p1841_p13 = pnand %p1847_p12, %p2159_p9 }
 0x1b3   : > { %2027 = dma.done.wait (!%p1841_p13), %s1387_s14, 16  }
 0x1b4   : > { %2029 = vsyncadd (!%p1841_p13), %s1387_s14, 4294967280  ;;  %s1395_s16 = scalar_lea.sflag [#allocation8], %s1386_s13 }
 0x1b5   : > { %2031 = dma.done.wait (!%p1841_p13), %s1395_s16, 16  }
 0x1b6   : > { %2033 = vsyncadd (!%p1841_p13), %s1395_s16, 4294967280  ;;  %s22_s25 = sadd.s32 1, %s2064_s25   ;;  %s2462_s30 = sld [smem:[#allocation11_spill]] }
 0x1b7   : > { %p19_p0 = scmp.ge.s32.totalorder %s22_s25, 20   ;;  %s2463_s17 = sld [smem:[#allocation12_spill]] }
 0x1b8   : > { %s2464_s18 = smov %s2040_s19  ;;  %s2465_s19 = smov %s2044_s20 }
 0x1b9   : > { %s2466_s20 = smov %s2167_s9  ;;  %s2467_s21 = smov %s2056_s23 }
 0x1ba   : > { %s2468_s22 = smov %s2060_s24  ;;  %21 = sbr.rel (!%p19_p0) target bundleno = 7 (0x7), region = 118 }
 0x1bc   : > { %s2469_s23 = smov %s2462_s30 }
 0x1bd   : > { %s2470_s24 = smov %s2463_s17 }
 0x1c1   :  { %1399 = vsyncpa [#allocation6], 1 }
 0x1c2   :  { %1401 = vsyncpa [#allocation6 + $0x1], 1 }
 0x1c3   :  { %1402 = vsyncpa [#allocation8], 1 }
 0x1c4   :  { %1404 = vsyncpa [#allocation8 + $0x1], 1 }

// kernel: discriminator_forward.10
= control target key start
LH: loop header
LB: loop body
LE: loop exit
PB: predicated region body
PF: predicated region fallthrough
CT: control target
= control target key end

     0   :  { %s1173_s12 = smov 0   ;;  %s1175_s13 = smov 0   ;;  %s1426_s0 = inlined_call_operand.vmem [shape: bf16[2,768,128], index: 0, kind: input, shape index: {}]   ;;  %s1427_s1 = inlined_call_operand.vmem [shape: f32[2,1,128], index: 1, kind: input, shape index: {}]   ;;  %s1428_s2 = inlined_call_operand.vmem [shape: f32[2,1,128], index: 2, kind: input, shape index: {}]   ;;  %s1429_s3 = inlined_call_operand.vmem [shape: bf16[2,768,128], index: 3, kind: output, shape index: {}]  }
   0x1   :  { %s1177_s14 = smov 0   ;;  %s1179_s15 = smov 0  }
   0x2   :  { %s1181_s16 = smov 0  }
   0x3 LB: > { %s25_s17 = sadd.s32 1, %s1143_s14  ;;  %s32_s18 = sadd.s32 1, %s1147_s15  ;;  %s1151_s16 = sphi %s1181_s16, %s13_s16   ;;  %s1147_s15 = sphi %s1179_s15, %s1433_s15   ;;  %s1143_s14 = sphi %s1177_s14, %s1432_s14   ;;  %s1139_s13 = sphi %s1175_s13, %s1431_s13   ;;  %s1135_s12 = sphi %s1173_s12, %s1430_s12  }
   0x4   : > { %p26_p0 = scmp.ge.s32.totalorder %s25_s17, 3  ;;  %p825_p1 = scmp.ge.s32.totalorder %s1151_s16, 1 }
   0x5   : > { %p198_p2 = scmp.lt.s32.totalorder %s1151_s16, 7 }
   0x6   : > { %s1435_s17 = smov (%p26_p0, %s25_s17), 0  ;;  %s1437_s18 = smov (!%p26_p0, %s32_s18), %s1147_s15 }
   0x7   : > { %p199_p3 = pnand %p825_p1, %p198_p2  ;;  %p34_p4 = scmp.ge.s32.totalorder %s1437_s18, 2 }
   0x8   : > { %s826_s19 = sshll.u32 (!%p199_p3), %s1135_s12, 5  ;;  %p249_p5 = scmp.lt.s32.totalorder (!%p199_p3), %s1139_s13, 1  ;;  %v360_v0 = vlaneseq (!%p199_p3) }
   0x9   : > { %s1439_s18 = smov (%p34_p4, %s1437_s18), 0  ;;  %202 = sbr.rel (%p199_p3) target bundleno = 83 (0x53), region = 32 }
   0xa   : > { %p251_p6 = scmp.lt.s32.totalorder (!%p199_p3), %s826_s19, 95  ;;  %v1203_v1 = vshrl.u32 (!%p199_p3), %v360_v0, 7 }
   0xc   : > { %v362_v5 = vsub.s32 (!%p199_p3), 0, %v1203_v1 }
  0x10   : > { %s1441_s13 = smov (!%p249_p5, %s1139_s13), 1  ;;  %s1443_s19 = smov (!%p251_p6, %s826_s19), 95 }
  0x11   : > { %s1070_s20 = smul.u32 96, %s1441_s13  ;;  %s266_s23 = scalar_lea.vmem %s1427_s1, %s1441_s13 }
  0x12   : > { %s272_s26 = scalar_lea.vmem %s1428_s2, %s1441_s13  ;;  %v286_v2 = vld [vmem:[%s266_s23] sm:$0x1] }
  0x13   : > { %s1211_s27 = sadd.s32 %s1070_s20, %s1443_s19  ;;  %v287_v3 = vmul.f32 0.0017361111, %v286_v2  ;;  %v288_v4 = vld [vmem:[%s272_s26] sm:$0x1] }
  0x14   : > { %s827_s28 = sshll.u32 %s1211_s27, 2  ;;  %v289_v6 = vmul.f32 0.0017361111, %v288_v4 }
  0x15   : > { %s1220_s4 = scalar_lea.vmem %s1426_s0, %s827_s28  ;;  %v290_v7 = vmul.f32 %v287_v3, %v287_v3  ;;  %v1226_v12 = vrot.slane %v287_v3, %v362_v5  ;;  %s1345_s7 = scalar_lea.vmem %s1429_s3, %s827_s28 }
  0x16   : > { %v897_v8 = vld [vmem:[%s1220_s4] sm:$0xff]   ;;  %v1040_v9 = vld [vmem:[%s1220_s4 + $0x8] sm:$0xff]   ;;  %v1041_v13 = vld [vmem:[%s1220_s4 + $0x10] sm:$0xff]  }
  0x17   : > { %v291_v10 = vsub.f32 %v289_v6, %v290_v7  ;;  %v898_v11 = vunpack.c.l.bf16 %v897_v8  ;;  %v1042_v14 = vld [vmem:[%s1220_s4 + $0x18] sm:$0xff]   ;;  %v899_v15 = vunpack.c.h.bf16 %v897_v8  ;;  %v1043_v16 = vld [vmem:[%s1220_s4 + $0x20] sm:$0xff]   ;;  %v902_v18 = vunpack.c.l.bf16 %v1040_v9  ;;  %v1044_v19 = vld [vmem:[%s1220_s4 + $0x28] sm:$0xff]  }
  0x18   : > { %v903_v20 = vunpack.c.h.bf16 %v1040_v9  ;;  %v906_v21 = vunpack.c.l.bf16 %v1041_v13  ;;  %v907_v22 = vunpack.c.h.bf16 %v1041_v13  ;;  %v910_v23 = vunpack.c.l.bf16 %v1042_v14  ;;  %v1045_v24 = vld [vmem:[%s1220_s4 + $0x30] sm:$0xff]   ;;  %v1046_v29 = vld [vmem:[%s1220_s4 + $0x38] sm:$0xff]   ;;  %v1047_v37 = vld [vmem:[%s1220_s4 + $0x40] sm:$0xff]  }
  0x19   : > { %v292_v17 = vmax.f32 %v291_v10, 0.0  ;;  %v1234_v26 = vsub.f32 %v898_v11, %v1226_v12  ;;  %v911_v27 = vunpack.c.h.bf16 %v1042_v14  ;;  %v914_v28 = vunpack.c.l.bf16 %v1043_v16  ;;  %v1048_v42 = vld [vmem:[%s1220_s4 + $0x48] sm:$0xff]   ;;  %v1049_v47 = vld [vmem:[%s1220_s4 + $0x50] sm:$0xff]   ;;  %v1050_v52 = vld [vmem:[%s1220_s4 + $0x58] sm:$0xff]  }
  0x1a   : > { %v1238_v30 = vsub.f32 %v899_v15, %v1226_v12  ;;  %v915_v31 = vunpack.c.h.bf16 %v1043_v16  ;;  %v918_v32 = vunpack.c.l.bf16 %v1044_v19  ;;  %v919_v33 = vunpack.c.h.bf16 %v1044_v19  ;;  %v1051_v53 = vld [vmem:[%s1220_s4 + $0x60] sm:$0xff]   ;;  %v1052_v58 = vld [vmem:[%s1220_s4 + $0x68] sm:$0xff]   ;;  %v1053_v63 = vld [vmem:[%s1220_s4 + $0x70] sm:$0xff]  }
  0x1b   : > { %v293_v25 = vadd.f32 1e-05, %v292_v17  ;;  %v367_v34 = vsub.f32 %v902_v18, %v1226_v12  ;;  %v922_v35 = vunpack.c.l.bf16 %v1045_v24  ;;  %v923_v36 = vunpack.c.h.bf16 %v1045_v24  ;;  %v1054_v6 = vld [vmem:[%s1220_s4 + $0x78] sm:$0xff]  }
  0x1c   : > { %v368_v38 = vsub.f32 %v903_v20, %v1226_v12  ;;  %v369_v39 = vsub.f32 %v906_v21, %v1226_v12  ;;  %v370_v40 = vsub.f32 %v907_v22, %v1226_v12  ;;  %v926_v41 = vunpack.c.l.bf16 %v1046_v29 }
  0x1d   : > { %1111 = vrsqrt.f32 %v293_v25  ;;  %v371_v43 = vsub.f32 %v910_v23, %v1226_v12  ;;  %v372_v44 = vsub.f32 %v911_v27, %v1226_v12  ;;  %v1249_v45 = vsub.f32 %v914_v28, %v1226_v12 }
  0x1e   : > { %v927_v46 = vunpack.c.h.bf16 %v1046_v29  ;;  %v1253_v48 = vsub.f32 %v915_v31, %v1226_v12  ;;  %v1256_v49 = vsub.f32 %v918_v32, %v1226_v12  ;;  %v1259_v50 = vsub.f32 %v919_v33, %v1226_v12 }
  0x1f   : > { %v930_v51 = vunpack.c.l.bf16 %v1047_v37  ;;  %v1264_v54 = vsub.f32 %v922_v35, %v1226_v12  ;;  %v1267_v55 = vsub.f32 %v923_v36, %v1226_v12  ;;  %v931_v56 = vunpack.c.h.bf16 %v1047_v37 }
  0x20   : > { %v934_v57 = vunpack.c.l.bf16 %v1048_v42  ;;  %v1271_v59 = vsub.f32 %v926_v41, %v1226_v12  ;;  %v935_v60 = vunpack.c.h.bf16 %v1048_v42  ;;  %v938_v61 = vunpack.c.l.bf16 %v1049_v47 }
  0x21   : > { %v939_v62 = vunpack.c.h.bf16 %v1049_v47  ;;  %v1275_v0 = vsub.f32 %v927_v46, %v1226_v12  ;;  %v942_v2 = vunpack.c.l.bf16 %v1050_v52  ;;  %v943_v3 = vunpack.c.h.bf16 %v1050_v52 }
  0x22   : > { %v946_v4 = vunpack.c.l.bf16 %v1051_v53  ;;  %v1279_v7 = vsub.f32 %v930_v51, %v1226_v12  ;;  %v947_v8 = vunpack.c.h.bf16 %v1051_v53  ;;  %v950_v9 = vunpack.c.l.bf16 %v1052_v58 }
  0x23   : > { %v951_v10 = vunpack.c.h.bf16 %v1052_v58  ;;  %v1282_v11 = vsub.f32 %v931_v56, %v1226_v12  ;;  %v1285_v13 = vsub.f32 %v934_v57, %v1226_v12  ;;  %v954_v14 = vunpack.c.l.bf16 %v1053_v63 }
  0x24   : > { %v955_v15 = vunpack.c.h.bf16 %v1053_v63  ;;  %v1288_v16 = vsub.f32 %v935_v60, %v1226_v12  ;;  %v1291_v17 = vsub.f32 %v938_v61, %v1226_v12  ;;  %v1294_v18 = vsub.f32 %v939_v62, %v1226_v12 }
  0x25   : > { %v958_v19 = vunpack.c.l.bf16 %v1054_v6  ;;  %v1297_v21 = vsub.f32 %v942_v2, %v1226_v12  ;;  %v1300_v22 = vsub.f32 %v943_v3, %v1226_v12  ;;  %v1303_v23 = vsub.f32 %v946_v4, %v1226_v12 }
  0x26   : > { %v959_v24 = vunpack.c.h.bf16 %v1054_v6  ;;  %v1310_v27 = vsub.f32 %v947_v8, %v1226_v12  ;;  %v1313_v28 = vsub.f32 %v950_v9, %v1226_v12  ;;  %v1316_v29 = vsub.f32 %v951_v10, %v1226_v12 }
  0x27   : > { %v1112_v20 = vpop.eup %1111  ;;  %v1319_v31 = vsub.f32 %v954_v14, %v1226_v12  ;;  %v1322_v32 = vsub.f32 %v955_v15, %v1226_v12  ;;  %v1325_v33 = vsub.f32 %v958_v19, %v1226_v12 }
  0x28   : > { %v1307_v25 = vrot.slane %v1112_v20, %v362_v5  ;;  %v1328_v1 = vsub.f32 %v959_v24, %v1226_v12 }
  0x2a   : > { %v403_v5 = vmul.f32 %v1307_v25, %v1234_v26  ;;  %v404_v35 = vmul.f32 %v1307_v25, %v1238_v30  ;;  %v405_v36 = vmul.f32 %v1307_v25, %v367_v34  ;;  %v406_v37 = vmul.f32 %v1307_v25, %v368_v38 }
  0x2b   : > { %v407_v41 = vmul.f32 %v1307_v25, %v369_v39  ;;  %v408_v42 = vmul.f32 %v1307_v25, %v370_v40  ;;  %v409_v46 = vmul.f32 %v1307_v25, %v371_v43  ;;  %v410_v12 = vmul.f32 %v1307_v25, %v372_v44 }
  0x2c   : > { %vm435_vm0 = vcmp.ge.f32.partialorder %v403_v5, 0.0  ;;  %vm436_vm1 = vcmp.ge.f32.partialorder %v404_v35, 0.0  ;;  %v467_v47 = vmul.f32 0.2, %v403_v5  ;;  %v468_v26 = vmul.f32 0.2, %v404_v35 }
  0x2d   : > { %vm437_vm2 = vcmp.ge.f32.partialorder %v405_v36, 0.0  ;;  %vm438_vm3 = vcmp.ge.f32.partialorder %v406_v37, 0.0  ;;  %v469_v51 = vmul.f32 0.2, %v405_v36  ;;  %v470_v30 = vmul.f32 0.2, %v406_v37 }
  0x2e   : > { %v499_v34 = vsel %vm435_vm0, %v403_v5, %v467_v47  ;;  %v500_v38 = vsel %vm436_vm1, %v404_v35, %v468_v26  ;;  %vm439_vm4 = vcmp.ge.f32.partialorder %v407_v41, 0.0  ;;  %vm440_vm5 = vcmp.ge.f32.partialorder %v408_v42, 0.0 }
  0x2f   : > { %v963_v39 = vpack.c.bf16 %v500_v38, %v499_v34  ;;  %v501_v40 = vsel %vm437_vm2, %v405_v36, %v469_v51  ;;  %v502_v43 = vsel %vm438_vm3, %v406_v37, %v470_v30  ;;  %v471_v44 = vmul.f32 0.2, %v407_v41 }
  0x30   : > { %v968_v52 = vpack.c.bf16 %v502_v43, %v501_v40  ;;  %v472_v53 = vmul.f32 0.2, %v408_v42  ;;  %vm441_vm6 = vcmp.ge.f32.partialorder %v409_v46, 0.0  ;;  %vm442_vm7 = vcmp.ge.f32.partialorder %v410_v12, 0.0 }
  0x31   : > { %964 = vst [vmem:[%s1345_s7] sm:$0xff] %v963_v39   ;;  %v503_v56 = vsel %vm439_vm4, %v407_v41, %v471_v44  ;;  %v473_v57 = vmul.f32 0.2, %v409_v46  ;;  %v474_v58 = vmul.f32 0.2, %v410_v12  ;;  %v411_v60 = vmul.f32 %v1307_v25, %v1249_v45 }
  0x32   : > { %1055 = vst [vmem:[%s1345_s7 + $0x8] sm:$0xff] %v968_v52   ;;  %v504_v61 = vsel %vm440_vm5, %v408_v42, %v472_v53  ;;  %v412_v62 = vmul.f32 %v1307_v25, %v1253_v48  ;;  %v413_v63 = vmul.f32 %v1307_v25, %v1256_v49  ;;  %v414_v2 = vmul.f32 %v1307_v25, %v1259_v50 }
  0x33   : > { %v973_v3 = vpack.c.bf16 %v504_v61, %v503_v56  ;;  %v505_v4 = vsel %vm441_vm6, %v409_v46, %v473_v57  ;;  %v506_v6 = vsel %vm442_vm7, %v410_v12, %v474_v58  ;;  %vm443_vm8 = vcmp.ge.f32.partialorder %v411_v60, 0.0 }
  0x34   : > { %v978_v8 = vpack.c.bf16 %v506_v6, %v505_v4  ;;  %vm444_vm9 = vcmp.ge.f32.partialorder %v412_v62, 0.0  ;;  %v475_v9 = vmul.f32 0.2, %v411_v60  ;;  %v476_v45 = vmul.f32 0.2, %v412_v62 }
  0x35   : > { %1056 = vst [vmem:[%s1345_s7 + $0x10] sm:$0xff] %v973_v3   ;;  %vm445_vm10 = vcmp.ge.f32.partialorder %v413_v63, 0.0  ;;  %vm446_vm11 = vcmp.ge.f32.partialorder %v414_v2, 0.0  ;;  %v477_v48 = vmul.f32 0.2, %v413_v63  ;;  %v415_v50 = vmul.f32 %v1307_v25, %v1264_v54 }
  0x36   : > { %v478_v10 = vmul.f32 0.2, %v414_v2  ;;  %1057 = vst [vmem:[%s1345_s7 + $0x18] sm:$0xff] %v978_v8   ;;  %v507_v14 = vsel %vm443_vm8, %v411_v60, %v475_v9  ;;  %v508_v49 = vsel %vm444_vm9, %v412_v62, %v476_v45  ;;  %v416_v15 = vmul.f32 %v1307_v25, %v1267_v55 }
  0x37   : > { %v983_v19 = vpack.c.bf16 %v508_v49, %v507_v14  ;;  %v509_v20 = vsel %vm445_vm10, %v413_v63, %v477_v48  ;;  %v417_v5 = vmul.f32 %v1307_v25, %v1271_v59  ;;  %vm447_vm12 = vcmp.ge.f32.partialorder %v415_v50, 0.0 }
  0x38   : > { %v510_v24 = vsel %vm446_vm11, %v414_v2, %v478_v10  ;;  %vm448_vm13 = vcmp.ge.f32.partialorder %v416_v15, 0.0  ;;  %v479_v36 = vmul.f32 0.2, %v415_v50  ;;  %v480_v37 = vmul.f32 0.2, %v416_v15 }
  0x39   : > { %v988_v35 = vpack.c.bf16 %v510_v24, %v509_v20  ;;  %1058 = vst [vmem:[%s1345_s7 + $0x20] sm:$0xff] %v983_v19   ;;  %v418_v41 = vmul.f32 %v1307_v25, %v1275_v0  ;;  %vm449_vm14 = vcmp.ge.f32.partialorder %v417_v5, 0.0  ;;  %v481_v54 = vmul.f32 0.2, %v417_v5 }
  0x3a   : > { %v511_v42 = vsel %vm447_vm12, %v415_v50, %v479_v36  ;;  %v419_v55 = vmul.f32 %v1307_v25, %v1279_v7  ;;  %v420_v59 = vmul.f32 %v1307_v25, %v1282_v11  ;;  %v421_v46 = vmul.f32 %v1307_v25, %v1285_v13 }
  0x3b   : > { %1059 = vst [vmem:[%s1345_s7 + $0x28] sm:$0xff] %v988_v35   ;;  %v512_v12 = vsel %vm448_vm13, %v416_v15, %v480_v37  ;;  %vm450_vm15 = vcmp.ge.f32.partialorder %v418_v41, 0.0  ;;  %v482_v47 = vmul.f32 0.2, %v418_v41  ;;  %v513_v26 = vsel %vm449_vm14, %v417_v5, %v481_v54 }
  0x3c   : > { %v993_v51 = vpack.c.bf16 %v512_v12, %v511_v42  ;;  %vm451_vm0 = vcmp.ge.f32.partialorder %v419_v55, 0.0  ;;  %vm452_vm1 = vcmp.ge.f32.partialorder %v420_v59, 0.0  ;;  %v483_v0 = vmul.f32 0.2, %v419_v55 }
  0x3d   : > { %v514_v30 = vsel %vm450_vm15, %v418_v41, %v482_v47  ;;  %v484_v34 = vmul.f32 0.2, %v420_v59  ;;  %v422_v7 = vmul.f32 %v1307_v25, %v1288_v16  ;;  %vm453_vm2 = vcmp.ge.f32.partialorder %v421_v46, 0.0 }
  0x3e   : > { %1060 = vst [vmem:[%s1345_s7 + $0x30] sm:$0xff] %v993_v51   ;;  %v998_v11 = vpack.c.bf16 %v514_v30, %v513_v26  ;;  %v515_v38 = vsel %vm451_vm0, %v419_v55, %v483_v0  ;;  %v485_v13 = vmul.f32 0.2, %v421_v46  ;;  %v423_v39 = vmul.f32 %v1307_v25, %v1291_v17 }
  0x3f   : > { %v516_v40 = vsel %vm452_vm1, %v420_v59, %v484_v34  ;;  %vm454_vm3 = vcmp.ge.f32.partialorder %v422_v7, 0.0  ;;  %v486_v43 = vmul.f32 0.2, %v422_v7  ;;  %v424_v44 = vmul.f32 %v1307_v25, %v1294_v18 }
  0x40   : > { %1061 = vst [vmem:[%s1345_s7 + $0x38] sm:$0xff] %v998_v11   ;;  %v1003_v52 = vpack.c.bf16 %v516_v40, %v515_v38  ;;  %v517_v53 = vsel %vm453_vm2, %v421_v46, %v485_v13  ;;  %vm455_vm4 = vcmp.ge.f32.partialorder %v423_v39, 0.0  ;;  %v487_v16 = vmul.f32 0.2, %v423_v39 }
  0x41   : > { %v518_v56 = vsel %vm454_vm3, %v422_v7, %v486_v43  ;;  %vm456_vm5 = vcmp.ge.f32.partialorder %v424_v44, 0.0  ;;  %v488_v57 = vmul.f32 0.2, %v424_v44  ;;  %v425_v58 = vmul.f32 %v1307_v25, %v1297_v21 }
  0x42   : > { %1062 = vst [vmem:[%s1345_s7 + $0x40] sm:$0xff] %v1003_v52   ;;  %v1008_v17 = vpack.c.bf16 %v518_v56, %v517_v53  ;;  %v519_v60 = vsel %vm455_vm4, %v423_v39, %v487_v16  ;;  %v426_v61 = vmul.f32 %v1307_v25, %v1300_v22  ;;  %v427_v18 = vmul.f32 %v1307_v25, %v1303_v23 }
  0x43   : > { %v520_v62 = vsel %vm456_vm5, %v424_v44, %v488_v57  ;;  %vm457_vm6 = vcmp.ge.f32.partialorder %v425_v58, 0.0  ;;  %v489_v63 = vmul.f32 0.2, %v425_v58  ;;  %v428_v2 = vmul.f32 %v1307_v25, %v1310_v27 }
  0x44   : > { %1063 = vst [vmem:[%s1345_s7 + $0x48] sm:$0xff] %v1008_v17   ;;  %v1013_v3 = vpack.c.bf16 %v520_v62, %v519_v60  ;;  %vm458_vm7 = vcmp.ge.f32.partialorder %v426_v61, 0.0  ;;  %v490_v21 = vmul.f32 0.2, %v426_v61  ;;  %vm459_vm8 = vcmp.ge.f32.partialorder %v427_v18, 0.0 }
  0x45   : > { %v521_v4 = vsel %vm457_vm6, %v425_v58, %v489_v63  ;;  %vm460_vm9 = vcmp.ge.f32.partialorder %v428_v2, 0.0  ;;  %v491_v6 = vmul.f32 0.2, %v427_v18  ;;  %v492_v8 = vmul.f32 0.2, %v428_v2 }
  0x46   : > { %1064 = vst [vmem:[%s1345_s7 + $0x50] sm:$0xff] %v1013_v3   ;;  %v522_v22 = vsel %vm458_vm7, %v426_v61, %v490_v21  ;;  %v429_v23 = vmul.f32 %v1307_v25, %v1313_v28  ;;  %v430_v9 = vmul.f32 %v1307_v25, %v1316_v29  ;;  %v431_v27 = vmul.f32 %v1307_v25, %v1319_v31 }
  0x47   : > { %v1018_v45 = vpack.c.bf16 %v522_v22, %v521_v4  ;;  %v523_v48 = vsel %vm459_vm8, %v427_v18, %v491_v6  ;;  %v524_v10 = vsel %vm460_vm9, %v428_v2, %v492_v8  ;;  %v432_v14 = vmul.f32 %v1307_v25, %v1322_v32 }
  0x48   : > { %v1023_v49 = vpack.c.bf16 %v524_v10, %v523_v48  ;;  %vm461_vm10 = vcmp.ge.f32.partialorder %v429_v23, 0.0  ;;  %vm462_vm11 = vcmp.ge.f32.partialorder %v430_v9, 0.0  ;;  %v493_v50 = vmul.f32 0.2, %v429_v23 }
  0x49   : > { %1065 = vst [vmem:[%s1345_s7 + $0x58] sm:$0xff] %v1018_v45   ;;  %v494_v15 = vmul.f32 0.2, %v430_v9  ;;  %vm463_vm12 = vcmp.ge.f32.partialorder %v431_v27, 0.0  ;;  %vm464_vm13 = vcmp.ge.f32.partialorder %v432_v14, 0.0  ;;  %v433_v19 = vmul.f32 %v1307_v25, %v1325_v33 }
  0x4a   : > { %v495_v28 = vmul.f32 0.2, %v431_v27  ;;  %1066 = vst [vmem:[%s1345_s7 + $0x60] sm:$0xff] %v1023_v49   ;;  %v525_v29 = vsel %vm461_vm10, %v429_v23, %v493_v50  ;;  %v496_v31 = vmul.f32 0.2, %v432_v14  ;;  %v434_v32 = vmul.f32 %v1307_v25, %v1328_v1 }
  0x4b   : > { %v526_v20 = vsel %vm462_vm11, %v430_v9, %v494_v15  ;;  %vm465_vm14 = vcmp.ge.f32.partialorder %v433_v19, 0.0  ;;  %v497_v37 = vmul.f32 0.2, %v433_v19 }
  0x4c   : > { %v527_v24 = vsel %vm463_vm12, %v431_v27, %v495_v28  ;;  %v1028_v5 = vpack.c.bf16 %v526_v20, %v525_v29  ;;  %v528_v35 = vsel %vm464_vm13, %v432_v14, %v496_v31  ;;  %vm466_vm15 = vcmp.ge.f32.partialorder %v434_v32, 0.0 }
  0x4d   : > { %v1033_v36 = vpack.c.bf16 %v528_v35, %v527_v24  ;;  %v498_v41 = vmul.f32 0.2, %v434_v32  ;;  %v529_v54 = vsel %vm465_vm14, %v433_v19, %v497_v37 }
  0x4e   : > { %1067 = vst [vmem:[%s1345_s7 + $0x68] sm:$0xff] %v1028_v5  }
  0x4f   : > { %1068 = vst [vmem:[%s1345_s7 + $0x70] sm:$0xff] %v1033_v36   ;;  %v530_v42 = vsel %vm466_vm15, %v434_v32, %v498_v41 }
  0x50   : > { %v1038_v55 = vpack.c.bf16 %v530_v42, %v529_v54 }
  0x52   : > { %1069 = vst [vmem:[%s1345_s7 + $0x78] sm:$0xff] %v1038_v55  }
  0x53 PF: > { %s13_s16 = sadd.s32 1, %s1151_s16   ;;  %s1430_s12 = smov %s1143_s14 }
  0x54   : > { %p10_p7 = scmp.ge.s32.totalorder %s13_s16, 8   ;;  %s1431_s13 = smov %s1147_s15 }
  0x55   : > { %s1432_s14 = smov %s1435_s17  ;;  %s1433_s15 = smov %s1439_s18 }
  0x56   :  { %12 = sbr.rel (!%p10_p7) target bundleno = 3 (0x3), region = 68 }

// kernel: discriminator_forward.9
= control target key start
LH: loop header
LB: loop body
LE: loop exit
PB: predicated region body
PF: predicated region fallthrough
CT: control target
= control target key end

     0   :  { %s3487_s0 = inlined_call_operand.vmem [shape: bf16[2,768,1024], index: 0, kind: input, shape index: {}]   ;;  %s3488_s1 = inlined_call_operand.vmem [shape: bf16[1024,128], index: 1, kind: input, shape index: {}]   ;;  %s3489_s2 = inlined_call_operand.vmem [shape: f32[1,128], index: 2, kind: input, shape index: {}]   ;;  %s3490_s3 = inlined_call_operand.vmem [shape: bf16[2,768,128], index: 3, kind: output, shape index: {0}]   ;;  %s3491_s4 = inlined_call_operand.vmem [shape: f32[2,1,128], index: 4, kind: output, shape index: {1}]   ;;  %s3492_s5 = inlined_call_operand.vmem [shape: f32[2,1,128], index: 5, kind: output, shape index: {2}]  }
   0x1   :  { %3493 = sst [smem:[#allocation6_spill]] %s3487_s0 }
   0x2   :  { %3494 = sst [smem:[#allocation7_spill]] %s3488_s1 }
   0x3   :  { %s2945_s18 = smov 0   ;;  %s2947_s19 = smov 0  }
   0x4   :  { %s2949_s20 = smov 0   ;;  %s2951_s21 = smov 0  }
   0x5   :  { %s2953_s22 = smov 0   ;;  %s2955_s2 = smov 0  }
   0x6   :  { %s2957_s23 = smov 0   ;;  %s2959_s24 = smov 0  }
   0x7   :  { %s2961_s25 = smov 0  }
   0x8 LB: > { %s31_s26 = sadd.s32 1, %s2899_s2  ;;  %s34_s27 = sadd.s32 1, %s2903_s23  ;;  %s2911_s25 = sphi %s2961_s25, %s16_s25   ;;  %s2907_s24 = sphi %s2959_s24, %s3505_s24   ;;  %s2903_s23 = sphi %s2957_s23, %s3504_s23   ;;  %s2899_s2 = sphi %s2955_s2, %s3503_s2   ;;  %s2895_s22 = sphi %s2953_s22, %s3502_s22   ;;  %s2891_s21 = sphi %s2951_s21, %s3501_s21   ;;  %s2887_s20 = sphi %s2949_s20, %s3500_s20   ;;  %s2883_s19 = sphi %s2947_s19, %s3499_s19   ;;  %s2879_s18 = sphi %s2945_s18, %s3498_s18  }
   0x9   : > { %p32_p0 = scmp.ge.s32.totalorder %s31_s26, 2  ;;  %p60_p1 = scmp.ne.s32.totalorder %s2883_s19, %s2879_s18 }
   0xa   : > { %p61_p2 = scmp.eq.s32.totalorder %s2911_s25, 0  ;;  %s42_s28 = sadd.s32 1, %s2907_s24 }
   0xb   : > { %s3507_s27 = smov (!%p32_p0, %s34_s27), %s2903_s23  ;;  %s3513_s26 = smov (%p32_p0, %s31_s26), 0 }
   0xc   : > { %p36_p3 = scmp.ge.s32.totalorder %s3507_s27, 3  ;;  %p2997_p4 = por %p61_p2, %p60_p1 }
   0xd   : > { %s49_s6 = ssub.s32 %s2899_s2, %s3513_s26  ;;  %s53_s10 = sadd.s32 1, %s2883_s19 }
   0xe   : > { %s3509_s27 = smov (%p36_p3, %s3507_s27), 0  ;;  %s3511_s28 = smov (!%p36_p3, %s42_s28), %s2907_s24 }
   0xf   : > { %p44_p5 = scmp.ge.s32.totalorder %s3511_s28, 2  ;;  %s47_s30 = ssub.s32 %s2903_s23, %s3509_s27 }
  0x10   : > { %p2141_p7 = scmp.ge.s32.totalorder %s2911_s25, 12 }
  0x11   : > { %s3515_s28 = smov (%p44_p5, %s3511_s28), 0 }
  0x12   : > { %s46_s7 = ssub.s32 %s2907_s24, %s3515_s28  ;;  %232 = sbr.rel (%p2141_p7) target bundleno = 68 (0x44), region = 20 }
  0x13   : > { %s48_s8 = sor.u32 %s47_s30, %s46_s7 }
  0x14   : > { %s50_s9 = sor.u32 %s49_s6, %s48_s8 }
  0x15   : > { %p51_p6 = scmp.eq.s32.totalorder %s50_s9, 0 }
  0x17   : > { %s3016_s11 = scalar_select %p51_p6, %s2883_s19, %s53_s10  }
  0x19   : > { %235 = sbr.rel (!%p2997_p4) target bundleno = 68 (0x44), region = 24  ;;  %s237_s12 = sand.u32 (%p2997_p4), 1, %s2883_s19  }
  0x1a   : > { %s2144_s13 = sshll.u32 (%p2997_p4), %s2899_s2, 2  ;;  %s2285_s14 = sshll.u32 (%p2997_p4), %s2903_s23, 8 }
  0x1b   : > { %s243_s15 = sadd.s32 (%p2997_p4), %s2285_s14, %s2144_s13  ;;  %s2142_s16 = sshll.u32 (%p2997_p4), %s237_s12, 9 }
  0x1c   : > { %s2637_s17 = smul.u32 (%p2997_p4), 768, %s2907_s24  ;;  %s3496_s0 = sld [smem:[#allocation6_spill]] (%p2997_p4) }
  0x1d   : > { %s3033_s29 = scalar_lea.vmem (%p2997_p4), [#allocation5], %s2142_s16 }
  0x1e   : > { %s245_s30 = sadd.s32 (%p2997_p4), %s2637_s17, %s243_s15 }
  0x1f   : > { %s2146_s6 = sshll.u32 (%p2997_p4), %s245_s30, 2 }
  0x22   : > { %s3028_s9 = scalar_lea.vmem %s3496_s0, %s2146_s6 }
  0x23   : > { %v260_v0 = vld [vmem:[%s3028_s9] sm:$0xff]  ;;  %v262_v1 = vld [vmem:[%s3028_s9 + $0x8] sm:$0xff] }
  0x24   : > { %v264_v2 = vld [vmem:[%s3028_s9 + $0x20] sm:$0xff]  ;;  %261 = vst [vmem:[%s3033_s29] sm:$0xff] %v260_v0  ;;  %263 = vst [vmem:[%s3033_s29 + $0x8] sm:$0xff] %v262_v1  ;;  %v266_v3 = vld [vmem:[%s3028_s9 + $0x28] sm:$0xff] }
  0x25   : > { %265 = vst [vmem:[%s3033_s29 + $0x10] sm:$0xff] %v264_v2  ;;  %v268_v4 = vld [vmem:[%s3028_s9 + $0x40] sm:$0xff]  ;;  %v270_v5 = vld [vmem:[%s3028_s9 + $0x48] sm:$0xff]  ;;  %267 = vst [vmem:[%s3033_s29 + $0x18] sm:$0xff] %v266_v3 }
  0x26   : > { %269 = vst [vmem:[%s3033_s29 + $0x20] sm:$0xff] %v268_v4  ;;  %271 = vst [vmem:[%s3033_s29 + $0x28] sm:$0xff] %v270_v5  ;;  %v272_v6 = vld [vmem:[%s3028_s9 + $0x60] sm:$0xff]  ;;  %v274_v7 = vld [vmem:[%s3028_s9 + $0x68] sm:$0xff] }
  0x27   : > { %v276_v8 = vld [vmem:[%s3028_s9 + $0x80] sm:$0xff]  ;;  %273 = vst [vmem:[%s3033_s29 + $0x30] sm:$0xff] %v272_v6  ;;  %275 = vst [vmem:[%s3033_s29 + $0x38] sm:$0xff] %v274_v7  ;;  %v278_v9 = vld [vmem:[%s3028_s9 + $0x88] sm:$0xff] }
  0x28   : > { %277 = vst [vmem:[%s3033_s29 + $0x40] sm:$0xff] %v276_v8  ;;  %v280_v10 = vld [vmem:[%s3028_s9 + $0xa0] sm:$0xff]  ;;  %v282_v11 = vld [vmem:[%s3028_s9 + $0xa8] sm:$0xff]  ;;  %279 = vst [vmem:[%s3033_s29 + $0x48] sm:$0xff] %v278_v9 }
  0x29   : > { %281 = vst [vmem:[%s3033_s29 + $0x50] sm:$0xff] %v280_v10  ;;  %283 = vst [vmem:[%s3033_s29 + $0x58] sm:$0xff] %v282_v11  ;;  %v284_v12 = vld [vmem:[%s3028_s9 + $0xc0] sm:$0xff]  ;;  %v286_v13 = vld [vmem:[%s3028_s9 + $0xc8] sm:$0xff] }
  0x2a   : > { %v288_v14 = vld [vmem:[%s3028_s9 + $0xe0] sm:$0xff]  ;;  %285 = vst [vmem:[%s3033_s29 + $0x60] sm:$0xff] %v284_v12  ;;  %287 = vst [vmem:[%s3033_s29 + $0x68] sm:$0xff] %v286_v13  ;;  %v290_v15 = vld [vmem:[%s3028_s9 + $0xe8] sm:$0xff] }
  0x2b   : > { %289 = vst [vmem:[%s3033_s29 + $0x70] sm:$0xff] %v288_v14  ;;  %v292_v16 = vld [vmem:[%s3028_s9 + $0x100] sm:$0xff]  ;;  %v294_v17 = vld [vmem:[%s3028_s9 + $0x108] sm:$0xff]  ;;  %291 = vst [vmem:[%s3033_s29 + $0x78] sm:$0xff] %v290_v15 }
  0x2c   : > { %293 = vst [vmem:[%s3033_s29 + $0x80] sm:$0xff] %v292_v16  ;;  %295 = vst [vmem:[%s3033_s29 + $0x88] sm:$0xff] %v294_v17  ;;  %v296_v18 = vld [vmem:[%s3028_s9 + $0x120] sm:$0xff]  ;;  %v298_v19 = vld [vmem:[%s3028_s9 + $0x128] sm:$0xff] }
  0x2d   : > { %v300_v20 = vld [vmem:[%s3028_s9 + $0x140] sm:$0xff]  ;;  %297 = vst [vmem:[%s3033_s29 + $0x90] sm:$0xff] %v296_v18  ;;  %299 = vst [vmem:[%s3033_s29 + $0x98] sm:$0xff] %v298_v19  ;;  %v302_v21 = vld [vmem:[%s3028_s9 + $0x148] sm:$0xff] }
  0x2e   : > { %301 = vst [vmem:[%s3033_s29 + $0xa0] sm:$0xff] %v300_v20  ;;  %v304_v22 = vld [vmem:[%s3028_s9 + $0x160] sm:$0xff]  ;;  %v306_v23 = vld [vmem:[%s3028_s9 + $0x168] sm:$0xff]  ;;  %303 = vst [vmem:[%s3033_s29 + $0xa8] sm:$0xff] %v302_v21 }
  0x2f   : > { %305 = vst [vmem:[%s3033_s29 + $0xb0] sm:$0xff] %v304_v22  ;;  %307 = vst [vmem:[%s3033_s29 + $0xb8] sm:$0xff] %v306_v23  ;;  %v308_v24 = vld [vmem:[%s3028_s9 + $0x180] sm:$0xff]  ;;  %v310_v25 = vld [vmem:[%s3028_s9 + $0x188] sm:$0xff] }
  0x30   : > { %v312_v26 = vld [vmem:[%s3028_s9 + $0x1a0] sm:$0xff]  ;;  %309 = vst [vmem:[%s3033_s29 + $0xc0] sm:$0xff] %v308_v24  ;;  %311 = vst [vmem:[%s3033_s29 + $0xc8] sm:$0xff] %v310_v25  ;;  %v314_v27 = vld [vmem:[%s3028_s9 + $0x1a8] sm:$0xff] }
  0x31   : > { %313 = vst [vmem:[%s3033_s29 + $0xd0] sm:$0xff] %v312_v26  ;;  %v316_v28 = vld [vmem:[%s3028_s9 + $0x1c0] sm:$0xff]  ;;  %v318_v29 = vld [vmem:[%s3028_s9 + $0x1c8] sm:$0xff]  ;;  %315 = vst [vmem:[%s3033_s29 + $0xd8] sm:$0xff] %v314_v27 }
  0x32   : > { %317 = vst [vmem:[%s3033_s29 + $0xe0] sm:$0xff] %v316_v28  ;;  %319 = vst [vmem:[%s3033_s29 + $0xe8] sm:$0xff] %v318_v29  ;;  %v320_v30 = vld [vmem:[%s3028_s9 + $0x1e0] sm:$0xff]  ;;  %v322_v31 = vld [vmem:[%s3028_s9 + $0x1e8] sm:$0xff] }
  0x33   : > { %v324_v32 = vld [vmem:[%s3028_s9 + $0x200] sm:$0xff]  ;;  %321 = vst [vmem:[%s3033_s29 + $0xf0] sm:$0xff] %v320_v30  ;;  %323 = vst [vmem:[%s3033_s29 + $0xf8] sm:$0xff] %v322_v31  ;;  %v326_v33 = vld [vmem:[%s3028_s9 + $0x208] sm:$0xff] }
  0x34   : > { %325 = vst [vmem:[%s3033_s29 + $0x100] sm:$0xff] %v324_v32  ;;  %v328_v34 = vld [vmem:[%s3028_s9 + $0x220] sm:$0xff]  ;;  %v330_v35 = vld [vmem:[%s3028_s9 + $0x228] sm:$0xff]  ;;  %327 = vst [vmem:[%s3033_s29 + $0x108] sm:$0xff] %v326_v33 }
  0x35   : > { %329 = vst [vmem:[%s3033_s29 + $0x110] sm:$0xff] %v328_v34  ;;  %331 = vst [vmem:[%s3033_s29 + $0x118] sm:$0xff] %v330_v35  ;;  %v332_v36 = vld [vmem:[%s3028_s9 + $0x240] sm:$0xff]  ;;  %v334_v37 = vld [vmem:[%s3028_s9 + $0x248] sm:$0xff] }
  0x36   : > { %v336_v38 = vld [vmem:[%s3028_s9 + $0x260] sm:$0xff]  ;;  %333 = vst [vmem:[%s3033_s29 + $0x120] sm:$0xff] %v332_v36  ;;  %335 = vst [vmem:[%s3033_s29 + $0x128] sm:$0xff] %v334_v37  ;;  %v338_v39 = vld [vmem:[%s3028_s9 + $0x268] sm:$0xff] }
  0x37   : > { %337 = vst [vmem:[%s3033_s29 + $0x130] sm:$0xff] %v336_v38  ;;  %v340_v40 = vld [vmem:[%s3028_s9 + $0x280] sm:$0xff]  ;;  %v342_v41 = vld [vmem:[%s3028_s9 + $0x288] sm:$0xff]  ;;  %339 = vst [vmem:[%s3033_s29 + $0x138] sm:$0xff] %v338_v39 }
  0x38   : > { %341 = vst [vmem:[%s3033_s29 + $0x140] sm:$0xff] %v340_v40  ;;  %343 = vst [vmem:[%s3033_s29 + $0x148] sm:$0xff] %v342_v41  ;;  %v344_v42 = vld [vmem:[%s3028_s9 + $0x2a0] sm:$0xff]  ;;  %v346_v43 = vld [vmem:[%s3028_s9 + $0x2a8] sm:$0xff] }
  0x39   : > { %v348_v44 = vld [vmem:[%s3028_s9 + $0x2c0] sm:$0xff]  ;;  %345 = vst [vmem:[%s3033_s29 + $0x150] sm:$0xff] %v344_v42  ;;  %347 = vst [vmem:[%s3033_s29 + $0x158] sm:$0xff] %v346_v43  ;;  %v350_v45 = vld [vmem:[%s3028_s9 + $0x2c8] sm:$0xff] }
  0x3a   : > { %349 = vst [vmem:[%s3033_s29 + $0x160] sm:$0xff] %v348_v44  ;;  %v352_v46 = vld [vmem:[%s3028_s9 + $0x2e0] sm:$0xff]  ;;  %v354_v47 = vld [vmem:[%s3028_s9 + $0x2e8] sm:$0xff]  ;;  %351 = vst [vmem:[%s3033_s29 + $0x168] sm:$0xff] %v350_v45 }
  0x3b   : > { %353 = vst [vmem:[%s3033_s29 + $0x170] sm:$0xff] %v352_v46  ;;  %355 = vst [vmem:[%s3033_s29 + $0x178] sm:$0xff] %v354_v47  ;;  %v356_v48 = vld [vmem:[%s3028_s9 + $0x300] sm:$0xff]  ;;  %v358_v49 = vld [vmem:[%s3028_s9 + $0x308] sm:$0xff] }
  0x3c   : > { %v360_v50 = vld [vmem:[%s3028_s9 + $0x320] sm:$0xff]  ;;  %357 = vst [vmem:[%s3033_s29 + $0x180] sm:$0xff] %v356_v48  ;;  %359 = vst [vmem:[%s3033_s29 + $0x188] sm:$0xff] %v358_v49  ;;  %v362_v51 = vld [vmem:[%s3028_s9 + $0x328] sm:$0xff] }
  0x3d   : > { %361 = vst [vmem:[%s3033_s29 + $0x190] sm:$0xff] %v360_v50  ;;  %v364_v52 = vld [vmem:[%s3028_s9 + $0x340] sm:$0xff]  ;;  %v366_v53 = vld [vmem:[%s3028_s9 + $0x348] sm:$0xff]  ;;  %363 = vst [vmem:[%s3033_s29 + $0x198] sm:$0xff] %v362_v51 }
  0x3e   : > { %365 = vst [vmem:[%s3033_s29 + $0x1a0] sm:$0xff] %v364_v52  ;;  %367 = vst [vmem:[%s3033_s29 + $0x1a8] sm:$0xff] %v366_v53  ;;  %v368_v54 = vld [vmem:[%s3028_s9 + $0x360] sm:$0xff]  ;;  %v370_v55 = vld [vmem:[%s3028_s9 + $0x368] sm:$0xff] }
  0x3f   : > { %v372_v56 = vld [vmem:[%s3028_s9 + $0x380] sm:$0xff]  ;;  %369 = vst [vmem:[%s3033_s29 + $0x1b0] sm:$0xff] %v368_v54  ;;  %371 = vst [vmem:[%s3033_s29 + $0x1b8] sm:$0xff] %v370_v55  ;;  %v374_v57 = vld [vmem:[%s3028_s9 + $0x388] sm:$0xff] }
  0x40   : > { %373 = vst [vmem:[%s3033_s29 + $0x1c0] sm:$0xff] %v372_v56  ;;  %v376_v58 = vld [vmem:[%s3028_s9 + $0x3a0] sm:$0xff]  ;;  %v378_v59 = vld [vmem:[%s3028_s9 + $0x3a8] sm:$0xff]  ;;  %375 = vst [vmem:[%s3033_s29 + $0x1c8] sm:$0xff] %v374_v57 }
  0x41   : > { %377 = vst [vmem:[%s3033_s29 + $0x1d0] sm:$0xff] %v376_v58  ;;  %379 = vst [vmem:[%s3033_s29 + $0x1d8] sm:$0xff] %v378_v59  ;;  %v380_v60 = vld [vmem:[%s3028_s9 + $0x3c0] sm:$0xff]  ;;  %v382_v61 = vld [vmem:[%s3028_s9 + $0x3c8] sm:$0xff] }
  0x42   : > { %v384_v62 = vld [vmem:[%s3028_s9 + $0x3e0] sm:$0xff]  ;;  %381 = vst [vmem:[%s3033_s29 + $0x1e0] sm:$0xff] %v380_v60  ;;  %383 = vst [vmem:[%s3033_s29 + $0x1e8] sm:$0xff] %v382_v61  ;;  %v386_v63 = vld [vmem:[%s3028_s9 + $0x3e8] sm:$0xff] }
  0x43   : > { %385 = vst [vmem:[%s3033_s29 + $0x1f0] sm:$0xff] %v384_v62  ;;  %387 = vst [vmem:[%s3033_s29 + $0x1f8] sm:$0xff] %v386_v63 }
  0x44 PF: > { %p2147_p8 = scmp.ge.s32.totalorder %s2911_s25, 1  ;;  %p404_p9 = scmp.lt.s32.totalorder %s2911_s25, 13 }
  0x46   : > { %p405_p10 = pnand %p2147_p8, %p404_p9 }
  0x47   : > { %s411_s10 = sand.u32 (!%p405_p10), 1, %s2879_s18   ;;  %s2149_s12 = sshll.u32 (!%p405_p10), %s2887_s20, 6 }
  0x48   : > { %408 = sbr.rel (%p405_p10) target bundleno = 560 (0x230), region = 51  ;;  %s2148_s13 = sshll.u32 (!%p405_p10), %s411_s10, 9 }
  0x49   : > { %p471_p11 = scmp.lt.s32.totalorder (!%p405_p10), %s2149_s12, 127  ;;  %s2151_s14 = sshll.u32 (!%p405_p10), %s2891_s21, 5 }
  0x4a   : > { %p483_p12 = scmp.lt.s32.totalorder (!%p405_p10), %s2895_s22, 1  ;;  %p485_p13 = scmp.lt.s32.totalorder (!%p405_p10), %s2151_s14, 95 }
  0x4b   : > { %p508_p0 = scmp.eq.s32.totalorder (!%p405_p10), %s2887_s20, 0  ;;  %s3497_s1 = sld [smem:[#allocation7_spill]] (!%p405_p10) }
  0x4c   : > { %p2153_p1 = scmp.ne.s32.totalorder (!%p405_p10), %s2887_s20, 0 }
  0x4f   : > { %s3517_s12 = smov (!%p471_p11, %s2149_s12), 127  ;;  %s3519_s22 = smov (!%p483_p12, %s2895_s22), 1 }
  0x50   : > { %s2150_s15 = sshll.u32 %s3517_s12, 2  ;;  %s3521_s14 = smov (!%p485_p13, %s2151_s14), 95  ;;  %v2913_v0 = vmov (!%p2153_p1), 0.0  }
  0x51   : > { %s3170_s30 = scalar_lea.vmem %s3497_s1, %s2150_s15  ;;  %s2638_s18 = smul.u32 96, %s3519_s22  ;;  %512 = vst [vmem:[#allocation2] sm:$0xff] (!%p2153_p1), %v2913_v0  ;;  %513 = vst [vmem:[#allocation2 + $0x8] sm:$0xff] (!%p2153_p1), %v2913_v0 }
  0x52   : > { %s500_s8 = scalar_lea.vmem %s3491_s4, %s3519_s22  ;;  %s506_s10 = scalar_lea.vmem %s3492_s5, %s3519_s22  ;;  %514 = vst [vmem:[#allocation2 + $0x10] sm:$0xff] (!%p2153_p1), %v2913_v0  ;;  %515 = vst [vmem:[#allocation2 + $0x18] sm:$0xff] (!%p2153_p1), %v2913_v0 }
  0x53   : > { %s491_s12 = sadd.s32 %s2638_s18, %s3521_s14  ;;  %s3189_s1 = scalar_lea.vmem [#allocation5], %s2148_s13  ;;  %516 = vst [vmem:[#allocation2 + $0x20] sm:$0xff] (!%p2153_p1), %v2913_v0  ;;  %517 = vst [vmem:[#allocation2 + $0x28] sm:$0xff] (!%p2153_p1), %v2913_v0 }
  0x54   : > { %s2152_s0 = sshll.u32 %s491_s12, 2  ;;  %511 = sbr.rel (%p2153_p1) target bundleno = 97 (0x61), region = 59  ;;  %518 = vst [vmem:[#allocation2 + $0x30] sm:$0xff] (!%p2153_p1), %v2913_v0  ;;  %519 = vst [vmem:[#allocation2 + $0x38] sm:$0xff] (!%p2153_p1), %v2913_v0 }
  0x55   : > { %s3187_s17 = scalar_lea.vmem %s3490_s3, %s2152_s0  ;;  %520 = vst [vmem:[#allocation2 + $0x40] sm:$0xff] (!%p2153_p1), %v2913_v0  ;;  %521 = vst [vmem:[#allocation2 + $0x48] sm:$0xff] (!%p2153_p1), %v2913_v0 }
  0x56   : > { %522 = vst [vmem:[#allocation2 + $0x50] sm:$0xff] (!%p2153_p1), %v2913_v0  ;;  %523 = vst [vmem:[#allocation2 + $0x58] sm:$0xff] (!%p2153_p1), %v2913_v0 }
  0x57   : > { %524 = vst [vmem:[#allocation2 + $0x60] sm:$0xff] (!%p2153_p1), %v2913_v0  ;;  %525 = vst [vmem:[#allocation2 + $0x68] sm:$0xff] (!%p2153_p1), %v2913_v0 }
  0x58   : > { %526 = vst [vmem:[#allocation2 + $0x70] sm:$0xff] (!%p2153_p1), %v2913_v0  ;;  %527 = vst [vmem:[#allocation2 + $0x78] sm:$0xff] (!%p2153_p1), %v2913_v0 }
  0x59   : > { %528 = vst [vmem:[#allocation2 + $0x80] sm:$0xff] (!%p2153_p1), %v2913_v0  ;;  %529 = vst [vmem:[#allocation2 + $0x88] sm:$0xff] (!%p2153_p1), %v2913_v0 }
  0x5a   : > { %530 = vst [vmem:[#allocation2 + $0x90] sm:$0xff] (!%p2153_p1), %v2913_v0  ;;  %531 = vst [vmem:[#allocation2 + $0x98] sm:$0xff] (!%p2153_p1), %v2913_v0 }
  0x5b   : > { %532 = vst [vmem:[#allocation2 + $0xa0] sm:$0xff] %v2913_v0  ;;  %533 = vst [vmem:[#allocation2 + $0xa8] sm:$0xff] %v2913_v0 }
  0x5c   : > { %534 = vst [vmem:[#allocation2 + $0xb0] sm:$0xff] %v2913_v0  ;;  %535 = vst [vmem:[#allocation2 + $0xb8] sm:$0xff] %v2913_v0 }
  0x5d   : > { %536 = vst [vmem:[#allocation2 + $0xc0] sm:$0xff] %v2913_v0  ;;  %537 = vst [vmem:[#allocation2 + $0xc8] sm:$0xff] %v2913_v0 }
  0x5e   : > { %538 = vst [vmem:[#allocation2 + $0xd0] sm:$0xff] %v2913_v0  ;;  %539 = vst [vmem:[#allocation2 + $0xd8] sm:$0xff] %v2913_v0 }
  0x5f   : > { %540 = vst [vmem:[#allocation2 + $0xe0] sm:$0xff] %v2913_v0  ;;  %541 = vst [vmem:[#allocation2 + $0xe8] sm:$0xff] %v2913_v0 }
  0x60   : > { %542 = vst [vmem:[#allocation2 + $0xf0] sm:$0xff] %v2913_v0  ;;  %543 = vst [vmem:[#allocation2 + $0xf8] sm:$0xff] %v2913_v0 }
  0x61 PF: > { %p544_p2 = scmp.eq.s32.totalorder %s2891_s21, 0 }
  0x63   : > { %p545_p3 = pnand %p544_p2, %p508_p0 }
  0x64   : > { %v2914_v1 = vmov (!%p545_p3), 0.0  }
  0x65   : > { %548 = sbr.rel (%p545_p3) target bundleno = 108 (0x6c), region = 63  ;;  %549 = vst [vmem:[#allocation3] sm:$0x1] (!%p545_p3), %v2914_v1  ;;  %550 = vst [vmem:[#allocation4] sm:$0x1] (!%p545_p3), %v2914_v1 }
  0x6c PF: > { %v2713_v2 = vld [vmem:[%s3170_s30 + $0x40] sm:$0xff]   ;;  %v2717_v6 = vld [vmem:[%s3170_s30 + $0x48] sm:$0xff]   ;;  %v2721_v10 = vld [vmem:[%s3170_s30 + $0x50] sm:$0xff]   ;;  %p1609_p4 = scmp.eq.s32.totalorder %s2887_s20, 1  ;;  %p2250_p5 = scmp.ne.s32.totalorder %s2887_s20, 1 }
  0x6d   : > { %v2714_v3 = vld [vmem:[%s3170_s30 + $0xc0] sm:$0xff]   ;;  %2413 = vmatprep.subr.bf16.mxu0 %v2713_v2  ;;  %v2718_v7 = vld [vmem:[%s3170_s30 + $0xc8] sm:$0xff]   ;;  %v2722_v11 = vld [vmem:[%s3170_s30 + $0xd0] sm:$0xff]  }
  0x6e   : > { %v2715_v4 = vld [vmem:[%s3170_s30] sm:$0xff]   ;;  %2525 = vmatprep.subr.bf16.mxu1 %v2714_v3  ;;  %v2719_v8 = vld [vmem:[%s3170_s30 + $0x8] sm:$0xff]   ;;  %v2723_v12 = vld [vmem:[%s3170_s30 + $0x10] sm:$0xff]  }
  0x6f   : > { %v2716_v5 = vld [vmem:[%s3170_s30 + $0x80] sm:$0xff]   ;;  %2414 = vmatpush3.bf16.msra.mxu0 %v2715_v4  ;;  %v2720_v9 = vld [vmem:[%s3170_s30 + $0x88] sm:$0xff]   ;;  %v2724_v13 = vld [vmem:[%s3170_s30 + $0x90] sm:$0xff]  }
  0x70   : > { %2526 = vmatpush3.bf16.msra.mxu1 %v2716_v5  ;;  %2415 = vmatprep.subr.bf16.mxu0 %v2717_v6  ;;  %v2725_v14 = vld [vmem:[%s3170_s30 + $0x58] sm:$0xff]   ;;  %v2729_v18 = vld [vmem:[%s3170_s30 + $0x60] sm:$0xff]   ;;  %v2733_v22 = vld [vmem:[%s3170_s30 + $0x68] sm:$0xff]  }
  0x71   : > { %2527 = vmatprep.subr.bf16.mxu1 %v2718_v7  ;;  %v2726_v15 = vld [vmem:[%s3170_s30 + $0xd8] sm:$0xff]   ;;  %v2730_v19 = vld [vmem:[%s3170_s30 + $0xe0] sm:$0xff]   ;;  %v2734_v23 = vld [vmem:[%s3170_s30 + $0xe8] sm:$0xff]  }
  0x72   : > { %v2727_v16 = vld [vmem:[%s3170_s30 + $0x18] sm:$0xff]   ;;  %v2731_v20 = vld [vmem:[%s3170_s30 + $0x20] sm:$0xff]   ;;  %v2735_v24 = vld [vmem:[%s3170_s30 + $0x28] sm:$0xff]  }
  0x73   : > { %2416 = vmatpush3.bf16.msra.mxu0 %v2719_v8  ;;  %v2728_v17 = vld [vmem:[%s3170_s30 + $0x98] sm:$0xff]   ;;  %v2732_v21 = vld [vmem:[%s3170_s30 + $0xa0] sm:$0xff]   ;;  %v2736_v25 = vld [vmem:[%s3170_s30 + $0xa8] sm:$0xff]  }
  0x74   : > { %2528 = vmatpush3.bf16.msra.mxu1 %v2720_v9  ;;  %2417 = vmatprep.subr.bf16.mxu0 %v2721_v10  ;;  %v2737_v26 = vld [vmem:[%s3170_s30 + $0x70] sm:$0xff]   ;;  %v2741_v30 = vld [vmem:[%s3170_s30 + $0x78] sm:$0xff]  }
  0x75   : > { %2529 = vmatprep.subr.bf16.mxu1 %v2722_v11  ;;  %v2738_v27 = vld [vmem:[%s3170_s30 + $0xf0] sm:$0xff]   ;;  %v2742_v31 = vld [vmem:[%s3170_s30 + $0xf8] sm:$0xff]  }
  0x76   : > { %v2739_v28 = vld [vmem:[%s3170_s30 + $0x30] sm:$0xff]   ;;  %v2743_v32 = vld [vmem:[%s3170_s30 + $0x38] sm:$0xff]  }
  0x77   : > { %2418 = vmatpush3.bf16.msra.mxu0 %v2723_v12  ;;  %v2740_v29 = vld [vmem:[%s3170_s30 + $0xb0] sm:$0xff]   ;;  %v2744_v33 = vld [vmem:[%s3170_s30 + $0xb8] sm:$0xff]  }
  0x78   : > { %2530 = vmatpush3.bf16.msra.mxu1 %v2724_v13  ;;  %2419 = vmatprep.subr.bf16.mxu0 %v2725_v14  ;;  %v2745_v34 = vld [vmem:[%s3189_s1] ss:$16 sps:$4 sm:$0xff]   ;;  %v2747_v35 = vld [vmem:[%s3189_s1 + $0x4] ss:$16 sps:$4 sm:$0xff]   ;;  %v2748_v36 = vld [vmem:[%s3189_s1 + $0x8] ss:$16 sps:$4 sm:$0xff]  }
  0x79   : > { %2531 = vmatprep.subr.bf16.mxu1 %v2726_v15  ;;  %v2750_v37 = vld [vmem:[%s3189_s1 + $0xc] ss:$16 sps:$4 sm:$0xff]   ;;  %1255 = vmatprep.mubr.bf16.mxu0 %v2747_v35  ;;  %v2751_v38 = vld [vmem:[%s3189_s1 + $0x24] ss:$16 sps:$4 sm:$0xff]   ;;  %v2755_v40 = vld [vmem:[%s3189_s1 + $0x20] ss:$16 sps:$4 sm:$0xff]  }
  0x7a   : > { %1416 = vmatprep.mubr.bf16.mxu1 %v2750_v37  ;;  %v2753_v39 = vld [vmem:[%s3189_s1 + $0x2c] ss:$16 sps:$4 sm:$0xff]   ;;  %v2756_v41 = vld [vmem:[%s3189_s1 + $0x28] ss:$16 sps:$4 sm:$0xff]   ;;  %v2757_v42 = vld [vmem:[%s3189_s1 + $0x44] ss:$16 sps:$4 sm:$0xff]  }
  0x7b   : > { %2420 = vmatpush3.bf16.msra.mxu0 %v2727_v16  ;;  %v2759_v43 = vld [vmem:[%s3189_s1 + $0x4c] ss:$16 sps:$4 sm:$0xff]   ;;  %v2761_v44 = vld [vmem:[%s3189_s1 + $0x40] ss:$16 sps:$4 sm:$0xff]   ;;  %v2762_v45 = vld [vmem:[%s3189_s1 + $0x48] ss:$16 sps:$4 sm:$0xff]  }
  0x7c   : > { %2532 = vmatpush3.bf16.msra.mxu1 %v2728_v17  ;;  %2421 = vmatprep.subr.bf16.mxu0 %v2729_v18  ;;  %v2763_v46 = vld [vmem:[%s3189_s1 + $0x64] ss:$16 sps:$4 sm:$0xff]   ;;  %v2765_v47 = vld [vmem:[%s3189_s1 + $0x6c] ss:$16 sps:$4 sm:$0xff]   ;;  %v2767_v48 = vld [vmem:[%s3189_s1 + $0x60] ss:$16 sps:$4 sm:$0xff]  }
  0x7d   : > { %2533 = vmatprep.subr.bf16.mxu1 %v2730_v19  ;;  %v2768_v49 = vld [vmem:[%s3189_s1 + $0x68] ss:$16 sps:$4 sm:$0xff]   ;;  %v2769_v50 = vld [vmem:[%s3189_s1 + $0x84] ss:$16 sps:$4 sm:$0xff]   ;;  %v2771_v51 = vld [vmem:[%s3189_s1 + $0x8c] ss:$16 sps:$4 sm:$0xff]  }
  0x7e   : > { %v2773_v52 = vld [vmem:[%s3189_s1 + $0x80] ss:$16 sps:$4 sm:$0xff]   ;;  %v2774_v53 = vld [vmem:[%s3189_s1 + $0x88] ss:$16 sps:$4 sm:$0xff]   ;;  %v2775_v54 = vld [vmem:[%s3189_s1 + $0xa4] ss:$16 sps:$4 sm:$0xff]  }
  0x7f   : > { %2422 = vmatpush3.bf16.msra.mxu0 %v2731_v20  ;;  %v2777_v55 = vld [vmem:[%s3189_s1 + $0xac] ss:$16 sps:$4 sm:$0xff]   ;;  %v2779_v56 = vld [vmem:[%s3189_s1 + $0xa0] ss:$16 sps:$4 sm:$0xff]   ;;  %v2780_v57 = vld [vmem:[%s3189_s1 + $0xa8] ss:$16 sps:$4 sm:$0xff]  }
  0x80   : > { %2534 = vmatpush3.bf16.msra.mxu1 %v2732_v21  ;;  %2423 = vmatprep.subr.bf16.mxu0 %v2733_v22  ;;  %v2781_v58 = vld [vmem:[%s3189_s1 + $0xc4] ss:$16 sps:$4 sm:$0xff]   ;;  %v2783_v59 = vld [vmem:[%s3189_s1 + $0xcc] ss:$16 sps:$4 sm:$0xff]   ;;  %v2785_v60 = vld [vmem:[%s3189_s1 + $0xc0] ss:$16 sps:$4 sm:$0xff]  }
  0x81   : > { %2535 = vmatprep.subr.bf16.mxu1 %v2734_v23  ;;  %v2786_v61 = vld [vmem:[%s3189_s1 + $0xc8] ss:$16 sps:$4 sm:$0xff]   ;;  %v2787_v62 = vld [vmem:[%s3189_s1 + $0xe4] ss:$16 sps:$4 sm:$0xff]   ;;  %v2789_v63 = vld [vmem:[%s3189_s1 + $0xec] ss:$16 sps:$4 sm:$0xff]  }
  0x82   : > { %v2791_v0 = vld [vmem:[%s3189_s1 + $0xe0] ss:$16 sps:$4 sm:$0xff]   ;;  %v2792_v1 = vld [vmem:[%s3189_s1 + $0xe8] ss:$16 sps:$4 sm:$0xff]   ;;  %v2793_v2 = vld [vmem:[%s3189_s1 + $0x104] ss:$16 sps:$4 sm:$0xff]  }
  0x83   : > { %2424 = vmatpush3.bf16.msra.mxu0 %v2735_v24  ;;  %v2795_v3 = vld [vmem:[%s3189_s1 + $0x10c] ss:$16 sps:$4 sm:$0xff]   ;;  %v2797_v4 = vld [vmem:[%s3189_s1 + $0x100] ss:$16 sps:$4 sm:$0xff]   ;;  %v2798_v5 = vld [vmem:[%s3189_s1 + $0x108] ss:$16 sps:$4 sm:$0xff]  }
  0x84   : > { %2536 = vmatpush3.bf16.msra.mxu1 %v2736_v25  ;;  %2425 = vmatprep.subr.bf16.mxu0 %v2737_v26  ;;  %v2799_v6 = vld [vmem:[%s3189_s1 + $0x124] ss:$16 sps:$4 sm:$0xff]   ;;  %v2801_v7 = vld [vmem:[%s3189_s1 + $0x12c] ss:$16 sps:$4 sm:$0xff]   ;;  %v2803_v8 = vld [vmem:[%s3189_s1 + $0x120] ss:$16 sps:$4 sm:$0xff]  }
  0x85   : > { %2537 = vmatprep.subr.bf16.mxu1 %v2738_v27  ;;  %v2804_v9 = vld [vmem:[%s3189_s1 + $0x128] ss:$16 sps:$4 sm:$0xff]   ;;  %v2805_v10 = vld [vmem:[%s3189_s1 + $0x144] ss:$16 sps:$4 sm:$0xff]   ;;  %v2807_v11 = vld [vmem:[%s3189_s1 + $0x14c] ss:$16 sps:$4 sm:$0xff]  }
  0x86   : > { %v2809_v12 = vld [vmem:[%s3189_s1 + $0x140] ss:$16 sps:$4 sm:$0xff]   ;;  %v2810_v13 = vld [vmem:[%s3189_s1 + $0x148] ss:$16 sps:$4 sm:$0xff]   ;;  %v2811_v14 = vld [vmem:[%s3189_s1 + $0x164] ss:$16 sps:$4 sm:$0xff]  }
  0x87   : > { %2426 = vmatpush3.bf16.msra.mxu0 %v2739_v28  ;;  %v2813_v15 = vld [vmem:[%s3189_s1 + $0x16c] ss:$16 sps:$4 sm:$0xff]   ;;  %v2815_v16 = vld [vmem:[%s3189_s1 + $0x160] ss:$16 sps:$4 sm:$0xff]   ;;  %v2816_v17 = vld [vmem:[%s3189_s1 + $0x168] ss:$16 sps:$4 sm:$0xff]  }
  0x88   : > { %2538 = vmatpush3.bf16.msra.mxu1 %v2740_v29  ;;  %2427 = vmatprep.subr.bf16.mxu0 %v2741_v30  ;;  %v2817_v18 = vld [vmem:[%s3189_s1 + $0x184] ss:$16 sps:$4 sm:$0xff]   ;;  %v2819_v19 = vld [vmem:[%s3189_s1 + $0x18c] ss:$16 sps:$4 sm:$0xff]   ;;  %v2821_v20 = vld [vmem:[%s3189_s1 + $0x180] ss:$16 sps:$4 sm:$0xff]  }
  0x89   : > { %2539 = vmatprep.subr.bf16.mxu1 %v2742_v31  ;;  %v2822_v21 = vld [vmem:[%s3189_s1 + $0x188] ss:$16 sps:$4 sm:$0xff]   ;;  %v2823_v22 = vld [vmem:[%s3189_s1 + $0x1a4] ss:$16 sps:$4 sm:$0xff]   ;;  %v2825_v23 = vld [vmem:[%s3189_s1 + $0x1ac] ss:$16 sps:$4 sm:$0xff]  }
  0x8a   : > { %v2827_v24 = vld [vmem:[%s3189_s1 + $0x1a0] ss:$16 sps:$4 sm:$0xff]   ;;  %v2828_v25 = vld [vmem:[%s3189_s1 + $0x1a8] ss:$16 sps:$4 sm:$0xff]   ;;  %v2829_v26 = vld [vmem:[%s3189_s1 + $0x1c4] ss:$16 sps:$4 sm:$0xff]  }
  0x8b   : > { %2428 = vmatpush3.bf16.msra.mxu0 %v2743_v32  ;;  %v2831_v27 = vld [vmem:[%s3189_s1 + $0x1cc] ss:$16 sps:$4 sm:$0xff]   ;;  %v2833_v28 = vld [vmem:[%s3189_s1 + $0x1c0] ss:$16 sps:$4 sm:$0xff]   ;;  %v2834_v29 = vld [vmem:[%s3189_s1 + $0x1c8] ss:$16 sps:$4 sm:$0xff]  }
  0x8c   : > { %2540 = vmatpush3.bf16.msra.mxu1 %v2744_v33  ;;  %v2835_v30 = vld [vmem:[%s3189_s1 + $0x1e4] ss:$16 sps:$4 sm:$0xff]   ;;  %v2837_v31 = vld [vmem:[%s3189_s1 + $0x1ec] ss:$16 sps:$4 sm:$0xff]   ;;  %v2839_v32 = vld [vmem:[%s3189_s1 + $0x1e0] ss:$16 sps:$4 sm:$0xff]  }
  0x8d   : > { %v2840_v33 = vld [vmem:[%s3189_s1 + $0x1e8] ss:$16 sps:$4 sm:$0xff]  }
  0x8e   : > { %1256 = vmatmul.mubr.bf16.vlgmr.msra.gmra.mrb[0].mxu0 %v2745_v34 }
  0x8f   : > { %1417 = vmatmul.mubr.bf16.vlgmr.msra.gmra.mrb[0].mxu1 %v2748_v36  ;;  %1263 = vmatprep.mubr.bf16.mxu0 %v2751_v38 }
  0x90   : > { %1424 = vmatprep.mubr.bf16.mxu1 %v2753_v39 }
  0x96   : > { %1264 = vmatmul.mubr.bf16.gmra.mrb[4].mxu0 %v2755_v40 }
  0x97   : > { %1425 = vmatmul.mubr.bf16.gmra.mrb[4].mxu1 %v2756_v41  ;;  %1271 = vmatprep.mubr.bf16.mxu0 %v2757_v42 }
  0x98   : > { %1432 = vmatprep.mubr.bf16.mxu1 %v2759_v43  ;;  %v551_v43 = vld [vmem:[#allocation2] sm:$0xff] }
  0x9e   : > { %1272 = vmatmul.mubr.bf16.gmra.mrb[8].mxu0 %v2761_v44 }
  0x9f   : > { %1433 = vmatmul.mubr.bf16.gmra.mrb[8].mxu1 %v2762_v45  ;;  %1279 = vmatprep.mubr.bf16.mxu0 %v2763_v46 }
  0xa0   : > { %1440 = vmatprep.mubr.bf16.mxu1 %v2765_v47 }
  0xa6   : > { %1280 = vmatmul.mubr.bf16.gmra.mrb[12].mxu0 %v2767_v48  ;;  %v552_v48 = vld [vmem:[#allocation2 + $0x8] sm:$0xff] }
  0xa7   : > { %1441 = vmatmul.mubr.bf16.gmra.mrb[12].mxu1 %v2768_v49  ;;  %1287 = vmatprep.mubr.bf16.mxu0 %v2769_v50 }
  0xa8   : > { %1448 = vmatprep.mubr.bf16.mxu1 %v2771_v51 }
  0xae   : > { %1288 = vmatmul.mubr.bf16.gmra.mrb[16].mxu0 %v2773_v52 }
  0xaf   : > { %1449 = vmatmul.mubr.bf16.gmra.mrb[16].mxu1 %v2774_v53  ;;  %1295 = vmatprep.mubr.bf16.mxu0 %v2775_v54 }
  0xb0   : > { %1456 = vmatprep.mubr.bf16.mxu1 %v2777_v55 }
  0xb6   : > { %1296 = vmatmul.mubr.bf16.gmra.mrb[20].mxu0 %v2779_v56 }
  0xb7   : > { %1457 = vmatmul.mubr.bf16.gmra.mrb[20].mxu1 %v2780_v57  ;;  %1303 = vmatprep.mubr.bf16.mxu0 %v2781_v58 }
  0xb8   : > { %1464 = vmatprep.mubr.bf16.mxu1 %v2783_v59 }
  0xbe   : > { %1304 = vmatmul.mubr.bf16.gmra.mrb[24].mxu0 %v2785_v60 }
  0xbf   : > { %1465 = vmatmul.mubr.bf16.gmra.mrb[24].mxu1 %v2786_v61  ;;  %1311 = vmatprep.mubr.bf16.mxu0 %v2787_v62  ;;  %v553_v61 = vld [vmem:[#allocation2 + $0x10] sm:$0xff] }
  0xc0   : > { %1472 = vmatprep.mubr.bf16.mxu1 %v2789_v63 }
  0xc6   : > { %1312 = vmatmul.mubr.bf16.gmra.mrb[28].mxu0 %v2791_v0 }
  0xc7   : > { %1473 = vmatmul.mubr.bf16.gmra.mrb[28].mxu1 %v2792_v1  ;;  %1319 = vmatprep.mubr.bf16.mxu0 %v2793_v2  ;;  %v554_v2 = vld [vmem:[#allocation2 + $0x18] sm:$0xff] }
  0xc8   : > { %1480 = vmatprep.mubr.bf16.mxu1 %v2795_v3 }
  0xce   : > { %1320 = vmatmul.mubr.bf16.gmra.mrb[32].mxu0 %v2797_v4 }
  0xcf   : > { %1481 = vmatmul.mubr.bf16.gmra.mrb[32].mxu1 %v2798_v5  ;;  %1327 = vmatprep.mubr.bf16.mxu0 %v2799_v6 }
  0xd0   : > { %1488 = vmatprep.mubr.bf16.mxu1 %v2801_v7 }
  0xd6   : > { %1328 = vmatmul.mubr.bf16.gmra.mrb[36].mxu0 %v2803_v8 }
  0xd7   : > { %1489 = vmatmul.mubr.bf16.gmra.mrb[36].mxu1 %v2804_v9  ;;  %1335 = vmatprep.mubr.bf16.mxu0 %v2805_v10 }
  0xd8   : > { %1496 = vmatprep.mubr.bf16.mxu1 %v2807_v11 }
  0xde   : > { %1336 = vmatmul.mubr.bf16.gmra.mrb[40].mxu0 %v2809_v12 }
  0xdf   : > { %1497 = vmatmul.mubr.bf16.gmra.mrb[40].mxu1 %v2810_v13  ;;  %1343 = vmatprep.mubr.bf16.mxu0 %v2811_v14 }
  0xe0   : > { %1504 = vmatprep.mubr.bf16.mxu1 %v2813_v15  ;;  %v555_v15 = vld [vmem:[#allocation2 + $0x20] sm:$0xff] }
  0xe6   : > { %1344 = vmatmul.mubr.bf16.gmra.mrb[44].mxu0 %v2815_v16 }
  0xe7   : > { %1505 = vmatmul.mubr.bf16.gmra.mrb[44].mxu1 %v2816_v17  ;;  %1351 = vmatprep.mubr.bf16.mxu0 %v2817_v18 }
  0xe8   : > { %1512 = vmatprep.mubr.bf16.mxu1 %v2819_v19 }
  0xee   : > { %1352 = vmatmul.mubr.bf16.gmra.mrb[48].mxu0 %v2821_v20  ;;  %v556_v20 = vld [vmem:[#allocation2 + $0x28] sm:$0xff] }
  0xef   : > { %1513 = vmatmul.mubr.bf16.gmra.mrb[48].mxu1 %v2822_v21  ;;  %1359 = vmatprep.mubr.bf16.mxu0 %v2823_v22 }
  0xf0   : > { %1520 = vmatprep.mubr.bf16.mxu1 %v2825_v23 }
  0xf6   : > { %1360 = vmatmul.mubr.bf16.gmra.mrb[52].mxu0 %v2827_v24 }
  0xf7   : > { %1521 = vmatmul.mubr.bf16.gmra.mrb[52].mxu1 %v2828_v25  ;;  %1367 = vmatprep.mubr.bf16.mxu0 %v2829_v26 }
  0xf8   : > { %1528 = vmatprep.mubr.bf16.mxu1 %v2831_v27 }
  0xfe   : > { %1368 = vmatmul.mubr.bf16.gmra.mrb[56].mxu0 %v2833_v28 }
  0xff   : > { %1529 = vmatmul.mubr.bf16.gmra.mrb[56].mxu1 %v2834_v29  ;;  %1375 = vmatprep.mubr.bf16.mxu0 %v2835_v30 }
 0x100   : > { %1536 = vmatprep.mubr.bf16.mxu1 %v2837_v31 }
 0x106   : > { %1376 = vmatmul.mubr.bf16.gmra.mrb[60].mxu0 %v2839_v32 }
 0x107   : > { %1537 = vmatmul.mubr.bf16.gmra.mrb[60].mxu1 %v2840_v33  ;;  %v557_v33 = vld [vmem:[#allocation2 + $0x30] sm:$0xff] }
 0x161   : > { %v2429_v34 = vpop.f32.mrb[0].mxu0 }
 0x162   : > { %v2541_v35 = vpop.f32.mrb[0].mxu1  ;;  %v2430_v36 = vpop.f32.mrb[1].mxu0 }
 0x163   : > { %v2431_v37 = vadd.f32 %v2430_v36, %v2429_v34  ;;  %v2542_v38 = vpop.f32.mrb[1].mxu1  ;;  %v2432_v39 = vpop.f32.mrb[2].mxu0 }
 0x164   : > { %v2543_v40 = vadd.f32 %v2542_v38, %v2541_v35  ;;  %v2544_v41 = vpop.f32.mrb[2].mxu1  ;;  %v2433_v42 = vpop.f32.mrb[3].mxu0  ;;  %v558_v38 = vld [vmem:[#allocation2 + $0x38] sm:$0xff] }
 0x165   : > { %v2434_v44 = vadd.f32 %v2433_v42, %v2432_v39  ;;  %v2545_v45 = vpop.f32.mrb[3].mxu1 }
 0x166   : > { %v1419_v46 = vadd.f32 %v2543_v40, %v2431_v37  ;;  %v2546_v47 = vadd.f32 %v2545_v45, %v2544_v41 }
 0x168   : > { %v1545_v49 = vadd.f32 %v1419_v46, %v551_v43  ;;  %v1422_v50 = vadd.f32 %v2546_v47, %v2434_v44 }
 0x169   : > { %v2435_v51 = vpop.f32.mrb[4].mxu0 }
 0x16a   : > { %1577 = vst [vmem:[#allocation2] sm:$0xff] %v1545_v49  ;;  %v1546_v52 = vadd.f32 %v1422_v50, %v552_v48  ;;  %v2547_v53 = vpop.f32.mrb[4].mxu1  ;;  %v2436_v54 = vpop.f32.mrb[5].mxu0 }
 0x16b   : > { %v2437_v55 = vadd.f32 %v2436_v54, %v2435_v51  ;;  %v2548_v56 = vpop.f32.mrb[5].mxu1  ;;  %v2438_v57 = vpop.f32.mrb[6].mxu0  ;;  %v559_v51 = vld [vmem:[#allocation2 + $0x40] sm:$0xff] }
 0x16c   : > { %1578 = vst [vmem:[#allocation2 + $0x8] sm:$0xff] %v1546_v52  ;;  %v2549_v58 = vadd.f32 %v2548_v56, %v2547_v53  ;;  %v2550_v59 = vpop.f32.mrb[6].mxu1  ;;  %v2439_v60 = vpop.f32.mrb[7].mxu0  ;;  %v560_v56 = vld [vmem:[#allocation2 + $0x48] sm:$0xff] }
 0x16d   : > { %v2440_v62 = vadd.f32 %v2439_v60, %v2438_v57  ;;  %v2551_v63 = vpop.f32.mrb[7].mxu1 }
 0x16e   : > { %v1427_v0 = vadd.f32 %v2549_v58, %v2437_v55  ;;  %v2552_v1 = vadd.f32 %v2551_v63, %v2550_v59 }
 0x170   : > { %v1547_v3 = vadd.f32 %v1427_v0, %v553_v61  ;;  %v1430_v4 = vadd.f32 %v2552_v1, %v2440_v62 }
 0x171   : > { %v2441_v5 = vpop.f32.mrb[8].mxu0 }
 0x172   : > { %1579 = vst [vmem:[#allocation2 + $0x10] sm:$0xff] %v1547_v3  ;;  %v1548_v6 = vadd.f32 %v1430_v4, %v554_v2  ;;  %v2553_v7 = vpop.f32.mrb[8].mxu1  ;;  %v2442_v8 = vpop.f32.mrb[9].mxu0 }
 0x173   : > { %v2443_v9 = vadd.f32 %v2442_v8, %v2441_v5  ;;  %v2554_v10 = vpop.f32.mrb[9].mxu1  ;;  %v2444_v11 = vpop.f32.mrb[10].mxu0  ;;  %v561_v5 = vld [vmem:[#allocation2 + $0x50] sm:$0xff] }
 0x174   : > { %1580 = vst [vmem:[#allocation2 + $0x18] sm:$0xff] %v1548_v6  ;;  %v2555_v12 = vadd.f32 %v2554_v10, %v2553_v7  ;;  %v2556_v13 = vpop.f32.mrb[10].mxu1  ;;  %v2445_v14 = vpop.f32.mrb[11].mxu0  ;;  %v562_v10 = vld [vmem:[#allocation2 + $0x58] sm:$0xff] }
 0x175   : > { %v2446_v16 = vadd.f32 %v2445_v14, %v2444_v11  ;;  %v2557_v17 = vpop.f32.mrb[11].mxu1 }
 0x176   : > { %v1435_v18 = vadd.f32 %v2555_v12, %v2443_v9  ;;  %v2558_v19 = vadd.f32 %v2557_v17, %v2556_v13 }
 0x178   : > { %v1549_v21 = vadd.f32 %v1435_v18, %v555_v15  ;;  %v1438_v22 = vadd.f32 %v2558_v19, %v2446_v16 }
 0x179   : > { %v2447_v23 = vpop.f32.mrb[12].mxu0 }
 0x17a   : > { %1581 = vst [vmem:[#allocation2 + $0x20] sm:$0xff] %v1549_v21  ;;  %v1550_v24 = vadd.f32 %v1438_v22, %v556_v20  ;;  %v2559_v25 = vpop.f32.mrb[12].mxu1  ;;  %v2448_v26 = vpop.f32.mrb[13].mxu0 }
 0x17b   : > { %v2449_v27 = vadd.f32 %v2448_v26, %v2447_v23  ;;  %v2560_v28 = vpop.f32.mrb[13].mxu1  ;;  %v2450_v29 = vpop.f32.mrb[14].mxu0  ;;  %v563_v23 = vld [vmem:[#allocation2 + $0x60] sm:$0xff] }
 0x17c   : > { %1582 = vst [vmem:[#allocation2 + $0x28] sm:$0xff] %v1550_v24  ;;  %v2561_v30 = vadd.f32 %v2560_v28, %v2559_v25  ;;  %v2562_v31 = vpop.f32.mrb[14].mxu1  ;;  %v2451_v32 = vpop.f32.mrb[15].mxu0  ;;  %v564_v28 = vld [vmem:[#allocation2 + $0x68] sm:$0xff] }
 0x17d   : > { %v2452_v34 = vadd.f32 %v2451_v32, %v2450_v29  ;;  %v2563_v35 = vpop.f32.mrb[15].mxu1 }
 0x17e   : > { %v1443_v36 = vadd.f32 %v2561_v30, %v2449_v27  ;;  %v2564_v37 = vadd.f32 %v2563_v35, %v2562_v31 }
 0x180   : > { %v1551_v39 = vadd.f32 %v1443_v36, %v557_v33  ;;  %v1446_v40 = vadd.f32 %v2564_v37, %v2452_v34 }
 0x181   : > { %v2453_v41 = vpop.f32.mrb[16].mxu0 }
 0x182   : > { %1583 = vst [vmem:[#allocation2 + $0x30] sm:$0xff] %v1551_v39  ;;  %v1552_v42 = vadd.f32 %v1446_v40, %v558_v38  ;;  %v2565_v43 = vpop.f32.mrb[16].mxu1  ;;  %v2454_v44 = vpop.f32.mrb[17].mxu0 }
 0x183   : > { %v2455_v45 = vadd.f32 %v2454_v44, %v2453_v41  ;;  %v2566_v46 = vpop.f32.mrb[17].mxu1  ;;  %v2456_v47 = vpop.f32.mrb[18].mxu0  ;;  %v565_v41 = vld [vmem:[#allocation2 + $0x70] sm:$0xff] }
 0x184   : > { %1584 = vst [vmem:[#allocation2 + $0x38] sm:$0xff] %v1552_v42  ;;  %v2567_v48 = vadd.f32 %v2566_v46, %v2565_v43  ;;  %v2568_v49 = vpop.f32.mrb[18].mxu1  ;;  %v2457_v50 = vpop.f32.mrb[19].mxu0  ;;  %v566_v46 = vld [vmem:[#allocation2 + $0x78] sm:$0xff] }
 0x185   : > { %v2458_v52 = vadd.f32 %v2457_v50, %v2456_v47  ;;  %v2569_v53 = vpop.f32.mrb[19].mxu1 }
 0x186   : > { %v1451_v54 = vadd.f32 %v2567_v48, %v2455_v45  ;;  %v2570_v55 = vadd.f32 %v2569_v53, %v2568_v49 }
 0x188   : > { %v1553_v57 = vadd.f32 %v1451_v54, %v559_v51  ;;  %v1454_v58 = vadd.f32 %v2570_v55, %v2458_v52 }
 0x189   : > { %v2459_v59 = vpop.f32.mrb[20].mxu0 }
 0x18a   : > { %1585 = vst [vmem:[#allocation2 + $0x40] sm:$0xff] %v1553_v57  ;;  %v1554_v60 = vadd.f32 %v1454_v58, %v560_v56  ;;  %v2571_v61 = vpop.f32.mrb[20].mxu1  ;;  %v2460_v62 = vpop.f32.mrb[21].mxu0 }
 0x18b   : > { %v2461_v63 = vadd.f32 %v2460_v62, %v2459_v59  ;;  %v2572_v0 = vpop.f32.mrb[21].mxu1  ;;  %v2462_v1 = vpop.f32.mrb[22].mxu0  ;;  %v567_v59 = vld [vmem:[#allocation2 + $0x80] sm:$0xff] }
 0x18c   : > { %1586 = vst [vmem:[#allocation2 + $0x48] sm:$0xff] %v1554_v60  ;;  %v2573_v2 = vadd.f32 %v2572_v0, %v2571_v61  ;;  %v2574_v3 = vpop.f32.mrb[22].mxu1  ;;  %v2463_v4 = vpop.f32.mrb[23].mxu0  ;;  %v568_v0 = vld [vmem:[#allocation2 + $0x88] sm:$0xff] }
 0x18d   : > { %v2464_v6 = vadd.f32 %v2463_v4, %v2462_v1  ;;  %v2575_v7 = vpop.f32.mrb[23].mxu1 }
 0x18e   : > { %v1459_v8 = vadd.f32 %v2573_v2, %v2461_v63  ;;  %v2576_v9 = vadd.f32 %v2575_v7, %v2574_v3 }
 0x190   : > { %v1555_v11 = vadd.f32 %v1459_v8, %v561_v5  ;;  %v1462_v12 = vadd.f32 %v2576_v9, %v2464_v6 }
 0x191   : > { %v2465_v13 = vpop.f32.mrb[24].mxu0 }
 0x192   : > { %1587 = vst [vmem:[#allocation2 + $0x50] sm:$0xff] %v1555_v11  ;;  %v1556_v14 = vadd.f32 %v1462_v12, %v562_v10  ;;  %v2577_v15 = vpop.f32.mrb[24].mxu1  ;;  %v2466_v16 = vpop.f32.mrb[25].mxu0 }
 0x193   : > { %v2467_v17 = vadd.f32 %v2466_v16, %v2465_v13  ;;  %v2578_v18 = vpop.f32.mrb[25].mxu1  ;;  %v2468_v19 = vpop.f32.mrb[26].mxu0  ;;  %v569_v13 = vld [vmem:[#allocation2 + $0x90] sm:$0xff] }
 0x194   : > { %1588 = vst [vmem:[#allocation2 + $0x58] sm:$0xff] %v1556_v14  ;;  %v2579_v20 = vadd.f32 %v2578_v18, %v2577_v15  ;;  %v2580_v21 = vpop.f32.mrb[26].mxu1  ;;  %v2469_v22 = vpop.f32.mrb[27].mxu0  ;;  %v570_v18 = vld [vmem:[#allocation2 + $0x98] sm:$0xff] }
 0x195   : > { %v2470_v24 = vadd.f32 %v2469_v22, %v2468_v19  ;;  %v2581_v25 = vpop.f32.mrb[27].mxu1 }
 0x196   : > { %v1467_v26 = vadd.f32 %v2579_v20, %v2467_v17  ;;  %v2582_v27 = vadd.f32 %v2581_v25, %v2580_v21 }
 0x198   : > { %v1557_v29 = vadd.f32 %v1467_v26, %v563_v23  ;;  %v1470_v30 = vadd.f32 %v2582_v27, %v2470_v24 }
 0x199   : > { %v2471_v31 = vpop.f32.mrb[28].mxu0 }
 0x19a   : > { %1589 = vst [vmem:[#allocation2 + $0x60] sm:$0xff] %v1557_v29  ;;  %v1558_v32 = vadd.f32 %v1470_v30, %v564_v28  ;;  %v2583_v33 = vpop.f32.mrb[28].mxu1  ;;  %v2472_v34 = vpop.f32.mrb[29].mxu0 }
 0x19b   : > { %v2473_v35 = vadd.f32 %v2472_v34, %v2471_v31  ;;  %v2584_v36 = vpop.f32.mrb[29].mxu1  ;;  %v2474_v37 = vpop.f32.mrb[30].mxu0  ;;  %v571_v31 = vld [vmem:[#allocation2 + $0xa0] sm:$0xff] }
 0x19c   : > { %1590 = vst [vmem:[#allocation2 + $0x68] sm:$0xff] %v1558_v32  ;;  %v2585_v38 = vadd.f32 %v2584_v36, %v2583_v33  ;;  %v2586_v39 = vpop.f32.mrb[30].mxu1  ;;  %v2475_v40 = vpop.f32.mrb[31].mxu0  ;;  %v572_v36 = vld [vmem:[#allocation2 + $0xa8] sm:$0xff] }
 0x19d   : > { %v2476_v42 = vadd.f32 %v2475_v40, %v2474_v37  ;;  %v2587_v43 = vpop.f32.mrb[31].mxu1 }
 0x19e   : > { %v1475_v44 = vadd.f32 %v2585_v38, %v2473_v35  ;;  %v2588_v45 = vadd.f32 %v2587_v43, %v2586_v39 }
 0x1a0   : > { %v1559_v47 = vadd.f32 %v1475_v44, %v565_v41  ;;  %v1478_v48 = vadd.f32 %v2588_v45, %v2476_v42 }
 0x1a1   : > { %v2477_v49 = vpop.f32.mrb[32].mxu0 }
 0x1a2   : > { %1591 = vst [vmem:[#allocation2 + $0x70] sm:$0xff] %v1559_v47  ;;  %v1560_v50 = vadd.f32 %v1478_v48, %v566_v46  ;;  %v2589_v51 = vpop.f32.mrb[32].mxu1  ;;  %v2478_v52 = vpop.f32.mrb[33].mxu0 }
 0x1a3   : > { %v2479_v53 = vadd.f32 %v2478_v52, %v2477_v49  ;;  %v2590_v54 = vpop.f32.mrb[33].mxu1  ;;  %v2480_v55 = vpop.f32.mrb[34].mxu0  ;;  %v573_v49 = vld [vmem:[#allocation2 + $0xb0] sm:$0xff] }
 0x1a4   : > { %1592 = vst [vmem:[#allocation2 + $0x78] sm:$0xff] %v1560_v50  ;;  %v2591_v56 = vadd.f32 %v2590_v54, %v2589_v51  ;;  %v2592_v57 = vpop.f32.mrb[34].mxu1  ;;  %v2481_v58 = vpop.f32.mrb[35].mxu0  ;;  %v574_v54 = vld [vmem:[#allocation2 + $0xb8] sm:$0xff] }
 0x1a5   : > { %v2482_v60 = vadd.f32 %v2481_v58, %v2480_v55  ;;  %v2593_v61 = vpop.f32.mrb[35].mxu1 }
 0x1a6   : > { %v1483_v62 = vadd.f32 %v2591_v56, %v2479_v53  ;;  %v2594_v63 = vadd.f32 %v2593_v61, %v2592_v57 }
 0x1a8   : > { %v1561_v1 = vadd.f32 %v1483_v62, %v567_v59  ;;  %v1486_v2 = vadd.f32 %v2594_v63, %v2482_v60 }
 0x1a9   : > { %v2483_v3 = vpop.f32.mrb[36].mxu0 }
 0x1aa   : > { %1593 = vst [vmem:[#allocation2 + $0x80] sm:$0xff] %v1561_v1  ;;  %v1562_v4 = vadd.f32 %v1486_v2, %v568_v0  ;;  %v2595_v5 = vpop.f32.mrb[36].mxu1  ;;  %v2484_v6 = vpop.f32.mrb[37].mxu0 }
 0x1ab   : > { %v2485_v7 = vadd.f32 %v2484_v6, %v2483_v3  ;;  %v2596_v8 = vpop.f32.mrb[37].mxu1  ;;  %v2486_v9 = vpop.f32.mrb[38].mxu0  ;;  %v575_v3 = vld [vmem:[#allocation2 + $0xc0] sm:$0xff] }
 0x1ac   : > { %1594 = vst [vmem:[#allocation2 + $0x88] sm:$0xff] %v1562_v4  ;;  %v2597_v10 = vadd.f32 %v2596_v8, %v2595_v5  ;;  %v2598_v11 = vpop.f32.mrb[38].mxu1  ;;  %v2487_v12 = vpop.f32.mrb[39].mxu0  ;;  %v576_v8 = vld [vmem:[#allocation2 + $0xc8] sm:$0xff] }
 0x1ad   : > { %v2488_v14 = vadd.f32 %v2487_v12, %v2486_v9  ;;  %v2599_v15 = vpop.f32.mrb[39].mxu1 }
 0x1ae   : > { %v1491_v16 = vadd.f32 %v2597_v10, %v2485_v7  ;;  %v2600_v17 = vadd.f32 %v2599_v15, %v2598_v11 }
 0x1b0   : > { %v1563_v19 = vadd.f32 %v1491_v16, %v569_v13  ;;  %v1494_v20 = vadd.f32 %v2600_v17, %v2488_v14 }
 0x1b1   : > { %v2489_v21 = vpop.f32.mrb[40].mxu0 }
 0x1b2   : > { %1595 = vst [vmem:[#allocation2 + $0x90] sm:$0xff] %v1563_v19  ;;  %v1564_v22 = vadd.f32 %v1494_v20, %v570_v18  ;;  %v2601_v23 = vpop.f32.mrb[40].mxu1  ;;  %v2490_v24 = vpop.f32.mrb[41].mxu0 }
 0x1b3   : > { %v2491_v25 = vadd.f32 %v2490_v24, %v2489_v21  ;;  %v2602_v26 = vpop.f32.mrb[41].mxu1  ;;  %v2492_v27 = vpop.f32.mrb[42].mxu0  ;;  %v577_v21 = vld [vmem:[#allocation2 + $0xd0] sm:$0xff] }
 0x1b4   : > { %1596 = vst [vmem:[#allocation2 + $0x98] sm:$0xff] %v1564_v22  ;;  %v2603_v28 = vadd.f32 %v2602_v26, %v2601_v23  ;;  %v2604_v29 = vpop.f32.mrb[42].mxu1  ;;  %v2493_v30 = vpop.f32.mrb[43].mxu0  ;;  %v578_v26 = vld [vmem:[#allocation2 + $0xd8] sm:$0xff] }
 0x1b5   : > { %v2494_v32 = vadd.f32 %v2493_v30, %v2492_v27  ;;  %v2605_v33 = vpop.f32.mrb[43].mxu1 }
 0x1b6   : > { %v1499_v34 = vadd.f32 %v2603_v28, %v2491_v25  ;;  %v2606_v35 = vadd.f32 %v2605_v33, %v2604_v29 }
 0x1b8   : > { %v1565_v37 = vadd.f32 %v1499_v34, %v571_v31  ;;  %v1502_v38 = vadd.f32 %v2606_v35, %v2494_v32 }
 0x1b9   : > { %v2495_v39 = vpop.f32.mrb[44].mxu0 }
 0x1ba   : > { %1597 = vst [vmem:[#allocation2 + $0xa0] sm:$0xff] %v1565_v37  ;;  %v1566_v40 = vadd.f32 %v1502_v38, %v572_v36  ;;  %v2607_v41 = vpop.f32.mrb[44].mxu1  ;;  %v2496_v42 = vpop.f32.mrb[45].mxu0 }
 0x1bb   : > { %v2497_v43 = vadd.f32 %v2496_v42, %v2495_v39  ;;  %v2608_v44 = vpop.f32.mrb[45].mxu1  ;;  %v2498_v45 = vpop.f32.mrb[46].mxu0  ;;  %v579_v39 = vld [vmem:[#allocation2 + $0xe0] sm:$0xff] }
 0x1bc   : > { %1598 = vst [vmem:[#allocation2 + $0xa8] sm:$0xff] %v1566_v40  ;;  %v2609_v46 = vadd.f32 %v2608_v44, %v2607_v41  ;;  %v2610_v47 = vpop.f32.mrb[46].mxu1  ;;  %v2499_v48 = vpop.f32.mrb[47].mxu0  ;;  %v580_v44 = vld [vmem:[#allocation2 + $0xe8] sm:$0xff] }
 0x1bd   : > { %v2500_v50 = vadd.f32 %v2499_v48, %v2498_v45  ;;  %v2611_v51 = vpop.f32.mrb[47].mxu1 }
 0x1be   : > { %v1507_v52 = vadd.f32 %v2609_v46, %v2497_v43  ;;  %v2612_v53 = vadd.f32 %v2611_v51, %v2610_v47 }
 0x1c0   : > { %v1567_v55 = vadd.f32 %v1507_v52, %v573_v49  ;;  %v1510_v56 = vadd.f32 %v2612_v53, %v2500_v50 }
 0x1c1   : > { %v2501_v57 = vpop.f32.mrb[48].mxu0 }
 0x1c2   : > { %1599 = vst [vmem:[#allocation2 + $0xb0] sm:$0xff] %v1567_v55  ;;  %v1568_v58 = vadd.f32 %v1510_v56, %v574_v54  ;;  %v2613_v59 = vpop.f32.mrb[48].mxu1  ;;  %v2502_v60 = vpop.f32.mrb[49].mxu0 }
 0x1c3   : > { %v2503_v61 = vadd.f32 %v2502_v60, %v2501_v57  ;;  %v2614_v62 = vpop.f32.mrb[49].mxu1  ;;  %v2504_v63 = vpop.f32.mrb[50].mxu0  ;;  %v581_v57 = vld [vmem:[#allocation2 + $0xf0] sm:$0xff] }
 0x1c4   : > { %1600 = vst [vmem:[#allocation2 + $0xb8] sm:$0xff] %v1568_v58  ;;  %v2615_v0 = vadd.f32 %v2614_v62, %v2613_v59  ;;  %v2616_v1 = vpop.f32.mrb[50].mxu1  ;;  %v2505_v2 = vpop.f32.mrb[51].mxu0  ;;  %v582_v62 = vld [vmem:[#allocation2 + $0xf8] sm:$0xff] }
 0x1c5   : > { %v2506_v4 = vadd.f32 %v2505_v2, %v2504_v63  ;;  %v2617_v5 = vpop.f32.mrb[51].mxu1  ;;  %v1613_v2 = vld [vmem:[#allocation2] sm:$0xff] (!%p2250_p5) }
 0x1c6   : > { %v1515_v6 = vadd.f32 %v2615_v0, %v2503_v61  ;;  %v2618_v7 = vadd.f32 %v2617_v5, %v2616_v1 }
 0x1c8   : > { %v1569_v9 = vadd.f32 %v1515_v6, %v575_v3  ;;  %v1518_v10 = vadd.f32 %v2618_v7, %v2506_v4  ;;  %v1614_v3 = vld [vmem:[#allocation2 + $0x8] sm:$0xff] (!%p2250_p5)  ;;  %v1615_v4 = vld [vmem:[#allocation2 + $0x10] sm:$0xff] (!%p2250_p5)  ;;  %v1846_v7 = vmul.f32 (!%p2250_p5), %v1613_v2, %v1613_v2 }
 0x1c9   : > { %v2507_v11 = vpop.f32.mrb[52].mxu0  ;;  %v2321_v5 = vpack.c.bf16 (!%p2250_p5), %v1614_v3, %v1613_v2  ;;  %v1806_v6 = vadd.f32 (!%p2250_p5), %v1614_v3, %v1613_v2 }
 0x1ca   : > { %1601 = vst [vmem:[#allocation2 + $0xc0] sm:$0xff] %v1569_v9  ;;  %v1570_v12 = vadd.f32 %v1518_v10, %v576_v8  ;;  %v2619_v13 = vpop.f32.mrb[52].mxu1  ;;  %v2508_v14 = vpop.f32.mrb[53].mxu0  ;;  %v1847_v8 = vmul.f32 (!%p2250_p5), %v1614_v3, %v1614_v3  ;;  %v1616_v9 = vld [vmem:[#allocation2 + $0x18] sm:$0xff] (!%p2250_p5)  ;;  %v1617_v10 = vld [vmem:[#allocation2 + $0x20] sm:$0xff] (!%p2250_p5) }
 0x1cb   : > { %v2509_v15 = vadd.f32 %v2508_v14, %v2507_v11  ;;  %v2620_v16 = vpop.f32.mrb[53].mxu1  ;;  %v2510_v17 = vpop.f32.mrb[54].mxu0  ;;  %v1618_v11 = vld [vmem:[#allocation2 + $0x28] sm:$0xff] (!%p2250_p5)  ;;  %2322 = vst [vmem:[%s3187_s17] sm:$0xff] (!%p2250_p5), %v2321_v5  }
 0x1cc   : > { %1602 = vst [vmem:[#allocation2 + $0xc8] sm:$0xff] %v1570_v12  ;;  %v2621_v18 = vadd.f32 %v2620_v16, %v2619_v13  ;;  %v2622_v19 = vpop.f32.mrb[54].mxu1  ;;  %v2511_v20 = vpop.f32.mrb[55].mxu0  ;;  %v2326_v12 = vpack.c.bf16 (!%p2250_p5), %v1616_v9, %v1615_v4  ;;  %v1848_v13 = vmul.f32 (!%p2250_p5), %v1615_v4, %v1615_v4  ;;  %v2331_v14 = vpack.c.bf16 (!%p2250_p5), %v1618_v11, %v1617_v10 }
 0x1cd   : > { %v2512_v22 = vadd.f32 %v2511_v20, %v2510_v17  ;;  %v2623_v23 = vpop.f32.mrb[55].mxu1  ;;  %v1878_v16 = vadd.f32 (!%p2250_p5), %v1847_v8, %v1846_v7  ;;  %v1807_v17 = vadd.f32 (!%p2250_p5), %v1806_v6, %v1615_v4  ;;  %v1621_v20 = vld [vmem:[#allocation2 + $0x40] sm:$0xff] (!%p2250_p5) }
 0x1ce   : > { %v1523_v24 = vadd.f32 %v2621_v18, %v2509_v15  ;;  %v2624_v25 = vadd.f32 %v2623_v23, %v2622_v19  ;;  %v1619_v15 = vld [vmem:[#allocation2 + $0x30] sm:$0xff] (!%p2250_p5)  ;;  %v1849_v18 = vmul.f32 (!%p2250_p5), %v1616_v9, %v1616_v9  ;;  %v1620_v19 = vld [vmem:[#allocation2 + $0x38] sm:$0xff] (!%p2250_p5)  ;;  %2398 = vst [vmem:[%s3187_s17 + $0x8] sm:$0xff] (!%p2250_p5), %v2326_v12   ;;  %2399 = vst [vmem:[%s3187_s17 + $0x10] sm:$0xff] (!%p2250_p5), %v2331_v14  }
 0x1d0   : > { %v1571_v27 = vadd.f32 %v1523_v24, %v577_v21  ;;  %v1526_v28 = vadd.f32 %v2624_v25, %v2512_v22  ;;  %v3294_v21 = vld [vmem:[#allocation2 + $0x48] sm:$0xff] (!%p2250_p5)  ;;  %v2336_v22 = vpack.c.bf16 (!%p2250_p5), %v1620_v19, %v1619_v15  ;;  %v3299_v24 = vld [vmem:[#allocation2 + $0x50] sm:$0xff] (!%p2250_p5)  ;;  %v1808_v25 = vadd.f32 (!%p2250_p5), %v1807_v17, %v1616_v9 }
 0x1d1   : > { %v2513_v29 = vpop.f32.mrb[56].mxu0  ;;  %v2341_v23 = vpack.c.bf16 (!%p2250_p5), %v3294_v21, %v1621_v20  ;;  %v1855_v7 = vmul.f32 (!%p2250_p5), %v3294_v21, %v3294_v21 }
 0x1d2   : > { %1603 = vst [vmem:[#allocation2 + $0xd0] sm:$0xff] %v1571_v27  ;;  %v1572_v30 = vadd.f32 %v1526_v28, %v578_v26  ;;  %v2625_v31 = vpop.f32.mrb[56].mxu1  ;;  %v2514_v32 = vpop.f32.mrb[57].mxu0  ;;  %v1879_v26 = vadd.f32 (!%p2250_p5), %v1878_v16, %v1848_v13  ;;  %v1850_v27 = vmul.f32 (!%p2250_p5), %v1617_v10, %v1617_v10  ;;  %v3301_v28 = vld [vmem:[#allocation2 + $0x58] sm:$0xff] (!%p2250_p5)  ;;  %2400 = vst [vmem:[%s3187_s17 + $0x18] sm:$0xff] (!%p2250_p5), %v2336_v22  }
 0x1d3   : > { %v2515_v33 = vadd.f32 %v2514_v32, %v2513_v29  ;;  %v2626_v34 = vpop.f32.mrb[57].mxu1  ;;  %v2516_v35 = vpop.f32.mrb[58].mxu0  ;;  %v3303_v29 = vld [vmem:[#allocation2 + $0x60] sm:$0xff] (!%p2250_p5)  ;;  %2401 = vst [vmem:[%s3187_s17 + $0x20] sm:$0xff] (!%p2250_p5), %v2341_v23   ;;  %v1856_v13 = vmul.f32 (!%p2250_p5), %v3299_v24, %v3299_v24  ;;  %v1857_v16 = vmul.f32 (!%p2250_p5), %v3301_v28, %v3301_v28 }
 0x1d4   : > { %1604 = vst [vmem:[#allocation2 + $0xd8] sm:$0xff] %v1572_v30  ;;  %v2627_v36 = vadd.f32 %v2626_v34, %v2625_v31  ;;  %v2628_v37 = vpop.f32.mrb[58].mxu1  ;;  %v2517_v38 = vpop.f32.mrb[59].mxu0  ;;  %v3305_v30 = vld [vmem:[#allocation2 + $0x68] sm:$0xff] (!%p2250_p5)  ;;  %v2346_v31 = vpack.c.bf16 (!%p2250_p5), %v3301_v28, %v3299_v24  ;;  %v1880_v34 = vadd.f32 (!%p2250_p5), %v1879_v26, %v1849_v18 }
 0x1d5   : > { %v2518_v40 = vadd.f32 %v2517_v38, %v2516_v35  ;;  %v2629_v41 = vpop.f32.mrb[59].mxu1  ;;  %v2351_v32 = vpack.c.bf16 (!%p2250_p5), %v3305_v30, %v3303_v29  ;;  %v1809_v35 = vadd.f32 (!%p2250_p5), %v1808_v25, %v1617_v10  ;;  %v3317_v38 = vld [vmem:[#allocation2 + $0x80] sm:$0xff] (!%p2250_p5)  ;;  %v1859_v22 = vmul.f32 (!%p2250_p5), %v3305_v30, %v3305_v30 }
 0x1d6   : > { %v1531_v42 = vadd.f32 %v2627_v36, %v2515_v33  ;;  %v2630_v43 = vadd.f32 %v2629_v41, %v2628_v37  ;;  %v3313_v33 = vld [vmem:[#allocation2 + $0x70] sm:$0xff] (!%p2250_p5)  ;;  %v1851_v36 = vmul.f32 (!%p2250_p5), %v1618_v11, %v1618_v11  ;;  %v3315_v37 = vld [vmem:[#allocation2 + $0x78] sm:$0xff] (!%p2250_p5)  ;;  %2402 = vst [vmem:[%s3187_s17 + $0x28] sm:$0xff] (!%p2250_p5), %v2346_v31  }
 0x1d7   : > { %2403 = vst [vmem:[%s3187_s17 + $0x30] sm:$0xff] (!%p2250_p5), %v2351_v32  }
 0x1d8   : > { %v1573_v45 = vadd.f32 %v1531_v42, %v579_v39  ;;  %v1534_v46 = vadd.f32 %v2630_v43, %v2518_v40  ;;  %v3319_v39 = vld [vmem:[#allocation2 + $0x88] sm:$0xff] (!%p2250_p5)  ;;  %v2356_v40 = vpack.c.bf16 (!%p2250_p5), %v3315_v37, %v3313_v33  ;;  %v3327_v42 = vld [vmem:[#allocation2 + $0x90] sm:$0xff] (!%p2250_p5)  ;;  %v1810_v43 = vadd.f32 (!%p2250_p5), %v1809_v35, %v1618_v11 }
 0x1d9   : > { %v2519_v47 = vpop.f32.mrb[60].mxu0  ;;  %v2361_v41 = vpack.c.bf16 (!%p2250_p5), %v3319_v39, %v3317_v38 }
 0x1da   : > { %1605 = vst [vmem:[#allocation2 + $0xe0] sm:$0xff] %v1573_v45  ;;  %v1574_v48 = vadd.f32 %v1534_v46, %v580_v44  ;;  %v2631_v49 = vpop.f32.mrb[60].mxu1  ;;  %v2520_v50 = vpop.f32.mrb[61].mxu0  ;;  %v1881_v44 = vadd.f32 (!%p2250_p5), %v1880_v34, %v1850_v27  ;;  %v1852_v45 = vmul.f32 (!%p2250_p5), %v1619_v15, %v1619_v15  ;;  %v3329_v46 = vld [vmem:[#allocation2 + $0x98] sm:$0xff] (!%p2250_p5)  ;;  %2404 = vst [vmem:[%s3187_s17 + $0x38] sm:$0xff] (!%p2250_p5), %v2356_v40  }
 0x1db   : > { %v2521_v51 = vadd.f32 %v2520_v50, %v2519_v47  ;;  %v2632_v52 = vpop.f32.mrb[61].mxu1  ;;  %v2522_v53 = vpop.f32.mrb[62].mxu0  ;;  %v3331_v47 = vld [vmem:[#allocation2 + $0xa0] sm:$0xff] (!%p2250_p5)  ;;  %2405 = vst [vmem:[%s3187_s17 + $0x40] sm:$0xff] (!%p2250_p5), %v2361_v41  }
 0x1dc   : > { %1606 = vst [vmem:[#allocation2 + $0xe8] sm:$0xff] %v1574_v48  ;;  %v2633_v54 = vadd.f32 %v2632_v52, %v2631_v49  ;;  %v2634_v55 = vpop.f32.mrb[62].mxu1  ;;  %v2523_v56 = vpop.f32.mrb[63].mxu0  ;;  %v3333_v48 = vld [vmem:[#allocation2 + $0xa8] sm:$0xff] (!%p2250_p5)  ;;  %v2366_v49 = vpack.c.bf16 (!%p2250_p5), %v3329_v46, %v3327_v42  ;;  %v1882_v52 = vadd.f32 (!%p2250_p5), %v1881_v44, %v1851_v36 }
 0x1dd   : > { %v2524_v58 = vadd.f32 %v2523_v56, %v2522_v53  ;;  %v2635_v59 = vpop.f32.mrb[63].mxu1  ;;  %v2371_v50 = vpack.c.bf16 (!%p2250_p5), %v3333_v48, %v3331_v47  ;;  %v1811_v53 = vadd.f32 (!%p2250_p5), %v1810_v43, %v1619_v15  ;;  %v3345_v56 = vld [vmem:[#allocation2 + $0xc0] sm:$0xff] (!%p2250_p5) }
 0x1de   : > { %v1539_v60 = vadd.f32 %v2633_v54, %v2521_v51  ;;  %v2636_v61 = vadd.f32 %v2635_v59, %v2634_v55  ;;  %1612 = sbr.rel (%p2250_p5) target bundleno = 549 (0x225), region = 67  ;;  %v3341_v51 = vld [vmem:[#allocation2 + $0xb0] sm:$0xff] (!%p2250_p5)  ;;  %v1853_v54 = vmul.f32 (!%p2250_p5), %v1620_v19, %v1620_v19  ;;  %v3343_v55 = vld [vmem:[#allocation2 + $0xb8] sm:$0xff] (!%p2250_p5)  ;;  %2406 = vst [vmem:[%s3187_s17 + $0x48] sm:$0xff] (!%p2250_p5), %v2366_v49  }
 0x1df   : > { %2407 = vst [vmem:[%s3187_s17 + $0x50] sm:$0xff] (!%p2250_p5), %v2371_v50  }
 0x1e0   : > { %v1575_v63 = vadd.f32 %v1539_v60, %v581_v57  ;;  %v1542_v0 = vadd.f32 %v2636_v61, %v2524_v58  ;;  %v3347_v57 = vld [vmem:[#allocation2 + $0xc8] sm:$0xff] (!%p2250_p5)  ;;  %v2376_v58 = vpack.c.bf16 (!%p2250_p5), %v3343_v55, %v3341_v51  ;;  %v3355_v60 = vld [vmem:[#allocation2 + $0xd0] sm:$0xff] (!%p2250_p5)  ;;  %v1812_v61 = vadd.f32 (!%p2250_p5), %v1811_v53, %v1620_v19 }
 0x1e1   : > { %v2381_v59 = vpack.c.bf16 (!%p2250_p5), %v3347_v57, %v3345_v56  ;;  %v1858_v19 = vmul.f32 (!%p2250_p5), %v3303_v29, %v3303_v29 }
 0x1e2   : > { %1607 = vst [vmem:[#allocation2 + $0xf0] sm:$0xff] %v1575_v63  ;;  %v1576_v1 = vadd.f32 %v1542_v0, %v582_v62  ;;  %v1883_v62 = vadd.f32 (!%p2250_p5), %v1882_v52, %v1852_v45  ;;  %v1854_v63 = vmul.f32 (!%p2250_p5), %v1621_v20, %v1621_v20  ;;  %v3357_v0 = vld [vmem:[#allocation2 + $0xd8] sm:$0xff] (!%p2250_p5)  ;;  %2408 = vst [vmem:[%s3187_s17 + $0x58] sm:$0xff] (!%p2250_p5), %v2376_v58  }
 0x1e3   : > { %v3361_v2 = vld [vmem:[#allocation2 + $0xe8] sm:$0xff] (!%p2250_p5)  ;;  %2409 = vst [vmem:[%s3187_s17 + $0x60] sm:$0xff] (!%p2250_p5), %v2381_v59   ;;  %v2386_v3 = vpack.c.bf16 (!%p2250_p5), %v3357_v0, %v3355_v60  ;;  %v1813_v6 = vadd.f32 (!%p2250_p5), %v1812_v61, %v1621_v20 }
 0x1e4   : > { %1608 = vst [vmem:[#allocation2 + $0xf8] sm:$0xff] %v1576_v1  ;;  %v3359_v1 = vld [vmem:[#allocation2 + $0xe0] sm:$0xff] (!%p2250_p5)  ;;  %v1884_v5 = vadd.f32 (!%p2250_p5), %v1883_v62, %v1853_v54 }
 0x1e5   : > { %v2391_v4 = vpack.c.bf16 %v3361_v2, %v3359_v1  ;;  %2410 = vst [vmem:[%s3187_s17 + $0x68] sm:$0xff] %v2386_v3   ;;  %v1814_v11 = vadd.f32 %v1813_v6, %v3294_v21 }
 0x1e6   : > { %v1885_v12 = vadd.f32 %v1884_v5, %v1854_v63 }
 0x1e7   : > { %2411 = vst [vmem:[%s3187_s17 + $0x70] sm:$0xff] %v2391_v4   ;;  %v1815_v15 = vadd.f32 %v1814_v11, %v3299_v24  ;;  %v1860_v24 = vmul.f32 %v3313_v33, %v3313_v33 }
 0x1e8   : > { %v1886_v14 = vadd.f32 %v1885_v12, %v1855_v7 }
 0x1e9   : > { %v3371_v8 = vld [vmem:[#allocation2 + $0xf0] sm:$0xff]  ;;  %v1816_v17 = vadd.f32 %v1815_v15, %v3301_v28  ;;  %v1861_v28 = vmul.f32 %v3315_v37, %v3315_v37 }
 0x1ea   : > { %v1887_v18 = vadd.f32 %v1886_v14, %v1856_v13 }
 0x1eb   : > { %v3373_v9 = vld [vmem:[#allocation2 + $0xf8] sm:$0xff]  ;;  %v1817_v21 = vadd.f32 %v1816_v17, %v3303_v29  ;;  %v1862_v29 = vmul.f32 %v3317_v38, %v3317_v38 }
 0x1ec   : > { %v2396_v10 = vpack.c.bf16 %v3373_v9, %v3371_v8  ;;  %v1888_v20 = vadd.f32 %v1887_v18, %v1857_v16 }
 0x1ed   : > { %v1818_v23 = vadd.f32 %v1817_v21, %v3305_v30  ;;  %v1863_v30 = vmul.f32 %v3319_v39, %v3319_v39 }
 0x1ee   : > { %2412 = vst [vmem:[%s3187_s17 + $0x78] sm:$0xff] %v2396_v10   ;;  %v1889_v25 = vadd.f32 %v1888_v20, %v1858_v19 }
 0x1ef   : > { %v1819_v27 = vadd.f32 %v1818_v23, %v3313_v33  ;;  %v1864_v33 = vmul.f32 %v3327_v42, %v3327_v42 }
 0x1f0   : > { %v1890_v26 = vadd.f32 %v1889_v25, %v1859_v22 }
 0x1f1   : > { %v1820_v31 = vadd.f32 %v1819_v27, %v3315_v37  ;;  %v1865_v37 = vmul.f32 %v3329_v46, %v3329_v46  ;;  %v1805_v27 = vld [vmem:[#allocation3] sm:$0x1] }
 0x1f2   : > { %v1891_v32 = vadd.f32 %v1890_v26, %v1860_v24 }
 0x1f3   : > { %v1821_v35 = vadd.f32 %v1820_v31, %v3317_v38  ;;  %v1866_v38 = vmul.f32 %v3331_v47, %v3331_v47 }
 0x1f4   : > { %v1892_v34 = vadd.f32 %v1891_v32, %v1861_v28 }
 0x1f5   : > { %v1822_v36 = vadd.f32 %v1821_v35, %v3319_v39  ;;  %v1867_v39 = vmul.f32 %v3333_v48, %v3333_v48 }
 0x1f6   : > { %v1893_v40 = vadd.f32 %v1892_v34, %v1862_v29 }
 0x1f7   : > { %v1823_v43 = vadd.f32 %v1822_v36, %v3327_v42  ;;  %v1868_v42 = vmul.f32 %v3341_v51, %v3341_v51 }
 0x1f8   : > { %v1894_v41 = vadd.f32 %v1893_v40, %v1863_v30 }
 0x1f9   : > { %v1824_v44 = vadd.f32 %v1823_v43, %v3329_v46  ;;  %v1869_v46 = vmul.f32 %v3343_v55, %v3343_v55 }
 0x1fa   : > { %v1895_v45 = vadd.f32 %v1894_v41, %v1864_v33 }
 0x1fb   : > { %v1825_v50 = vadd.f32 %v1824_v44, %v3331_v47  ;;  %v1870_v47 = vmul.f32 %v3345_v56, %v3345_v56 }
 0x1fc   : > { %v1896_v49 = vadd.f32 %v1895_v45, %v1865_v37 }
 0x1fd   : > { %v1826_v52 = vadd.f32 %v1825_v50, %v3333_v48  ;;  %v1871_v48 = vmul.f32 %v3347_v57, %v3347_v57 }
 0x1fe   : > { %v1897_v53 = vadd.f32 %v1896_v49, %v1866_v38 }
 0x1ff   : > { %v1827_v58 = vadd.f32 %v1826_v52, %v3341_v51  ;;  %v1872_v51 = vmul.f32 %v3355_v60, %v3355_v60 }
 0x200   : > { %v1898_v54 = vadd.f32 %v1897_v53, %v1867_v39 }
 0x201   : > { %v1828_v59 = vadd.f32 %v1827_v58, %v3343_v55  ;;  %v1873_v55 = vmul.f32 %v3357_v0, %v3357_v0 }
 0x202   : > { %v1899_v61 = vadd.f32 %v1898_v54, %v1868_v42 }
 0x203   : > { %v1829_v63 = vadd.f32 %v1828_v59, %v3345_v56  ;;  %v1874_v56 = vmul.f32 %v3359_v1, %v3359_v1 }
 0x204   : > { %v1900_v62 = vadd.f32 %v1899_v61, %v1869_v46 }
 0x205   : > { %v1830_v3 = vadd.f32 %v1829_v63, %v3347_v57  ;;  %v1875_v57 = vmul.f32 %v3361_v2, %v3361_v2 }
 0x206   : > { %v1901_v4 = vadd.f32 %v1900_v62, %v1870_v47 }
 0x207   : > { %v1831_v6 = vadd.f32 %v1830_v3, %v3355_v60  ;;  %v1876_v60 = vmul.f32 %v3371_v8, %v3371_v8 }
 0x208   : > { %v1902_v5 = vadd.f32 %v1901_v4, %v1871_v48 }
 0x209   : > { %v1832_v7 = vadd.f32 %v1831_v6, %v3357_v0  ;;  %v1877_v0 = vmul.f32 %v3373_v9, %v3373_v9 }
 0x20a   : > { %v1903_v10 = vadd.f32 %v1902_v5, %v1872_v51 }
 0x20b   : > { %v1833_v12 = vadd.f32 %v1832_v7, %v3359_v1 }
 0x20c   : > { %v1904_v11 = vadd.f32 %v1903_v10, %v1873_v55 }
 0x20d   : > { %v1834_v13 = vadd.f32 %v1833_v12, %v3361_v2 }
 0x20e   : > { %v1905_v14 = vadd.f32 %v1904_v11, %v1874_v56 }
 0x20f   : > { %v1835_v16 = vadd.f32 %v1834_v13, %v3371_v8  ;;  %v1845_v8 = vld [vmem:[#allocation4] sm:$0x1] }
 0x210   : > { %v1906_v15 = vadd.f32 %v1905_v14, %v1875_v57 }
 0x211   : > { %v1836_v17 = vadd.f32 %v1835_v16, %v3373_v9 }
 0x212   : > { %v1907_v18 = vadd.f32 %v1906_v15, %v1876_v60 }
 0x213   : > { %v1837_v19 = vrot.slane %v1836_v17, 4 }
 0x214   : > { %v1908_v1 = vadd.f32 %v1907_v18, %v1877_v0 }
 0x215   : > { %v1838_v20 = vadd.f32 %v1837_v19, %v1836_v17 }
 0x216   : > { %v1909_v21 = vrot.slane %v1908_v1, 4 }
 0x217   : > { %v1839_v22 = vrot.slane %v1838_v20, 2 }
 0x218   : > { %v1910_v23 = vadd.f32 %v1909_v21, %v1908_v1 }
 0x219   : > { %v1840_v2 = vadd.f32 %v1839_v22, %v1838_v20 }
 0x21a   : > { %v1911_v25 = vrot.slane %v1910_v23, 2 }
 0x21b   : > { %v1841_v24 = vrot.slane %v1840_v2, 1 }
 0x21c   : > { %v1912_v26 = vadd.f32 %v1911_v25, %v1910_v23 }
 0x21d   : > { %v1842_v28 = vadd.f32 %v1841_v24, %v1840_v2 }
 0x21e   : > { %v1913_v31 = vrot.slane %v1912_v26, 1 }
 0x21f   : > { %v1843_v32 = vadd.f32 %v1842_v28, %v1805_v27 }
 0x220   : > { %v1914_v29 = vadd.f32 %v1913_v31, %v1912_v26 }
 0x221   : > { %1844 = vst [vmem:[#allocation3] sm:$0x1] %v1843_v32 }
 0x222   : > { %v1915_v34 = vadd.f32 %v1914_v29, %v1845_v8 }
 0x224   : > { %1916 = vst [vmem:[#allocation4] sm:$0x1] %v1915_v34 }
 0x225 PF: > { %p1917_p6 = scmp.eq.s32.totalorder %s2891_s21, 2 }
 0x227   : > { %p1918_p7 = pnand %p1917_p6, %p1609_p4 }
 0x228   : > { %v1922_v9 = vld [vmem:[#allocation3] sm:$0x1] (!%p1918_p7) }
 0x229   : > { %1921 = sbr.rel (%p1918_p7) target bundleno = 560 (0x230), region = 71  ;;  %1923 = vst [vmem:[%s500_s8] sm:$0x1] (!%p1918_p7), %v1922_v9 }
 0x22b   : > { %v1924_v35 = vld [vmem:[#allocation4] sm:$0x1] (!%p1918_p7) }
 0x22c   : > { %1925 = vst [vmem:[%s506_s10] sm:$0x1] (!%p1918_p7), %v1924_v35 }
 0x230 PF: > { %s16_s25 = sadd.s32 1, %s2911_s25   ;;  %s3498_s18 = smov %s2883_s19 }
 0x231   : > { %p13_p8 = scmp.ge.s32.totalorder %s16_s25, 14   ;;  %s3499_s19 = smov %s3016_s11 }
 0x232   : > { %s3500_s20 = smov %s2899_s2  ;;  %s3501_s21 = smov %s2903_s23 }
 0x233   : > { %s3502_s22 = smov %s2907_s24  ;;  %s3503_s2 = smov %s3513_s26 }
 0x234   : > { %s3504_s23 = smov %s3509_s27  ;;  %s3505_s24 = smov %s3515_s28 }
 0x235   :  { %15 = sbr.rel (!%p13_p8) target bundleno = 8 (0x8), region = 136 }

// kernel: discriminator_forward.11
= control target key start
LH: loop header
LB: loop body
LE: loop exit
PB: predicated region body
PF: predicated region fallthrough
CT: control target
= control target key end

     0   :  { %s2571_s18 = smov 0   ;;  %s2573_s19 = smov 0   ;;  %s2884_s0 = inlined_call_operand.vmem [shape: bf16[2,144,2048], index: 0, kind: input, shape index: {}]   ;;  %s2885_s1 = inlined_call_operand.vmem [shape: bf16[2048,256], index: 1, kind: input, shape index: {}]   ;;  %s2886_s2 = inlined_call_operand.vmem [shape: f32[1,256], index: 2, kind: input, shape index: {}]   ;;  %s2887_s3 = inlined_call_operand.vmem [shape: bf16[2,144,256], index: 3, kind: output, shape index: {0}]   ;;  %s2888_s4 = inlined_call_operand.vmem [shape: f32[2,1,256], index: 4, kind: output, shape index: {1}]   ;;  %s2889_s5 = inlined_call_operand.vmem [shape: f32[2,1,256], index: 5, kind: output, shape index: {2}]  }
   0x1   :  { %s2575_s20 = smov 0   ;;  %s2577_s21 = smov 0  }
   0x2   :  { %s2579_s22 = smov 0   ;;  %s2581_s2 = smov 0  }
   0x3   :  { %s2583_s23 = smov 0  }
   0x4 LB: > { %s31_s24 = sadd.s32 1, %s2528_s22  ;;  %s42_s25 = sadd.s32 1, %s2532_s2  ;;  %s2536_s23 = sphi %s2583_s23, %s16_s23   ;;  %s2532_s2 = sphi %s2581_s2, %s2895_s2   ;;  %s2528_s22 = sphi %s2579_s22, %s2894_s22   ;;  %s2524_s21 = sphi %s2577_s21, %s2893_s21   ;;  %s2520_s20 = sphi %s2575_s20, %s2892_s20   ;;  %s2516_s19 = sphi %s2573_s19, %s2891_s19   ;;  %s2512_s18 = sphi %s2571_s18, %s2890_s18  }
   0x5   : > { %p32_p0 = scmp.ge.s32.totalorder %s31_s24, 4  ;;  %p60_p1 = scmp.ne.s32.totalorder %s2516_s19, %s2512_s18 }
   0x6   : > { %p61_p2 = scmp.eq.s32.totalorder %s2536_s23, 0  ;;  %s53_s29 = sadd.s32 1, %s2516_s19 }
   0x7   : > { %s2897_s24 = smov (%p32_p0, %s31_s24), 0  ;;  %s2899_s25 = smov (!%p32_p0, %s42_s25), %s2532_s2 }
   0x8   : > { %p62_p3 = por %p61_p2, %p60_p1  ;;  %p44_p4 = scmp.ge.s32.totalorder %s2899_s25, 2 }
   0x9   : > { %s49_s26 = ssub.s32 %s2528_s22, %s2897_s24  ;;  %p2078_p6 = scmp.ge.s32.totalorder %s2536_s23, 8 }
   0xa   : > { %s2901_s25 = smov (%p44_p4, %s2899_s25), 0 }
   0xb   : > { %s46_s27 = ssub.s32 %s2532_s2, %s2901_s25  ;;  %234 = sbr.rel (%p2078_p6) target bundleno = 44 (0x2c), region = 20 }
   0xc   : > { %s50_s28 = sor.u32 %s49_s26, %s46_s27 }
   0xd   : > { %p51_p5 = scmp.eq.s32.totalorder %s50_s28, 0 }
   0xf   : > { %s2622_s30 = scalar_select %p51_p5, %s2516_s19, %s53_s29  }
  0x12   : > { %237 = sbr.rel (!%p62_p3) target bundleno = 44 (0x2c), region = 24  ;;  %s239_s6 = sand.u32 (%p62_p3), 1, %s2516_s19  }
  0x13   : > { %s2269_s7 = smul.u32 (%p62_p3), 288, %s239_s6  ;;  %s2079_s8 = sshll.u32 (%p62_p3), %s2528_s22, 2 }
  0x14   : > { %s2270_s9 = smul.u32 (%p62_p3), 288, %s2532_s2 }
  0x15   : > { %s2636_s15 = scalar_lea.vmem (%p62_p3), [#allocation5], %s2269_s7 }
  0x16   : > { %s247_s10 = sadd.s32 (%p62_p3), %s2270_s9, %s2079_s8 }
  0x17   : > { %s2080_s11 = sshll.u32 (%p62_p3), %s247_s10, 2 }
  0x18   : > { %s2631_s14 = scalar_lea.vmem (%p62_p3), %s2884_s0, %s2080_s11 }
  0x19   : > { %v262_v0 = vld [vmem:[%s2631_s14] sm:$0xff]  ;;  %v264_v1 = vld [vmem:[%s2631_s14 + $0x8] sm:$0xff] }
  0x1a   : > { %v266_v2 = vld [vmem:[%s2631_s14 + $0x40] sm:$0xff]  ;;  %263 = vst [vmem:[%s2636_s15] sm:$0xff] %v262_v0  ;;  %265 = vst [vmem:[%s2636_s15 + $0x8] sm:$0xff] %v264_v1  ;;  %v268_v3 = vld [vmem:[%s2631_s14 + $0x48] sm:$0xff] }
  0x1b   : > { %267 = vst [vmem:[%s2636_s15 + $0x10] sm:$0xff] %v266_v2  ;;  %v270_v4 = vld [vmem:[%s2631_s14 + $0x80] sm:$0xff]  ;;  %v272_v5 = vld [vmem:[%s2631_s14 + $0x88] sm:$0xff]  ;;  %269 = vst [vmem:[%s2636_s15 + $0x18] sm:$0xff] %v268_v3 }
  0x1c   : > { %271 = vst [vmem:[%s2636_s15 + $0x20] sm:$0xff] %v270_v4  ;;  %273 = vst [vmem:[%s2636_s15 + $0x28] sm:$0xff] %v272_v5  ;;  %v274_v6 = vld [vmem:[%s2631_s14 + $0xc0] sm:$0xff]  ;;  %v276_v7 = vld [vmem:[%s2631_s14 + $0xc8] sm:$0xff] }
  0x1d   : > { %v278_v8 = vld [vmem:[%s2631_s14 + $0x100] sm:$0xff]  ;;  %275 = vst [vmem:[%s2636_s15 + $0x30] sm:$0xff] %v274_v6  ;;  %277 = vst [vmem:[%s2636_s15 + $0x38] sm:$0xff] %v276_v7  ;;  %v280_v9 = vld [vmem:[%s2631_s14 + $0x108] sm:$0xff] }
  0x1e   : > { %279 = vst [vmem:[%s2636_s15 + $0x40] sm:$0xff] %v278_v8  ;;  %v282_v10 = vld [vmem:[%s2631_s14 + $0x140] sm:$0xff]  ;;  %v284_v11 = vld [vmem:[%s2631_s14 + $0x148] sm:$0xff]  ;;  %281 = vst [vmem:[%s2636_s15 + $0x48] sm:$0xff] %v280_v9 }
  0x1f   : > { %283 = vst [vmem:[%s2636_s15 + $0x50] sm:$0xff] %v282_v10  ;;  %285 = vst [vmem:[%s2636_s15 + $0x58] sm:$0xff] %v284_v11  ;;  %v286_v12 = vld [vmem:[%s2631_s14 + $0x180] sm:$0xff]  ;;  %v288_v13 = vld [vmem:[%s2631_s14 + $0x188] sm:$0xff] }
  0x20   : > { %v290_v14 = vld [vmem:[%s2631_s14 + $0x1c0] sm:$0xff]  ;;  %287 = vst [vmem:[%s2636_s15 + $0x60] sm:$0xff] %v286_v12  ;;  %289 = vst [vmem:[%s2636_s15 + $0x68] sm:$0xff] %v288_v13  ;;  %v292_v15 = vld [vmem:[%s2631_s14 + $0x1c8] sm:$0xff] }
  0x21   : > { %291 = vst [vmem:[%s2636_s15 + $0x70] sm:$0xff] %v290_v14  ;;  %v294_v16 = vld [vmem:[%s2631_s14 + $0x200] sm:$0xff]  ;;  %v296_v17 = vld [vmem:[%s2631_s14 + $0x208] sm:$0xff]  ;;  %293 = vst [vmem:[%s2636_s15 + $0x78] sm:$0xff] %v292_v15 }
  0x22   : > { %295 = vst [vmem:[%s2636_s15 + $0x80] sm:$0xff] %v294_v16  ;;  %297 = vst [vmem:[%s2636_s15 + $0x88] sm:$0xff] %v296_v17  ;;  %v298_v18 = vld [vmem:[%s2631_s14 + $0x240] sm:$0xff]  ;;  %v300_v19 = vld [vmem:[%s2631_s14 + $0x248] sm:$0xff] }
  0x23   : > { %v302_v20 = vld [vmem:[%s2631_s14 + $0x280] sm:$0xff]  ;;  %299 = vst [vmem:[%s2636_s15 + $0x90] sm:$0xff] %v298_v18  ;;  %301 = vst [vmem:[%s2636_s15 + $0x98] sm:$0xff] %v300_v19  ;;  %v304_v21 = vld [vmem:[%s2631_s14 + $0x288] sm:$0xff] }
  0x24   : > { %303 = vst [vmem:[%s2636_s15 + $0xa0] sm:$0xff] %v302_v20  ;;  %v306_v22 = vld [vmem:[%s2631_s14 + $0x2c0] sm:$0xff]  ;;  %v308_v23 = vld [vmem:[%s2631_s14 + $0x2c8] sm:$0xff]  ;;  %305 = vst [vmem:[%s2636_s15 + $0xa8] sm:$0xff] %v304_v21 }
  0x25   : > { %307 = vst [vmem:[%s2636_s15 + $0xb0] sm:$0xff] %v306_v22  ;;  %309 = vst [vmem:[%s2636_s15 + $0xb8] sm:$0xff] %v308_v23  ;;  %v310_v24 = vld [vmem:[%s2631_s14 + $0x300] sm:$0xff]  ;;  %v312_v25 = vld [vmem:[%s2631_s14 + $0x308] sm:$0xff] }
  0x26   : > { %v314_v26 = vld [vmem:[%s2631_s14 + $0x340] sm:$0xff]  ;;  %311 = vst [vmem:[%s2636_s15 + $0xc0] sm:$0xff] %v310_v24  ;;  %313 = vst [vmem:[%s2636_s15 + $0xc8] sm:$0xff] %v312_v25  ;;  %v316_v27 = vld [vmem:[%s2631_s14 + $0x348] sm:$0xff] }
  0x27   : > { %315 = vst [vmem:[%s2636_s15 + $0xd0] sm:$0xff] %v314_v26  ;;  %v318_v28 = vld [vmem:[%s2631_s14 + $0x380] sm:$0xff]  ;;  %v320_v29 = vld [vmem:[%s2631_s14 + $0x388] sm:$0xff]  ;;  %317 = vst [vmem:[%s2636_s15 + $0xd8] sm:$0xff] %v316_v27 }
  0x28   : > { %319 = vst [vmem:[%s2636_s15 + $0xe0] sm:$0xff] %v318_v28  ;;  %321 = vst [vmem:[%s2636_s15 + $0xe8] sm:$0xff] %v320_v29  ;;  %v322_v30 = vld [vmem:[%s2631_s14 + $0x3c0] sm:$0xff]  ;;  %v324_v31 = vld [vmem:[%s2631_s14 + $0x3c8] sm:$0xff] }
  0x29   : > { %v326_v32 = vld [vmem:[%s2631_s14 + $0x400] sm:$0xff]  ;;  %323 = vst [vmem:[%s2636_s15 + $0xf0] sm:$0xff] %v322_v30  ;;  %325 = vst [vmem:[%s2636_s15 + $0xf8] sm:$0xff] %v324_v31  ;;  %v328_v33 = vld [vmem:[%s2631_s14 + $0x408] sm:$0xff] }
  0x2a   : > { %327 = vst [vmem:[%s2636_s15 + $0x100] sm:$0xff] %v326_v32  ;;  %v330_v34 = vld [vmem:[%s2631_s14 + $0x440] sm:$0xff]  ;;  %v332_v35 = vld [vmem:[%s2631_s14 + $0x448] sm:$0xff]  ;;  %329 = vst [vmem:[%s2636_s15 + $0x108] sm:$0xff] %v328_v33 }
  0x2b   : > { %331 = vst [vmem:[%s2636_s15 + $0x110] sm:$0xff] %v330_v34  ;;  %333 = vst [vmem:[%s2636_s15 + $0x118] sm:$0xff] %v332_v35 }
  0x2c PF: > { %p2081_p7 = scmp.ge.s32.totalorder %s2536_s23, 1  ;;  %p353_p8 = scmp.lt.s32.totalorder %s2536_s23, 9 }
  0x2e   : > { %p354_p9 = pnand %p2081_p7, %p353_p8 }
  0x2f   : > { %s360_s16 = sand.u32 (!%p354_p9), 1, %s2512_s18   ;;  %s2082_s17 = sshll.u32 (!%p354_p9), %s2520_s20, 6 }
  0x30   : > { %357 = sbr.rel (%p354_p9) target bundleno = 485 (0x1e5), region = 51  ;;  %p430_p10 = scmp.lt.s32.totalorder (!%p354_p9), %s2082_s17, 255 }
  0x31   : > { %s2271_s26 = smul.u32 (!%p354_p9), 288, %s360_s16  ;;  %p447_p11 = scmp.lt.s32.totalorder (!%p354_p9), %s2524_s21, 1 }
  0x32   : > { %p479_p12 = scmp.eq.s32.totalorder (!%p354_p9), %s2520_s20, 0  ;;  %p2088_p13 = scmp.ne.s32.totalorder (!%p354_p9), %s2520_s20, 0 }
  0x37   : > { %s2903_s17 = smov (!%p430_p10, %s2082_s17), 255  ;;  %s2905_s21 = smov (!%p447_p11, %s2524_s21), 1 }
  0x38   : > { %s2212_s27 = sshll.u32 %s2903_s17, 3  ;;  %s2272_s7 = smul.u32 144, %s2905_s21  ;;  %v2538_v36 = vmov (!%p2088_p13), 0.0  }
  0x39   : > { %s2717_s6 = scalar_lea.vmem %s2885_s1, %s2212_s27  ;;  %s2086_s8 = sshll.u32 %s2905_s21, 1  ;;  %483 = vst [vmem:[#allocation2] sm:$0xff] (!%p2088_p13), %v2538_v36  ;;  %484 = vst [vmem:[#allocation2 + $0x8] sm:$0xff] (!%p2088_p13), %v2538_v36 }
  0x3a   : > { %s2722_s11 = scalar_lea.vmem %s2887_s3, %s2272_s7  ;;  %s2727_s13 = scalar_lea.vmem %s2888_s4, %s2086_s8  ;;  %485 = vst [vmem:[#allocation2 + $0x10] sm:$0xff] (!%p2088_p13), %v2538_v36  ;;  %486 = vst [vmem:[#allocation2 + $0x18] sm:$0xff] (!%p2088_p13), %v2538_v36 }
  0x3b   : > { %s2732_s16 = scalar_lea.vmem %s2889_s5, %s2086_s8  ;;  %s2734_s17 = scalar_lea.vmem [#allocation5], %s2271_s26  ;;  %487 = vst [vmem:[#allocation2 + $0x20] sm:$0xff] (!%p2088_p13), %v2538_v36  ;;  %488 = vst [vmem:[#allocation2 + $0x28] sm:$0xff] (!%p2088_p13), %v2538_v36 }
  0x3c   : > { %482 = sbr.rel (%p2088_p13) target bundleno = 75 (0x4b), region = 59  ;;  %489 = vst [vmem:[#allocation2 + $0x30] sm:$0xff] (!%p2088_p13), %v2538_v36  ;;  %490 = vst [vmem:[#allocation2 + $0x38] sm:$0xff] (!%p2088_p13), %v2538_v36 }
  0x3d   : > { %491 = vst [vmem:[#allocation2 + $0x40] sm:$0xff] (!%p2088_p13), %v2538_v36  ;;  %492 = vst [vmem:[#allocation2 + $0x48] sm:$0xff] (!%p2088_p13), %v2538_v36 }
  0x3e   : > { %493 = vst [vmem:[#allocation2 + $0x50] sm:$0xff] (!%p2088_p13), %v2538_v36  ;;  %494 = vst [vmem:[#allocation2 + $0x58] sm:$0xff] (!%p2088_p13), %v2538_v36 }
  0x3f   : > { %495 = vst [vmem:[#allocation2 + $0x60] sm:$0xff] (!%p2088_p13), %v2538_v36  ;;  %496 = vst [vmem:[#allocation2 + $0x68] sm:$0xff] (!%p2088_p13), %v2538_v36 }
  0x40   : > { %497 = vst [vmem:[#allocation2 + $0x70] sm:$0xff] (!%p2088_p13), %v2538_v36  ;;  %498 = vst [vmem:[#allocation2 + $0x78] sm:$0xff] (!%p2088_p13), %v2538_v36 }
  0x41   : > { %499 = vst [vmem:[#allocation2 + $0x80] sm:$0xff] (!%p2088_p13), %v2538_v36  ;;  %500 = vst [vmem:[#allocation2 + $0x88] sm:$0xff] (!%p2088_p13), %v2538_v36 }
  0x42   : > { %501 = vst [vmem:[#allocation2 + $0x90] sm:$0xff] (!%p2088_p13), %v2538_v36  ;;  %502 = vst [vmem:[#allocation2 + $0x98] sm:$0xff] (!%p2088_p13), %v2538_v36 }
  0x43   : > { %503 = vst [vmem:[#allocation2 + $0xa0] sm:$0xff] %v2538_v36  ;;  %504 = vst [vmem:[#allocation2 + $0xa8] sm:$0xff] %v2538_v36 }
  0x44   : > { %505 = vst [vmem:[#allocation2 + $0xb0] sm:$0xff] %v2538_v36  ;;  %506 = vst [vmem:[#allocation2 + $0xb8] sm:$0xff] %v2538_v36 }
  0x45   : > { %507 = vst [vmem:[#allocation2 + $0xc0] sm:$0xff] %v2538_v36  ;;  %508 = vst [vmem:[#allocation2 + $0xc8] sm:$0xff] %v2538_v36 }
  0x46   : > { %509 = vst [vmem:[#allocation2 + $0xd0] sm:$0xff] %v2538_v36  ;;  %510 = vst [vmem:[#allocation2 + $0xd8] sm:$0xff] %v2538_v36 }
  0x47   : > { %511 = vst [vmem:[#allocation2 + $0xe0] sm:$0xff] %v2538_v36  ;;  %512 = vst [vmem:[#allocation2 + $0xe8] sm:$0xff] %v2538_v36 }
  0x48   : > { %513 = vst [vmem:[#allocation2 + $0xf0] sm:$0xff] %v2538_v36  ;;  %514 = vst [vmem:[#allocation2 + $0xf8] sm:$0xff] %v2538_v36 }
  0x49   : > { %515 = vst [vmem:[#allocation2 + $0x100] sm:$0xff] %v2538_v36  ;;  %516 = vst [vmem:[#allocation2 + $0x108] sm:$0xff] %v2538_v36 }
  0x4a   : > { %517 = vst [vmem:[#allocation2 + $0x110] sm:$0xff] %v2538_v36  ;;  %518 = vst [vmem:[#allocation2 + $0x118] sm:$0xff] %v2538_v36 }
  0x4b PF: > { %523 = sbr.rel (!%p479_p12) target bundleno = 82 (0x52), region = 63  ;;  %v524_v37 = vlaneseq (%p479_p12)  ;;  %v2539_v38 = vmov (%p479_p12), 0.0  }
  0x4d   : > { %vm526_vm0 = vcmp.lt.s32.totalorder (%p479_p12), %v524_v37, 256 }
  0x4e   : > { %528 = vst.msk [vmem:[#allocation3] sm:$0x3] (%p479_p12), %vm526_vm0, %v2539_v38  ;;  %529 = vst.msk [vmem:[#allocation4] sm:$0x3] (%p479_p12), %vm526_vm0, %v2539_v38 }
  0x52 PF: > { %v2332_v39 = vld [vmem:[%s2717_s6 + $0x4] ss:$8 sps:$4 sm:$0xff]   ;;  %v2336_v41 = vld [vmem:[%s2717_s6] ss:$8 sps:$4 sm:$0xff]   ;;  %v2338_v43 = vld [vmem:[%s2717_s6 + $0x14] ss:$8 sps:$4 sm:$0xff]  }
  0x53   : > { %v2334_v40 = vld [vmem:[%s2717_s6 + $0x104] ss:$8 sps:$4 sm:$0xff]   ;;  %1166 = vmatprep.subr.bf16.mxu1 %v2332_v39  ;;  %v2337_v42 = vld [vmem:[%s2717_s6 + $0x100] ss:$8 sps:$4 sm:$0xff]   ;;  %v2340_v44 = vld [vmem:[%s2717_s6 + $0x114] ss:$8 sps:$4 sm:$0xff]  }
  0x54   : > { %1289 = vmatprep.subr.bf16.mxu0 %v2334_v40  ;;  %1167 = vmatpush1.bf16.msra.mxu1 %v2336_v41  ;;  %v2342_v45 = vld [vmem:[%s2717_s6 + $0x10] ss:$8 sps:$4 sm:$0xff]   ;;  %v2344_v47 = vld [vmem:[%s2717_s6 + $0x24] ss:$8 sps:$4 sm:$0xff]   ;;  %v2348_v49 = vld [vmem:[%s2717_s6 + $0x20] ss:$8 sps:$4 sm:$0xff]  }
  0x55   : > { %1290 = vmatpush1.bf16.msra.mxu0 %v2337_v42  ;;  %1168 = vmatprep.subr.bf16.mxu1 %v2338_v43  ;;  %v2343_v46 = vld [vmem:[%s2717_s6 + $0x110] ss:$8 sps:$4 sm:$0xff]   ;;  %v2346_v48 = vld [vmem:[%s2717_s6 + $0x124] ss:$8 sps:$4 sm:$0xff]   ;;  %v2349_v50 = vld [vmem:[%s2717_s6 + $0x120] ss:$8 sps:$4 sm:$0xff]  }
  0x56   : > { %1291 = vmatprep.subr.bf16.mxu0 %v2340_v44  ;;  %v2350_v51 = vld [vmem:[%s2717_s6 + $0x34] ss:$8 sps:$4 sm:$0xff]   ;;  %v2354_v53 = vld [vmem:[%s2717_s6 + $0x30] ss:$8 sps:$4 sm:$0xff]   ;;  %v2356_v55 = vld [vmem:[%s2717_s6 + $0x44] ss:$8 sps:$4 sm:$0xff]  }
  0x57   : > { %v2352_v52 = vld [vmem:[%s2717_s6 + $0x134] ss:$8 sps:$4 sm:$0xff]   ;;  %v2355_v54 = vld [vmem:[%s2717_s6 + $0x130] ss:$8 sps:$4 sm:$0xff]   ;;  %v2358_v56 = vld [vmem:[%s2717_s6 + $0x144] ss:$8 sps:$4 sm:$0xff]  }
  0x58   : > { %1169 = vmatpush1.bf16.msra.mxu1 %v2342_v45  ;;  %v2360_v57 = vld [vmem:[%s2717_s6 + $0x40] ss:$8 sps:$4 sm:$0xff]   ;;  %v2362_v59 = vld [vmem:[%s2717_s6 + $0x54] ss:$8 sps:$4 sm:$0xff]   ;;  %v2366_v61 = vld [vmem:[%s2717_s6 + $0x50] ss:$8 sps:$4 sm:$0xff]  }
  0x59   : > { %1292 = vmatpush1.bf16.msra.mxu0 %v2343_v46  ;;  %1170 = vmatprep.subr.bf16.mxu1 %v2344_v47  ;;  %v2361_v58 = vld [vmem:[%s2717_s6 + $0x140] ss:$8 sps:$4 sm:$0xff]   ;;  %v2364_v60 = vld [vmem:[%s2717_s6 + $0x154] ss:$8 sps:$4 sm:$0xff]   ;;  %v2367_v62 = vld [vmem:[%s2717_s6 + $0x150] ss:$8 sps:$4 sm:$0xff]  }
  0x5a   : > { %1293 = vmatprep.subr.bf16.mxu0 %v2346_v48  ;;  %v2368_v63 = vld [vmem:[%s2717_s6 + $0x64] ss:$8 sps:$4 sm:$0xff]   ;;  %v2372_v1 = vld [vmem:[%s2717_s6 + $0x60] ss:$8 sps:$4 sm:$0xff]   ;;  %v2374_v3 = vld [vmem:[%s2717_s6 + $0x74] ss:$8 sps:$4 sm:$0xff]  }
  0x5b   : > { %v2370_v0 = vld [vmem:[%s2717_s6 + $0x164] ss:$8 sps:$4 sm:$0xff]   ;;  %v2373_v2 = vld [vmem:[%s2717_s6 + $0x160] ss:$8 sps:$4 sm:$0xff]   ;;  %v2376_v4 = vld [vmem:[%s2717_s6 + $0x174] ss:$8 sps:$4 sm:$0xff]  }
  0x5c   : > { %1171 = vmatpush1.bf16.msra.mxu1 %v2348_v49  ;;  %v2378_v5 = vld [vmem:[%s2717_s6 + $0x70] ss:$8 sps:$4 sm:$0xff]   ;;  %v2380_v7 = vld [vmem:[%s2717_s6 + $0x84] ss:$8 sps:$4 sm:$0xff]   ;;  %v2384_v9 = vld [vmem:[%s2717_s6 + $0x80] ss:$8 sps:$4 sm:$0xff]  }
  0x5d   : > { %1294 = vmatpush1.bf16.msra.mxu0 %v2349_v50  ;;  %1172 = vmatprep.subr.bf16.mxu1 %v2350_v51  ;;  %v2379_v6 = vld [vmem:[%s2717_s6 + $0x170] ss:$8 sps:$4 sm:$0xff]   ;;  %v2382_v8 = vld [vmem:[%s2717_s6 + $0x184] ss:$8 sps:$4 sm:$0xff]   ;;  %v2385_v10 = vld [vmem:[%s2717_s6 + $0x180] ss:$8 sps:$4 sm:$0xff]  }
  0x5e   : > { %1295 = vmatprep.subr.bf16.mxu0 %v2352_v52  ;;  %v2386_v11 = vld [vmem:[%s2717_s6 + $0x94] ss:$8 sps:$4 sm:$0xff]   ;;  %v2390_v13 = vld [vmem:[%s2717_s6 + $0x90] ss:$8 sps:$4 sm:$0xff]   ;;  %v2392_v15 = vld [vmem:[%s2717_s6 + $0xa4] ss:$8 sps:$4 sm:$0xff]  }
  0x5f   : > { %v2388_v12 = vld [vmem:[%s2717_s6 + $0x194] ss:$8 sps:$4 sm:$0xff]   ;;  %v2391_v14 = vld [vmem:[%s2717_s6 + $0x190] ss:$8 sps:$4 sm:$0xff]   ;;  %v2394_v16 = vld [vmem:[%s2717_s6 + $0x1a4] ss:$8 sps:$4 sm:$0xff]  }
  0x60   : > { %1173 = vmatpush1.bf16.msra.mxu1 %v2354_v53  ;;  %v2396_v17 = vld [vmem:[%s2717_s6 + $0xa0] ss:$8 sps:$4 sm:$0xff]   ;;  %v2398_v19 = vld [vmem:[%s2717_s6 + $0xb4] ss:$8 sps:$4 sm:$0xff]   ;;  %v2402_v21 = vld [vmem:[%s2717_s6 + $0xb0] ss:$8 sps:$4 sm:$0xff]  }
  0x61   : > { %1296 = vmatpush1.bf16.msra.mxu0 %v2355_v54  ;;  %1174 = vmatprep.subr.bf16.mxu1 %v2356_v55  ;;  %v2397_v18 = vld [vmem:[%s2717_s6 + $0x1a0] ss:$8 sps:$4 sm:$0xff]   ;;  %v2400_v20 = vld [vmem:[%s2717_s6 + $0x1b4] ss:$8 sps:$4 sm:$0xff]   ;;  %v2403_v22 = vld [vmem:[%s2717_s6 + $0x1b0] ss:$8 sps:$4 sm:$0xff]  }
  0x62   : > { %1297 = vmatprep.subr.bf16.mxu0 %v2358_v56  ;;  %v2404_v23 = vld [vmem:[%s2717_s6 + $0xc4] ss:$8 sps:$4 sm:$0xff]   ;;  %v2430_v24 = vld [vmem:[%s2734_s17 + $0x4] ss:$16 sps:$4 sm:$0xff]   ;;  %v2433_v26 = vld [vmem:[%s2734_s17 + $0xc] ss:$16 sps:$4 sm:$0xff]  }
  0x63   : > { %v2406_v25 = vld [vmem:[%s2717_s6 + $0x1c4] ss:$8 sps:$4 sm:$0xff]   ;;  %1198 = vmatprep.mubr.bf16.mxu1 %v2430_v24  ;;  %v2408_v27 = vld [vmem:[%s2717_s6 + $0xc0] ss:$8 sps:$4 sm:$0xff]   ;;  %1321 = vmatprep.mubr.bf16.mxu0 %v2433_v26  ;;  %v2410_v29 = vld [vmem:[%s2717_s6 + $0xd4] ss:$8 sps:$4 sm:$0xff]  }
  0x64   : > { %1175 = vmatpush1.bf16.msra.mxu1 %v2360_v57  ;;  %v2409_v28 = vld [vmem:[%s2717_s6 + $0x1c0] ss:$8 sps:$4 sm:$0xff]   ;;  %v2412_v30 = vld [vmem:[%s2717_s6 + $0x1d4] ss:$8 sps:$4 sm:$0xff]   ;;  %v2414_v31 = vld [vmem:[%s2717_s6 + $0xd0] ss:$8 sps:$4 sm:$0xff]  }
  0x65   : > { %1298 = vmatpush1.bf16.msra.mxu0 %v2361_v58  ;;  %1176 = vmatprep.subr.bf16.mxu1 %v2362_v59  ;;  %v2415_v32 = vld [vmem:[%s2717_s6 + $0x1d0] ss:$8 sps:$4 sm:$0xff]   ;;  %v2416_v33 = vld [vmem:[%s2717_s6 + $0xe4] ss:$8 sps:$4 sm:$0xff]   ;;  %v2420_v35 = vld [vmem:[%s2717_s6 + $0xe0] ss:$8 sps:$4 sm:$0xff]  }
  0x66   : > { %1299 = vmatprep.subr.bf16.mxu0 %v2364_v60  ;;  %v2418_v34 = vld [vmem:[%s2717_s6 + $0x1e4] ss:$8 sps:$4 sm:$0xff]   ;;  %v2421_v36 = vld [vmem:[%s2717_s6 + $0x1e0] ss:$8 sps:$4 sm:$0xff]   ;;  %v2422_v37 = vld [vmem:[%s2717_s6 + $0xf4] ss:$8 sps:$4 sm:$0xff]  }
  0x67   : > { %v2424_v38 = vld [vmem:[%s2717_s6 + $0x1f4] ss:$8 sps:$4 sm:$0xff]   ;;  %v2426_v39 = vld [vmem:[%s2717_s6 + $0xf0] ss:$8 sps:$4 sm:$0xff]   ;;  %p1484_p0 = scmp.eq.s32.totalorder %s2520_s20, 3  ;;  %p2190_p1 = scmp.ne.s32.totalorder %s2520_s20, 3 }
  0x68   : > { %1177 = vmatpush1.bf16.msra.mxu1 %v2366_v61  ;;  %v2427_v40 = vld [vmem:[%s2717_s6 + $0x1f0] ss:$8 sps:$4 sm:$0xff]   ;;  %v2428_v41 = vld [vmem:[%s2734_s17] ss:$16 sps:$4 sm:$0xff]   ;;  %v2431_v42 = vld [vmem:[%s2734_s17 + $0x8] ss:$16 sps:$4 sm:$0xff]  }
  0x69   : > { %1300 = vmatpush1.bf16.msra.mxu0 %v2367_v62  ;;  %1178 = vmatprep.subr.bf16.mxu1 %v2368_v63  ;;  %v2434_v43 = vld [vmem:[%s2734_s17 + $0x24] ss:$16 sps:$4 sm:$0xff]   ;;  %v2436_v44 = vld [vmem:[%s2734_s17 + $0x2c] ss:$16 sps:$4 sm:$0xff]   ;;  %v2438_v45 = vld [vmem:[%s2734_s17 + $0x20] ss:$16 sps:$4 sm:$0xff]  }
  0x6a   : > { %1301 = vmatprep.subr.bf16.mxu0 %v2370_v0  ;;  %v2439_v46 = vld [vmem:[%s2734_s17 + $0x28] ss:$16 sps:$4 sm:$0xff]   ;;  %v2440_v47 = vld [vmem:[%s2734_s17 + $0x44] ss:$16 sps:$4 sm:$0xff]   ;;  %v2442_v48 = vld [vmem:[%s2734_s17 + $0x4c] ss:$16 sps:$4 sm:$0xff]  }
  0x6b   : > { %v2444_v49 = vld [vmem:[%s2734_s17 + $0x40] ss:$16 sps:$4 sm:$0xff]   ;;  %v2445_v50 = vld [vmem:[%s2734_s17 + $0x48] ss:$16 sps:$4 sm:$0xff]   ;;  %v2446_v51 = vld [vmem:[%s2734_s17 + $0x64] ss:$16 sps:$4 sm:$0xff]  }
  0x6c   : > { %1179 = vmatpush1.bf16.msra.mxu1 %v2372_v1  ;;  %v2448_v52 = vld [vmem:[%s2734_s17 + $0x6c] ss:$16 sps:$4 sm:$0xff]   ;;  %v2450_v53 = vld [vmem:[%s2734_s17 + $0x60] ss:$16 sps:$4 sm:$0xff]   ;;  %v2451_v54 = vld [vmem:[%s2734_s17 + $0x68] ss:$16 sps:$4 sm:$0xff]  }
  0x6d   : > { %1302 = vmatpush1.bf16.msra.mxu0 %v2373_v2  ;;  %1180 = vmatprep.subr.bf16.mxu1 %v2374_v3  ;;  %v2452_v55 = vld [vmem:[%s2734_s17 + $0x84] ss:$16 sps:$4 sm:$0xff]   ;;  %v2454_v56 = vld [vmem:[%s2734_s17 + $0x8c] ss:$16 sps:$4 sm:$0xff]   ;;  %v2456_v57 = vld [vmem:[%s2734_s17 + $0x80] ss:$16 sps:$4 sm:$0xff]  }
  0x6e   : > { %1303 = vmatprep.subr.bf16.mxu0 %v2376_v4  ;;  %v2457_v58 = vld [vmem:[%s2734_s17 + $0x88] ss:$16 sps:$4 sm:$0xff]   ;;  %v2458_v59 = vld [vmem:[%s2734_s17 + $0xa4] ss:$16 sps:$4 sm:$0xff]   ;;  %v2460_v60 = vld [vmem:[%s2734_s17 + $0xac] ss:$16 sps:$4 sm:$0xff]  }
  0x6f   : > { %v2462_v61 = vld [vmem:[%s2734_s17 + $0xa0] ss:$16 sps:$4 sm:$0xff]   ;;  %v2463_v62 = vld [vmem:[%s2734_s17 + $0xa8] ss:$16 sps:$4 sm:$0xff]   ;;  %v2464_v63 = vld [vmem:[%s2734_s17 + $0xc4] ss:$16 sps:$4 sm:$0xff]  }
  0x70   : > { %1181 = vmatpush1.bf16.msra.mxu1 %v2378_v5  ;;  %v2466_v0 = vld [vmem:[%s2734_s17 + $0xcc] ss:$16 sps:$4 sm:$0xff]   ;;  %v2468_v1 = vld [vmem:[%s2734_s17 + $0xc0] ss:$16 sps:$4 sm:$0xff]   ;;  %v2469_v2 = vld [vmem:[%s2734_s17 + $0xc8] ss:$16 sps:$4 sm:$0xff]  }
  0x71   : > { %1304 = vmatpush1.bf16.msra.mxu0 %v2379_v6  ;;  %1182 = vmatprep.subr.bf16.mxu1 %v2380_v7  ;;  %v2470_v3 = vld [vmem:[%s2734_s17 + $0xe4] ss:$16 sps:$4 sm:$0xff]   ;;  %v2472_v4 = vld [vmem:[%s2734_s17 + $0xec] ss:$16 sps:$4 sm:$0xff]   ;;  %v2474_v5 = vld [vmem:[%s2734_s17 + $0xe0] ss:$16 sps:$4 sm:$0xff]  }
  0x72   : > { %1305 = vmatprep.subr.bf16.mxu0 %v2382_v8  ;;  %v2475_v6 = vld [vmem:[%s2734_s17 + $0xe8] ss:$16 sps:$4 sm:$0xff]   ;;  %v2476_v7 = vld [vmem:[%s2734_s17 + $0x104] ss:$16 sps:$4 sm:$0xff]   ;;  %v2478_v8 = vld [vmem:[%s2734_s17 + $0x10c] ss:$16 sps:$4 sm:$0xff]  }
  0x74   : > { %1183 = vmatpush1.bf16.msra.mxu1 %v2384_v9  ;;  %v2480_v9 = vld [vmem:[%s2734_s17 + $0x100] ss:$16 sps:$4 sm:$0xff]  }
  0x75   : > { %1306 = vmatpush1.bf16.msra.mxu0 %v2385_v10  ;;  %1184 = vmatprep.subr.bf16.mxu1 %v2386_v11  ;;  %v2481_v10 = vld [vmem:[%s2734_s17 + $0x108] ss:$16 sps:$4 sm:$0xff]  }
  0x76   : > { %1307 = vmatprep.subr.bf16.mxu0 %v2388_v12  ;;  %v530_v12 = vld [vmem:[#allocation2] sm:$0xff] }
  0x78   : > { %1185 = vmatpush1.bf16.msra.mxu1 %v2390_v13 }
  0x79   : > { %1308 = vmatpush1.bf16.msra.mxu0 %v2391_v14  ;;  %1186 = vmatprep.subr.bf16.mxu1 %v2392_v15 }
  0x7a   : > { %1309 = vmatprep.subr.bf16.mxu0 %v2394_v16  ;;  %v531_v16 = vld [vmem:[#allocation2 + $0x8] sm:$0xff] }
  0x7c   : > { %1187 = vmatpush1.bf16.msra.mxu1 %v2396_v17 }
  0x7d   : > { %1310 = vmatpush1.bf16.msra.mxu0 %v2397_v18  ;;  %1188 = vmatprep.subr.bf16.mxu1 %v2398_v19 }
  0x7e   : > { %1311 = vmatprep.subr.bf16.mxu0 %v2400_v20  ;;  %v532_v20 = vld [vmem:[#allocation2 + $0x10] sm:$0xff] }
  0x80   : > { %1189 = vmatpush1.bf16.msra.mxu1 %v2402_v21 }
  0x81   : > { %1312 = vmatpush1.bf16.msra.mxu0 %v2403_v22  ;;  %1190 = vmatprep.subr.bf16.mxu1 %v2404_v23 }
  0x82   : > { %1313 = vmatprep.subr.bf16.mxu0 %v2406_v25  ;;  %v533_v25 = vld [vmem:[#allocation2 + $0x18] sm:$0xff] }
  0x84   : > { %1191 = vmatpush1.bf16.msra.mxu1 %v2408_v27 }
  0x85   : > { %1314 = vmatpush1.bf16.msra.mxu0 %v2409_v28  ;;  %1192 = vmatprep.subr.bf16.mxu1 %v2410_v29 }
  0x86   : > { %1315 = vmatprep.subr.bf16.mxu0 %v2412_v30 }
  0x88   : > { %1193 = vmatpush1.bf16.msra.mxu1 %v2414_v31 }
  0x89   : > { %1316 = vmatpush1.bf16.msra.mxu0 %v2415_v32  ;;  %1194 = vmatprep.subr.bf16.mxu1 %v2416_v33  ;;  %v534_v32 = vld [vmem:[#allocation2 + $0x20] sm:$0xff] }
  0x8a   : > { %1317 = vmatprep.subr.bf16.mxu0 %v2418_v34 }
  0x8c   : > { %1195 = vmatpush1.bf16.msra.mxu1 %v2420_v35 }
  0x8d   : > { %1318 = vmatpush1.bf16.msra.mxu0 %v2421_v36  ;;  %1196 = vmatprep.subr.bf16.mxu1 %v2422_v37  ;;  %v535_v36 = vld [vmem:[#allocation2 + $0x28] sm:$0xff] }
  0x8e   : > { %1319 = vmatprep.subr.bf16.mxu0 %v2424_v38 }
  0x90   : > { %1197 = vmatpush1.bf16.msra.mxu1 %v2426_v39 }
  0x91   : > { %1320 = vmatpush1.bf16.msra.mxu0 %v2427_v40  ;;  %v536_v40 = vld [vmem:[#allocation2 + $0x30] sm:$0xff] }
  0x93   : > { %1199 = vmatmul.mubr.bf16.vlgmr.msra.gmra.mrb[0].mxu1 %v2428_v41 }
  0x94   : > { %1322 = vmatmul.mubr.bf16.vlgmr.msra.gmra.mrb[0].mxu0 %v2431_v42  ;;  %1208 = vmatprep.mubr.bf16.mxu1 %v2434_v43 }
  0x95   : > { %1331 = vmatprep.mubr.bf16.mxu0 %v2436_v44 }
  0x9b   : > { %1209 = vmatmul.mubr.bf16.gmra.mrb[4].mxu1 %v2438_v45  ;;  %v537_v45 = vld [vmem:[#allocation2 + $0x38] sm:$0xff] }
  0x9c   : > { %1332 = vmatmul.mubr.bf16.gmra.mrb[4].mxu0 %v2439_v46  ;;  %1218 = vmatprep.mubr.bf16.mxu1 %v2440_v47 }
  0x9d   : > { %1341 = vmatprep.mubr.bf16.mxu0 %v2442_v48 }
  0xa3   : > { %1219 = vmatmul.mubr.bf16.gmra.mrb[8].mxu1 %v2444_v49 }
  0xa4   : > { %1342 = vmatmul.mubr.bf16.gmra.mrb[8].mxu0 %v2445_v50  ;;  %1228 = vmatprep.mubr.bf16.mxu1 %v2446_v51 }
  0xa5   : > { %1351 = vmatprep.mubr.bf16.mxu0 %v2448_v52  ;;  %v538_v52 = vld [vmem:[#allocation2 + $0x40] sm:$0xff] }
  0xab   : > { %1229 = vmatmul.mubr.bf16.gmra.mrb[12].mxu1 %v2450_v53 }
  0xac   : > { %1352 = vmatmul.mubr.bf16.gmra.mrb[12].mxu0 %v2451_v54  ;;  %1238 = vmatprep.mubr.bf16.mxu1 %v2452_v55 }
  0xad   : > { %1361 = vmatprep.mubr.bf16.mxu0 %v2454_v56  ;;  %v539_v56 = vld [vmem:[#allocation2 + $0x48] sm:$0xff] }
  0xb3   : > { %1239 = vmatmul.mubr.bf16.gmra.mrb[16].mxu1 %v2456_v57 }
  0xb4   : > { %1362 = vmatmul.mubr.bf16.gmra.mrb[16].mxu0 %v2457_v58  ;;  %1248 = vmatprep.mubr.bf16.mxu1 %v2458_v59 }
  0xb5   : > { %1371 = vmatprep.mubr.bf16.mxu0 %v2460_v60  ;;  %v540_v60 = vld [vmem:[#allocation2 + $0x50] sm:$0xff] }
  0xbb   : > { %1249 = vmatmul.mubr.bf16.gmra.mrb[20].mxu1 %v2462_v61 }
  0xbc   : > { %1372 = vmatmul.mubr.bf16.gmra.mrb[20].mxu0 %v2463_v62  ;;  %1258 = vmatprep.mubr.bf16.mxu1 %v2464_v63 }
  0xbd   : > { %1381 = vmatprep.mubr.bf16.mxu0 %v2466_v0 }
  0xc3   : > { %1259 = vmatmul.mubr.bf16.gmra.mrb[24].mxu1 %v2468_v1  ;;  %v541_v1 = vld [vmem:[#allocation2 + $0x58] sm:$0xff] }
  0xc4   : > { %1382 = vmatmul.mubr.bf16.gmra.mrb[24].mxu0 %v2469_v2  ;;  %1268 = vmatprep.mubr.bf16.mxu1 %v2470_v3 }
  0xc5   : > { %1391 = vmatprep.mubr.bf16.mxu0 %v2472_v4 }
  0xcb   : > { %1269 = vmatmul.mubr.bf16.gmra.mrb[28].mxu1 %v2474_v5 }
  0xcc   : > { %1392 = vmatmul.mubr.bf16.gmra.mrb[28].mxu0 %v2475_v6  ;;  %1278 = vmatprep.mubr.bf16.mxu1 %v2476_v7 }
  0xcd   : > { %1401 = vmatprep.mubr.bf16.mxu0 %v2478_v8  ;;  %v542_v8 = vld [vmem:[#allocation2 + $0x60] sm:$0xff] }
  0xd3   : > { %1279 = vmatmul.mubr.bf16.gmra.mrb[32].mxu1 %v2480_v9 }
  0xd4   : > { %1402 = vmatmul.mubr.bf16.gmra.mrb[32].mxu0 %v2481_v10 }
 0x166   : > { %v1200_v11 = vpop.f32.mrb[0].mxu1 }
 0x167   : > { %v1323_v13 = vpop.f32.mrb[0].mxu0  ;;  %v1202_v15 = vpop.f32.mrb[1].mxu1 }
 0x168   : > { %v1324_v14 = vadd.f32 %v1323_v13, %v1200_v11  ;;  %v1325_v17 = vpop.f32.mrb[1].mxu0  ;;  %v1204_v19 = vpop.f32.mrb[2].mxu1 }
 0x169   : > { %v1326_v18 = vadd.f32 %v1325_v17, %v1202_v15  ;;  %v1327_v21 = vpop.f32.mrb[2].mxu0  ;;  %v1206_v24 = vpop.f32.mrb[3].mxu1 }
 0x16a   : > { %v1412_v22 = vadd.f32 %v1324_v14, %v530_v12  ;;  %v1328_v23 = vadd.f32 %v1327_v21, %v1204_v19  ;;  %v1329_v26 = vpop.f32.mrb[3].mxu0  ;;  %v543_v12 = vld [vmem:[#allocation2 + $0x68] sm:$0xff]  ;;  %v545_v21 = vld [vmem:[#allocation2 + $0x78] sm:$0xff] }
 0x16b   : > { %v1413_v27 = vadd.f32 %v1326_v18, %v531_v16  ;;  %v1330_v28 = vadd.f32 %v1329_v26, %v1206_v24  ;;  %v544_v16 = vld [vmem:[#allocation2 + $0x70] sm:$0xff] }
 0x16c   : > { %1448 = vst [vmem:[#allocation2] sm:$0xff] %v1412_v22  ;;  %v1414_v29 = vadd.f32 %v1328_v23, %v532_v20 }
 0x16d   : > { %1449 = vst [vmem:[#allocation2 + $0x8] sm:$0xff] %v1413_v27  ;;  %v1415_v30 = vadd.f32 %v1330_v28, %v533_v25  ;;  %v546_v28 = vld [vmem:[#allocation2 + $0x80] sm:$0xff] }
 0x16e   : > { %1450 = vst [vmem:[#allocation2 + $0x10] sm:$0xff] %v1414_v29  ;;  %v1210_v31 = vpop.f32.mrb[4].mxu1 }
 0x16f   : > { %1451 = vst [vmem:[#allocation2 + $0x18] sm:$0xff] %v1415_v30  ;;  %v1333_v33 = vpop.f32.mrb[4].mxu0  ;;  %v1212_v35 = vpop.f32.mrb[5].mxu1 }
 0x170   : > { %v1334_v34 = vadd.f32 %v1333_v33, %v1210_v31  ;;  %v1335_v37 = vpop.f32.mrb[5].mxu0  ;;  %v1214_v39 = vpop.f32.mrb[6].mxu1 }
 0x171   : > { %v1336_v38 = vadd.f32 %v1335_v37, %v1212_v35  ;;  %v1337_v41 = vpop.f32.mrb[6].mxu0  ;;  %v1216_v44 = vpop.f32.mrb[7].mxu1 }
 0x172   : > { %v1416_v42 = vadd.f32 %v1334_v34, %v534_v32  ;;  %v1338_v43 = vadd.f32 %v1337_v41, %v1214_v39  ;;  %v1339_v46 = vpop.f32.mrb[7].mxu0  ;;  %v547_v32 = vld [vmem:[#allocation2 + $0x88] sm:$0xff]  ;;  %v549_v41 = vld [vmem:[#allocation2 + $0x98] sm:$0xff] }
 0x173   : > { %v1417_v47 = vadd.f32 %v1336_v38, %v535_v36  ;;  %v1340_v48 = vadd.f32 %v1339_v46, %v1216_v44  ;;  %v548_v36 = vld [vmem:[#allocation2 + $0x90] sm:$0xff] }
 0x174   : > { %1452 = vst [vmem:[#allocation2 + $0x20] sm:$0xff] %v1416_v42  ;;  %v1418_v49 = vadd.f32 %v1338_v43, %v536_v40 }
 0x175   : > { %1453 = vst [vmem:[#allocation2 + $0x28] sm:$0xff] %v1417_v47  ;;  %v1419_v50 = vadd.f32 %v1340_v48, %v537_v45  ;;  %v550_v48 = vld [vmem:[#allocation2 + $0xa0] sm:$0xff] }
 0x176   : > { %1454 = vst [vmem:[#allocation2 + $0x30] sm:$0xff] %v1418_v49  ;;  %v1220_v51 = vpop.f32.mrb[8].mxu1 }
 0x177   : > { %1455 = vst [vmem:[#allocation2 + $0x38] sm:$0xff] %v1419_v50  ;;  %v1343_v53 = vpop.f32.mrb[8].mxu0  ;;  %v1222_v55 = vpop.f32.mrb[9].mxu1 }
 0x178   : > { %v1344_v54 = vadd.f32 %v1343_v53, %v1220_v51  ;;  %v1345_v57 = vpop.f32.mrb[9].mxu0  ;;  %v1224_v59 = vpop.f32.mrb[10].mxu1 }
 0x179   : > { %v1346_v58 = vadd.f32 %v1345_v57, %v1222_v55  ;;  %v1347_v61 = vpop.f32.mrb[10].mxu0  ;;  %v1226_v0 = vpop.f32.mrb[11].mxu1 }
 0x17a   : > { %v1420_v62 = vadd.f32 %v1344_v54, %v538_v52  ;;  %v1348_v63 = vadd.f32 %v1347_v61, %v1224_v59  ;;  %v1349_v2 = vpop.f32.mrb[11].mxu0  ;;  %v551_v52 = vld [vmem:[#allocation2 + $0xa8] sm:$0xff]  ;;  %v553_v61 = vld [vmem:[#allocation2 + $0xb8] sm:$0xff] }
 0x17b   : > { %v1421_v3 = vadd.f32 %v1346_v58, %v539_v56  ;;  %v1350_v4 = vadd.f32 %v1349_v2, %v1226_v0  ;;  %v552_v56 = vld [vmem:[#allocation2 + $0xb0] sm:$0xff] }
 0x17c   : > { %1456 = vst [vmem:[#allocation2 + $0x40] sm:$0xff] %v1420_v62  ;;  %v1422_v5 = vadd.f32 %v1348_v63, %v540_v60 }
 0x17d   : > { %1457 = vst [vmem:[#allocation2 + $0x48] sm:$0xff] %v1421_v3  ;;  %v1423_v6 = vadd.f32 %v1350_v4, %v541_v1  ;;  %v554_v4 = vld [vmem:[#allocation2 + $0xc0] sm:$0xff] }
 0x17e   : > { %1458 = vst [vmem:[#allocation2 + $0x50] sm:$0xff] %v1422_v5  ;;  %v1230_v7 = vpop.f32.mrb[12].mxu1 }
 0x17f   : > { %1459 = vst [vmem:[#allocation2 + $0x58] sm:$0xff] %v1423_v6  ;;  %v1353_v9 = vpop.f32.mrb[12].mxu0  ;;  %v1232_v11 = vpop.f32.mrb[13].mxu1 }
 0x180   : > { %v1354_v10 = vadd.f32 %v1353_v9, %v1230_v7  ;;  %v1355_v13 = vpop.f32.mrb[13].mxu0  ;;  %v1234_v15 = vpop.f32.mrb[14].mxu1 }
 0x181   : > { %v1356_v14 = vadd.f32 %v1355_v13, %v1232_v11  ;;  %v1357_v17 = vpop.f32.mrb[14].mxu0  ;;  %v1236_v20 = vpop.f32.mrb[15].mxu1 }
 0x182   : > { %v1424_v18 = vadd.f32 %v1354_v10, %v542_v8  ;;  %v1358_v19 = vadd.f32 %v1357_v17, %v1234_v15  ;;  %v1359_v22 = vpop.f32.mrb[15].mxu0  ;;  %v555_v8 = vld [vmem:[#allocation2 + $0xc8] sm:$0xff]  ;;  %v557_v17 = vld [vmem:[#allocation2 + $0xd8] sm:$0xff] }
 0x183   : > { %v1425_v23 = vadd.f32 %v1356_v14, %v543_v12  ;;  %v1360_v24 = vadd.f32 %v1359_v22, %v1236_v20  ;;  %v556_v12 = vld [vmem:[#allocation2 + $0xd0] sm:$0xff] }
 0x184   : > { %1460 = vst [vmem:[#allocation2 + $0x60] sm:$0xff] %v1424_v18  ;;  %v1426_v25 = vadd.f32 %v1358_v19, %v544_v16 }
 0x185   : > { %1461 = vst [vmem:[#allocation2 + $0x68] sm:$0xff] %v1425_v23  ;;  %v1427_v26 = vadd.f32 %v1360_v24, %v545_v21  ;;  %v558_v24 = vld [vmem:[#allocation2 + $0xe0] sm:$0xff] }
 0x186   : > { %1462 = vst [vmem:[#allocation2 + $0x70] sm:$0xff] %v1426_v25  ;;  %v1240_v27 = vpop.f32.mrb[16].mxu1 }
 0x187   : > { %1463 = vst [vmem:[#allocation2 + $0x78] sm:$0xff] %v1427_v26  ;;  %v1363_v29 = vpop.f32.mrb[16].mxu0  ;;  %v1242_v31 = vpop.f32.mrb[17].mxu1 }
 0x188   : > { %v1364_v30 = vadd.f32 %v1363_v29, %v1240_v27  ;;  %v1365_v33 = vpop.f32.mrb[17].mxu0  ;;  %v1244_v35 = vpop.f32.mrb[18].mxu1 }
 0x189   : > { %v1366_v34 = vadd.f32 %v1365_v33, %v1242_v31  ;;  %v1367_v37 = vpop.f32.mrb[18].mxu0  ;;  %v1246_v40 = vpop.f32.mrb[19].mxu1 }
 0x18a   : > { %v1428_v38 = vadd.f32 %v1364_v30, %v546_v28  ;;  %v1368_v39 = vadd.f32 %v1367_v37, %v1244_v35  ;;  %v1369_v42 = vpop.f32.mrb[19].mxu0  ;;  %v559_v28 = vld [vmem:[#allocation2 + $0xe8] sm:$0xff]  ;;  %v561_v37 = vld [vmem:[#allocation2 + $0xf8] sm:$0xff] }
 0x18b   : > { %v1429_v43 = vadd.f32 %v1366_v34, %v547_v32  ;;  %v1370_v44 = vadd.f32 %v1369_v42, %v1246_v40  ;;  %v560_v32 = vld [vmem:[#allocation2 + $0xf0] sm:$0xff] }
 0x18c   : > { %1464 = vst [vmem:[#allocation2 + $0x80] sm:$0xff] %v1428_v38  ;;  %v1430_v45 = vadd.f32 %v1368_v39, %v548_v36 }
 0x18d   : > { %1465 = vst [vmem:[#allocation2 + $0x88] sm:$0xff] %v1429_v43  ;;  %v1431_v46 = vadd.f32 %v1370_v44, %v549_v41  ;;  %v562_v44 = vld [vmem:[#allocation2 + $0x100] sm:$0xff] }
 0x18e   : > { %1466 = vst [vmem:[#allocation2 + $0x90] sm:$0xff] %v1430_v45  ;;  %v1250_v47 = vpop.f32.mrb[20].mxu1 }
 0x18f   : > { %1467 = vst [vmem:[#allocation2 + $0x98] sm:$0xff] %v1431_v46  ;;  %v1373_v49 = vpop.f32.mrb[20].mxu0  ;;  %v1252_v51 = vpop.f32.mrb[21].mxu1 }
 0x190   : > { %v1374_v50 = vadd.f32 %v1373_v49, %v1250_v47  ;;  %v1375_v53 = vpop.f32.mrb[21].mxu0  ;;  %v1254_v55 = vpop.f32.mrb[22].mxu1 }
 0x191   : > { %v1376_v54 = vadd.f32 %v1375_v53, %v1252_v51  ;;  %v1377_v57 = vpop.f32.mrb[22].mxu0  ;;  %v1256_v60 = vpop.f32.mrb[23].mxu1 }
 0x192   : > { %v1432_v58 = vadd.f32 %v1374_v50, %v550_v48  ;;  %v1378_v59 = vadd.f32 %v1377_v57, %v1254_v55  ;;  %v1379_v62 = vpop.f32.mrb[23].mxu0  ;;  %v563_v48 = vld [vmem:[#allocation2 + $0x108] sm:$0xff]  ;;  %v565_v57 = vld [vmem:[#allocation2 + $0x118] sm:$0xff] }
 0x193   : > { %v1433_v63 = vadd.f32 %v1376_v54, %v551_v52  ;;  %v1380_v0 = vadd.f32 %v1379_v62, %v1256_v60  ;;  %v564_v52 = vld [vmem:[#allocation2 + $0x110] sm:$0xff] }
 0x194   : > { %1468 = vst [vmem:[#allocation2 + $0xa0] sm:$0xff] %v1432_v58  ;;  %v1434_v1 = vadd.f32 %v1378_v59, %v552_v56 }
 0x195   : > { %1469 = vst [vmem:[#allocation2 + $0xa8] sm:$0xff] %v1433_v63  ;;  %v1435_v2 = vadd.f32 %v1380_v0, %v553_v61  ;;  %v1488_v63 = vld [vmem:[#allocation2] sm:$0xff] (!%p2190_p1)  ;;  %v1489_v0 = vld [vmem:[#allocation2 + $0x8] sm:$0xff] (!%p2190_p1) }
 0x196   : > { %1470 = vst [vmem:[#allocation2 + $0xb0] sm:$0xff] %v1434_v1  ;;  %v1260_v3 = vpop.f32.mrb[24].mxu1  ;;  %v1490_v1 = vld [vmem:[#allocation2 + $0x10] sm:$0xff] (!%p2190_p1) }
 0x197   : > { %1471 = vst [vmem:[#allocation2 + $0xb8] sm:$0xff] %v1435_v2  ;;  %v1383_v5 = vpop.f32.mrb[24].mxu0  ;;  %v1262_v7 = vpop.f32.mrb[25].mxu1  ;;  %v2214_v2 = vpack.c.bf16 (!%p2190_p1), %v1489_v0, %v1488_v63 }
 0x198   : > { %v1384_v6 = vadd.f32 %v1383_v5, %v1260_v3  ;;  %v1385_v9 = vpop.f32.mrb[25].mxu0  ;;  %v1264_v11 = vpop.f32.mrb[26].mxu1  ;;  %v1722_v3 = vmul.f32 (!%p2190_p1), %v1488_v63, %v1488_v63  ;;  %v1491_v5 = vld [vmem:[#allocation2 + $0x18] sm:$0xff] (!%p2190_p1) }
 0x199   : > { %v1386_v10 = vadd.f32 %v1385_v9, %v1262_v7  ;;  %v1387_v13 = vpop.f32.mrb[26].mxu0  ;;  %v1266_v16 = vpop.f32.mrb[27].mxu1  ;;  %v1492_v7 = vld [vmem:[#allocation2 + $0x20] sm:$0xff] (!%p2190_p1)  ;;  %v2215_v9 = vpack.c.bf16 (!%p2190_p1), %v1491_v5, %v1490_v1  ;;  %1632 = vst [vmem:[%s2722_s11] sm:$0xff] (!%p2190_p1), %v2214_v2 }
 0x19a   : > { %v1436_v14 = vadd.f32 %v1384_v6, %v554_v4  ;;  %v1388_v15 = vadd.f32 %v1387_v13, %v1264_v11  ;;  %v1389_v18 = vpop.f32.mrb[27].mxu0  ;;  %v1723_v4 = vmul.f32 (!%p2190_p1), %v1489_v0, %v1489_v0  ;;  %v1651_v6 = vadd.f32 (!%p2190_p1), %v1490_v1, %v1488_v63  ;;  %v1494_v13 = vld [vmem:[#allocation2 + $0x30] sm:$0xff] (!%p2190_p1) }
 0x19b   : > { %v1437_v19 = vadd.f32 %v1386_v10, %v555_v8  ;;  %v1390_v20 = vadd.f32 %v1389_v18, %v1266_v16  ;;  %v1493_v8 = vld [vmem:[#allocation2 + $0x28] sm:$0xff] (!%p2190_p1)  ;;  %v1674_v10 = vadd.f32 (!%p2190_p1), %v1491_v5, %v1489_v0  ;;  %v1724_v11 = vmul.f32 (!%p2190_p1), %v1490_v1, %v1490_v1  ;;  %1633 = vst [vmem:[%s2722_s11 + $0x8] sm:$0xff] (!%p2190_p1), %v2215_v9  ;;  %v1506_v0 = vld [vmem:[#allocation2 + $0x90] sm:$0xff] (!%p2190_p1)  ;;  %v1507_v1 = vld [vmem:[#allocation2 + $0x98] sm:$0xff] (!%p2190_p1) }
 0x19c   : > { %1472 = vst [vmem:[#allocation2 + $0xc0] sm:$0xff] %v1436_v14  ;;  %v1438_v21 = vadd.f32 %v1388_v15, %v556_v12  ;;  %v1725_v12 = vmul.f32 (!%p2190_p1), %v1491_v5, %v1491_v5  ;;  %v1495_v14 = vld [vmem:[#allocation2 + $0x38] sm:$0xff] (!%p2190_p1)  ;;  %v2216_v15 = vpack.c.bf16 (!%p2190_p1), %v1493_v8, %v1492_v7  ;;  %v1652_v16 = vadd.f32 (!%p2190_p1), %v1651_v6, %v1492_v7  ;;  %v1508_v9 = vld [vmem:[#allocation2 + $0xa0] sm:$0xff] (!%p2190_p1) }
 0x19d   : > { %1473 = vst [vmem:[#allocation2 + $0xc8] sm:$0xff] %v1437_v19  ;;  %v1439_v22 = vadd.f32 %v1390_v20, %v557_v17  ;;  %v1726_v17 = vmul.f32 (!%p2190_p1), %v1492_v7, %v1492_v7  ;;  %v1727_v18 = vmul.f32 (!%p2190_p1), %v1493_v8, %v1493_v8  ;;  %v1496_v19 = vld [vmem:[#allocation2 + $0x40] sm:$0xff] (!%p2190_p1)  ;;  %v1758_v20 = vadd.f32 (!%p2190_p1), %v1724_v11, %v1722_v3 }
 0x19e   : > { %1474 = vst [vmem:[#allocation2 + $0xd0] sm:$0xff] %v1438_v21  ;;  %v1270_v23 = vpop.f32.mrb[28].mxu1  ;;  %v1781_v21 = vadd.f32 (!%p2190_p1), %v1725_v12, %v1723_v4  ;;  %1634 = vst [vmem:[%s2722_s11 + $0x10] sm:$0xff] (!%p2190_p1), %v2216_v15  ;;  %v2223_v4 = vpack.c.bf16 (!%p2190_p1), %v1507_v1, %v1506_v0  ;;  %v1740_v12 = vmul.f32 (!%p2190_p1), %v1506_v0, %v1506_v0  ;;  %v1510_v15 = vld [vmem:[#allocation2 + $0xb0] sm:$0xff] (!%p2190_p1) }
 0x19f   : > { %1475 = vst [vmem:[#allocation2 + $0xd8] sm:$0xff] %v1439_v22  ;;  %v1393_v25 = vpop.f32.mrb[28].mxu0  ;;  %v1272_v27 = vpop.f32.mrb[29].mxu1  ;;  %v1675_v22 = vadd.f32 (!%p2190_p1), %v1674_v10, %v1493_v8  ;;  %v1509_v10 = vld [vmem:[#allocation2 + $0xa8] sm:$0xff] (!%p2190_p1) }
 0x1a0   : > { %v1394_v26 = vadd.f32 %v1393_v25, %v1270_v23  ;;  %v1395_v29 = vpop.f32.mrb[29].mxu0  ;;  %v1274_v31 = vpop.f32.mrb[30].mxu1  ;;  %v2217_v23 = vpack.c.bf16 (!%p2190_p1), %v1495_v14, %v1494_v13  ;;  %v1498_v25 = vld [vmem:[#allocation2 + $0x50] sm:$0xff] (!%p2190_p1)  ;;  %1641 = vst [vmem:[%s2722_s11 + $0x48] sm:$0xff] (!%p2190_p1), %v2223_v4 }
 0x1a1   : > { %v1396_v30 = vadd.f32 %v1395_v29, %v1272_v27  ;;  %v1397_v33 = vpop.f32.mrb[30].mxu0  ;;  %v1276_v36 = vpop.f32.mrb[31].mxu1  ;;  %v1728_v27 = vmul.f32 (!%p2190_p1), %v1494_v13, %v1494_v13 }
 0x1a2   : > { %v1440_v34 = vadd.f32 %v1394_v26, %v558_v24  ;;  %v1398_v35 = vadd.f32 %v1397_v33, %v1274_v31  ;;  %v1399_v38 = vpop.f32.mrb[31].mxu0  ;;  %v1497_v24 = vld [vmem:[#allocation2 + $0x48] sm:$0xff] (!%p2190_p1)  ;;  %v1653_v26 = vadd.f32 (!%p2190_p1), %v1652_v16, %v1494_v13  ;;  %v1759_v31 = vadd.f32 (!%p2190_p1), %v1758_v20, %v1726_v17  ;;  %1635 = vst [vmem:[%s2722_s11 + $0x18] sm:$0xff] (!%p2190_p1), %v2217_v23  ;;  %v1511_v16 = vld [vmem:[#allocation2 + $0xb8] sm:$0xff] (!%p2190_p1) }
 0x1a3   : > { %v1441_v39 = vadd.f32 %v1396_v30, %v559_v28  ;;  %v1400_v40 = vadd.f32 %v1399_v38, %v1276_v36  ;;  %v1729_v28 = vmul.f32 (!%p2190_p1), %v1495_v14, %v1495_v14  ;;  %v2218_v29 = vpack.c.bf16 (!%p2190_p1), %v1497_v24, %v1496_v19  ;;  %v1499_v30 = vld [vmem:[#allocation2 + $0x58] sm:$0xff] (!%p2190_p1)  ;;  %v1501_v36 = vld [vmem:[#allocation2 + $0x68] sm:$0xff] (!%p2190_p1) }
 0x1a4   : > { %1476 = vst [vmem:[#allocation2 + $0xe0] sm:$0xff] %v1440_v34  ;;  %v1442_v41 = vadd.f32 %v1398_v35, %v560_v32  ;;  %v1782_v32 = vadd.f32 (!%p2190_p1), %v1781_v21, %v1727_v18  ;;  %v1676_v33 = vadd.f32 (!%p2190_p1), %v1675_v22, %v1495_v14  ;;  %v1730_v34 = vmul.f32 (!%p2190_p1), %v1496_v19, %v1496_v19  ;;  %v1500_v35 = vld [vmem:[#allocation2 + $0x60] sm:$0xff] (!%p2190_p1)  ;;  %v1513_v22 = vld [vmem:[#allocation2 + $0xc8] sm:$0xff] (!%p2190_p1) }
 0x1a5   : > { %1477 = vst [vmem:[#allocation2 + $0xe8] sm:$0xff] %v1441_v39  ;;  %v1443_v42 = vadd.f32 %v1400_v40, %v561_v37  ;;  %1636 = vst [vmem:[%s2722_s11 + $0x20] sm:$0xff] (!%p2190_p1), %v2218_v29  ;;  %v1654_v37 = vadd.f32 (!%p2190_p1), %v1653_v26, %v1496_v19  ;;  %v1731_v38 = vmul.f32 (!%p2190_p1), %v1497_v24, %v1497_v24  ;;  %v1512_v21 = vld [vmem:[#allocation2 + $0xc0] sm:$0xff] (!%p2190_p1) }
 0x1a6   : > { %1478 = vst [vmem:[#allocation2 + $0xf0] sm:$0xff] %v1442_v41  ;;  %v1280_v43 = vpop.f32.mrb[32].mxu1  ;;  %v2219_v39 = vpack.c.bf16 (!%p2190_p1), %v1499_v30, %v1498_v25  ;;  %v1732_v40 = vmul.f32 (!%p2190_p1), %v1498_v25, %v1498_v25  ;;  %v1760_v41 = vadd.f32 (!%p2190_p1), %v1759_v31, %v1728_v27  ;;  %v1741_v13 = vmul.f32 (!%p2190_p1), %v1507_v1, %v1507_v1  ;;  %v1515_v31 = vld [vmem:[#allocation2 + $0xd8] sm:$0xff] (!%p2190_p1) }
 0x1a7   : > { %1479 = vst [vmem:[#allocation2 + $0xf8] sm:$0xff] %v1443_v42  ;;  %v1403_v45 = vpop.f32.mrb[32].mxu0  ;;  %v1282_v47 = vpop.f32.mrb[33].mxu1  ;;  %v1783_v42 = vadd.f32 (!%p2190_p1), %v1782_v32, %v1729_v28  ;;  %v2224_v14 = vpack.c.bf16 (!%p2190_p1), %v1509_v10, %v1508_v9  ;;  %v2225_v20 = vpack.c.bf16 (!%p2190_p1), %v1511_v16, %v1510_v15  ;;  %v1743_v29 = vmul.f32 (!%p2190_p1), %v1509_v10, %v1509_v10 }
 0x1a8   : > { %v1404_v46 = vadd.f32 %v1403_v45, %v1280_v43  ;;  %v1405_v49 = vpop.f32.mrb[33].mxu0  ;;  %v1284_v51 = vpop.f32.mrb[34].mxu1  ;;  %v1677_v43 = vadd.f32 (!%p2190_p1), %v1676_v33, %v1497_v24  ;;  %v1502_v45 = vld [vmem:[#allocation2 + $0x70] sm:$0xff] (!%p2190_p1)  ;;  %1637 = vst [vmem:[%s2722_s11 + $0x28] sm:$0xff] (!%p2190_p1), %v2219_v39  ;;  %v1742_v24 = vmul.f32 (!%p2190_p1), %v1508_v9, %v1508_v9  ;;  %v1744_v33 = vmul.f32 (!%p2190_p1), %v1510_v15, %v1510_v15 }
 0x1a9   : > { %v1406_v50 = vadd.f32 %v1405_v49, %v1282_v47  ;;  %v1407_v53 = vpop.f32.mrb[34].mxu0  ;;  %v1286_v56 = vpop.f32.mrb[35].mxu1  ;;  %1487 = sbr.rel (%p2190_p1) target bundleno = 477 (0x1dd), region = 67  ;;  %v2220_v47 = vpack.c.bf16 (!%p2190_p1), %v1501_v36, %v1500_v35  ;;  %v1735_v49 = vmul.f32 (!%p2190_p1), %v1501_v36, %v1501_v36  ;;  %1642 = vst [vmem:[%s2722_s11 + $0x50] sm:$0xff] (!%p2190_p1), %v2224_v14  ;;  %1643 = vst [vmem:[%s2722_s11 + $0x58] sm:$0xff] (!%p2190_p1), %v2225_v20 }
 0x1aa   : > { %v1444_v54 = vadd.f32 %v1404_v46, %v562_v44  ;;  %v1408_v55 = vadd.f32 %v1407_v53, %v1284_v51  ;;  %v1409_v58 = vpop.f32.mrb[35].mxu0  ;;  %v1733_v44 = vmul.f32 (!%p2190_p1), %v1499_v30, %v1499_v30  ;;  %v1655_v46 = vadd.f32 (!%p2190_p1), %v1654_v37, %v1498_v25 }
 0x1ab   : > { %v1445_v59 = vadd.f32 %v1406_v50, %v563_v48  ;;  %v1410_v60 = vadd.f32 %v1409_v58, %v1286_v56  ;;  %v1734_v48 = vmul.f32 (!%p2190_p1), %v1500_v35, %v1500_v35  ;;  %v1503_v50 = vld [vmem:[#allocation2 + $0x78] sm:$0xff] (!%p2190_p1)  ;;  %v1761_v51 = vadd.f32 (!%p2190_p1), %v1760_v41, %v1730_v34  ;;  %v1505_v56 = vld [vmem:[#allocation2 + $0x88] sm:$0xff] (!%p2190_p1)  ;;  %1638 = vst [vmem:[%s2722_s11 + $0x30] sm:$0xff] (!%p2190_p1), %v2220_v47  ;;  %v1516_v39 = vld [vmem:[#allocation2 + $0xe0] sm:$0xff] (!%p2190_p1) }
 0x1ac   : > { %1480 = vst [vmem:[#allocation2 + $0x100] sm:$0xff] %v1444_v54  ;;  %v1446_v61 = vadd.f32 %v1408_v55, %v564_v52  ;;  %v1784_v52 = vadd.f32 (!%p2190_p1), %v1783_v42, %v1731_v38  ;;  %v1678_v53 = vadd.f32 (!%p2190_p1), %v1677_v43, %v1499_v30  ;;  %v2221_v54 = vpack.c.bf16 (!%p2190_p1), %v1503_v50, %v1502_v45  ;;  %v1504_v55 = vld [vmem:[#allocation2 + $0x80] sm:$0xff] (!%p2190_p1)  ;;  %v1514_v30 = vld [vmem:[#allocation2 + $0xd0] sm:$0xff] (!%p2190_p1) }
 0x1ad   : > { %1481 = vst [vmem:[#allocation2 + $0x108] sm:$0xff] %v1445_v59  ;;  %v1447_v62 = vadd.f32 %v1410_v60, %v565_v57  ;;  %v1656_v57 = vadd.f32 (!%p2190_p1), %v1655_v46, %v1500_v35  ;;  %v1736_v58 = vmul.f32 (!%p2190_p1), %v1502_v45, %v1502_v45  ;;  %v2222_v59 = vpack.c.bf16 (!%p2190_p1), %v1505_v56, %v1504_v55 }
 0x1ae   : > { %1482 = vst [vmem:[#allocation2 + $0x110] sm:$0xff] %v1446_v61  ;;  %v1762_v60 = vadd.f32 (!%p2190_p1), %v1761_v51, %v1732_v40  ;;  %v1785_v61 = vadd.f32 (!%p2190_p1), %v1784_v52, %v1733_v44  ;;  %1639 = vst [vmem:[%s2722_s11 + $0x38] sm:$0xff] (!%p2190_p1), %v2221_v54  ;;  %v1737_v63 = vmul.f32 (!%p2190_p1), %v1503_v50, %v1503_v50  ;;  %v1517_v40 = vld [vmem:[#allocation2 + $0xe8] sm:$0xff] (!%p2190_p1)  ;;  %v1519_v46 = vld [vmem:[#allocation2 + $0xf8] sm:$0xff] (!%p2190_p1) }
 0x1af   : > { %1483 = vst [vmem:[#allocation2 + $0x118] sm:$0xff] %v1447_v62  ;;  %v1679_v62 = vadd.f32 (!%p2190_p1), %v1678_v53, %v1501_v36  ;;  %v1657_v2 = vadd.f32 (!%p2190_p1), %v1656_v57, %v1502_v45  ;;  %1640 = vst [vmem:[%s2722_s11 + $0x40] sm:$0xff] (!%p2190_p1), %v2222_v59  ;;  %v1738_v3 = vmul.f32 (!%p2190_p1), %v1504_v55, %v1504_v55  ;;  %v1518_v45 = vld [vmem:[#allocation2 + $0xf0] sm:$0xff] (!%p2190_p1) }
 0x1b0   : > { %v1763_v5 = vadd.f32 %v1762_v60, %v1734_v48  ;;  %v1786_v6 = vadd.f32 %v1785_v61, %v1735_v49  ;;  %v1739_v8 = vmul.f32 %v1505_v56, %v1505_v56  ;;  %v2226_v25 = vpack.c.bf16 %v1513_v22, %v1512_v21 }
 0x1b1   : > { %v1680_v7 = vadd.f32 %v1679_v62, %v1503_v50  ;;  %v1658_v11 = vadd.f32 %v1657_v2, %v1504_v55  ;;  %v2227_v34 = vpack.c.bf16 %v1515_v31, %v1514_v30  ;;  %v1745_v38 = vmul.f32 %v1511_v16, %v1511_v16 }
 0x1b2   : > { %v1764_v17 = vadd.f32 %v1763_v5, %v1736_v58  ;;  %v1787_v18 = vadd.f32 %v1786_v6, %v1737_v63  ;;  %1644 = vst [vmem:[%s2722_s11 + $0x60] sm:$0xff] %v2226_v25  ;;  %v1746_v42 = vmul.f32 %v1512_v21, %v1512_v21  ;;  %v1747_v43 = vmul.f32 %v1513_v22, %v1513_v22 }
 0x1b3   : > { %v1681_v19 = vadd.f32 %v1680_v7, %v1505_v56  ;;  %v1659_v23 = vadd.f32 %v1658_v11, %v1506_v0  ;;  %1645 = vst [vmem:[%s2722_s11 + $0x68] sm:$0xff] %v2227_v34  ;;  %v2228_v44 = vpack.c.bf16 %v1517_v40, %v1516_v39  ;;  %v2229_v50 = vpack.c.bf16 %v1519_v46, %v1518_v45  ;;  %v1520_v51 = vld [vmem:[#allocation2 + $0x100] sm:$0xff] }
 0x1b4   : > { %v1765_v26 = vadd.f32 %v1764_v17, %v1738_v3  ;;  %v1788_v27 = vadd.f32 %v1787_v18, %v1739_v8  ;;  %v1521_v52 = vld [vmem:[#allocation2 + $0x108] sm:$0xff]  ;;  %v1748_v54 = vmul.f32 %v1514_v30, %v1514_v30  ;;  %v1749_v59 = vmul.f32 %v1515_v31, %v1515_v31 }
 0x1b5   : > { %v1682_v28 = vadd.f32 %v1681_v19, %v1507_v1  ;;  %v1660_v32 = vadd.f32 %v1659_v23, %v1508_v9  ;;  %1646 = vst [vmem:[%s2722_s11 + $0x70] sm:$0xff] %v2228_v44  ;;  %v2230_v55 = vpack.c.bf16 %v1521_v52, %v1520_v51  ;;  %1647 = vst [vmem:[%s2722_s11 + $0x78] sm:$0xff] %v2229_v50  ;;  %v1522_v60 = vld [vmem:[#allocation2 + $0x110] sm:$0xff] }
 0x1b6   : > { %v1766_v35 = vadd.f32 %v1765_v26, %v1740_v12  ;;  %v1789_v36 = vadd.f32 %v1788_v27, %v1741_v13  ;;  %v1523_v61 = vld [vmem:[#allocation2 + $0x118] sm:$0xff]  ;;  %v1750_v63 = vmul.f32 %v1516_v39, %v1516_v39  ;;  %v1751_v4 = vmul.f32 %v1517_v40, %v1517_v40 }
 0x1b7   : > { %v1683_v37 = vadd.f32 %v1682_v28, %v1509_v10  ;;  %v1661_v41 = vadd.f32 %v1660_v32, %v1510_v15  ;;  %1648 = vst [vmem:[%s2722_s11 + $0x80] sm:$0xff] %v2230_v55  ;;  %v2231_v0 = vpack.c.bf16 %v1523_v61, %v1522_v60  ;;  %v1752_v6 = vmul.f32 %v1518_v45, %v1518_v45 }
 0x1b8   : > { %v1767_v47 = vadd.f32 %v1766_v35, %v1742_v24  ;;  %v1790_v48 = vadd.f32 %v1789_v36, %v1743_v29  ;;  %v1753_v10 = vmul.f32 %v1519_v46, %v1519_v46  ;;  %v1754_v12 = vmul.f32 %v1520_v51, %v1520_v51 }
 0x1b9   : > { %v1684_v49 = vadd.f32 %v1683_v37, %v1511_v16  ;;  %v1662_v53 = vadd.f32 %v1661_v41, %v1512_v21  ;;  %1649 = vst [vmem:[%s2722_s11 + $0x88] sm:$0xff] %v2231_v0  ;;  %v1755_v16 = vmul.f32 %v1521_v52, %v1521_v52  ;;  %v1756_v18 = vmul.f32 %v1522_v60, %v1522_v60 }
 0x1ba   : > { %v1768_v56 = vadd.f32 %v1767_v47, %v1744_v33  ;;  %v1791_v57 = vadd.f32 %v1790_v48, %v1745_v38  ;;  %v1703_v32 = vlaneseq  ;;  %v2540_v36 = vmov 1966171168  }
 0x1bb   : > { %v1685_v58 = vadd.f32 %v1684_v49, %v1513_v22  ;;  %v1663_v62 = vadd.f32 %v1662_v53, %v1514_v30  ;;  %v1757_v22 = vmul.f32 %v1523_v61, %v1523_v61  ;;  %v1701_v37 = vunpack.c.l.s4 %v2540_v36 }
 0x1bc   : > { %v1769_v1 = vadd.f32 %v1768_v56, %v1746_v42  ;;  %v1792_v2 = vadd.f32 %v1791_v57, %v1747_v43  ;;  %v1704_v43 = vshrl.u32 %v1703_v32, 7  ;;  %vm1718_vm1 = vcmp.lt.s32.totalorder %v1703_v32, 256 }
 0x1bd   : > { %v1686_v3 = vadd.f32 %v1685_v58, %v1515_v31  ;;  %v1664_v5 = vadd.f32 %v1663_v62, %v1516_v39  ;;  %v1702_v47 = vunpack.c.0.s8 %v1701_v37  ;;  %v1650_v62 = vld [vmem:[#allocation3] sm:$0x3] }
 0x1be   : > { %v1770_v7 = vadd.f32 %v1769_v1, %v1748_v54  ;;  %v1793_v8 = vadd.f32 %v1792_v2, %v1749_v59  ;;  %v1721_v1 = vld [vmem:[#allocation4] sm:$0x3] }
 0x1bf   : > { %v1687_v9 = vadd.f32 %v1686_v3, %v1517_v40  ;;  %v1665_v11 = vadd.f32 %v1664_v5, %v1518_v45  ;;  %v1705_v56 = vsub.s32 %v1702_v47, %v1704_v43 }
 0x1c0   : > { %v1771_v13 = vadd.f32 %v1770_v7, %v1750_v63  ;;  %v1794_v14 = vadd.f32 %v1793_v8, %v1751_v4 }
 0x1c1   : > { %v1688_v15 = vadd.f32 %v1687_v9, %v1519_v46  ;;  %v1666_v17 = vadd.f32 %v1665_v11, %v1520_v51 }
 0x1c2   : > { %v1772_v19 = vadd.f32 %v1771_v13, %v1752_v6  ;;  %v1795_v20 = vadd.f32 %v1794_v14, %v1753_v10 }
 0x1c3   : > { %v1689_v21 = vadd.f32 %v1688_v15, %v1521_v52  ;;  %v1667_v23 = vadd.f32 %v1666_v17, %v1522_v60 }
 0x1c4   : > { %v1773_v24 = vadd.f32 %v1772_v19, %v1754_v12  ;;  %v1796_v25 = vadd.f32 %v1795_v20, %v1755_v16 }
 0x1c5   : > { %v1690_v26 = vadd.f32 %v1689_v21, %v1523_v61  ;;  %v1668_v27 = vrot.slane %v1667_v23, 4 }
 0x1c6   : > { %v1774_v29 = vadd.f32 %v1773_v24, %v1756_v18  ;;  %v1797_v30 = vadd.f32 %v1796_v25, %v1757_v22 }
 0x1c7   : > { %v1691_v28 = vrot.slane %v1690_v26, 4  ;;  %v1669_v31 = vadd.f32 %v1668_v27, %v1667_v23 }
 0x1c8   : > { %v1775_v34 = vrot.slane %v1774_v29, 4  ;;  %v1798_v35 = vrot.slane %v1797_v30, 4 }
 0x1c9   : > { %v1692_v33 = vadd.f32 %v1691_v28, %v1690_v26  ;;  %v1670_v38 = vrot.slane %v1669_v31, 2 }
 0x1ca   : > { %v1776_v40 = vadd.f32 %v1775_v34, %v1774_v29  ;;  %v1799_v41 = vadd.f32 %v1798_v35, %v1797_v30 }
 0x1cb   : > { %v1693_v39 = vrot.slane %v1692_v33, 2  ;;  %v1671_v42 = vadd.f32 %v1670_v38, %v1669_v31 }
 0x1cc   : > { %v1777_v45 = vrot.slane %v1776_v40, 2  ;;  %v1800_v46 = vrot.slane %v1799_v41, 2 }
 0x1cd   : > { %v1694_v44 = vadd.f32 %v1693_v39, %v1692_v33  ;;  %v1672_v48 = vrot.slane %v1671_v42, 1 }
 0x1ce   : > { %v1778_v50 = vadd.f32 %v1777_v45, %v1776_v40  ;;  %v1801_v51 = vadd.f32 %v1800_v46, %v1799_v41 }
 0x1cf   : > { %v1695_v49 = vrot.slane %v1694_v44, 1  ;;  %v1673_v52 = vadd.f32 %v1672_v48, %v1671_v42 }
 0x1d0   : > { %v1779_v54 = vrot.slane %v1778_v50, 1  ;;  %v1802_v55 = vrot.slane %v1801_v51, 1 }
 0x1d1   : > { %v1696_v53 = vadd.f32 %v1695_v49, %v1694_v44 }
 0x1d2   : > { %v1780_v58 = vadd.f32 %v1779_v54, %v1778_v50  ;;  %v1803_v59 = vadd.f32 %v1802_v55, %v1801_v51 }
 0x1d3   : > { %v1699_v57 = vcombine.low %v1673_v52, %v1696_v53 }
 0x1d4   : > { %v1806_v61 = vcombine.low %v1780_v58, %v1803_v59 }
 0x1d5   : > { %v1706_v60 = vrot.slane %v1699_v57, %v1705_v56 }
 0x1d6   : > { %v1813_v0 = vrot.slane %v1806_v61, %v1705_v56 }
 0x1d7   : > { %v1713_v63 = vrot.slane %v1706_v60, %v1705_v56 }
 0x1d8   : > { %v1820_v3 = vrot.slane %v1813_v0, %v1705_v56 }
 0x1d9   : > { %v1715_v2 = vadd.f32 %v1713_v63, %v1650_v62 }
 0x1da   : > { %v1822_v4 = vadd.f32 %v1820_v3, %v1721_v1 }
 0x1db   : > { %1720 = vst.msk [vmem:[#allocation3] sm:$0x3] %vm1718_vm1, %v1715_v2 }
 0x1dc   : > { %1823 = vst.msk [vmem:[#allocation4] sm:$0x3] %vm1718_vm1, %v1822_v4 }
 0x1dd PF: > { %1827 = sbr.rel (!%p1484_p0) target bundleno = 485 (0x1e5), region = 71  ;;  %v1829_v6 = vlaneseq (%p1484_p0) }
 0x1df   : > { %vm1831_vm2 = vcmp.lt.s32.totalorder (%p1484_p0), %v1829_v6, 256 }
 0x1e2   : > { %v1828_v5 = vld [vmem:[#allocation3] sm:$0x3] (%p1484_p0) }
 0x1e3   : > { %v1834_v7 = vld [vmem:[#allocation4] sm:$0x3] (%p1484_p0)  ;;  %1833 = vst.msk [vmem:[%s2727_s13] sm:$0x3] (%p1484_p0), %vm1831_vm2, %v1828_v5 }
 0x1e4   : > { %1835 = vst.msk [vmem:[%s2732_s16] sm:$0x3] %vm1831_vm2, %v1834_v7 }
 0x1e5 PF: > { %s16_s23 = sadd.s32 1, %s2536_s23   ;;  %s2890_s18 = smov %s2516_s19 }
 0x1e6   : > { %p13_p2 = scmp.ge.s32.totalorder %s16_s23, 10   ;;  %s2891_s19 = smov %s2622_s30 }
 0x1e7   : > { %s2892_s20 = smov %s2528_s22  ;;  %s2893_s21 = smov %s2532_s2 }
 0x1e8   : > { %s2894_s22 = smov %s2897_s24  ;;  %s2895_s2 = smov %s2901_s25 }
 0x1e9   :  { %15 = sbr.rel (!%p13_p2) target bundleno = 4 (0x4), region = 136 }

// kernel: discriminator_forward.12
= control target key start
LH: loop header
LB: loop body
LE: loop exit
PB: predicated region body
PF: predicated region fallthrough
CT: control target
= control target key end

     0   :  { %s969_s12 = smov 0   ;;  %s971_s13 = smov 0   ;;  %s1256_s0 = inlined_call_operand.vmem [shape: bf16[2,144,256], index: 0, kind: input, shape index: {}]   ;;  %s1257_s1 = inlined_call_operand.vmem [shape: f32[2,1,256], index: 1, kind: input, shape index: {}]   ;;  %s1258_s2 = inlined_call_operand.vmem [shape: f32[2,1,256], index: 2, kind: input, shape index: {}]   ;;  %s1259_s3 = inlined_call_operand.vmem [shape: bf16[2,144,256], index: 3, kind: output, shape index: {}]  }
   0x1   :  { %s973_s14 = smov 0  }
   0x2 LB: > { %s32_s15 = sadd.s32 1, %s943_s13  ;;  %p855_p0 = scmp.ge.s32.totalorder %s947_s14, 1  ;;  %s947_s14 = sphi %s973_s14, %s13_s14   ;;  %s943_s13 = sphi %s971_s13, %s1261_s13   ;;  %s939_s12 = sphi %s969_s12, %s1260_s12  }
   0x3   : > { %p34_p1 = scmp.ge.s32.totalorder %s32_s15, 2  ;;  %p207_p2 = scmp.lt.s32.totalorder %s947_s14, 3 }
   0x5   : > { %s1263_s15 = smov (%p34_p1, %s32_s15), 0  ;;  %p208_p3 = pnand %p855_p0, %p207_p2 }
   0x6   : > { %p267_p4 = scmp.lt.s32.totalorder (!%p208_p3), %s939_s12, 1  ;;  %v379_v0 = vlaneseq (!%p208_p3) }
   0x7   : > { %211 = sbr.rel (%p208_p3) target bundleno = 86 (0x56), region = 32 }
   0x8   : > { %v989_v1 = vshrl.u32 (!%p208_p3), %v379_v0, 7 }
   0xa   : > { %v381_v2 = vsub.s32 (!%p208_p3), 0, %v989_v1  ;;  %v385_v3 = vsub.s32 (!%p208_p3), 1, %v989_v1 }
   0xe   : > { %s1265_s12 = smov (!%p267_p4, %s939_s12), 1 }
   0xf   : > { %s898_s16 = smul.u32 144, %s1265_s12  ;;  %s857_s17 = sshll.u32 %s1265_s12, 1 }
  0x10   : > { %s288_s20 = scalar_lea.vmem %s1257_s1, %s857_s17  ;;  %s297_s23 = scalar_lea.vmem %s1258_s2, %s857_s17 }
  0x11   : > { %s1006_s26 = scalar_lea.vmem %s1256_s0, %s898_s16  ;;  %v315_v4 = vld [vmem:[%s288_s20] sm:$0x3]  ;;  %s1171_s29 = scalar_lea.vmem %s1259_s3, %s898_s16 }
  0x12   : > { %v317_v5 = vld [vmem:[%s297_s23] sm:$0x3]  ;;  %v316_v6 = vmul.f32 0.0069444445, %v315_v4  ;;  %v325_v9 = vld [vmem:[%s1006_s26 + $0x8] sm:$0xff]  ;;  %v326_v12 = vld [vmem:[%s1006_s26 + $0x10] sm:$0xff] }
  0x13   : > { %v318_v7 = vmul.f32 0.0069444445, %v317_v5  ;;  %v324_v8 = vld [vmem:[%s1006_s26] sm:$0xff]  ;;  %v344_v16 = vunpack.c.l.bf16 %v325_v9  ;;  %v327_v17 = vld [vmem:[%s1006_s26 + $0x18] sm:$0xff]  ;;  %v345_v19 = vunpack.c.h.bf16 %v325_v9  ;;  %v346_v20 = vunpack.c.l.bf16 %v326_v12  ;;  %v329_v22 = vld [vmem:[%s1006_s26 + $0x28] sm:$0xff] }
  0x14   : > { %v342_v10 = vunpack.c.l.bf16 %v324_v8  ;;  %v343_v11 = vunpack.c.h.bf16 %v324_v8  ;;  %v319_v13 = vmul.f32 %v316_v6, %v316_v6  ;;  %v1013_v14 = vrot.slane %v316_v6, %v381_v2  ;;  %v328_v18 = vld [vmem:[%s1006_s26 + $0x20] sm:$0xff]  ;;  %v330_v27 = vld [vmem:[%s1006_s26 + $0x30] sm:$0xff]  ;;  %v331_v32 = vld [vmem:[%s1006_s26 + $0x38] sm:$0xff] }
  0x15   : > { %v1017_v15 = vrot.slane %v316_v6, %v385_v3  ;;  %v347_v23 = vunpack.c.h.bf16 %v326_v12  ;;  %v348_v24 = vunpack.c.l.bf16 %v327_v17  ;;  %v349_v25 = vunpack.c.h.bf16 %v327_v17  ;;  %v332_v37 = vld [vmem:[%s1006_s26 + $0x40] sm:$0xff]  ;;  %v333_v42 = vld [vmem:[%s1006_s26 + $0x48] sm:$0xff]  ;;  %v334_v50 = vld [vmem:[%s1006_s26 + $0x50] sm:$0xff] }
  0x16   : > { %v320_v21 = vsub.f32 %v318_v7, %v319_v13  ;;  %v350_v26 = vunpack.c.l.bf16 %v328_v18  ;;  %v1024_v29 = vsub.f32 %v342_v10, %v1013_v14  ;;  %v1030_v31 = vsub.f32 %v344_v16, %v1013_v14  ;;  %v335_v55 = vld [vmem:[%s1006_s26 + $0x58] sm:$0xff]  ;;  %v336_v56 = vld [vmem:[%s1006_s26 + $0x60] sm:$0xff]  ;;  %v337_v4 = vld [vmem:[%s1006_s26 + $0x68] sm:$0xff] }
  0x17   : > { %v1027_v30 = vsub.f32 %v343_v11, %v1017_v15  ;;  %v1034_v33 = vsub.f32 %v345_v19, %v1017_v15  ;;  %v1037_v34 = vsub.f32 %v346_v20, %v1013_v14  ;;  %v351_v35 = vunpack.c.h.bf16 %v328_v18  ;;  %v338_v5 = vld [vmem:[%s1006_s26 + $0x70] sm:$0xff]  ;;  %v339_v10 = vld [vmem:[%s1006_s26 + $0x78] sm:$0xff]  ;;  %v340_v17 = vld [vmem:[%s1006_s26 + $0x80] sm:$0xff] }
  0x18   : > { %v321_v28 = vmax.f32 %v320_v21, 0.0  ;;  %v352_v36 = vunpack.c.l.bf16 %v329_v22  ;;  %v353_v39 = vunpack.c.h.bf16 %v329_v22  ;;  %v354_v40 = vunpack.c.l.bf16 %v330_v27  ;;  %v341_v22 = vld [vmem:[%s1006_s26 + $0x88] sm:$0xff] }
  0x19   : > { %v355_v41 = vunpack.c.h.bf16 %v330_v27  ;;  %v1042_v43 = vsub.f32 %v347_v23, %v1017_v15  ;;  %v1045_v44 = vsub.f32 %v348_v24, %v1013_v14  ;;  %v356_v45 = vunpack.c.l.bf16 %v331_v32 }
  0x1a   : > { %v322_v38 = vadd.f32 1e-05, %v321_v28  ;;  %v357_v46 = vunpack.c.h.bf16 %v331_v32  ;;  %v1048_v47 = vsub.f32 %v349_v25, %v1017_v15  ;;  %v1051_v48 = vsub.f32 %v350_v26, %v1013_v14 }
  0x1b   : > { %v358_v49 = vunpack.c.l.bf16 %v332_v37  ;;  %v1055_v51 = vsub.f32 %v351_v35, %v1017_v15  ;;  %v359_v52 = vunpack.c.h.bf16 %v332_v37  ;;  %v360_v53 = vunpack.c.l.bf16 %v333_v42 }
  0x1c   : > { %923 = vrsqrt.f32 %v322_v38  ;;  %v361_v54 = vunpack.c.h.bf16 %v333_v42  ;;  %v1060_v57 = vsub.f32 %v352_v36, %v1013_v14  ;;  %v1063_v58 = vsub.f32 %v353_v39, %v1017_v15 }
  0x1d   : > { %v1066_v59 = vsub.f32 %v354_v40, %v1013_v14  ;;  %v1069_v60 = vsub.f32 %v355_v41, %v1017_v15  ;;  %v1072_v61 = vsub.f32 %v356_v45, %v1013_v14  ;;  %v1075_v62 = vsub.f32 %v357_v46, %v1017_v15 }
  0x1e   : > { %v362_v63 = vunpack.c.l.bf16 %v334_v50  ;;  %v363_v0 = vunpack.c.h.bf16 %v334_v50  ;;  %v1080_v6 = vsub.f32 %v358_v49, %v1013_v14  ;;  %v364_v7 = vunpack.c.l.bf16 %v335_v55 }
  0x1f   : > { %v365_v8 = vunpack.c.h.bf16 %v335_v55  ;;  %v366_v9 = vunpack.c.l.bf16 %v336_v56  ;;  %v1084_v11 = vsub.f32 %v359_v52, %v1017_v15  ;;  %v1087_v12 = vsub.f32 %v360_v53, %v1013_v14 }
  0x20   : > { %v1090_v13 = vsub.f32 %v361_v54, %v1017_v15  ;;  %v367_v16 = vunpack.c.h.bf16 %v336_v56  ;;  %v368_v18 = vunpack.c.l.bf16 %v337_v4  ;;  %v369_v19 = vunpack.c.h.bf16 %v337_v4 }
  0x21   : > { %v370_v20 = vunpack.c.l.bf16 %v338_v5  ;;  %v371_v21 = vunpack.c.h.bf16 %v338_v5  ;;  %v1095_v23 = vsub.f32 %v362_v63, %v1013_v14  ;;  %v1098_v24 = vsub.f32 %v363_v0, %v1017_v15 }
  0x22   : > { %v372_v25 = vunpack.c.l.bf16 %v339_v10  ;;  %v373_v26 = vunpack.c.h.bf16 %v339_v10  ;;  %v1101_v27 = vsub.f32 %v364_v7, %v1013_v14  ;;  %v1104_v28 = vsub.f32 %v365_v8, %v1017_v15 }
  0x23   : > { %v1107_v32 = vsub.f32 %v366_v9, %v1013_v14  ;;  %v374_v35 = vunpack.c.l.bf16 %v340_v17  ;;  %v1110_v36 = vsub.f32 %v367_v16, %v1017_v15  ;;  %v375_v37 = vunpack.c.h.bf16 %v340_v17 }
  0x24   : > { %v376_v38 = vunpack.c.l.bf16 %v341_v22  ;;  %v377_v39 = vunpack.c.h.bf16 %v341_v22  ;;  %v1113_v41 = vsub.f32 %v368_v18, %v1013_v14  ;;  %v1116_v42 = vsub.f32 %v369_v19, %v1017_v15 }
  0x25   : > { %v1119_v45 = vsub.f32 %v370_v20, %v1013_v14  ;;  %v1122_v46 = vsub.f32 %v371_v21, %v1017_v15  ;;  %v1133_v52 = vsub.f32 %v372_v25, %v1013_v14  ;;  %v1136_v53 = vsub.f32 %v373_v26, %v1017_v15 }
  0x26   : > { %v924_v40 = vpop.eup %923  ;;  %v1139_v54 = vsub.f32 %v374_v35, %v1013_v14  ;;  %v1142_v55 = vsub.f32 %v375_v37, %v1017_v15  ;;  %v1145_v56 = vsub.f32 %v376_v38, %v1013_v14 }
  0x27   : > { %v1126_v49 = vrot.slane %v924_v40, %v381_v2  ;;  %v1130_v50 = vrot.slane %v924_v40, %v385_v3  ;;  %v1148_v2 = vsub.f32 %v377_v39, %v1017_v15 }
  0x29   : > { %v436_v1 = vmul.f32 %v1126_v49, %v1024_v29  ;;  %v437_v3 = vmul.f32 %v1130_v50, %v1027_v30  ;;  %v438_v63 = vmul.f32 %v1126_v49, %v1030_v31  ;;  %v439_v0 = vmul.f32 %v1130_v50, %v1034_v33 }
  0x2a   : > { %v440_v14 = vmul.f32 %v1126_v49, %v1037_v34  ;;  %v441_v15 = vmul.f32 %v1130_v50, %v1042_v43  ;;  %v442_v4 = vmul.f32 %v1126_v49, %v1045_v44  ;;  %v443_v29 = vmul.f32 %v1130_v50, %v1048_v47 }
  0x2b   : > { %vm472_vm0 = vcmp.ge.f32.partialorder %v436_v1, 0.0  ;;  %vm473_vm1 = vcmp.ge.f32.partialorder %v437_v3, 0.0  ;;  %v508_v30 = vmul.f32 0.2, %v436_v1  ;;  %v509_v5 = vmul.f32 0.2, %v437_v3 }
  0x2c   : > { %vm474_vm2 = vcmp.ge.f32.partialorder %v438_v63, 0.0  ;;  %vm475_vm3 = vcmp.ge.f32.partialorder %v439_v0, 0.0  ;;  %v510_v31 = vmul.f32 0.2, %v438_v63  ;;  %v511_v33 = vmul.f32 0.2, %v439_v0 }
  0x2d   : > { %v544_v34 = vsel %vm472_vm0, %v436_v1, %v508_v30  ;;  %v545_v43 = vsel %vm473_vm1, %v437_v3, %v509_v5  ;;  %vm476_vm4 = vcmp.ge.f32.partialorder %v440_v14, 0.0  ;;  %vm477_vm5 = vcmp.ge.f32.partialorder %v441_v15, 0.0 }
  0x2e   : > { %v880_v44 = vpack.c.bf16 %v545_v43, %v544_v34  ;;  %v546_v47 = vsel %vm474_vm2, %v438_v63, %v510_v31  ;;  %v547_v7 = vsel %vm475_vm3, %v439_v0, %v511_v33  ;;  %v512_v8 = vmul.f32 0.2, %v440_v14 }
  0x2f   : > { %v881_v9 = vpack.c.bf16 %v547_v7, %v546_v47  ;;  %v513_v10 = vmul.f32 0.2, %v441_v15  ;;  %vm478_vm6 = vcmp.ge.f32.partialorder %v442_v4, 0.0  ;;  %vm479_vm7 = vcmp.ge.f32.partialorder %v443_v29, 0.0 }
  0x30   : > { %688 = vst [vmem:[%s1171_s29] sm:$0xff] %v880_v44  ;;  %v548_v16 = vsel %vm476_vm4, %v440_v14, %v512_v8  ;;  %v514_v17 = vmul.f32 0.2, %v442_v4  ;;  %v515_v18 = vmul.f32 0.2, %v443_v29  ;;  %v444_v19 = vmul.f32 %v1126_v49, %v1051_v48 }
  0x31   : > { %689 = vst [vmem:[%s1171_s29 + $0x8] sm:$0xff] %v881_v9  ;;  %v549_v20 = vsel %vm477_vm5, %v441_v15, %v513_v10  ;;  %v445_v21 = vmul.f32 %v1130_v50, %v1055_v51  ;;  %v446_v22 = vmul.f32 %v1126_v49, %v1060_v57  ;;  %v447_v25 = vmul.f32 %v1130_v50, %v1063_v58 }
  0x32   : > { %v882_v26 = vpack.c.bf16 %v549_v20, %v548_v16  ;;  %v550_v35 = vsel %vm478_vm6, %v442_v4, %v514_v17  ;;  %v551_v37 = vsel %vm479_vm7, %v443_v29, %v515_v18  ;;  %vm480_vm8 = vcmp.ge.f32.partialorder %v444_v19, 0.0 }
  0x33   : > { %v883_v38 = vpack.c.bf16 %v551_v37, %v550_v35  ;;  %vm481_vm9 = vcmp.ge.f32.partialorder %v445_v21, 0.0  ;;  %v516_v39 = vmul.f32 0.2, %v444_v19  ;;  %v517_v48 = vmul.f32 0.2, %v445_v21 }
  0x34   : > { %690 = vst [vmem:[%s1171_s29 + $0x10] sm:$0xff] %v882_v26  ;;  %vm482_vm10 = vcmp.ge.f32.partialorder %v446_v22, 0.0  ;;  %vm483_vm11 = vcmp.ge.f32.partialorder %v447_v25, 0.0  ;;  %v518_v51 = vmul.f32 0.2, %v446_v22  ;;  %v448_v58 = vmul.f32 %v1126_v49, %v1066_v59 }
  0x35   : > { %v519_v40 = vmul.f32 0.2, %v447_v25  ;;  %691 = vst [vmem:[%s1171_s29 + $0x18] sm:$0xff] %v883_v38  ;;  %v552_v1 = vsel %vm480_vm8, %v444_v19, %v516_v39  ;;  %v553_v57 = vsel %vm481_vm9, %v445_v21, %v517_v48  ;;  %v449_v3 = vmul.f32 %v1130_v50, %v1069_v60 }
  0x36   : > { %v884_v63 = vpack.c.bf16 %v553_v57, %v552_v1  ;;  %v554_v0 = vsel %vm482_vm10, %v446_v22, %v518_v51  ;;  %v450_v15 = vmul.f32 %v1126_v49, %v1072_v61  ;;  %vm484_vm12 = vcmp.ge.f32.partialorder %v448_v58, 0.0 }
  0x37   : > { %v555_v14 = vsel %vm483_vm11, %v447_v25, %v519_v40  ;;  %vm485_vm13 = vcmp.ge.f32.partialorder %v449_v3, 0.0  ;;  %v520_v29 = vmul.f32 0.2, %v448_v58  ;;  %v521_v30 = vmul.f32 0.2, %v449_v3 }
  0x38   : > { %v885_v4 = vpack.c.bf16 %v555_v14, %v554_v0  ;;  %692 = vst [vmem:[%s1171_s29 + $0x20] sm:$0xff] %v884_v63  ;;  %v451_v5 = vmul.f32 %v1130_v50, %v1075_v62  ;;  %vm486_vm14 = vcmp.ge.f32.partialorder %v450_v15, 0.0  ;;  %v522_v59 = vmul.f32 0.2, %v450_v15 }
  0x39   : > { %v556_v31 = vsel %vm484_vm12, %v448_v58, %v520_v29  ;;  %v452_v60 = vmul.f32 %v1126_v49, %v1080_v6  ;;  %v453_v61 = vmul.f32 %v1130_v50, %v1084_v11  ;;  %v454_v33 = vmul.f32 %v1126_v49, %v1087_v12 }
  0x3a   : > { %693 = vst [vmem:[%s1171_s29 + $0x28] sm:$0xff] %v885_v4  ;;  %v557_v34 = vsel %vm485_vm13, %v449_v3, %v521_v30  ;;  %vm487_vm15 = vcmp.ge.f32.partialorder %v451_v5, 0.0  ;;  %v523_v43 = vmul.f32 0.2, %v451_v5  ;;  %v558_v44 = vsel %vm486_vm14, %v450_v15, %v522_v59 }
  0x3b   : > { %v886_v47 = vpack.c.bf16 %v557_v34, %v556_v31  ;;  %vm488_vm0 = vcmp.ge.f32.partialorder %v452_v60, 0.0  ;;  %vm489_vm1 = vcmp.ge.f32.partialorder %v453_v61, 0.0  ;;  %v524_v62 = vmul.f32 0.2, %v452_v60 }
  0x3c   : > { %v559_v7 = vsel %vm487_vm15, %v451_v5, %v523_v43  ;;  %v525_v8 = vmul.f32 0.2, %v453_v61  ;;  %v455_v6 = vmul.f32 %v1130_v50, %v1090_v13  ;;  %vm490_vm2 = vcmp.ge.f32.partialorder %v454_v33, 0.0 }
  0x3d   : > { %694 = vst [vmem:[%s1171_s29 + $0x30] sm:$0xff] %v886_v47  ;;  %v887_v11 = vpack.c.bf16 %v559_v7, %v558_v44  ;;  %v560_v9 = vsel %vm488_vm0, %v452_v60, %v524_v62  ;;  %v526_v12 = vmul.f32 0.2, %v454_v33  ;;  %v456_v10 = vmul.f32 %v1126_v49, %v1095_v23 }
  0x3e   : > { %v561_v16 = vsel %vm489_vm1, %v453_v61, %v525_v8  ;;  %vm491_vm3 = vcmp.ge.f32.partialorder %v455_v6, 0.0  ;;  %v527_v17 = vmul.f32 0.2, %v455_v6  ;;  %v457_v18 = vmul.f32 %v1130_v50, %v1098_v24 }
  0x3f   : > { %695 = vst [vmem:[%s1171_s29 + $0x38] sm:$0xff] %v887_v11  ;;  %v888_v19 = vpack.c.bf16 %v561_v16, %v560_v9  ;;  %v562_v20 = vsel %vm490_vm2, %v454_v33, %v526_v12  ;;  %vm492_vm4 = vcmp.ge.f32.partialorder %v456_v10, 0.0  ;;  %v528_v13 = vmul.f32 0.2, %v456_v10 }
  0x40   : > { %v563_v21 = vsel %vm491_vm3, %v455_v6, %v527_v17  ;;  %vm493_vm5 = vcmp.ge.f32.partialorder %v457_v18, 0.0  ;;  %v529_v22 = vmul.f32 0.2, %v457_v18  ;;  %v458_v25 = vmul.f32 %v1126_v49, %v1101_v27 }
  0x41   : > { %696 = vst [vmem:[%s1171_s29 + $0x40] sm:$0xff] %v888_v19  ;;  %v889_v23 = vpack.c.bf16 %v563_v21, %v562_v20  ;;  %v564_v26 = vsel %vm492_vm4, %v456_v10, %v528_v13  ;;  %v459_v35 = vmul.f32 %v1130_v50, %v1104_v28  ;;  %v460_v24 = vmul.f32 %v1126_v49, %v1107_v32 }
  0x42   : > { %v565_v37 = vsel %vm493_vm5, %v457_v18, %v529_v22  ;;  %vm494_vm6 = vcmp.ge.f32.partialorder %v458_v25, 0.0  ;;  %v530_v38 = vmul.f32 0.2, %v458_v25  ;;  %v461_v39 = vmul.f32 %v1130_v50, %v1110_v36 }
  0x43   : > { %697 = vst [vmem:[%s1171_s29 + $0x48] sm:$0xff] %v889_v23  ;;  %v890_v48 = vpack.c.bf16 %v565_v37, %v564_v26  ;;  %vm495_vm7 = vcmp.ge.f32.partialorder %v459_v35, 0.0  ;;  %v531_v27 = vmul.f32 0.2, %v459_v35  ;;  %vm496_vm8 = vcmp.ge.f32.partialorder %v460_v24, 0.0 }
  0x44   : > { %v566_v51 = vsel %vm494_vm6, %v458_v25, %v530_v38  ;;  %vm497_vm9 = vcmp.ge.f32.partialorder %v461_v39, 0.0  ;;  %v532_v40 = vmul.f32 0.2, %v460_v24  ;;  %v533_v1 = vmul.f32 0.2, %v461_v39 }
  0x45   : > { %698 = vst [vmem:[%s1171_s29 + $0x50] sm:$0xff] %v890_v48  ;;  %v567_v28 = vsel %vm495_vm7, %v459_v35, %v531_v27  ;;  %v462_v32 = vmul.f32 %v1126_v49, %v1113_v41  ;;  %v463_v57 = vmul.f32 %v1130_v50, %v1116_v42  ;;  %v464_v36 = vmul.f32 %v1126_v49, %v1119_v45 }
  0x46   : > { %v891_v58 = vpack.c.bf16 %v567_v28, %v566_v51  ;;  %v568_v3 = vsel %vm496_vm8, %v460_v24, %v532_v40  ;;  %v569_v63 = vsel %vm497_vm9, %v461_v39, %v533_v1  ;;  %v465_v0 = vmul.f32 %v1130_v50, %v1122_v46 }
  0x47   : > { %v892_v14 = vpack.c.bf16 %v569_v63, %v568_v3  ;;  %vm498_vm10 = vcmp.ge.f32.partialorder %v462_v32, 0.0  ;;  %vm499_vm11 = vcmp.ge.f32.partialorder %v463_v57, 0.0  ;;  %v534_v15 = vmul.f32 0.2, %v462_v32 }
  0x48   : > { %699 = vst [vmem:[%s1171_s29 + $0x58] sm:$0xff] %v891_v58  ;;  %v535_v4 = vmul.f32 0.2, %v463_v57  ;;  %vm500_vm12 = vcmp.ge.f32.partialorder %v464_v36, 0.0  ;;  %vm501_vm13 = vcmp.ge.f32.partialorder %v465_v0, 0.0  ;;  %v466_v45 = vmul.f32 %v1126_v49, %v1133_v52 }
  0x49   : > { %v536_v41 = vmul.f32 0.2, %v464_v36  ;;  %700 = vst [vmem:[%s1171_s29 + $0x60] sm:$0xff] %v892_v14  ;;  %v570_v42 = vsel %vm498_vm10, %v462_v32, %v534_v15  ;;  %v537_v29 = vmul.f32 0.2, %v465_v0  ;;  %v467_v30 = vmul.f32 %v1130_v50, %v1136_v53 }
  0x4a   : > { %v571_v46 = vsel %vm499_vm11, %v463_v57, %v535_v4  ;;  %v468_v59 = vmul.f32 %v1126_v49, %v1139_v54  ;;  %v469_v31 = vmul.f32 %v1130_v50, %v1142_v55  ;;  %vm502_vm14 = vcmp.ge.f32.partialorder %v466_v45, 0.0 }
  0x4b   : > { %v572_v5 = vsel %vm500_vm12, %v464_v36, %v536_v41  ;;  %v893_v60 = vpack.c.bf16 %v571_v46, %v570_v42  ;;  %v573_v61 = vsel %vm501_vm13, %v465_v0, %v537_v29  ;;  %vm503_vm15 = vcmp.ge.f32.partialorder %v467_v30, 0.0 }
  0x4c   : > { %v894_v33 = vpack.c.bf16 %v573_v61, %v572_v5  ;;  %v538_v34 = vmul.f32 0.2, %v466_v45  ;;  %v539_v43 = vmul.f32 0.2, %v467_v30  ;;  %vm504_vm0 = vcmp.ge.f32.partialorder %v468_v59, 0.0 }
  0x4d   : > { %701 = vst [vmem:[%s1171_s29 + $0x68] sm:$0xff] %v893_v60  ;;  %vm505_vm1 = vcmp.ge.f32.partialorder %v469_v31, 0.0  ;;  %v540_v52 = vmul.f32 0.2, %v468_v59  ;;  %v541_v53 = vmul.f32 0.2, %v469_v31  ;;  %v470_v54 = vmul.f32 %v1126_v49, %v1145_v56 }
  0x4e   : > { %702 = vst [vmem:[%s1171_s29 + $0x70] sm:$0xff] %v894_v33  ;;  %v574_v44 = vsel %vm502_vm14, %v466_v45, %v538_v34  ;;  %v575_v55 = vsel %vm503_vm15, %v467_v30, %v539_v43  ;;  %v471_v47 = vmul.f32 %v1130_v50, %v1148_v2 }
  0x4f   : > { %v895_v62 = vpack.c.bf16 %v575_v55, %v574_v44  ;;  %v576_v7 = vsel %vm504_vm0, %v468_v59, %v540_v52  ;;  %v577_v8 = vsel %vm505_vm1, %v469_v31, %v541_v53  ;;  %vm506_vm2 = vcmp.ge.f32.partialorder %v470_v54, 0.0 }
  0x50   : > { %v896_v6 = vpack.c.bf16 %v577_v8, %v576_v7  ;;  %vm507_vm3 = vcmp.ge.f32.partialorder %v471_v47, 0.0  ;;  %v542_v11 = vmul.f32 0.2, %v470_v54  ;;  %v543_v9 = vmul.f32 0.2, %v471_v47 }
  0x51   : > { %703 = vst [vmem:[%s1171_s29 + $0x78] sm:$0xff] %v895_v62 }
  0x52   : > { %704 = vst [vmem:[%s1171_s29 + $0x80] sm:$0xff] %v896_v6  ;;  %v578_v12 = vsel %vm506_vm2, %v470_v54, %v542_v11  ;;  %v579_v10 = vsel %vm507_vm3, %v471_v47, %v543_v9 }
  0x53   : > { %v897_v49 = vpack.c.bf16 %v579_v10, %v578_v12 }
  0x55   : > { %705 = vst [vmem:[%s1171_s29 + $0x88] sm:$0xff] %v897_v49 }
  0x56 PF: > { %s13_s14 = sadd.s32 1, %s947_s14   ;;  %s1260_s12 = smov %s943_s13 }
  0x57   : > { %p10_p5 = scmp.ge.s32.totalorder %s13_s14, 4   ;;  %s1261_s13 = smov %s1263_s15 }
  0x59   :  { %12 = sbr.rel (!%p10_p5) target bundleno = 2 (0x2), region = 68 }

// kernel: discriminator_forward.14
= control target key start
LH: loop header
LB: loop body
LE: loop exit
PB: predicated region body
PF: predicated region fallthrough
CT: control target
= control target key end

     0   :  { %s1118_s12 = smov 0   ;;  %s1120_s13 = smov 0   ;;  %s1413_s0 = inlined_call_operand.vmem [shape: bf16[2,128,512], index: 0, kind: input, shape index: {}]   ;;  %s1414_s1 = inlined_call_operand.vmem [shape: f32[2,1,512], index: 1, kind: input, shape index: {}]   ;;  %s1415_s2 = inlined_call_operand.vmem [shape: f32[2,1,512], index: 2, kind: input, shape index: {}]   ;;  %s1416_s3 = inlined_call_operand.vmem [shape: bf16[2,128,512], index: 3, kind: output, shape index: {}]  }
   0x1   :  { %s1122_s14 = smov 0   ;;  %s1124_s15 = smov 0  }
   0x2   :  { %s1126_s16 = smov 0   ;;  %s1128_s17 = smov 0  }
   0x3   :  { %s1130_s18 = smov 0  }
   0x4 LB: > { %s28_s19 = sadd.s32 1, %s1088_s16  ;;  %s32_s20 = sadd.s32 1, %s1092_s17  ;;  %s1096_s18 = sphi %s1130_s18, %s13_s18   ;;  %s1092_s17 = sphi %s1128_s17, %s1423_s17   ;;  %s1088_s16 = sphi %s1126_s16, %s1422_s16   ;;  %s1084_s15 = sphi %s1124_s15, %s1421_s15   ;;  %s1080_s14 = sphi %s1122_s14, %s1420_s14   ;;  %s1076_s13 = sphi %s1120_s13, %s1419_s13   ;;  %s1072_s12 = sphi %s1118_s12, %s1418_s12  }
   0x5   : > { %p30_p0 = scmp.ge.s32.totalorder %s28_s19, 2  ;;  %s931_s21 = sadd.s32 4294967295, %s1096_s18  }
   0x6   : > { %p50_p1 = scmp.ne.s32.totalorder %s1076_s13, %s1072_s12  ;;  %p51_p2 = scmp.eq.s32.totalorder %s1096_s18, 0 }
   0x7   : > { %s1425_s19 = smov (%p30_p0, %s28_s19), 0  ;;  %s1427_s20 = smov (!%p30_p0, %s32_s20), %s1092_s17 }
   0x8   : > { %p34_p3 = scmp.ge.s32.totalorder %s1427_s20, 2  ;;  %p140_p4 = scmp.eq.s32.totalorder %s931_s21, 3 }
   0x9   : > { %s39_s22 = ssub.s32 %s1088_s16, %s1425_s19  ;;  %p52_p5 = por %p51_p2, %p50_p1 }
   0xa   : > { %s1429_s20 = smov (%p34_p3, %s1427_s20), 0  ;;  %p1166_p6 = por %p140_p4, %p50_p1 }
   0xb   : > { %s36_s24 = ssub.s32 %s1092_s17, %s1429_s20  ;;  %s43_s26 = sadd.s32 1, %s1076_s13 }
   0xc   : > { %s40_s25 = sor.u32 %s39_s22, %s36_s24  ;;  %p934_p8 = scmp.ge.s32.totalorder %s1096_s18, 4 }
   0xd   : > { %p41_p7 = scmp.eq.s32.totalorder %s40_s25, 0 }
   0xe   : > { %162 = sbr.rel (%p934_p8) target bundleno = 36 (0x24), region = 16 }
   0xf   : > { %s1174_s27 = scalar_select %p41_p7, %s1076_s13, %s43_s26  }
  0x15   : > { %165 = sbr.rel (!%p52_p5) target bundleno = 36 (0x24), region = 20  ;;  %s167_s28 = sand.u32 (%p52_p5), 1, %s1076_s13  }
  0x16   : > { %s936_s29 = sshll.u32 (%p52_p5), %s1088_s16, 1  ;;  %s935_s30 = sshll.u32 (%p52_p5), %s167_s28, 7 }
  0x17   : > { %s937_s4 = sshll.u32 (%p52_p5), %s1092_s17, 6  ;;  %s169_s10 = scalar_lea.vmem (%p52_p5), [#allocation2], %s935_s30 }
  0x18   : > { %s175_s5 = sadd.s32 (%p52_p5), %s937_s4, %s936_s29 }
  0x19   : > { %s938_s6 = sshll.u32 (%p52_p5), %s175_s5, 2 }
  0x1a   : > { %s1183_s9 = scalar_lea.vmem (%p52_p5), %s1413_s0, %s938_s6 }
  0x1b   : > { %v235_v0 = vld [vmem:[%s1183_s9] sm:$0xff] (%p52_p5)  ;;  %v237_v1 = vld [vmem:[%s1183_s9 + $0x10] sm:$0xff] (%p52_p5) }
  0x1c   : > { %v239_v2 = vld [vmem:[%s1183_s9 + $0x20] sm:$0xff]  ;;  %236 = vst [vmem:[%s169_s10] sm:$0xff] %v235_v0  ;;  %238 = vst [vmem:[%s169_s10 + $0x8] sm:$0xff] %v237_v1  ;;  %v241_v3 = vld [vmem:[%s1183_s9 + $0x30] sm:$0xff] }
  0x1d   : > { %240 = vst [vmem:[%s169_s10 + $0x10] sm:$0xff] %v239_v2  ;;  %v243_v4 = vld [vmem:[%s1183_s9 + $0x40] sm:$0xff]  ;;  %v245_v5 = vld [vmem:[%s1183_s9 + $0x50] sm:$0xff]  ;;  %242 = vst [vmem:[%s169_s10 + $0x18] sm:$0xff] %v241_v3 }
  0x1e   : > { %244 = vst [vmem:[%s169_s10 + $0x20] sm:$0xff] %v243_v4  ;;  %246 = vst [vmem:[%s169_s10 + $0x28] sm:$0xff] %v245_v5  ;;  %v247_v6 = vld [vmem:[%s1183_s9 + $0x60] sm:$0xff]  ;;  %v249_v7 = vld [vmem:[%s1183_s9 + $0x70] sm:$0xff] }
  0x1f   : > { %v251_v8 = vld [vmem:[%s1183_s9 + $0x80] sm:$0xff]  ;;  %248 = vst [vmem:[%s169_s10 + $0x30] sm:$0xff] %v247_v6  ;;  %250 = vst [vmem:[%s169_s10 + $0x38] sm:$0xff] %v249_v7  ;;  %v253_v9 = vld [vmem:[%s1183_s9 + $0x90] sm:$0xff] }
  0x20   : > { %252 = vst [vmem:[%s169_s10 + $0x40] sm:$0xff] %v251_v8  ;;  %v255_v10 = vld [vmem:[%s1183_s9 + $0xa0] sm:$0xff]  ;;  %v257_v11 = vld [vmem:[%s1183_s9 + $0xb0] sm:$0xff]  ;;  %254 = vst [vmem:[%s169_s10 + $0x48] sm:$0xff] %v253_v9 }
  0x21   : > { %256 = vst [vmem:[%s169_s10 + $0x50] sm:$0xff] %v255_v10  ;;  %258 = vst [vmem:[%s169_s10 + $0x58] sm:$0xff] %v257_v11  ;;  %v259_v12 = vld [vmem:[%s1183_s9 + $0xc0] sm:$0xff]  ;;  %v261_v13 = vld [vmem:[%s1183_s9 + $0xd0] sm:$0xff] }
  0x22   : > { %v263_v14 = vld [vmem:[%s1183_s9 + $0xe0] sm:$0xff]  ;;  %260 = vst [vmem:[%s169_s10 + $0x60] sm:$0xff] %v259_v12  ;;  %262 = vst [vmem:[%s169_s10 + $0x68] sm:$0xff] %v261_v13  ;;  %v265_v15 = vld [vmem:[%s1183_s9 + $0xf0] sm:$0xff] }
  0x23   : > { %264 = vst [vmem:[%s169_s10 + $0x70] sm:$0xff] %v263_v14  ;;  %266 = vst [vmem:[%s169_s10 + $0x78] sm:$0xff] %v265_v15 }
  0x24 PF: > { %p939_p9 = scmp.ge.s32.totalorder %s1096_s18, 1  ;;  %p295_p10 = scmp.lt.s32.totalorder %s1096_s18, 5 }
  0x26   : > { %p296_p11 = pnand %p939_p9, %p295_p10 }
  0x27   : > { %s1204_s11 = sshll.u32 (!%p296_p11), %s1080_s14, 1  ;;  %p343_p12 = scmp.lt.s32.totalorder (!%p296_p11), %s1084_s15, 1  ;;  %v420_v16 = vlaneseq (!%p296_p11) }
  0x28   : > { %299 = sbr.rel (%p296_p11) target bundleno = 125 (0x7d), region = 66  ;;  %s302_s21 = sand.u32 (!%p296_p11), 1, %s1072_s12  }
  0x29   : > { %p345_p13 = scmp.lt.s32.totalorder (!%p296_p11), %s1204_s11, 3  ;;  %s1210_s24 = sshll.u32 (!%p296_p11), %s302_s21, 7  ;;  %v1223_v22 = vshrl.u32 (!%p296_p11), %v420_v16, 7 }
  0x2a   : > { %s1220_s12 = scalar_lea.vmem (!%p296_p11), [#allocation2], %s1210_s24  ;;  %s1305_s7 = scalar_lea.vmem (!%p296_p11), [#allocation3], %s1210_s24 }
  0x2b   : > { %v371_v21 = vld [vmem:[%s1220_s12] sm:$0xff] (!%p296_p11)  ;;  %v372_v24 = vld [vmem:[%s1220_s12 + $0x8] sm:$0xff] (!%p296_p11)  ;;  %v373_v25 = vld [vmem:[%s1220_s12 + $0x10] sm:$0xff] (!%p296_p11)  ;;  %v422_v31 = vsub.s32 (!%p296_p11), 0, %v1223_v22  ;;  %v426_v32 = vsub.s32 (!%p296_p11), 1, %v1223_v22 }
  0x2c   : > { %v387_v27 = vunpack.c.l.bf16 (!%p296_p11), %v371_v21  ;;  %v374_v28 = vld [vmem:[%s1220_s12 + $0x18] sm:$0xff] (!%p296_p11)  ;;  %v375_v29 = vld [vmem:[%s1220_s12 + $0x20] sm:$0xff] (!%p296_p11)  ;;  %v388_v30 = vunpack.c.h.bf16 (!%p296_p11), %v371_v21  ;;  %v389_v33 = vunpack.c.l.bf16 (!%p296_p11), %v372_v24  ;;  %v376_v34 = vld [vmem:[%s1220_s12 + $0x28] sm:$0xff] (!%p296_p11)  ;;  %v390_v37 = vunpack.c.h.bf16 (!%p296_p11), %v372_v24 }
  0x2d   : > { %v377_v35 = vld [vmem:[%s1220_s12 + $0x30] sm:$0xff] (!%p296_p11)  ;;  %v391_v38 = vunpack.c.l.bf16 (!%p296_p11), %v373_v25  ;;  %v392_v39 = vunpack.c.h.bf16 (!%p296_p11), %v373_v25  ;;  %v378_v40 = vld [vmem:[%s1220_s12 + $0x38] sm:$0xff] (!%p296_p11)  ;;  %v379_v41 = vld [vmem:[%s1220_s12 + $0x40] sm:$0xff] (!%p296_p11)  ;;  %v393_v42 = vunpack.c.l.bf16 (!%p296_p11), %v374_v28  ;;  %v394_v43 = vunpack.c.h.bf16 (!%p296_p11), %v374_v28 }
  0x2e   : > { %v395_v44 = vunpack.c.l.bf16 (!%p296_p11), %v375_v29  ;;  %v396_v45 = vunpack.c.h.bf16 (!%p296_p11), %v375_v29  ;;  %v397_v47 = vunpack.c.l.bf16 (!%p296_p11), %v376_v34  ;;  %v398_v48 = vunpack.c.h.bf16 (!%p296_p11), %v376_v34  ;;  %v380_v50 = vld [vmem:[%s1220_s12 + $0x48] sm:$0xff] (!%p296_p11)  ;;  %v381_v51 = vld [vmem:[%s1220_s12 + $0x50] sm:$0xff] (!%p296_p11)  ;;  %v382_v56 = vld [vmem:[%s1220_s12 + $0x58] sm:$0xff] (!%p296_p11) }
  0x2f   : > { %s344_s22 = scalar_select %p343_p12, %s1084_s15, 1  ;;  %v399_v49 = vunpack.c.l.bf16 %v377_v35  ;;  %v400_v52 = vunpack.c.h.bf16 %v377_v35  ;;  %v401_v53 = vunpack.c.l.bf16 %v378_v40  ;;  %v402_v54 = vunpack.c.h.bf16 %v378_v40  ;;  %v383_v57 = vld [vmem:[%s1220_s12 + $0x60] sm:$0xff]  ;;  %v384_v61 = vld [vmem:[%s1220_s12 + $0x68] sm:$0xff]  ;;  %v385_v62 = vld [vmem:[%s1220_s12 + $0x70] sm:$0xff] }
  0x30   : > { %s346_s26 = scalar_select %p345_p13, %s1204_s11, 3  ;;  %v403_v55 = vunpack.c.l.bf16 %v379_v41  ;;  %v404_v60 = vunpack.c.h.bf16 %v379_v41  ;;  %v405_v63 = vunpack.c.l.bf16 %v380_v50  ;;  %v406_v0 = vunpack.c.h.bf16 %v380_v50  ;;  %v386_v3 = vld [vmem:[%s1220_s12 + $0x78] sm:$0xff] }
  0x31   : > { %s943_s25 = sshll.u32 %s344_s22, 2  ;;  %v407_v1 = vunpack.c.l.bf16 %v381_v51  ;;  %v408_v2 = vunpack.c.h.bf16 %v381_v51  ;;  %v409_v4 = vunpack.c.l.bf16 %v382_v56  ;;  %v410_v5 = vunpack.c.h.bf16 %v382_v56  ;;  %s964_s8 = sshll.u32 (%p1166_p6), %s1084_s15, 6 }
  0x32   : > { %s348_s28 = sadd.s32 %s943_s25, %s346_s26  ;;  %v411_v6 = vunpack.c.l.bf16 %v383_v57  ;;  %v412_v7 = vunpack.c.h.bf16 %v383_v57  ;;  %v413_v8 = vunpack.c.l.bf16 %v384_v61  ;;  %v414_v9 = vunpack.c.h.bf16 %v384_v61  ;;  %s725_s23 = sadd.s32 (%p1166_p6), %s964_s8, %s1204_s11 }
  0x33   : > { %s349_s4 = scalar_lea.vmem %s1414_s1, %s348_s28  ;;  %s358_s6 = scalar_lea.vmem %s1415_s2, %s348_s28  ;;  %v415_v10 = vunpack.c.l.bf16 %v385_v62  ;;  %v416_v11 = vunpack.c.h.bf16 %v385_v62  ;;  %v417_v14 = vunpack.c.l.bf16 %v386_v3  ;;  %v418_v15 = vunpack.c.h.bf16 %v386_v3 }
  0x34   : > { %v362_v17 = vld [vmem:[%s349_s4] sm:$0x3]  ;;  %s965_s9 = sshll.u32 (%p1166_p6), %s725_s23, 2 }
  0x35   : > { %v364_v18 = vld [vmem:[%s358_s6] sm:$0x3]  ;;  %v363_v19 = vmul.f32 0.008264462, %v362_v17  ;;  %s727_s22 = scalar_lea.vmem (%p1166_p6), %s1416_s3, %s965_s9 }
  0x36   : > { %v365_v20 = vmul.f32 0.008264462, %v364_v18 }
  0x37   : > { %v366_v23 = vmul.f32 %v363_v19, %v363_v19  ;;  %v423_v58 = vrot.slane %v363_v19, %v422_v31  ;;  %v427_v59 = vrot.slane %v363_v19, %v426_v32 }
  0x39   : > { %v367_v26 = vsub.f32 %v365_v20, %v366_v23  ;;  %v430_v12 = vsub.f32 %v387_v27, %v423_v58  ;;  %v431_v13 = vsub.f32 %v388_v30, %v427_v59  ;;  %v432_v16 = vsub.f32 %v389_v33, %v423_v58 }
  0x3a   : > { %v433_v17 = vsub.f32 %v390_v37, %v427_v59  ;;  %v434_v18 = vsub.f32 %v391_v38, %v423_v58  ;;  %v435_v19 = vsub.f32 %v392_v39, %v427_v59  ;;  %v436_v20 = vsub.f32 %v393_v42, %v423_v58 }
  0x3b   : > { %v368_v36 = vmax.f32 %v367_v26, 0.0  ;;  %v437_v21 = vsub.f32 %v394_v43, %v427_v59  ;;  %v438_v23 = vsub.f32 %v395_v44, %v423_v58  ;;  %v1246_v24 = vsub.f32 %v396_v45, %v427_v59 }
  0x3c   : > { %v440_v25 = vsub.f32 %v397_v47, %v423_v58  ;;  %v441_v26 = vsub.f32 %v398_v48, %v427_v59  ;;  %v1248_v28 = vsub.f32 %v399_v49, %v423_v58  ;;  %v1250_v29 = vsub.f32 %v400_v52, %v427_v59 }
  0x3d   : > { %v369_v46 = vadd.f32 1e-05, %v368_v36  ;;  %v1252_v34 = vsub.f32 %v401_v53, %v423_v58  ;;  %v1254_v27 = vsub.f32 %v402_v54, %v427_v59  ;;  %v1256_v30 = vsub.f32 %v403_v55, %v423_v58 }
  0x3e   : > { %v1258_v33 = vsub.f32 %v404_v60, %v427_v59  ;;  %v1260_v35 = vsub.f32 %v405_v63, %v423_v58  ;;  %v1262_v36 = vsub.f32 %v406_v0, %v427_v59  ;;  %v1264_v37 = vsub.f32 %v407_v1, %v423_v58 }
  0x3f   : > { %1040 = vrsqrt.f32 %v369_v46  ;;  %v1266_v38 = vsub.f32 %v408_v2, %v427_v59  ;;  %v1268_v40 = vsub.f32 %v409_v4, %v423_v58  ;;  %v1270_v41 = vsub.f32 %v410_v5, %v427_v59 }
  0x40   : > { %v1272_v42 = vsub.f32 %v411_v6, %v423_v58  ;;  %v1274_v43 = vsub.f32 %v412_v7, %v427_v59  ;;  %v1284_v46 = vsub.f32 %v413_v8, %v423_v58  ;;  %v1286_v47 = vsub.f32 %v414_v9, %v427_v59 }
  0x41   : > { %v1288_v48 = vsub.f32 %v415_v10, %v423_v58  ;;  %v1290_v49 = vsub.f32 %v416_v11, %v427_v59  ;;  %v1292_v50 = vsub.f32 %v417_v14, %v423_v58  ;;  %v1294_v51 = vsub.f32 %v418_v15, %v427_v59 }
  0x49   : > { %v1041_v39 = vpop.eup %1040 }
  0x4a   : > { %v1278_v44 = vrot.slane %v1041_v39, %v422_v31  ;;  %v1282_v45 = vrot.slane %v1041_v39, %v426_v32 }
  0x4c   : > { %v473_v52 = vmul.f32 %v1278_v44, %v430_v12  ;;  %v474_v31 = vmul.f32 %v1282_v45, %v431_v13  ;;  %v475_v22 = vmul.f32 %v1278_v44, %v432_v16  ;;  %v476_v32 = vmul.f32 %v1282_v45, %v433_v17 }
  0x4d   : > { %v477_v53 = vmul.f32 %v1278_v44, %v434_v18  ;;  %v478_v54 = vmul.f32 %v1282_v45, %v435_v19  ;;  %v479_v55 = vmul.f32 %v1278_v44, %v436_v20  ;;  %v480_v56 = vmul.f32 %v1282_v45, %v437_v21 }
  0x4e   : > { %vm505_vm0 = vcmp.ge.f32.partialorder %v473_v52, 0.0  ;;  %vm506_vm1 = vcmp.ge.f32.partialorder %v474_v31, 0.0  ;;  %v537_v57 = vmul.f32 0.2, %v473_v52  ;;  %v538_v58 = vmul.f32 0.2, %v474_v31 }
  0x4f   : > { %vm507_vm2 = vcmp.ge.f32.partialorder %v475_v22, 0.0  ;;  %vm508_vm3 = vcmp.ge.f32.partialorder %v476_v32, 0.0  ;;  %v539_v59 = vmul.f32 0.2, %v475_v22  ;;  %v540_v60 = vmul.f32 0.2, %v476_v32 }
  0x50   : > { %v569_v61 = vsel %vm505_vm0, %v473_v52, %v537_v57  ;;  %v570_v62 = vsel %vm506_vm1, %v474_v31, %v538_v58  ;;  %vm509_vm4 = vcmp.ge.f32.partialorder %v477_v53, 0.0  ;;  %vm510_vm5 = vcmp.ge.f32.partialorder %v478_v54, 0.0 }
  0x51   : > { %v968_v63 = vpack.c.bf16 %v570_v62, %v569_v61  ;;  %v571_v0 = vsel %vm507_vm2, %v475_v22, %v539_v59  ;;  %v572_v1 = vsel %vm508_vm3, %v476_v32, %v540_v60  ;;  %v541_v2 = vmul.f32 0.2, %v477_v53 }
  0x52   : > { %v969_v3 = vpack.c.bf16 %v572_v1, %v571_v0  ;;  %v542_v4 = vmul.f32 0.2, %v478_v54  ;;  %vm511_vm6 = vcmp.ge.f32.partialorder %v479_v55, 0.0  ;;  %vm512_vm7 = vcmp.ge.f32.partialorder %v480_v56, 0.0 }
  0x53   : > { %697 = vst [vmem:[%s1305_s7] sm:$0xff] %v968_v63  ;;  %v573_v5 = vsel %vm509_vm4, %v477_v53, %v541_v2  ;;  %v543_v6 = vmul.f32 0.2, %v479_v55  ;;  %v544_v7 = vmul.f32 0.2, %v480_v56  ;;  %v481_v8 = vmul.f32 %v1278_v44, %v438_v23 }
  0x54   : > { %698 = vst [vmem:[%s1305_s7 + $0x8] sm:$0xff] %v969_v3  ;;  %v574_v9 = vsel %vm510_vm5, %v478_v54, %v542_v4  ;;  %v482_v10 = vmul.f32 %v1282_v45, %v1246_v24  ;;  %v483_v11 = vmul.f32 %v1278_v44, %v440_v25  ;;  %v484_v12 = vmul.f32 %v1282_v45, %v441_v26 }
  0x55   : > { %v970_v13 = vpack.c.bf16 %v574_v9, %v573_v5  ;;  %v575_v14 = vsel %vm511_vm6, %v479_v55, %v543_v6  ;;  %v576_v15 = vsel %vm512_vm7, %v480_v56, %v544_v7  ;;  %vm513_vm8 = vcmp.ge.f32.partialorder %v481_v8, 0.0 }
  0x56   : > { %v971_v16 = vpack.c.bf16 %v576_v15, %v575_v14  ;;  %vm514_vm9 = vcmp.ge.f32.partialorder %v482_v10, 0.0  ;;  %v545_v17 = vmul.f32 0.2, %v481_v8  ;;  %v546_v18 = vmul.f32 0.2, %v482_v10 }
  0x57   : > { %699 = vst [vmem:[%s1305_s7 + $0x10] sm:$0xff] %v970_v13  ;;  %vm515_vm10 = vcmp.ge.f32.partialorder %v483_v11, 0.0  ;;  %vm516_vm11 = vcmp.ge.f32.partialorder %v484_v12, 0.0  ;;  %v547_v19 = vmul.f32 0.2, %v483_v11  ;;  %v485_v24 = vmul.f32 %v1278_v44, %v1248_v28 }
  0x58   : > { %v548_v20 = vmul.f32 0.2, %v484_v12  ;;  %700 = vst [vmem:[%s1305_s7 + $0x18] sm:$0xff] %v971_v16  ;;  %v577_v21 = vsel %vm513_vm8, %v481_v8, %v545_v17  ;;  %v578_v23 = vsel %vm514_vm9, %v482_v10, %v546_v18  ;;  %v486_v25 = vmul.f32 %v1282_v45, %v1250_v29 }
  0x59   : > { %v972_v26 = vpack.c.bf16 %v578_v23, %v577_v21  ;;  %v579_v39 = vsel %vm515_vm10, %v483_v11, %v547_v19  ;;  %v487_v31 = vmul.f32 %v1278_v44, %v1252_v34  ;;  %vm517_vm12 = vcmp.ge.f32.partialorder %v485_v24, 0.0 }
  0x5a   : > { %v580_v52 = vsel %vm516_vm11, %v484_v12, %v548_v20  ;;  %vm518_vm13 = vcmp.ge.f32.partialorder %v486_v25, 0.0  ;;  %v549_v32 = vmul.f32 0.2, %v485_v24  ;;  %v550_v53 = vmul.f32 0.2, %v486_v25 }
  0x5b   : > { %v973_v22 = vpack.c.bf16 %v580_v52, %v579_v39  ;;  %701 = vst [vmem:[%s1305_s7 + $0x20] sm:$0xff] %v972_v26  ;;  %v488_v54 = vmul.f32 %v1282_v45, %v1254_v27  ;;  %vm519_vm14 = vcmp.ge.f32.partialorder %v487_v31, 0.0  ;;  %v551_v28 = vmul.f32 0.2, %v487_v31 }
  0x5c   : > { %v581_v55 = vsel %vm517_vm12, %v485_v24, %v549_v32  ;;  %v489_v29 = vmul.f32 %v1278_v44, %v1256_v30  ;;  %v490_v34 = vmul.f32 %v1282_v45, %v1258_v33  ;;  %v491_v56 = vmul.f32 %v1278_v44, %v1260_v35 }
  0x5d   : > { %702 = vst [vmem:[%s1305_s7 + $0x28] sm:$0xff] %v973_v22  ;;  %v582_v57 = vsel %vm518_vm13, %v486_v25, %v550_v53  ;;  %vm520_vm15 = vcmp.ge.f32.partialorder %v488_v54, 0.0  ;;  %v552_v58 = vmul.f32 0.2, %v488_v54  ;;  %v583_v59 = vsel %vm519_vm14, %v487_v31, %v551_v28 }
  0x5e   : > { %v974_v60 = vpack.c.bf16 %v582_v57, %v581_v55  ;;  %vm521_vm0 = vcmp.ge.f32.partialorder %v489_v29, 0.0  ;;  %vm522_vm1 = vcmp.ge.f32.partialorder %v490_v34, 0.0  ;;  %v553_v27 = vmul.f32 0.2, %v489_v29 }
  0x5f   : > { %v584_v61 = vsel %vm520_vm15, %v488_v54, %v552_v58  ;;  %v554_v62 = vmul.f32 0.2, %v490_v34  ;;  %v492_v30 = vmul.f32 %v1282_v45, %v1262_v36  ;;  %vm523_vm2 = vcmp.ge.f32.partialorder %v491_v56, 0.0 }
  0x60   : > { %703 = vst [vmem:[%s1305_s7 + $0x30] sm:$0xff] %v974_v60  ;;  %v975_v33 = vpack.c.bf16 %v584_v61, %v583_v59  ;;  %v585_v63 = vsel %vm521_vm0, %v489_v29, %v553_v27  ;;  %v555_v35 = vmul.f32 0.2, %v491_v56  ;;  %v493_v0 = vmul.f32 %v1278_v44, %v1264_v37 }
  0x61   : > { %v586_v1 = vsel %vm522_vm1, %v490_v34, %v554_v62  ;;  %vm524_vm3 = vcmp.ge.f32.partialorder %v492_v30, 0.0  ;;  %v556_v2 = vmul.f32 0.2, %v492_v30  ;;  %v494_v3 = vmul.f32 %v1282_v45, %v1266_v38 }
  0x62   : > { %704 = vst [vmem:[%s1305_s7 + $0x38] sm:$0xff] %v975_v33  ;;  %v976_v4 = vpack.c.bf16 %v586_v1, %v585_v63  ;;  %v587_v5 = vsel %vm523_vm2, %v491_v56, %v555_v35  ;;  %vm525_vm4 = vcmp.ge.f32.partialorder %v493_v0, 0.0  ;;  %v557_v36 = vmul.f32 0.2, %v493_v0  ;;  %v793_v56 = vld [vmem:[%s1305_s7 + $0x20] sm:$0xff] (%p1166_p6) }
  0x63   : > { %v588_v6 = vsel %vm524_vm3, %v492_v30, %v556_v2  ;;  %vm526_vm5 = vcmp.ge.f32.partialorder %v494_v3, 0.0  ;;  %v558_v7 = vmul.f32 0.2, %v494_v3  ;;  %v495_v8 = vmul.f32 %v1278_v44, %v1268_v40  ;;  %794 = vst [vmem:[%s727_s22 + $0x40] sm:$0xff] (%p1166_p6), %v793_v56 }
  0x64   : > { %705 = vst [vmem:[%s1305_s7 + $0x40] sm:$0xff] %v976_v4  ;;  %v977_v37 = vpack.c.bf16 %v588_v6, %v587_v5  ;;  %v589_v9 = vsel %vm525_vm4, %v493_v0, %v557_v36  ;;  %v496_v10 = vmul.f32 %v1282_v45, %v1270_v41  ;;  %v497_v38 = vmul.f32 %v1278_v44, %v1272_v42  ;;  %v795_v57 = vld [vmem:[%s1305_s7 + $0x28] sm:$0xff] (%p1166_p6) }
  0x65   : > { %v590_v11 = vsel %vm526_vm5, %v494_v3, %v558_v7  ;;  %vm527_vm6 = vcmp.ge.f32.partialorder %v495_v8, 0.0  ;;  %v559_v12 = vmul.f32 0.2, %v495_v8  ;;  %v498_v13 = vmul.f32 %v1282_v45, %v1274_v43  ;;  %796 = vst [vmem:[%s727_s22 + $0x50] sm:$0xff] (%p1166_p6), %v795_v57 }
  0x66   : > { %706 = vst [vmem:[%s1305_s7 + $0x48] sm:$0xff] %v977_v37  ;;  %v978_v14 = vpack.c.bf16 %v590_v11, %v589_v9  ;;  %vm528_vm7 = vcmp.ge.f32.partialorder %v496_v10, 0.0  ;;  %v560_v40 = vmul.f32 0.2, %v496_v10  ;;  %vm529_vm8 = vcmp.ge.f32.partialorder %v497_v38, 0.0 }
  0x67   : > { %v591_v15 = vsel %vm527_vm6, %v495_v8, %v559_v12  ;;  %vm530_vm9 = vcmp.ge.f32.partialorder %v498_v13, 0.0  ;;  %v561_v16 = vmul.f32 0.2, %v497_v38  ;;  %v562_v17 = vmul.f32 0.2, %v498_v13  ;;  %v797_v58 = vld [vmem:[%s1305_s7 + $0x30] sm:$0xff] (%p1166_p6) }
  0x68   : > { %707 = vst [vmem:[%s1305_s7 + $0x50] sm:$0xff] %v978_v14  ;;  %v592_v41 = vsel %vm528_vm7, %v496_v10, %v560_v40  ;;  %v499_v42 = vmul.f32 %v1278_v44, %v1284_v46  ;;  %v500_v18 = vmul.f32 %v1282_v45, %v1286_v47  ;;  %v501_v43 = vmul.f32 %v1278_v44, %v1288_v48 }
  0x69   : > { %v979_v19 = vpack.c.bf16 %v592_v41, %v591_v15  ;;  %v593_v20 = vsel %vm529_vm8, %v497_v38, %v561_v16  ;;  %v594_v21 = vsel %vm530_vm9, %v498_v13, %v562_v17  ;;  %v502_v23 = vmul.f32 %v1282_v45, %v1290_v49  ;;  %v799_v59 = vld [vmem:[%s1305_s7 + $0x38] sm:$0xff] (%p1166_p6)  ;;  %798 = vst [vmem:[%s727_s22 + $0x60] sm:$0xff] (%p1166_p6), %v797_v58 }
  0x6a   : > { %v980_v24 = vpack.c.bf16 %v594_v21, %v593_v20  ;;  %vm531_vm10 = vcmp.ge.f32.partialorder %v499_v42, 0.0  ;;  %vm532_vm11 = vcmp.ge.f32.partialorder %v500_v18, 0.0  ;;  %v563_v25 = vmul.f32 0.2, %v499_v42  ;;  %800 = vst [vmem:[%s727_s22 + $0x70] sm:$0xff] (%p1166_p6), %v799_v59 }
  0x6b   : > { %708 = vst [vmem:[%s1305_s7 + $0x58] sm:$0xff] %v979_v19  ;;  %v564_v26 = vmul.f32 0.2, %v500_v18  ;;  %vm533_vm12 = vcmp.ge.f32.partialorder %v501_v43, 0.0  ;;  %vm534_vm13 = vcmp.ge.f32.partialorder %v502_v23, 0.0  ;;  %v503_v39 = vmul.f32 %v1278_v44, %v1292_v50  ;;  %v785_v44 = vld [vmem:[%s1305_s7] sm:$0xff] (%p1166_p6) }
  0x6c   : > { %v565_v46 = vmul.f32 0.2, %v501_v43  ;;  %709 = vst [vmem:[%s1305_s7 + $0x60] sm:$0xff] %v980_v24  ;;  %v595_v47 = vsel %vm531_vm10, %v499_v42, %v563_v25  ;;  %v566_v48 = vmul.f32 0.2, %v502_v23  ;;  %v504_v49 = vmul.f32 %v1282_v45, %v1294_v51  ;;  %v787_v45 = vld [vmem:[%s1305_s7 + $0x8] sm:$0xff] (%p1166_p6)  ;;  %786 = vst [vmem:[%s727_s22] sm:$0xff] (%p1166_p6), %v785_v44 }
  0x6d   : > { %v596_v52 = vsel %vm532_vm11, %v500_v18, %v564_v26  ;;  %vm535_vm14 = vcmp.ge.f32.partialorder %v503_v39, 0.0  ;;  %v567_v54 = vmul.f32 0.2, %v503_v39  ;;  %v789_v50 = vld [vmem:[%s1305_s7 + $0x10] sm:$0xff] (%p1166_p6)  ;;  %v791_v51 = vld [vmem:[%s1305_s7 + $0x18] sm:$0xff] (%p1166_p6)  ;;  %v801_v60 = vld [vmem:[%s1305_s7 + $0x40] sm:$0xff] (%p1166_p6) }
  0x6e   : > { %v597_v31 = vsel %vm533_vm12, %v501_v43, %v565_v46  ;;  %v981_v22 = vpack.c.bf16 %v596_v52, %v595_v47  ;;  %v598_v32 = vsel %vm534_vm13, %v502_v23, %v566_v48  ;;  %vm536_vm15 = vcmp.ge.f32.partialorder %v504_v49, 0.0  ;;  %719 = sbr.rel (!%p1166_p6) target bundleno = 125 (0x7d), region = 74  ;;  %v803_v27 = vld [vmem:[%s1305_s7 + $0x48] sm:$0xff] (%p1166_p6)  ;;  %788 = vst [vmem:[%s727_s22 + $0x10] sm:$0xff] (%p1166_p6), %v787_v45  ;;  %790 = vst [vmem:[%s727_s22 + $0x20] sm:$0xff] (%p1166_p6), %v789_v50 }
  0x6f   : > { %v982_v53 = vpack.c.bf16 %v598_v32, %v597_v31  ;;  %v568_v28 = vmul.f32 0.2, %v504_v49  ;;  %v599_v55 = vsel %vm535_vm14, %v503_v39, %v567_v54  ;;  %v805_v61 = vld [vmem:[%s1305_s7 + $0x50] sm:$0xff] (%p1166_p6)  ;;  %792 = vst [vmem:[%s727_s22 + $0x30] sm:$0xff] (%p1166_p6), %v791_v51  ;;  %802 = vst [vmem:[%s727_s22 + $0x80] sm:$0xff] (%p1166_p6), %v801_v60 }
  0x70   : > { %710 = vst [vmem:[%s1305_s7 + $0x68] sm:$0xff] %v981_v22  ;;  %804 = vst [vmem:[%s727_s22 + $0x90] sm:$0xff] (%p1166_p6), %v803_v27 }
  0x71   : > { %711 = vst [vmem:[%s1305_s7 + $0x70] sm:$0xff] %v982_v53  ;;  %v600_v29 = vsel %vm536_vm15, %v504_v49, %v568_v28  ;;  %806 = vst [vmem:[%s727_s22 + $0xa0] sm:$0xff] (%p1166_p6), %v805_v61 }
  0x72   : > { %v983_v34 = vpack.c.bf16 %v600_v29, %v599_v55  ;;  %v807_v62 = vld [vmem:[%s1305_s7 + $0x58] sm:$0xff] (%p1166_p6) }
  0x73   : > { %808 = vst [vmem:[%s727_s22 + $0xb0] sm:$0xff] (%p1166_p6), %v807_v62  ;;  %v809_v30 = vld [vmem:[%s1305_s7 + $0x60] sm:$0xff] (%p1166_p6) }
  0x74   : > { %712 = vst [vmem:[%s1305_s7 + $0x78] sm:$0xff] %v983_v34  ;;  %810 = vst [vmem:[%s727_s22 + $0xc0] sm:$0xff] (%p1166_p6), %v809_v30 }
  0x77   : > { %v811_v33 = vld [vmem:[%s1305_s7 + $0x68] sm:$0xff] }
  0x78   : > { %v813_v63 = vld [vmem:[%s1305_s7 + $0x70] sm:$0xff]  ;;  %812 = vst [vmem:[%s727_s22 + $0xd0] sm:$0xff] %v811_v33 }
  0x79   : > { %814 = vst [vmem:[%s727_s22 + $0xe0] sm:$0xff] %v813_v63 }
  0x7b   : > { %v815_v35 = vld [vmem:[%s1305_s7 + $0x78] sm:$0xff] }
  0x7c   : > { %816 = vst [vmem:[%s727_s22 + $0xf0] sm:$0xff] %v815_v35 }
  0x7d PF: > { %s13_s18 = sadd.s32 1, %s1096_s18   ;;  %s1418_s12 = smov %s1076_s13 }
  0x7e   : > { %p10_p0 = scmp.ge.s32.totalorder %s13_s18, 6   ;;  %s1419_s13 = smov %s1174_s27 }
  0x7f   : > { %s1420_s14 = smov %s1088_s16  ;;  %s1421_s15 = smov %s1092_s17 }
  0x80   : > { %s1422_s16 = smov %s1425_s19  ;;  %s1423_s17 = smov %s1429_s20 }
  0x81   :  { %12 = sbr.rel (!%p10_p0) target bundleno = 4 (0x4), region = 149 }

// kernel: discriminator_forward.13
= control target key start
LH: loop header
LB: loop body
LE: loop exit
PB: predicated region body
PF: predicated region fallthrough
CT: control target
= control target key end

     0   :  { %s3440_s0 = inlined_call_operand.vmem [shape: bf16[2,128,4096], index: 0, kind: input, shape index: {}]   ;;  %s3441_s1 = inlined_call_operand.vmem [shape: bf16[4096,512], index: 1, kind: input, shape index: {}]   ;;  %s3442_s2 = inlined_call_operand.vmem [shape: f32[1,512], index: 2, kind: input, shape index: {}]   ;;  %s3443_s3 = inlined_call_operand.vmem [shape: bf16[2,128,512], index: 3, kind: output, shape index: {0}]   ;;  %s3444_s4 = inlined_call_operand.vmem [shape: f32[2,1,512], index: 4, kind: output, shape index: {1}]   ;;  %s3445_s5 = inlined_call_operand.vmem [shape: f32[2,1,512], index: 5, kind: output, shape index: {2}]  }
   0x1   :  { %3450 = sst [smem:[#allocation12_spill]] %s3440_s0 }
   0x2   :  { %3451 = sst [smem:[#allocation13_spill]] %s3441_s1 }
   0x3   :  { %3452 = sst [smem:[#allocation14_spill]] %s3443_s3 }
   0x4   :  { %3453 = sst [smem:[#allocation15_spill]] %s3444_s4 }
   0x5   :  { %3454 = sst [smem:[#allocation16_spill]] %s3445_s5 }
   0x6   :  { %s2881_s18 = smov 0   ;;  %s2883_s19 = smov 0  }
   0x7   :  { %s2885_s20 = smov 0   ;;  %s2887_s21 = smov 0  }
   0x8   :  { %s2889_s22 = smov 0   ;;  %s2891_s2 = smov 0  }
   0x9   :  { %s2893_s23 = smov 0   ;;  %s2895_s24 = smov 0  }
   0xa   :  { %s2897_s25 = smov 0   ;;  %s2899_s26 = smov 0  }
   0xb   :  { %s2901_s27 = smov 0   ;;  %s2903_s28 = smov 0  }
   0xc   :  { %s2905_s29 = smov 0  }
   0xd LB: > { %3455 = sst [smem:[#allocation8_spill]] %s2842_s28  ;;  %s31_s6 = sadd.s32 1, %s2834_s26  ;;  %s2846_s29 = sphi %s2905_s29, %s16_s29   ;;  %s2842_s28 = sphi %s2903_s28, %s3487_s28   ;;  %s2838_s27 = sphi %s2901_s27, %s3486_s27   ;;  %s2834_s26 = sphi %s2899_s26, %s3485_s26   ;;  %s2830_s25 = sphi %s2897_s25, %s3484_s25   ;;  %s2826_s24 = sphi %s2895_s24, %s3483_s24   ;;  %s2822_s23 = sphi %s2893_s23, %s3482_s23   ;;  %s2818_s2 = sphi %s2891_s2, %s3481_s2   ;;  %s2814_s22 = sphi %s2889_s22, %s3480_s22   ;;  %s2810_s21 = sphi %s2887_s21, %s3479_s21   ;;  %s2806_s20 = sphi %s2885_s20, %s3478_s20   ;;  %s2802_s19 = sphi %s2883_s19, %s3477_s19   ;;  %s2798_s18 = sphi %s2881_s18, %s3476_s18  }
   0xe   : > { %p32_p0 = scmp.ge.s32.totalorder %s31_s6, 8  ;;  %s38_s7 = sadd.s32 1, %s2838_s27 }
   0xf   : > { %s42_s8 = sadd.s32 1, %s2842_s28  ;;  %s53_s9 = sadd.s32 1, %s2818_s2 }
  0x10   : > { %s3489_s6 = smov (%p32_p0, %s31_s6), 0  ;;  %s3491_s7 = smov (!%p32_p0, %s38_s7), %s2838_s27 }
  0x11   : > { %3456 = sst [smem:[#allocation9_spill]] %s3489_s6  ;;  %s49_s10 = ssub.s32 %s2834_s26, %s3489_s6 }
  0x12   : > { %p60_p1 = scmp.ne.s32.totalorder %s2818_s2, %s2814_s22  ;;  %p40_p2 = scmp.ge.s32.totalorder %s3491_s7, 2 }
  0x13   : > { %p61_p3 = scmp.eq.s32.totalorder %s2846_s29, 0  ;;  %s81_s11 = sadd.s32 1, %s2810_s21 }
  0x14   : > { %p88_p4 = scmp.ne.s32.totalorder %s2810_s21, %s2806_s20  ;;  %s3493_s7 = smov (%p40_p2, %s3491_s7), 0 }
  0x15   : > { %3457 = sst [smem:[#allocation10_spill]] %s3493_s7  ;;  %s3495_s8 = smov (!%p40_p2, %s42_s8), %s2842_s28 }
  0x16   : > { %p2965_p5 = por %p61_p3, %p60_p1  ;;  %s77_s13 = ssub.s32 %s2838_s27, %s3493_s7 }
  0x17   : > { %p44_p6 = scmp.ge.s32.totalorder %s3495_s8, 2  ;;  %s78_s14 = sor.u32 %s77_s13, %s49_s10 }
  0x18   : > { %p79_p7 = scmp.eq.s32.totalorder %s78_s14, 0  ;;  %p2971_p8 = por %p88_p4, %p61_p3 }
  0x19   : > { %s3497_s8 = smov (%p44_p6, %s3495_s8), 0  ;;  %s137_s30 = sadd.s32 1, %s2802_s19 }
  0x1a   : > { %3460 = sst [smem:[#allocation11_spill]] %s3497_s8  ;;  %s46_s17 = ssub.s32 %s2842_s28, %s3497_s8 }
  0x1b   : > { %s2978_s16 = scalar_select %p79_p7, %s2810_s21, %s81_s11  }
  0x1c   : > { %s50_s6 = sor.u32 %s49_s10, %s46_s17  ;;  %s134_s3 = sor.u32 %s77_s13, %s46_s17 }
  0x1d   : > { %p51_p9 = scmp.eq.s32.totalorder %s50_s6, 0  ;;  %p135_p10 = scmp.eq.s32.totalorder %s134_s3, 0 }
  0x1e   : > { %p147_p11 = scmp.ne.s32.totalorder %s2802_s19, %s2798_s18  ;;  %s3461_s7 = sadd.s32 4294967295, %s2846_s29  }
  0x1f   : > { %p148_p12 = scmp.eq.s32.totalorder %s3461_s7, 31  ;;  %p2302_p0 = scmp.ge.s32.totalorder %s2846_s29, 32 }
  0x20   : > { %s2988_s5 = scalar_select %p51_p9, %s2818_s2, %s53_s9  }
  0x21   : > { %s2991_s14 = scalar_select %p135_p10, %s2802_s19, %s137_s30  }
  0x22   : > { %p2993_p13 = por %p148_p12, %p147_p11  ;;  %226 = sbr.rel (%p2302_p0) target bundleno = 109 (0x6d), region = 16 }
  0x29   : > { %229 = sbr.rel (!%p2965_p5) target bundleno = 67 (0x43), region = 20  ;;  %s231_s3 = sand.u32 (%p2965_p5), 1, %s2818_s2  }
  0x2a   : > { %s2304_s6 = sshll.u32 (%p2965_p5), %s2834_s26, 2  ;;  %s2303_s7 = sshll.u32 (%p2965_p5), %s231_s3, 8 }
  0x2b   : > { %s2305_s9 = sshll.u32 (%p2965_p5), %s2842_s28, 9  ;;  %s3463_s0 = sld [smem:[#allocation12_spill]] (%p2965_p5) }
  0x2c   : > { %s239_s10 = sadd.s32 (%p2965_p5), %s2305_s9, %s2304_s6  ;;  %s3011_s12 = scalar_lea.vmem (%p2965_p5), [#allocation5], %s2303_s7 }
  0x2d   : > { %s2306_s30 = sshll.u32 (%p2965_p5), %s239_s10, 2 }
  0x31   : > { %s3006_s17 = scalar_lea.vmem %s3463_s0, %s2306_s30 }
  0x32   : > { %v254_v0 = vld [vmem:[%s3006_s17] sm:$0xff]  ;;  %v256_v1 = vld [vmem:[%s3006_s17 + $0x8] sm:$0xff] }
  0x33   : > { %v258_v2 = vld [vmem:[%s3006_s17 + $0x80] sm:$0xff]  ;;  %255 = vst [vmem:[%s3011_s12] sm:$0xff] %v254_v0  ;;  %257 = vst [vmem:[%s3011_s12 + $0x8] sm:$0xff] %v256_v1  ;;  %v260_v3 = vld [vmem:[%s3006_s17 + $0x88] sm:$0xff] }
  0x34   : > { %259 = vst [vmem:[%s3011_s12 + $0x10] sm:$0xff] %v258_v2  ;;  %v262_v4 = vld [vmem:[%s3006_s17 + $0x100] sm:$0xff]  ;;  %v264_v5 = vld [vmem:[%s3006_s17 + $0x108] sm:$0xff]  ;;  %261 = vst [vmem:[%s3011_s12 + $0x18] sm:$0xff] %v260_v3 }
  0x35   : > { %263 = vst [vmem:[%s3011_s12 + $0x20] sm:$0xff] %v262_v4  ;;  %265 = vst [vmem:[%s3011_s12 + $0x28] sm:$0xff] %v264_v5  ;;  %v266_v6 = vld [vmem:[%s3006_s17 + $0x180] sm:$0xff]  ;;  %v268_v7 = vld [vmem:[%s3006_s17 + $0x188] sm:$0xff] }
  0x36   : > { %v270_v8 = vld [vmem:[%s3006_s17 + $0x200] sm:$0xff]  ;;  %267 = vst [vmem:[%s3011_s12 + $0x30] sm:$0xff] %v266_v6  ;;  %269 = vst [vmem:[%s3011_s12 + $0x38] sm:$0xff] %v268_v7  ;;  %v272_v9 = vld [vmem:[%s3006_s17 + $0x208] sm:$0xff] }
  0x37   : > { %271 = vst [vmem:[%s3011_s12 + $0x40] sm:$0xff] %v270_v8  ;;  %v274_v10 = vld [vmem:[%s3006_s17 + $0x280] sm:$0xff]  ;;  %v276_v11 = vld [vmem:[%s3006_s17 + $0x288] sm:$0xff]  ;;  %273 = vst [vmem:[%s3011_s12 + $0x48] sm:$0xff] %v272_v9 }
  0x38   : > { %275 = vst [vmem:[%s3011_s12 + $0x50] sm:$0xff] %v274_v10  ;;  %277 = vst [vmem:[%s3011_s12 + $0x58] sm:$0xff] %v276_v11  ;;  %v278_v12 = vld [vmem:[%s3006_s17 + $0x300] sm:$0xff]  ;;  %v280_v13 = vld [vmem:[%s3006_s17 + $0x308] sm:$0xff] }
  0x39   : > { %v282_v14 = vld [vmem:[%s3006_s17 + $0x380] sm:$0xff]  ;;  %279 = vst [vmem:[%s3011_s12 + $0x60] sm:$0xff] %v278_v12  ;;  %281 = vst [vmem:[%s3011_s12 + $0x68] sm:$0xff] %v280_v13  ;;  %v284_v15 = vld [vmem:[%s3006_s17 + $0x388] sm:$0xff] }
  0x3a   : > { %283 = vst [vmem:[%s3011_s12 + $0x70] sm:$0xff] %v282_v14  ;;  %v286_v16 = vld [vmem:[%s3006_s17 + $0x400] sm:$0xff]  ;;  %v288_v17 = vld [vmem:[%s3006_s17 + $0x408] sm:$0xff]  ;;  %285 = vst [vmem:[%s3011_s12 + $0x78] sm:$0xff] %v284_v15 }
  0x3b   : > { %287 = vst [vmem:[%s3011_s12 + $0x80] sm:$0xff] %v286_v16  ;;  %289 = vst [vmem:[%s3011_s12 + $0x88] sm:$0xff] %v288_v17  ;;  %v290_v18 = vld [vmem:[%s3006_s17 + $0x480] sm:$0xff]  ;;  %v292_v19 = vld [vmem:[%s3006_s17 + $0x488] sm:$0xff] }
  0x3c   : > { %v294_v20 = vld [vmem:[%s3006_s17 + $0x500] sm:$0xff]  ;;  %291 = vst [vmem:[%s3011_s12 + $0x90] sm:$0xff] %v290_v18  ;;  %293 = vst [vmem:[%s3011_s12 + $0x98] sm:$0xff] %v292_v19  ;;  %v296_v21 = vld [vmem:[%s3006_s17 + $0x508] sm:$0xff] }
  0x3d   : > { %295 = vst [vmem:[%s3011_s12 + $0xa0] sm:$0xff] %v294_v20  ;;  %v298_v22 = vld [vmem:[%s3006_s17 + $0x580] sm:$0xff]  ;;  %v300_v23 = vld [vmem:[%s3006_s17 + $0x588] sm:$0xff]  ;;  %297 = vst [vmem:[%s3011_s12 + $0xa8] sm:$0xff] %v296_v21 }
  0x3e   : > { %299 = vst [vmem:[%s3011_s12 + $0xb0] sm:$0xff] %v298_v22  ;;  %301 = vst [vmem:[%s3011_s12 + $0xb8] sm:$0xff] %v300_v23  ;;  %v302_v24 = vld [vmem:[%s3006_s17 + $0x600] sm:$0xff]  ;;  %v304_v25 = vld [vmem:[%s3006_s17 + $0x608] sm:$0xff] }
  0x3f   : > { %v306_v26 = vld [vmem:[%s3006_s17 + $0x680] sm:$0xff]  ;;  %303 = vst [vmem:[%s3011_s12 + $0xc0] sm:$0xff] %v302_v24  ;;  %305 = vst [vmem:[%s3011_s12 + $0xc8] sm:$0xff] %v304_v25  ;;  %v308_v27 = vld [vmem:[%s3006_s17 + $0x688] sm:$0xff] }
  0x40   : > { %307 = vst [vmem:[%s3011_s12 + $0xd0] sm:$0xff] %v306_v26  ;;  %v310_v28 = vld [vmem:[%s3006_s17 + $0x700] sm:$0xff]  ;;  %v312_v29 = vld [vmem:[%s3006_s17 + $0x708] sm:$0xff]  ;;  %309 = vst [vmem:[%s3011_s12 + $0xd8] sm:$0xff] %v308_v27 }
  0x41   : > { %311 = vst [vmem:[%s3011_s12 + $0xe0] sm:$0xff] %v310_v28  ;;  %313 = vst [vmem:[%s3011_s12 + $0xe8] sm:$0xff] %v312_v29  ;;  %v314_v30 = vld [vmem:[%s3006_s17 + $0x780] sm:$0xff]  ;;  %v316_v31 = vld [vmem:[%s3006_s17 + $0x788] sm:$0xff] }
  0x42   : > { %315 = vst [vmem:[%s3011_s12 + $0xf0] sm:$0xff] %v314_v30  ;;  %317 = vst [vmem:[%s3011_s12 + $0xf8] sm:$0xff] %v316_v31 }
  0x43 PF: > { %323 = sbr.rel (!%p2971_p8) target bundleno = 109 (0x6d), region = 43  ;;  %s325_s3 = sand.u32 (%p2971_p8), 1, %s2810_s21  }
  0x44   : > { %s2309_s6 = sshll.u32 (%p2971_p8), %s2838_s27, 1  ;;  %s2307_s7 = sshll.u32 (%p2971_p8), %s325_s3, 9 }
  0x45   : > { %s2442_s9 = sshll.u32 (%p2971_p8), %s2834_s26, 8  ;;  %s3464_s1 = sld [smem:[#allocation13_spill]] (%p2971_p8) }
  0x46   : > { %s331_s10 = sadd.s32 (%p2971_p8), %s2442_s9, %s2309_s6  ;;  %s3087_s15 = scalar_lea.vmem (%p2971_p8), [#allocation6], %s2307_s7 }
  0x47   : > { %s2311_s30 = sshll.u32 (%p2971_p8), %s331_s10, 2 }
  0x4b   : > { %s3082_s0 = scalar_lea.vmem %s3464_s1, %s2311_s30 }
  0x4c   : > { %v487_v32 = vld [vmem:[%s3082_s0] sm:$0xff]  ;;  %v489_v33 = vld [vmem:[%s3082_s0 + $0x10] sm:$0xff] }
  0x4d   : > { %v491_v34 = vld [vmem:[%s3082_s0 + $0x20] sm:$0xff]  ;;  %488 = vst [vmem:[%s3087_s15] sm:$0xff] %v487_v32  ;;  %490 = vst [vmem:[%s3087_s15 + $0x8] sm:$0xff] %v489_v33  ;;  %v493_v35 = vld [vmem:[%s3082_s0 + $0x30] sm:$0xff] }
  0x4e   : > { %492 = vst [vmem:[%s3087_s15 + $0x10] sm:$0xff] %v491_v34  ;;  %v495_v36 = vld [vmem:[%s3082_s0 + $0x40] sm:$0xff]  ;;  %v497_v37 = vld [vmem:[%s3082_s0 + $0x50] sm:$0xff]  ;;  %494 = vst [vmem:[%s3087_s15 + $0x18] sm:$0xff] %v493_v35 }
  0x4f   : > { %496 = vst [vmem:[%s3087_s15 + $0x20] sm:$0xff] %v495_v36  ;;  %498 = vst [vmem:[%s3087_s15 + $0x28] sm:$0xff] %v497_v37  ;;  %v499_v38 = vld [vmem:[%s3082_s0 + $0x60] sm:$0xff]  ;;  %v501_v39 = vld [vmem:[%s3082_s0 + $0x70] sm:$0xff] }
  0x50   : > { %v503_v40 = vld [vmem:[%s3082_s0 + $0x80] sm:$0xff]  ;;  %500 = vst [vmem:[%s3087_s15 + $0x30] sm:$0xff] %v499_v38  ;;  %502 = vst [vmem:[%s3087_s15 + $0x38] sm:$0xff] %v501_v39  ;;  %v505_v41 = vld [vmem:[%s3082_s0 + $0x90] sm:$0xff] }
  0x51   : > { %504 = vst [vmem:[%s3087_s15 + $0x40] sm:$0xff] %v503_v40  ;;  %v507_v42 = vld [vmem:[%s3082_s0 + $0xa0] sm:$0xff]  ;;  %v509_v43 = vld [vmem:[%s3082_s0 + $0xb0] sm:$0xff]  ;;  %506 = vst [vmem:[%s3087_s15 + $0x48] sm:$0xff] %v505_v41 }
  0x52   : > { %508 = vst [vmem:[%s3087_s15 + $0x50] sm:$0xff] %v507_v42  ;;  %510 = vst [vmem:[%s3087_s15 + $0x58] sm:$0xff] %v509_v43  ;;  %v511_v44 = vld [vmem:[%s3082_s0 + $0xc0] sm:$0xff]  ;;  %v513_v45 = vld [vmem:[%s3082_s0 + $0xd0] sm:$0xff] }
  0x53   : > { %v515_v46 = vld [vmem:[%s3082_s0 + $0xe0] sm:$0xff]  ;;  %512 = vst [vmem:[%s3087_s15 + $0x60] sm:$0xff] %v511_v44  ;;  %514 = vst [vmem:[%s3087_s15 + $0x68] sm:$0xff] %v513_v45  ;;  %v517_v47 = vld [vmem:[%s3082_s0 + $0xf0] sm:$0xff] }
  0x54   : > { %516 = vst [vmem:[%s3087_s15 + $0x70] sm:$0xff] %v515_v46  ;;  %v519_v48 = vld [vmem:[%s3082_s0 + $0x100] sm:$0xff]  ;;  %v521_v49 = vld [vmem:[%s3082_s0 + $0x110] sm:$0xff]  ;;  %518 = vst [vmem:[%s3087_s15 + $0x78] sm:$0xff] %v517_v47 }
  0x55   : > { %520 = vst [vmem:[%s3087_s15 + $0x80] sm:$0xff] %v519_v48  ;;  %522 = vst [vmem:[%s3087_s15 + $0x88] sm:$0xff] %v521_v49  ;;  %v523_v50 = vld [vmem:[%s3082_s0 + $0x120] sm:$0xff]  ;;  %v525_v51 = vld [vmem:[%s3082_s0 + $0x130] sm:$0xff] }
  0x56   : > { %v527_v52 = vld [vmem:[%s3082_s0 + $0x140] sm:$0xff]  ;;  %524 = vst [vmem:[%s3087_s15 + $0x90] sm:$0xff] %v523_v50  ;;  %526 = vst [vmem:[%s3087_s15 + $0x98] sm:$0xff] %v525_v51  ;;  %v529_v53 = vld [vmem:[%s3082_s0 + $0x150] sm:$0xff] }
  0x57   : > { %528 = vst [vmem:[%s3087_s15 + $0xa0] sm:$0xff] %v527_v52  ;;  %v531_v54 = vld [vmem:[%s3082_s0 + $0x160] sm:$0xff]  ;;  %v533_v55 = vld [vmem:[%s3082_s0 + $0x170] sm:$0xff]  ;;  %530 = vst [vmem:[%s3087_s15 + $0xa8] sm:$0xff] %v529_v53 }
  0x58   : > { %532 = vst [vmem:[%s3087_s15 + $0xb0] sm:$0xff] %v531_v54  ;;  %534 = vst [vmem:[%s3087_s15 + $0xb8] sm:$0xff] %v533_v55  ;;  %v535_v56 = vld [vmem:[%s3082_s0 + $0x180] sm:$0xff]  ;;  %v537_v57 = vld [vmem:[%s3082_s0 + $0x190] sm:$0xff] }
  0x59   : > { %v539_v58 = vld [vmem:[%s3082_s0 + $0x1a0] sm:$0xff]  ;;  %536 = vst [vmem:[%s3087_s15 + $0xc0] sm:$0xff] %v535_v56  ;;  %538 = vst [vmem:[%s3087_s15 + $0xc8] sm:$0xff] %v537_v57  ;;  %v541_v59 = vld [vmem:[%s3082_s0 + $0x1b0] sm:$0xff] }
  0x5a   : > { %540 = vst [vmem:[%s3087_s15 + $0xd0] sm:$0xff] %v539_v58  ;;  %v543_v60 = vld [vmem:[%s3082_s0 + $0x1c0] sm:$0xff]  ;;  %v545_v61 = vld [vmem:[%s3082_s0 + $0x1d0] sm:$0xff]  ;;  %542 = vst [vmem:[%s3087_s15 + $0xd8] sm:$0xff] %v541_v59 }
  0x5b   : > { %544 = vst [vmem:[%s3087_s15 + $0xe0] sm:$0xff] %v543_v60  ;;  %546 = vst [vmem:[%s3087_s15 + $0xe8] sm:$0xff] %v545_v61  ;;  %v547_v62 = vld [vmem:[%s3082_s0 + $0x1e0] sm:$0xff]  ;;  %v549_v63 = vld [vmem:[%s3082_s0 + $0x1f0] sm:$0xff] }
  0x5c   : > { %v551_v0 = vld [vmem:[%s3082_s0 + $0x200] sm:$0xff]  ;;  %548 = vst [vmem:[%s3087_s15 + $0xf0] sm:$0xff] %v547_v62  ;;  %550 = vst [vmem:[%s3087_s15 + $0xf8] sm:$0xff] %v549_v63  ;;  %v553_v1 = vld [vmem:[%s3082_s0 + $0x210] sm:$0xff] }
  0x5d   : > { %552 = vst [vmem:[%s3087_s15 + $0x100] sm:$0xff] %v551_v0  ;;  %v555_v2 = vld [vmem:[%s3082_s0 + $0x220] sm:$0xff]  ;;  %v557_v3 = vld [vmem:[%s3082_s0 + $0x230] sm:$0xff]  ;;  %554 = vst [vmem:[%s3087_s15 + $0x108] sm:$0xff] %v553_v1 }
  0x5e   : > { %556 = vst [vmem:[%s3087_s15 + $0x110] sm:$0xff] %v555_v2  ;;  %558 = vst [vmem:[%s3087_s15 + $0x118] sm:$0xff] %v557_v3  ;;  %v559_v4 = vld [vmem:[%s3082_s0 + $0x240] sm:$0xff]  ;;  %v561_v5 = vld [vmem:[%s3082_s0 + $0x250] sm:$0xff] }
  0x5f   : > { %v563_v6 = vld [vmem:[%s3082_s0 + $0x260] sm:$0xff]  ;;  %560 = vst [vmem:[%s3087_s15 + $0x120] sm:$0xff] %v559_v4  ;;  %562 = vst [vmem:[%s3087_s15 + $0x128] sm:$0xff] %v561_v5  ;;  %v565_v7 = vld [vmem:[%s3082_s0 + $0x270] sm:$0xff] }
  0x60   : > { %564 = vst [vmem:[%s3087_s15 + $0x130] sm:$0xff] %v563_v6  ;;  %v567_v8 = vld [vmem:[%s3082_s0 + $0x280] sm:$0xff]  ;;  %v569_v9 = vld [vmem:[%s3082_s0 + $0x290] sm:$0xff]  ;;  %566 = vst [vmem:[%s3087_s15 + $0x138] sm:$0xff] %v565_v7 }
  0x61   : > { %568 = vst [vmem:[%s3087_s15 + $0x140] sm:$0xff] %v567_v8  ;;  %570 = vst [vmem:[%s3087_s15 + $0x148] sm:$0xff] %v569_v9  ;;  %v571_v10 = vld [vmem:[%s3082_s0 + $0x2a0] sm:$0xff]  ;;  %v573_v11 = vld [vmem:[%s3082_s0 + $0x2b0] sm:$0xff] }
  0x62   : > { %v575_v12 = vld [vmem:[%s3082_s0 + $0x2c0] sm:$0xff]  ;;  %572 = vst [vmem:[%s3087_s15 + $0x150] sm:$0xff] %v571_v10  ;;  %574 = vst [vmem:[%s3087_s15 + $0x158] sm:$0xff] %v573_v11  ;;  %v577_v13 = vld [vmem:[%s3082_s0 + $0x2d0] sm:$0xff] }
  0x63   : > { %576 = vst [vmem:[%s3087_s15 + $0x160] sm:$0xff] %v575_v12  ;;  %v579_v14 = vld [vmem:[%s3082_s0 + $0x2e0] sm:$0xff]  ;;  %v581_v15 = vld [vmem:[%s3082_s0 + $0x2f0] sm:$0xff]  ;;  %578 = vst [vmem:[%s3087_s15 + $0x168] sm:$0xff] %v577_v13 }
  0x64   : > { %580 = vst [vmem:[%s3087_s15 + $0x170] sm:$0xff] %v579_v14  ;;  %582 = vst [vmem:[%s3087_s15 + $0x178] sm:$0xff] %v581_v15  ;;  %v583_v16 = vld [vmem:[%s3082_s0 + $0x300] sm:$0xff]  ;;  %v585_v17 = vld [vmem:[%s3082_s0 + $0x310] sm:$0xff] }
  0x65   : > { %v587_v18 = vld [vmem:[%s3082_s0 + $0x320] sm:$0xff]  ;;  %584 = vst [vmem:[%s3087_s15 + $0x180] sm:$0xff] %v583_v16  ;;  %586 = vst [vmem:[%s3087_s15 + $0x188] sm:$0xff] %v585_v17  ;;  %v589_v19 = vld [vmem:[%s3082_s0 + $0x330] sm:$0xff] }
  0x66   : > { %588 = vst [vmem:[%s3087_s15 + $0x190] sm:$0xff] %v587_v18  ;;  %v591_v20 = vld [vmem:[%s3082_s0 + $0x340] sm:$0xff]  ;;  %v593_v21 = vld [vmem:[%s3082_s0 + $0x350] sm:$0xff]  ;;  %590 = vst [vmem:[%s3087_s15 + $0x198] sm:$0xff] %v589_v19 }
  0x67   : > { %592 = vst [vmem:[%s3087_s15 + $0x1a0] sm:$0xff] %v591_v20  ;;  %594 = vst [vmem:[%s3087_s15 + $0x1a8] sm:$0xff] %v593_v21  ;;  %v595_v22 = vld [vmem:[%s3082_s0 + $0x360] sm:$0xff]  ;;  %v597_v23 = vld [vmem:[%s3082_s0 + $0x370] sm:$0xff] }
  0x68   : > { %v599_v24 = vld [vmem:[%s3082_s0 + $0x380] sm:$0xff]  ;;  %596 = vst [vmem:[%s3087_s15 + $0x1b0] sm:$0xff] %v595_v22  ;;  %598 = vst [vmem:[%s3087_s15 + $0x1b8] sm:$0xff] %v597_v23  ;;  %v601_v25 = vld [vmem:[%s3082_s0 + $0x390] sm:$0xff] }
  0x69   : > { %600 = vst [vmem:[%s3087_s15 + $0x1c0] sm:$0xff] %v599_v24  ;;  %v603_v26 = vld [vmem:[%s3082_s0 + $0x3a0] sm:$0xff]  ;;  %v605_v27 = vld [vmem:[%s3082_s0 + $0x3b0] sm:$0xff]  ;;  %602 = vst [vmem:[%s3087_s15 + $0x1c8] sm:$0xff] %v601_v25 }
  0x6a   : > { %604 = vst [vmem:[%s3087_s15 + $0x1d0] sm:$0xff] %v603_v26  ;;  %606 = vst [vmem:[%s3087_s15 + $0x1d8] sm:$0xff] %v605_v27  ;;  %v607_v28 = vld [vmem:[%s3082_s0 + $0x3c0] sm:$0xff]  ;;  %v609_v29 = vld [vmem:[%s3082_s0 + $0x3d0] sm:$0xff] }
  0x6b   : > { %v611_v30 = vld [vmem:[%s3082_s0 + $0x3e0] sm:$0xff]  ;;  %608 = vst [vmem:[%s3087_s15 + $0x1e0] sm:$0xff] %v607_v28  ;;  %610 = vst [vmem:[%s3087_s15 + $0x1e8] sm:$0xff] %v609_v29  ;;  %v613_v31 = vld [vmem:[%s3082_s0 + $0x3f0] sm:$0xff] }
  0x6c   : > { %612 = vst [vmem:[%s3087_s15 + $0x1f0] sm:$0xff] %v611_v30  ;;  %614 = vst [vmem:[%s3087_s15 + $0x1f8] sm:$0xff] %v613_v31 }
  0x6d PF: > { %p2312_p1 = scmp.ge.s32.totalorder %s2846_s29, 1  ;;  %p627_p2 = scmp.lt.s32.totalorder %s2846_s29, 33 }
  0x6f   : > { %p628_p3 = pnand %p2312_p1, %p627_p2 }
  0x70   : > { %s634_s17 = sand.u32 (!%p628_p3), 1, %s2814_s22   ;;  %s641_s12 = sand.u32 (!%p628_p3), 1, %s2806_s20  }
  0x71   : > { %631 = sbr.rel (%p628_p3) target bundleno = 554 (0x22a), region = 85  ;;  %s2313_s3 = sshll.u32 (!%p628_p3), %s634_s17, 8 }
  0x72   : > { %s2314_s0 = sshll.u32 (!%p628_p3), %s641_s12, 9  ;;  %s668_s6 = sand.u32 (!%p628_p3), 1, %s2798_s18  }
  0x73   : > { %s3220_s7 = sshll.u32 (!%p628_p3), %s2826_s24, 1  ;;  %s2315_s9 = sshll.u32 (!%p628_p3), %s668_s6, 7 }
  0x74   : > { %p703_p4 = scmp.lt.s32.totalorder (!%p628_p3), %s2830_s25, 1  ;;  %p705_p5 = scmp.lt.s32.totalorder (!%p628_p3), %s3220_s7, 3 }
  0x75   : > { %p720_p6 = scmp.eq.s32.totalorder (!%p628_p3), %s2822_s23, 0  ;;  %s3465_s20 = sld [smem:[#allocation15_spill]] (!%p628_p3) }
  0x76   : > { %s3466_s12 = sld [smem:[#allocation16_spill]] (!%p628_p3)  ;;  %s3237_s8 = scalar_lea.vmem (!%p628_p3), [#allocation5], %s2313_s3 }
  0x77   : > { %s3239_s6 = scalar_lea.vmem (!%p628_p3), [#allocation6], %s2314_s0  ;;  %s3241_s28 = scalar_lea.vmem (!%p628_p3), [#allocation7], %s2315_s9 }
  0x78   : > { %s704_s10 = scalar_select %p703_p4, %s2830_s25, 1 }
  0x79   : > { %s706_s30 = scalar_select %p705_p5, %s3220_s7, 3 }
  0x7a   : > { %s2317_s11 = sshll.u32 %s704_s10, 2  ;;  %p2320_p7 = scmp.ne.s32.totalorder %s2822_s23, 0 }
  0x7b   : > { %s3227_s13 = sadd.s32 %s2317_s11, %s706_s30  ;;  %v2848_v32 = vmov (!%p2320_p7), 0.0  }
  0x7c   : > { %s709_s17 = scalar_lea.vmem %s3465_s20, %s3227_s13  ;;  %s718_s1 = scalar_lea.vmem %s3466_s12, %s3227_s13  ;;  %724 = vst [vmem:[#allocation2] sm:$0xff] (!%p2320_p7), %v2848_v32  ;;  %725 = vst [vmem:[#allocation2 + $0x8] sm:$0xff] (!%p2320_p7), %v2848_v32 }
  0x7d   : > { %723 = sbr.rel (%p2320_p7) target bundleno = 140 (0x8c), region = 97  ;;  %726 = vst [vmem:[#allocation2 + $0x10] sm:$0xff] (!%p2320_p7), %v2848_v32  ;;  %727 = vst [vmem:[#allocation2 + $0x18] sm:$0xff] (!%p2320_p7), %v2848_v32 }
  0x7e   : > { %728 = vst [vmem:[#allocation2 + $0x20] sm:$0xff] (!%p2320_p7), %v2848_v32  ;;  %729 = vst [vmem:[#allocation2 + $0x28] sm:$0xff] (!%p2320_p7), %v2848_v32 }
  0x7f   : > { %730 = vst [vmem:[#allocation2 + $0x30] sm:$0xff] (!%p2320_p7), %v2848_v32  ;;  %731 = vst [vmem:[#allocation2 + $0x38] sm:$0xff] (!%p2320_p7), %v2848_v32 }
  0x80   : > { %732 = vst [vmem:[#allocation2 + $0x40] sm:$0xff] (!%p2320_p7), %v2848_v32  ;;  %733 = vst [vmem:[#allocation2 + $0x48] sm:$0xff] (!%p2320_p7), %v2848_v32 }
  0x81   : > { %734 = vst [vmem:[#allocation2 + $0x50] sm:$0xff] (!%p2320_p7), %v2848_v32  ;;  %735 = vst [vmem:[#allocation2 + $0x58] sm:$0xff] (!%p2320_p7), %v2848_v32 }
  0x82   : > { %736 = vst [vmem:[#allocation2 + $0x60] sm:$0xff] (!%p2320_p7), %v2848_v32  ;;  %737 = vst [vmem:[#allocation2 + $0x68] sm:$0xff] (!%p2320_p7), %v2848_v32 }
  0x83   : > { %738 = vst [vmem:[#allocation2 + $0x70] sm:$0xff] (!%p2320_p7), %v2848_v32  ;;  %739 = vst [vmem:[#allocation2 + $0x78] sm:$0xff] (!%p2320_p7), %v2848_v32 }
  0x84   : > { %740 = vst [vmem:[#allocation2 + $0x80] sm:$0xff] %v2848_v32  ;;  %741 = vst [vmem:[#allocation2 + $0x88] sm:$0xff] %v2848_v32 }
  0x85   : > { %742 = vst [vmem:[#allocation2 + $0x90] sm:$0xff] %v2848_v32  ;;  %743 = vst [vmem:[#allocation2 + $0x98] sm:$0xff] %v2848_v32 }
  0x86   : > { %744 = vst [vmem:[#allocation2 + $0xa0] sm:$0xff] %v2848_v32  ;;  %745 = vst [vmem:[#allocation2 + $0xa8] sm:$0xff] %v2848_v32 }
  0x87   : > { %746 = vst [vmem:[#allocation2 + $0xb0] sm:$0xff] %v2848_v32  ;;  %747 = vst [vmem:[#allocation2 + $0xb8] sm:$0xff] %v2848_v32 }
  0x88   : > { %748 = vst [vmem:[#allocation2 + $0xc0] sm:$0xff] %v2848_v32  ;;  %749 = vst [vmem:[#allocation2 + $0xc8] sm:$0xff] %v2848_v32 }
  0x89   : > { %750 = vst [vmem:[#allocation2 + $0xd0] sm:$0xff] %v2848_v32  ;;  %751 = vst [vmem:[#allocation2 + $0xd8] sm:$0xff] %v2848_v32 }
  0x8a   : > { %752 = vst [vmem:[#allocation2 + $0xe0] sm:$0xff] %v2848_v32  ;;  %753 = vst [vmem:[#allocation2 + $0xe8] sm:$0xff] %v2848_v32 }
  0x8b   : > { %754 = vst [vmem:[#allocation2 + $0xf0] sm:$0xff] %v2848_v32  ;;  %755 = vst [vmem:[#allocation2 + $0xf8] sm:$0xff] %v2848_v32 }
  0x8c PF: > { %760 = sbr.rel (!%p720_p6) target bundleno = 147 (0x93), region = 101  ;;  %v761_v33 = vlaneseq (%p720_p6)  ;;  %v2849_v34 = vmov (%p720_p6), 0.0  }
  0x8e   : > { %vm763_vm0 = vcmp.lt.s32.totalorder (%p720_p6), %v761_v33, 256 }
  0x8f   : > { %765 = vst.msk [vmem:[#allocation3] sm:$0x3] (%p720_p6), %vm763_vm0, %v2849_v34  ;;  %766 = vst.msk [vmem:[#allocation4] sm:$0x3] (%p720_p6), %vm763_vm0, %v2849_v34 }
  0x93 PF: > { %v2600_v35 = vld [vmem:[%s3239_s6 + $0x4] ss:$8 sps:$4 sm:$0xff]   ;;  %v2604_v37 = vld [vmem:[%s3239_s6] ss:$8 sps:$4 sm:$0xff]   ;;  %v2606_v39 = vld [vmem:[%s3239_s6 + $0x14] ss:$8 sps:$4 sm:$0xff]  }
  0x94   : > { %v2602_v36 = vld [vmem:[%s3239_s6 + $0x104] ss:$8 sps:$4 sm:$0xff]   ;;  %1375 = vmatprep.subr.bf16.mxu1 %v2600_v35  ;;  %v2605_v38 = vld [vmem:[%s3239_s6 + $0x100] ss:$8 sps:$4 sm:$0xff]   ;;  %v2608_v40 = vld [vmem:[%s3239_s6 + $0x114] ss:$8 sps:$4 sm:$0xff]  }
  0x95   : > { %1488 = vmatprep.subr.bf16.mxu0 %v2602_v36  ;;  %1376 = vmatpush1.bf16.msra.mxu1 %v2604_v37  ;;  %v2610_v41 = vld [vmem:[%s3239_s6 + $0x10] ss:$8 sps:$4 sm:$0xff]   ;;  %v2612_v43 = vld [vmem:[%s3239_s6 + $0x24] ss:$8 sps:$4 sm:$0xff]   ;;  %v2616_v45 = vld [vmem:[%s3239_s6 + $0x20] ss:$8 sps:$4 sm:$0xff]  }
  0x96   : > { %1489 = vmatpush1.bf16.msra.mxu0 %v2605_v38  ;;  %1377 = vmatprep.subr.bf16.mxu1 %v2606_v39  ;;  %v2611_v42 = vld [vmem:[%s3239_s6 + $0x110] ss:$8 sps:$4 sm:$0xff]   ;;  %v2614_v44 = vld [vmem:[%s3239_s6 + $0x124] ss:$8 sps:$4 sm:$0xff]   ;;  %v2617_v46 = vld [vmem:[%s3239_s6 + $0x120] ss:$8 sps:$4 sm:$0xff]  }
  0x97   : > { %1490 = vmatprep.subr.bf16.mxu0 %v2608_v40  ;;  %v2618_v47 = vld [vmem:[%s3239_s6 + $0x34] ss:$8 sps:$4 sm:$0xff]   ;;  %v2622_v49 = vld [vmem:[%s3239_s6 + $0x30] ss:$8 sps:$4 sm:$0xff]   ;;  %v2624_v51 = vld [vmem:[%s3239_s6 + $0x44] ss:$8 sps:$4 sm:$0xff]  }
  0x98   : > { %v2620_v48 = vld [vmem:[%s3239_s6 + $0x134] ss:$8 sps:$4 sm:$0xff]   ;;  %v2623_v50 = vld [vmem:[%s3239_s6 + $0x130] ss:$8 sps:$4 sm:$0xff]   ;;  %v2626_v52 = vld [vmem:[%s3239_s6 + $0x144] ss:$8 sps:$4 sm:$0xff]  }
  0x99   : > { %1378 = vmatpush1.bf16.msra.mxu1 %v2610_v41  ;;  %v2628_v53 = vld [vmem:[%s3239_s6 + $0x40] ss:$8 sps:$4 sm:$0xff]   ;;  %v2630_v55 = vld [vmem:[%s3239_s6 + $0x54] ss:$8 sps:$4 sm:$0xff]   ;;  %v2634_v57 = vld [vmem:[%s3239_s6 + $0x50] ss:$8 sps:$4 sm:$0xff]  }
  0x9a   : > { %1491 = vmatpush1.bf16.msra.mxu0 %v2611_v42  ;;  %1379 = vmatprep.subr.bf16.mxu1 %v2612_v43  ;;  %v2629_v54 = vld [vmem:[%s3239_s6 + $0x140] ss:$8 sps:$4 sm:$0xff]   ;;  %v2632_v56 = vld [vmem:[%s3239_s6 + $0x154] ss:$8 sps:$4 sm:$0xff]   ;;  %v2635_v58 = vld [vmem:[%s3239_s6 + $0x150] ss:$8 sps:$4 sm:$0xff]  }
  0x9b   : > { %1492 = vmatprep.subr.bf16.mxu0 %v2614_v44  ;;  %v2636_v59 = vld [vmem:[%s3239_s6 + $0x64] ss:$8 sps:$4 sm:$0xff]   ;;  %v2640_v61 = vld [vmem:[%s3239_s6 + $0x60] ss:$8 sps:$4 sm:$0xff]   ;;  %v2642_v63 = vld [vmem:[%s3239_s6 + $0x74] ss:$8 sps:$4 sm:$0xff]  }
  0x9c   : > { %v2638_v60 = vld [vmem:[%s3239_s6 + $0x164] ss:$8 sps:$4 sm:$0xff]   ;;  %v2641_v62 = vld [vmem:[%s3239_s6 + $0x160] ss:$8 sps:$4 sm:$0xff]   ;;  %v2644_v0 = vld [vmem:[%s3239_s6 + $0x174] ss:$8 sps:$4 sm:$0xff]  }
  0x9d   : > { %1380 = vmatpush1.bf16.msra.mxu1 %v2616_v45  ;;  %v2646_v1 = vld [vmem:[%s3239_s6 + $0x70] ss:$8 sps:$4 sm:$0xff]   ;;  %v2648_v3 = vld [vmem:[%s3239_s6 + $0x84] ss:$8 sps:$4 sm:$0xff]   ;;  %v2652_v5 = vld [vmem:[%s3239_s6 + $0x80] ss:$8 sps:$4 sm:$0xff]  }
  0x9e   : > { %1493 = vmatpush1.bf16.msra.mxu0 %v2617_v46  ;;  %1381 = vmatprep.subr.bf16.mxu1 %v2618_v47  ;;  %v2647_v2 = vld [vmem:[%s3239_s6 + $0x170] ss:$8 sps:$4 sm:$0xff]   ;;  %v2650_v4 = vld [vmem:[%s3239_s6 + $0x184] ss:$8 sps:$4 sm:$0xff]   ;;  %v2653_v6 = vld [vmem:[%s3239_s6 + $0x180] ss:$8 sps:$4 sm:$0xff]  }
  0x9f   : > { %1494 = vmatprep.subr.bf16.mxu0 %v2620_v48  ;;  %v2654_v7 = vld [vmem:[%s3239_s6 + $0x94] ss:$8 sps:$4 sm:$0xff]   ;;  %v2658_v9 = vld [vmem:[%s3239_s6 + $0x90] ss:$8 sps:$4 sm:$0xff]   ;;  %v2660_v11 = vld [vmem:[%s3239_s6 + $0xa4] ss:$8 sps:$4 sm:$0xff]  }
  0xa0   : > { %v2656_v8 = vld [vmem:[%s3239_s6 + $0x194] ss:$8 sps:$4 sm:$0xff]   ;;  %v2659_v10 = vld [vmem:[%s3239_s6 + $0x190] ss:$8 sps:$4 sm:$0xff]   ;;  %v2662_v12 = vld [vmem:[%s3239_s6 + $0x1a4] ss:$8 sps:$4 sm:$0xff]  }
  0xa1   : > { %1382 = vmatpush1.bf16.msra.mxu1 %v2622_v49  ;;  %v2664_v13 = vld [vmem:[%s3239_s6 + $0xa0] ss:$8 sps:$4 sm:$0xff]   ;;  %v2666_v15 = vld [vmem:[%s3239_s6 + $0xb4] ss:$8 sps:$4 sm:$0xff]   ;;  %v2670_v17 = vld [vmem:[%s3239_s6 + $0xb0] ss:$8 sps:$4 sm:$0xff]  }
  0xa2   : > { %1495 = vmatpush1.bf16.msra.mxu0 %v2623_v50  ;;  %1383 = vmatprep.subr.bf16.mxu1 %v2624_v51  ;;  %v2665_v14 = vld [vmem:[%s3239_s6 + $0x1a0] ss:$8 sps:$4 sm:$0xff]   ;;  %v2668_v16 = vld [vmem:[%s3239_s6 + $0x1b4] ss:$8 sps:$4 sm:$0xff]   ;;  %v2671_v18 = vld [vmem:[%s3239_s6 + $0x1b0] ss:$8 sps:$4 sm:$0xff]  }
  0xa3   : > { %1496 = vmatprep.subr.bf16.mxu0 %v2626_v52  ;;  %v2672_v19 = vld [vmem:[%s3239_s6 + $0xc4] ss:$8 sps:$4 sm:$0xff]   ;;  %v2676_v23 = vld [vmem:[%s3239_s6 + $0xc0] ss:$8 sps:$4 sm:$0xff]   ;;  %v2678_v25 = vld [vmem:[%s3239_s6 + $0xd4] ss:$8 sps:$4 sm:$0xff]  }
  0xa4   : > { %v2698_v20 = vld [vmem:[%s3237_s8 + $0x4] ss:$16 sps:$4 sm:$0xff]   ;;  %v2701_v22 = vld [vmem:[%s3237_s8 + $0xc] ss:$16 sps:$4 sm:$0xff]   ;;  %v2677_v24 = vld [vmem:[%s3239_s6 + $0x1c0] ss:$8 sps:$4 sm:$0xff]  }
  0xa5   : > { %1384 = vmatpush1.bf16.msra.mxu1 %v2628_v53  ;;  %v2674_v21 = vld [vmem:[%s3239_s6 + $0x1c4] ss:$8 sps:$4 sm:$0xff]   ;;  %1407 = vmatprep.mubr.bf16.mxu1 %v2698_v20  ;;  %v2680_v26 = vld [vmem:[%s3239_s6 + $0x1d4] ss:$8 sps:$4 sm:$0xff]   ;;  %v2682_v27 = vld [vmem:[%s3239_s6 + $0xd0] ss:$8 sps:$4 sm:$0xff]  }
  0xa6   : > { %1497 = vmatpush1.bf16.msra.mxu0 %v2629_v54  ;;  %1385 = vmatprep.subr.bf16.mxu1 %v2630_v55  ;;  %v2683_v28 = vld [vmem:[%s3239_s6 + $0x1d0] ss:$8 sps:$4 sm:$0xff]   ;;  %v2684_v29 = vld [vmem:[%s3239_s6 + $0xe4] ss:$8 sps:$4 sm:$0xff]   ;;  %v2688_v31 = vld [vmem:[%s3239_s6 + $0xe0] ss:$8 sps:$4 sm:$0xff]  }
  0xa7   : > { %1498 = vmatprep.subr.bf16.mxu0 %v2632_v56  ;;  %1520 = vmatprep.mubr.bf16.mxu0 %v2701_v22  ;;  %v2686_v30 = vld [vmem:[%s3239_s6 + $0x1e4] ss:$8 sps:$4 sm:$0xff]   ;;  %v2689_v32 = vld [vmem:[%s3239_s6 + $0x1e0] ss:$8 sps:$4 sm:$0xff]   ;;  %v2690_v33 = vld [vmem:[%s3239_s6 + $0xf4] ss:$8 sps:$4 sm:$0xff]  }
  0xa8   : > { %v2692_v34 = vld [vmem:[%s3239_s6 + $0x1f4] ss:$8 sps:$4 sm:$0xff]   ;;  %v2694_v35 = vld [vmem:[%s3239_s6 + $0xf0] ss:$8 sps:$4 sm:$0xff]   ;;  %p1665_p8 = scmp.eq.s32.totalorder %s2822_s23, 7  ;;  %p2418_p9 = scmp.ne.s32.totalorder %s2822_s23, 7 }
  0xa9   : > { %1386 = vmatpush1.bf16.msra.mxu1 %v2634_v57  ;;  %v2695_v36 = vld [vmem:[%s3239_s6 + $0x1f0] ss:$8 sps:$4 sm:$0xff]   ;;  %v2702_v39 = vld [vmem:[%s3237_s8 + $0x24] ss:$16 sps:$4 sm:$0xff]   ;;  %v2704_v40 = vld [vmem:[%s3237_s8 + $0x2c] ss:$16 sps:$4 sm:$0xff]  }
  0xaa   : > { %1499 = vmatpush1.bf16.msra.mxu0 %v2635_v58  ;;  %1387 = vmatprep.subr.bf16.mxu1 %v2636_v59  ;;  %v2696_v37 = vld [vmem:[%s3237_s8] ss:$16 sps:$4 sm:$0xff]   ;;  %v2699_v38 = vld [vmem:[%s3237_s8 + $0x8] ss:$16 sps:$4 sm:$0xff]   ;;  %v2708_v43 = vld [vmem:[%s3237_s8 + $0x44] ss:$16 sps:$4 sm:$0xff]  }
  0xab   : > { %1500 = vmatprep.subr.bf16.mxu0 %v2638_v60  ;;  %v2706_v41 = vld [vmem:[%s3237_s8 + $0x20] ss:$16 sps:$4 sm:$0xff]   ;;  %v2707_v42 = vld [vmem:[%s3237_s8 + $0x28] ss:$16 sps:$4 sm:$0xff]   ;;  %v2710_v44 = vld [vmem:[%s3237_s8 + $0x4c] ss:$16 sps:$4 sm:$0xff]  }
  0xac   : > { %v2712_v45 = vld [vmem:[%s3237_s8 + $0x40] ss:$16 sps:$4 sm:$0xff]   ;;  %v2713_v46 = vld [vmem:[%s3237_s8 + $0x48] ss:$16 sps:$4 sm:$0xff]   ;;  %v2714_v47 = vld [vmem:[%s3237_s8 + $0x64] ss:$16 sps:$4 sm:$0xff]  }
  0xad   : > { %1388 = vmatpush1.bf16.msra.mxu1 %v2640_v61  ;;  %v2716_v48 = vld [vmem:[%s3237_s8 + $0x6c] ss:$16 sps:$4 sm:$0xff]   ;;  %v2718_v49 = vld [vmem:[%s3237_s8 + $0x60] ss:$16 sps:$4 sm:$0xff]   ;;  %v2719_v50 = vld [vmem:[%s3237_s8 + $0x68] ss:$16 sps:$4 sm:$0xff]  }
  0xae   : > { %1501 = vmatpush1.bf16.msra.mxu0 %v2641_v62  ;;  %1389 = vmatprep.subr.bf16.mxu1 %v2642_v63  ;;  %v2720_v51 = vld [vmem:[%s3237_s8 + $0x84] ss:$16 sps:$4 sm:$0xff]   ;;  %v2722_v52 = vld [vmem:[%s3237_s8 + $0x8c] ss:$16 sps:$4 sm:$0xff]   ;;  %v2724_v53 = vld [vmem:[%s3237_s8 + $0x80] ss:$16 sps:$4 sm:$0xff]  }
  0xaf   : > { %1502 = vmatprep.subr.bf16.mxu0 %v2644_v0  ;;  %v2725_v54 = vld [vmem:[%s3237_s8 + $0x88] ss:$16 sps:$4 sm:$0xff]   ;;  %v2726_v55 = vld [vmem:[%s3237_s8 + $0xa4] ss:$16 sps:$4 sm:$0xff]   ;;  %v2728_v56 = vld [vmem:[%s3237_s8 + $0xac] ss:$16 sps:$4 sm:$0xff]  }
  0xb0   : > { %v2730_v57 = vld [vmem:[%s3237_s8 + $0xa0] ss:$16 sps:$4 sm:$0xff]   ;;  %v2731_v58 = vld [vmem:[%s3237_s8 + $0xa8] ss:$16 sps:$4 sm:$0xff]   ;;  %v2732_v59 = vld [vmem:[%s3237_s8 + $0xc4] ss:$16 sps:$4 sm:$0xff]  }
  0xb1   : > { %1390 = vmatpush1.bf16.msra.mxu1 %v2646_v1  ;;  %v2734_v60 = vld [vmem:[%s3237_s8 + $0xcc] ss:$16 sps:$4 sm:$0xff]   ;;  %v2736_v61 = vld [vmem:[%s3237_s8 + $0xc0] ss:$16 sps:$4 sm:$0xff]   ;;  %v2737_v62 = vld [vmem:[%s3237_s8 + $0xc8] ss:$16 sps:$4 sm:$0xff]  }
  0xb2   : > { %1503 = vmatpush1.bf16.msra.mxu0 %v2647_v2  ;;  %1391 = vmatprep.subr.bf16.mxu1 %v2648_v3  ;;  %v2738_v63 = vld [vmem:[%s3237_s8 + $0xe4] ss:$16 sps:$4 sm:$0xff]   ;;  %v2740_v0 = vld [vmem:[%s3237_s8 + $0xec] ss:$16 sps:$4 sm:$0xff]   ;;  %v2742_v1 = vld [vmem:[%s3237_s8 + $0xe0] ss:$16 sps:$4 sm:$0xff]  }
  0xb3   : > { %1504 = vmatprep.subr.bf16.mxu0 %v2650_v4  ;;  %v2743_v2 = vld [vmem:[%s3237_s8 + $0xe8] ss:$16 sps:$4 sm:$0xff]   ;;  %v767_v4 = vld [vmem:[#allocation2] sm:$0xff] }
  0xb5   : > { %1392 = vmatpush1.bf16.msra.mxu1 %v2652_v5 }
  0xb6   : > { %1505 = vmatpush1.bf16.msra.mxu0 %v2653_v6  ;;  %1393 = vmatprep.subr.bf16.mxu1 %v2654_v7 }
  0xb7   : > { %1506 = vmatprep.subr.bf16.mxu0 %v2656_v8  ;;  %v768_v8 = vld [vmem:[#allocation2 + $0x8] sm:$0xff] }
  0xb9   : > { %1394 = vmatpush1.bf16.msra.mxu1 %v2658_v9 }
  0xba   : > { %1507 = vmatpush1.bf16.msra.mxu0 %v2659_v10  ;;  %1395 = vmatprep.subr.bf16.mxu1 %v2660_v11 }
  0xbb   : > { %1508 = vmatprep.subr.bf16.mxu0 %v2662_v12  ;;  %v769_v12 = vld [vmem:[#allocation2 + $0x10] sm:$0xff] }
  0xbd   : > { %1396 = vmatpush1.bf16.msra.mxu1 %v2664_v13 }
  0xbe   : > { %1509 = vmatpush1.bf16.msra.mxu0 %v2665_v14  ;;  %1397 = vmatprep.subr.bf16.mxu1 %v2666_v15 }
  0xbf   : > { %1510 = vmatprep.subr.bf16.mxu0 %v2668_v16 }
  0xc1   : > { %1398 = vmatpush1.bf16.msra.mxu1 %v2670_v17  ;;  %v770_v17 = vld [vmem:[#allocation2 + $0x18] sm:$0xff] }
  0xc2   : > { %1511 = vmatpush1.bf16.msra.mxu0 %v2671_v18  ;;  %1399 = vmatprep.subr.bf16.mxu1 %v2672_v19 }
  0xc3   : > { %1512 = vmatprep.subr.bf16.mxu0 %v2674_v21 }
  0xc5   : > { %1400 = vmatpush1.bf16.msra.mxu1 %v2676_v23 }
  0xc6   : > { %1513 = vmatpush1.bf16.msra.mxu0 %v2677_v24  ;;  %1401 = vmatprep.subr.bf16.mxu1 %v2678_v25  ;;  %v771_v24 = vld [vmem:[#allocation2 + $0x20] sm:$0xff] }
  0xc7   : > { %1514 = vmatprep.subr.bf16.mxu0 %v2680_v26 }
  0xc9   : > { %1402 = vmatpush1.bf16.msra.mxu1 %v2682_v27 }
  0xca   : > { %1515 = vmatpush1.bf16.msra.mxu0 %v2683_v28  ;;  %1403 = vmatprep.subr.bf16.mxu1 %v2684_v29  ;;  %v772_v28 = vld [vmem:[#allocation2 + $0x28] sm:$0xff] }
  0xcb   : > { %1516 = vmatprep.subr.bf16.mxu0 %v2686_v30 }
  0xcd   : > { %1404 = vmatpush1.bf16.msra.mxu1 %v2688_v31 }
  0xce   : > { %1517 = vmatpush1.bf16.msra.mxu0 %v2689_v32  ;;  %1405 = vmatprep.subr.bf16.mxu1 %v2690_v33  ;;  %v773_v32 = vld [vmem:[#allocation2 + $0x30] sm:$0xff] }
  0xcf   : > { %1518 = vmatprep.subr.bf16.mxu0 %v2692_v34 }
  0xd1   : > { %1406 = vmatpush1.bf16.msra.mxu1 %v2694_v35 }
  0xd2   : > { %1519 = vmatpush1.bf16.msra.mxu0 %v2695_v36 }
  0xd4   : > { %1408 = vmatmul.mubr.bf16.vlgmr.msra.gmra.mrb[0].mxu1 %v2696_v37  ;;  %v774_v37 = vld [vmem:[#allocation2 + $0x38] sm:$0xff] }
  0xd5   : > { %1521 = vmatmul.mubr.bf16.vlgmr.msra.gmra.mrb[0].mxu0 %v2699_v38  ;;  %1417 = vmatprep.mubr.bf16.mxu1 %v2702_v39 }
  0xd6   : > { %1530 = vmatprep.mubr.bf16.mxu0 %v2704_v40 }
  0xdc   : > { %1418 = vmatmul.mubr.bf16.gmra.mrb[4].mxu1 %v2706_v41 }
  0xdd   : > { %1531 = vmatmul.mubr.bf16.gmra.mrb[4].mxu0 %v2707_v42  ;;  %1427 = vmatprep.mubr.bf16.mxu1 %v2708_v43 }
  0xde   : > { %1540 = vmatprep.mubr.bf16.mxu0 %v2710_v44  ;;  %v775_v44 = vld [vmem:[#allocation2 + $0x40] sm:$0xff] }
  0xe4   : > { %1428 = vmatmul.mubr.bf16.gmra.mrb[8].mxu1 %v2712_v45 }
  0xe5   : > { %1541 = vmatmul.mubr.bf16.gmra.mrb[8].mxu0 %v2713_v46  ;;  %1437 = vmatprep.mubr.bf16.mxu1 %v2714_v47 }
  0xe6   : > { %1550 = vmatprep.mubr.bf16.mxu0 %v2716_v48  ;;  %v776_v48 = vld [vmem:[#allocation2 + $0x48] sm:$0xff] }
  0xec   : > { %1438 = vmatmul.mubr.bf16.gmra.mrb[12].mxu1 %v2718_v49 }
  0xed   : > { %1551 = vmatmul.mubr.bf16.gmra.mrb[12].mxu0 %v2719_v50  ;;  %1447 = vmatprep.mubr.bf16.mxu1 %v2720_v51 }
  0xee   : > { %1560 = vmatprep.mubr.bf16.mxu0 %v2722_v52  ;;  %v777_v52 = vld [vmem:[#allocation2 + $0x50] sm:$0xff] }
  0xf4   : > { %1448 = vmatmul.mubr.bf16.gmra.mrb[16].mxu1 %v2724_v53 }
  0xf5   : > { %1561 = vmatmul.mubr.bf16.gmra.mrb[16].mxu0 %v2725_v54  ;;  %1457 = vmatprep.mubr.bf16.mxu1 %v2726_v55 }
  0xf6   : > { %1570 = vmatprep.mubr.bf16.mxu0 %v2728_v56 }
  0xfc   : > { %1458 = vmatmul.mubr.bf16.gmra.mrb[20].mxu1 %v2730_v57  ;;  %v778_v57 = vld [vmem:[#allocation2 + $0x58] sm:$0xff] }
  0xfd   : > { %1571 = vmatmul.mubr.bf16.gmra.mrb[20].mxu0 %v2731_v58  ;;  %1467 = vmatprep.mubr.bf16.mxu1 %v2732_v59 }
  0xfe   : > { %1580 = vmatprep.mubr.bf16.mxu0 %v2734_v60 }
 0x104   : > { %1468 = vmatmul.mubr.bf16.gmra.mrb[24].mxu1 %v2736_v61 }
 0x105   : > { %1581 = vmatmul.mubr.bf16.gmra.mrb[24].mxu0 %v2737_v62  ;;  %1477 = vmatprep.mubr.bf16.mxu1 %v2738_v63 }
 0x106   : > { %1590 = vmatprep.mubr.bf16.mxu0 %v2740_v0  ;;  %v779_v0 = vld [vmem:[#allocation2 + $0x60] sm:$0xff] }
 0x10c   : > { %1478 = vmatmul.mubr.bf16.gmra.mrb[28].mxu1 %v2742_v1 }
 0x10d   : > { %1591 = vmatmul.mubr.bf16.gmra.mrb[28].mxu0 %v2743_v2 }
 0x1a7   : > { %v1409_v3 = vpop.f32.mrb[0].mxu1 }
 0x1a8   : > { %v1522_v5 = vpop.f32.mrb[0].mxu0  ;;  %v1411_v7 = vpop.f32.mrb[1].mxu1 }
 0x1a9   : > { %v1523_v6 = vadd.f32 %v1522_v5, %v1409_v3  ;;  %v1524_v9 = vpop.f32.mrb[1].mxu0  ;;  %v1413_v11 = vpop.f32.mrb[2].mxu1 }
 0x1aa   : > { %v1525_v10 = vadd.f32 %v1524_v9, %v1411_v7  ;;  %v1526_v13 = vpop.f32.mrb[2].mxu0  ;;  %v1415_v16 = vpop.f32.mrb[3].mxu1 }
 0x1ab   : > { %v1601_v14 = vadd.f32 %v1523_v6, %v767_v4  ;;  %v1527_v15 = vadd.f32 %v1526_v13, %v1413_v11  ;;  %v1528_v18 = vpop.f32.mrb[3].mxu0  ;;  %v780_v4 = vld [vmem:[#allocation2 + $0x68] sm:$0xff]  ;;  %v782_v13 = vld [vmem:[#allocation2 + $0x78] sm:$0xff] }
 0x1ac   : > { %v1602_v19 = vadd.f32 %v1525_v10, %v768_v8  ;;  %v1529_v20 = vadd.f32 %v1528_v18, %v1415_v16  ;;  %v781_v8 = vld [vmem:[#allocation2 + $0x70] sm:$0xff] }
 0x1ad   : > { %1633 = vst [vmem:[#allocation2] sm:$0xff] %v1601_v14  ;;  %v1603_v21 = vadd.f32 %v1527_v15, %v769_v12 }
 0x1ae   : > { %1634 = vst [vmem:[#allocation2 + $0x8] sm:$0xff] %v1602_v19  ;;  %v1604_v22 = vadd.f32 %v1529_v20, %v770_v17  ;;  %v783_v20 = vld [vmem:[#allocation2 + $0x80] sm:$0xff] }
 0x1af   : > { %1635 = vst [vmem:[#allocation2 + $0x10] sm:$0xff] %v1603_v21  ;;  %v1419_v23 = vpop.f32.mrb[4].mxu1 }
 0x1b0   : > { %1636 = vst [vmem:[#allocation2 + $0x18] sm:$0xff] %v1604_v22  ;;  %v1532_v25 = vpop.f32.mrb[4].mxu0  ;;  %v1421_v27 = vpop.f32.mrb[5].mxu1 }
 0x1b1   : > { %v1533_v26 = vadd.f32 %v1532_v25, %v1419_v23  ;;  %v1534_v29 = vpop.f32.mrb[5].mxu0  ;;  %v1423_v31 = vpop.f32.mrb[6].mxu1 }
 0x1b2   : > { %v1535_v30 = vadd.f32 %v1534_v29, %v1421_v27  ;;  %v1536_v33 = vpop.f32.mrb[6].mxu0  ;;  %v1425_v36 = vpop.f32.mrb[7].mxu1 }
 0x1b3   : > { %v1605_v34 = vadd.f32 %v1533_v26, %v771_v24  ;;  %v1537_v35 = vadd.f32 %v1536_v33, %v1423_v31  ;;  %v1538_v38 = vpop.f32.mrb[7].mxu0  ;;  %v784_v24 = vld [vmem:[#allocation2 + $0x88] sm:$0xff]  ;;  %v786_v33 = vld [vmem:[#allocation2 + $0x98] sm:$0xff] }
 0x1b4   : > { %v1606_v39 = vadd.f32 %v1535_v30, %v772_v28  ;;  %v1539_v40 = vadd.f32 %v1538_v38, %v1425_v36  ;;  %v785_v28 = vld [vmem:[#allocation2 + $0x90] sm:$0xff] }
 0x1b5   : > { %1637 = vst [vmem:[#allocation2 + $0x20] sm:$0xff] %v1605_v34  ;;  %v1607_v41 = vadd.f32 %v1537_v35, %v773_v32 }
 0x1b6   : > { %1638 = vst [vmem:[#allocation2 + $0x28] sm:$0xff] %v1606_v39  ;;  %v1608_v42 = vadd.f32 %v1539_v40, %v774_v37  ;;  %v787_v40 = vld [vmem:[#allocation2 + $0xa0] sm:$0xff] }
 0x1b7   : > { %1639 = vst [vmem:[#allocation2 + $0x30] sm:$0xff] %v1607_v41  ;;  %v1429_v43 = vpop.f32.mrb[8].mxu1 }
 0x1b8   : > { %1640 = vst [vmem:[#allocation2 + $0x38] sm:$0xff] %v1608_v42  ;;  %v1542_v45 = vpop.f32.mrb[8].mxu0  ;;  %v1431_v47 = vpop.f32.mrb[9].mxu1 }
 0x1b9   : > { %v1543_v46 = vadd.f32 %v1542_v45, %v1429_v43  ;;  %v1544_v49 = vpop.f32.mrb[9].mxu0  ;;  %v1433_v51 = vpop.f32.mrb[10].mxu1 }
 0x1ba   : > { %v1545_v50 = vadd.f32 %v1544_v49, %v1431_v47  ;;  %v1546_v53 = vpop.f32.mrb[10].mxu0  ;;  %v1435_v56 = vpop.f32.mrb[11].mxu1 }
 0x1bb   : > { %v1609_v54 = vadd.f32 %v1543_v46, %v775_v44  ;;  %v1547_v55 = vadd.f32 %v1546_v53, %v1433_v51  ;;  %v1548_v58 = vpop.f32.mrb[11].mxu0  ;;  %v788_v44 = vld [vmem:[#allocation2 + $0xa8] sm:$0xff]  ;;  %v790_v53 = vld [vmem:[#allocation2 + $0xb8] sm:$0xff] }
 0x1bc   : > { %v1610_v59 = vadd.f32 %v1545_v50, %v776_v48  ;;  %v1549_v60 = vadd.f32 %v1548_v58, %v1435_v56  ;;  %v789_v48 = vld [vmem:[#allocation2 + $0xb0] sm:$0xff] }
 0x1bd   : > { %1641 = vst [vmem:[#allocation2 + $0x40] sm:$0xff] %v1609_v54  ;;  %v1611_v61 = vadd.f32 %v1547_v55, %v777_v52 }
 0x1be   : > { %1642 = vst [vmem:[#allocation2 + $0x48] sm:$0xff] %v1610_v59  ;;  %v1612_v62 = vadd.f32 %v1549_v60, %v778_v57  ;;  %v791_v60 = vld [vmem:[#allocation2 + $0xc0] sm:$0xff] }
 0x1bf   : > { %1643 = vst [vmem:[#allocation2 + $0x50] sm:$0xff] %v1611_v61  ;;  %v1439_v63 = vpop.f32.mrb[12].mxu1 }
 0x1c0   : > { %1644 = vst [vmem:[#allocation2 + $0x58] sm:$0xff] %v1612_v62  ;;  %v1552_v1 = vpop.f32.mrb[12].mxu0  ;;  %v1441_v3 = vpop.f32.mrb[13].mxu1 }
 0x1c1   : > { %v1553_v2 = vadd.f32 %v1552_v1, %v1439_v63  ;;  %v1554_v5 = vpop.f32.mrb[13].mxu0  ;;  %v1443_v7 = vpop.f32.mrb[14].mxu1 }
 0x1c2   : > { %v1555_v6 = vadd.f32 %v1554_v5, %v1441_v3  ;;  %v1556_v9 = vpop.f32.mrb[14].mxu0  ;;  %v1445_v12 = vpop.f32.mrb[15].mxu1 }
 0x1c3   : > { %v1613_v10 = vadd.f32 %v1553_v2, %v779_v0  ;;  %v1557_v11 = vadd.f32 %v1556_v9, %v1443_v7  ;;  %v1558_v14 = vpop.f32.mrb[15].mxu0  ;;  %v792_v0 = vld [vmem:[#allocation2 + $0xc8] sm:$0xff]  ;;  %v794_v9 = vld [vmem:[#allocation2 + $0xd8] sm:$0xff] }
 0x1c4   : > { %v1614_v15 = vadd.f32 %v1555_v6, %v780_v4  ;;  %v1559_v16 = vadd.f32 %v1558_v14, %v1445_v12  ;;  %v793_v4 = vld [vmem:[#allocation2 + $0xd0] sm:$0xff] }
 0x1c5   : > { %1645 = vst [vmem:[#allocation2 + $0x60] sm:$0xff] %v1613_v10  ;;  %v1615_v17 = vadd.f32 %v1557_v11, %v781_v8 }
 0x1c6   : > { %1646 = vst [vmem:[#allocation2 + $0x68] sm:$0xff] %v1614_v15  ;;  %v1616_v18 = vadd.f32 %v1559_v16, %v782_v13  ;;  %v795_v16 = vld [vmem:[#allocation2 + $0xe0] sm:$0xff] }
 0x1c7   : > { %1647 = vst [vmem:[#allocation2 + $0x70] sm:$0xff] %v1615_v17  ;;  %v1449_v19 = vpop.f32.mrb[16].mxu1 }
 0x1c8   : > { %1648 = vst [vmem:[#allocation2 + $0x78] sm:$0xff] %v1616_v18  ;;  %v1562_v21 = vpop.f32.mrb[16].mxu0  ;;  %v1451_v23 = vpop.f32.mrb[17].mxu1 }
 0x1c9   : > { %v1563_v22 = vadd.f32 %v1562_v21, %v1449_v19  ;;  %v1564_v25 = vpop.f32.mrb[17].mxu0  ;;  %v1453_v27 = vpop.f32.mrb[18].mxu1 }
 0x1ca   : > { %v1565_v26 = vadd.f32 %v1564_v25, %v1451_v23  ;;  %v1566_v29 = vpop.f32.mrb[18].mxu0  ;;  %v1455_v32 = vpop.f32.mrb[19].mxu1 }
 0x1cb   : > { %v1617_v30 = vadd.f32 %v1563_v22, %v783_v20  ;;  %v1567_v31 = vadd.f32 %v1566_v29, %v1453_v27  ;;  %v1568_v34 = vpop.f32.mrb[19].mxu0  ;;  %v796_v20 = vld [vmem:[#allocation2 + $0xe8] sm:$0xff]  ;;  %v798_v29 = vld [vmem:[#allocation2 + $0xf8] sm:$0xff] }
 0x1cc   : > { %v1618_v35 = vadd.f32 %v1565_v26, %v784_v24  ;;  %v1569_v36 = vadd.f32 %v1568_v34, %v1455_v32  ;;  %v797_v24 = vld [vmem:[#allocation2 + $0xf0] sm:$0xff] }
 0x1cd   : > { %1649 = vst [vmem:[#allocation2 + $0x80] sm:$0xff] %v1617_v30  ;;  %v1619_v37 = vadd.f32 %v1567_v31, %v785_v28 }
 0x1ce   : > { %1650 = vst [vmem:[#allocation2 + $0x88] sm:$0xff] %v1618_v35  ;;  %v1620_v38 = vadd.f32 %v1569_v36, %v786_v33  ;;  %v1669_v35 = vld [vmem:[#allocation2] sm:$0xff] (!%p2418_p9)  ;;  %v1670_v36 = vld [vmem:[#allocation2 + $0x8] sm:$0xff] (!%p2418_p9) }
 0x1cf   : > { %1651 = vst [vmem:[#allocation2 + $0x90] sm:$0xff] %v1619_v37  ;;  %v1459_v39 = vpop.f32.mrb[20].mxu1  ;;  %v1671_v37 = vld [vmem:[#allocation2 + $0x10] sm:$0xff] (!%p2418_p9) }
 0x1d0   : > { %1652 = vst [vmem:[#allocation2 + $0x98] sm:$0xff] %v1620_v38  ;;  %v1572_v41 = vpop.f32.mrb[20].mxu0  ;;  %v1461_v43 = vpop.f32.mrb[21].mxu1  ;;  %v2444_v38 = vpack.c.bf16 (!%p2418_p9), %v1670_v36, %v1669_v35 }
 0x1d1   : > { %v1573_v42 = vadd.f32 %v1572_v41, %v1459_v39  ;;  %v1574_v45 = vpop.f32.mrb[21].mxu0  ;;  %v1463_v47 = vpop.f32.mrb[22].mxu1  ;;  %v1881_v39 = vmul.f32 (!%p2418_p9), %v1669_v35, %v1669_v35  ;;  %v1672_v41 = vld [vmem:[#allocation2 + $0x18] sm:$0xff] (!%p2418_p9) }
 0x1d2   : > { %v1575_v46 = vadd.f32 %v1574_v45, %v1461_v43  ;;  %v1576_v49 = vpop.f32.mrb[22].mxu0  ;;  %v1465_v52 = vpop.f32.mrb[23].mxu1  ;;  %v1673_v43 = vld [vmem:[#allocation2 + $0x20] sm:$0xff] (!%p2418_p9)  ;;  %v2445_v45 = vpack.c.bf16 (!%p2418_p9), %v1672_v41, %v1671_v37  ;;  %1797 = vst [vmem:[%s3241_s28] sm:$0xff] (!%p2418_p9), %v2444_v38 }
 0x1d3   : > { %v1621_v50 = vadd.f32 %v1573_v42, %v787_v40  ;;  %v1577_v51 = vadd.f32 %v1576_v49, %v1463_v47  ;;  %v1578_v54 = vpop.f32.mrb[23].mxu0  ;;  %v1882_v40 = vmul.f32 (!%p2418_p9), %v1670_v36, %v1670_v36  ;;  %v1814_v42 = vadd.f32 (!%p2418_p9), %v1671_v37, %v1669_v35  ;;  %v1675_v49 = vld [vmem:[#allocation2 + $0x30] sm:$0xff] (!%p2418_p9) }
 0x1d4   : > { %v1622_v55 = vadd.f32 %v1575_v46, %v788_v44  ;;  %v1579_v56 = vadd.f32 %v1578_v54, %v1465_v52  ;;  %v1674_v44 = vld [vmem:[#allocation2 + $0x28] sm:$0xff] (!%p2418_p9)  ;;  %v1835_v46 = vadd.f32 (!%p2418_p9), %v1672_v41, %v1670_v36  ;;  %v1883_v47 = vmul.f32 (!%p2418_p9), %v1671_v37, %v1671_v37  ;;  %1798 = vst [vmem:[%s3241_s28 + $0x8] sm:$0xff] (!%p2418_p9), %v2445_v45 }
 0x1d5   : > { %1653 = vst [vmem:[#allocation2 + $0xa0] sm:$0xff] %v1621_v50  ;;  %v1623_v57 = vadd.f32 %v1577_v51, %v789_v48  ;;  %v1884_v48 = vmul.f32 (!%p2418_p9), %v1672_v41, %v1672_v41  ;;  %v1676_v50 = vld [vmem:[#allocation2 + $0x38] sm:$0xff] (!%p2418_p9)  ;;  %v2446_v51 = vpack.c.bf16 (!%p2418_p9), %v1674_v44, %v1673_v43  ;;  %v1815_v52 = vadd.f32 (!%p2418_p9), %v1814_v42, %v1673_v43 }
 0x1d6   : > { %1654 = vst [vmem:[#allocation2 + $0xa8] sm:$0xff] %v1622_v55  ;;  %v1624_v58 = vadd.f32 %v1579_v56, %v790_v53  ;;  %v1885_v53 = vmul.f32 (!%p2418_p9), %v1673_v43, %v1673_v43  ;;  %v1886_v54 = vmul.f32 (!%p2418_p9), %v1674_v44, %v1674_v44  ;;  %v1677_v55 = vld [vmem:[#allocation2 + $0x40] sm:$0xff] (!%p2418_p9)  ;;  %v1913_v56 = vadd.f32 (!%p2418_p9), %v1883_v47, %v1881_v39  ;;  %v1687_v36 = vld [vmem:[#allocation2 + $0x90] sm:$0xff] (!%p2418_p9) }
 0x1d7   : > { %1655 = vst [vmem:[#allocation2 + $0xb0] sm:$0xff] %v1623_v57  ;;  %v1469_v59 = vpop.f32.mrb[24].mxu1  ;;  %v1934_v57 = vadd.f32 (!%p2418_p9), %v1884_v48, %v1882_v40  ;;  %1799 = vst [vmem:[%s3241_s28 + $0x10] sm:$0xff] (!%p2418_p9), %v2446_v51  ;;  %v1688_v37 = vld [vmem:[#allocation2 + $0x98] sm:$0xff] (!%p2418_p9)  ;;  %v1899_v48 = vmul.f32 (!%p2418_p9), %v1687_v36, %v1687_v36 }
 0x1d8   : > { %1656 = vst [vmem:[#allocation2 + $0xb8] sm:$0xff] %v1624_v58  ;;  %v1582_v61 = vpop.f32.mrb[24].mxu0  ;;  %v1471_v63 = vpop.f32.mrb[25].mxu1  ;;  %v1836_v58 = vadd.f32 (!%p2418_p9), %v1835_v46, %v1674_v44  ;;  %v2453_v40 = vpack.c.bf16 (!%p2418_p9), %v1688_v37, %v1687_v36 }
 0x1d9   : > { %v1583_v62 = vadd.f32 %v1582_v61, %v1469_v59  ;;  %v1584_v1 = vpop.f32.mrb[25].mxu0  ;;  %v1473_v3 = vpop.f32.mrb[26].mxu1  ;;  %v2447_v59 = vpack.c.bf16 (!%p2418_p9), %v1676_v50, %v1675_v49  ;;  %v1679_v61 = vld [vmem:[#allocation2 + $0x50] sm:$0xff] (!%p2418_p9) }
 0x1da   : > { %v1585_v2 = vadd.f32 %v1584_v1, %v1471_v63  ;;  %v1586_v5 = vpop.f32.mrb[26].mxu0  ;;  %v1475_v8 = vpop.f32.mrb[27].mxu1  ;;  %v1887_v63 = vmul.f32 (!%p2418_p9), %v1675_v49, %v1675_v49  ;;  %1806 = vst [vmem:[%s3241_s28 + $0x48] sm:$0xff] (!%p2418_p9), %v2453_v40 }
 0x1db   : > { %v1625_v6 = vadd.f32 %v1583_v62, %v791_v60  ;;  %v1587_v7 = vadd.f32 %v1586_v5, %v1473_v3  ;;  %v1588_v10 = vpop.f32.mrb[27].mxu0  ;;  %v1678_v60 = vld [vmem:[#allocation2 + $0x48] sm:$0xff] (!%p2418_p9)  ;;  %v1816_v62 = vadd.f32 (!%p2418_p9), %v1815_v52, %v1675_v49  ;;  %v1914_v3 = vadd.f32 (!%p2418_p9), %v1913_v56, %v1885_v53  ;;  %1800 = vst [vmem:[%s3241_s28 + $0x18] sm:$0xff] (!%p2418_p9), %v2447_v59 }
 0x1dc   : > { %v1626_v11 = vadd.f32 %v1585_v2, %v792_v0  ;;  %v1589_v12 = vadd.f32 %v1588_v10, %v1475_v8  ;;  %v1888_v0 = vmul.f32 (!%p2418_p9), %v1676_v50, %v1676_v50  ;;  %v2448_v1 = vpack.c.bf16 (!%p2418_p9), %v1678_v60, %v1677_v55  ;;  %v1680_v2 = vld [vmem:[#allocation2 + $0x58] sm:$0xff] (!%p2418_p9)  ;;  %v1682_v8 = vld [vmem:[#allocation2 + $0x68] sm:$0xff] (!%p2418_p9)  ;;  %v1689_v45 = vld [vmem:[#allocation2 + $0xa0] sm:$0xff] (!%p2418_p9) }
 0x1dd   : > { %1657 = vst [vmem:[#allocation2 + $0xc0] sm:$0xff] %v1625_v6  ;;  %v1627_v13 = vadd.f32 %v1587_v7, %v793_v4  ;;  %v1935_v4 = vadd.f32 (!%p2418_p9), %v1934_v57, %v1886_v54  ;;  %v1837_v5 = vadd.f32 (!%p2418_p9), %v1836_v58, %v1676_v50  ;;  %v1889_v6 = vmul.f32 (!%p2418_p9), %v1677_v55, %v1677_v55  ;;  %v1681_v7 = vld [vmem:[#allocation2 + $0x60] sm:$0xff] (!%p2418_p9)  ;;  %v1690_v46 = vld [vmem:[#allocation2 + $0xa8] sm:$0xff] (!%p2418_p9) }
 0x1de   : > { %1658 = vst [vmem:[#allocation2 + $0xc8] sm:$0xff] %v1626_v11  ;;  %v1628_v14 = vadd.f32 %v1589_v12, %v794_v9  ;;  %1801 = vst [vmem:[%s3241_s28 + $0x20] sm:$0xff] (!%p2418_p9), %v2448_v1  ;;  %v1817_v9 = vadd.f32 (!%p2418_p9), %v1816_v62, %v1677_v55  ;;  %v1890_v10 = vmul.f32 (!%p2418_p9), %v1678_v60, %v1678_v60  ;;  %v1691_v51 = vld [vmem:[#allocation2 + $0xb0] sm:$0xff] (!%p2418_p9) }
 0x1df   : > { %1659 = vst [vmem:[#allocation2 + $0xd0] sm:$0xff] %v1627_v13  ;;  %v1479_v15 = vpop.f32.mrb[28].mxu1  ;;  %v2449_v11 = vpack.c.bf16 (!%p2418_p9), %v1680_v2, %v1679_v61  ;;  %v1891_v12 = vmul.f32 (!%p2418_p9), %v1679_v61, %v1679_v61  ;;  %v1915_v13 = vadd.f32 (!%p2418_p9), %v1914_v3, %v1887_v63  ;;  %v1900_v49 = vmul.f32 (!%p2418_p9), %v1688_v37, %v1688_v37  ;;  %v1692_v52 = vld [vmem:[#allocation2 + $0xb8] sm:$0xff] (!%p2418_p9) }
 0x1e0   : > { %1660 = vst [vmem:[#allocation2 + $0xd8] sm:$0xff] %v1628_v14  ;;  %v1592_v17 = vpop.f32.mrb[28].mxu0  ;;  %v1481_v19 = vpop.f32.mrb[29].mxu1  ;;  %v1936_v14 = vadd.f32 (!%p2418_p9), %v1935_v4, %v1888_v0  ;;  %v2454_v50 = vpack.c.bf16 (!%p2418_p9), %v1690_v46, %v1689_v45  ;;  %v2455_v56 = vpack.c.bf16 (!%p2418_p9), %v1692_v52, %v1691_v51  ;;  %v1902_v1 = vmul.f32 (!%p2418_p9), %v1690_v46, %v1690_v46 }
 0x1e1   : > { %v1593_v18 = vadd.f32 %v1592_v17, %v1479_v15  ;;  %v1594_v21 = vpop.f32.mrb[29].mxu0  ;;  %v1483_v23 = vpop.f32.mrb[30].mxu1  ;;  %v1838_v15 = vadd.f32 (!%p2418_p9), %v1837_v5, %v1678_v60  ;;  %v1683_v17 = vld [vmem:[#allocation2 + $0x70] sm:$0xff] (!%p2418_p9)  ;;  %1802 = vst [vmem:[%s3241_s28 + $0x28] sm:$0xff] (!%p2418_p9), %v2449_v11  ;;  %v1901_v60 = vmul.f32 (!%p2418_p9), %v1689_v45, %v1689_v45  ;;  %v1903_v5 = vmul.f32 (!%p2418_p9), %v1691_v51, %v1691_v51 }
 0x1e2   : > { %v1595_v22 = vadd.f32 %v1594_v21, %v1481_v19  ;;  %v1596_v25 = vpop.f32.mrb[30].mxu0  ;;  %v1485_v28 = vpop.f32.mrb[31].mxu1  ;;  %1668 = sbr.rel (%p2418_p9) target bundleno = 530 (0x212), region = 105  ;;  %v2450_v19 = vpack.c.bf16 (!%p2418_p9), %v1682_v8, %v1681_v7  ;;  %v1894_v21 = vmul.f32 (!%p2418_p9), %v1682_v8, %v1682_v8  ;;  %1807 = vst [vmem:[%s3241_s28 + $0x50] sm:$0xff] (!%p2418_p9), %v2454_v50  ;;  %1808 = vst [vmem:[%s3241_s28 + $0x58] sm:$0xff] (!%p2418_p9), %v2455_v56  ;;  %v1862_v50 = vlaneseq (!%p2418_p9) }
 0x1e3   : > { %v1629_v26 = vadd.f32 %v1593_v18, %v795_v16  ;;  %v1597_v27 = vadd.f32 %v1596_v25, %v1483_v23  ;;  %v1598_v30 = vpop.f32.mrb[31].mxu0  ;;  %v1892_v16 = vmul.f32 (!%p2418_p9), %v1680_v2, %v1680_v2  ;;  %v1818_v18 = vadd.f32 (!%p2418_p9), %v1817_v9, %v1679_v61 }
 0x1e4   : > { %v1630_v31 = vadd.f32 %v1595_v22, %v796_v20  ;;  %v1599_v32 = vadd.f32 %v1598_v30, %v1485_v28  ;;  %v1893_v20 = vmul.f32 (!%p2418_p9), %v1681_v7, %v1681_v7  ;;  %v1684_v22 = vld [vmem:[#allocation2 + $0x78] sm:$0xff] (!%p2418_p9)  ;;  %v1916_v23 = vadd.f32 (!%p2418_p9), %v1915_v13, %v1889_v6  ;;  %v1686_v28 = vld [vmem:[#allocation2 + $0x88] sm:$0xff] (!%p2418_p9)  ;;  %1803 = vst [vmem:[%s3241_s28 + $0x30] sm:$0xff] (!%p2418_p9), %v2450_v19  ;;  %v1693_v57 = vld [vmem:[#allocation2 + $0xc0] sm:$0xff] (!%p2418_p9) }
 0x1e5   : > { %1661 = vst [vmem:[#allocation2 + $0xe0] sm:$0xff] %v1629_v26  ;;  %v1631_v33 = vadd.f32 %v1597_v27, %v797_v24  ;;  %v1937_v24 = vadd.f32 (!%p2418_p9), %v1936_v14, %v1890_v10  ;;  %v1839_v25 = vadd.f32 (!%p2418_p9), %v1838_v15, %v1680_v2  ;;  %v2451_v26 = vpack.c.bf16 (!%p2418_p9), %v1684_v22, %v1683_v17  ;;  %v1685_v27 = vld [vmem:[#allocation2 + $0x80] sm:$0xff] (!%p2418_p9)  ;;  %v1694_v58 = vld [vmem:[#allocation2 + $0xc8] sm:$0xff] (!%p2418_p9) }
 0x1e6   : > { %1662 = vst [vmem:[#allocation2 + $0xe8] sm:$0xff] %v1630_v31  ;;  %v1632_v34 = vadd.f32 %v1599_v32, %v798_v29  ;;  %v1819_v29 = vadd.f32 (!%p2418_p9), %v1818_v18, %v1681_v7  ;;  %v1895_v30 = vmul.f32 (!%p2418_p9), %v1683_v17, %v1683_v17  ;;  %v2452_v31 = vpack.c.bf16 (!%p2418_p9), %v1686_v28, %v1685_v27  ;;  %v1695_v2 = vld [vmem:[#allocation2 + $0xd0] sm:$0xff] (!%p2418_p9) }
 0x1e7   : > { %1663 = vst [vmem:[#allocation2 + $0xf0] sm:$0xff] %v1631_v33  ;;  %v1917_v32 = vadd.f32 (!%p2418_p9), %v1916_v23, %v1891_v12  ;;  %v1938_v33 = vadd.f32 (!%p2418_p9), %v1937_v24, %v1892_v16  ;;  %1804 = vst [vmem:[%s3241_s28 + $0x38] sm:$0xff] (!%p2418_p9), %v2451_v26  ;;  %v1896_v35 = vmul.f32 (!%p2418_p9), %v1684_v22, %v1684_v22  ;;  %v1696_v3 = vld [vmem:[#allocation2 + $0xd8] sm:$0xff] (!%p2418_p9)  ;;  %vm1877_vm1 = vcmp.lt.s32.totalorder (!%p2418_p9), %v1862_v50, 256 }
 0x1e8   : > { %1664 = vst [vmem:[#allocation2 + $0xf8] sm:$0xff] %v1632_v34  ;;  %v1840_v34 = vadd.f32 (!%p2418_p9), %v1839_v25, %v1682_v8  ;;  %v1820_v38 = vadd.f32 (!%p2418_p9), %v1819_v29, %v1683_v17  ;;  %1805 = vst [vmem:[%s3241_s28 + $0x40] sm:$0xff] (!%p2418_p9), %v2452_v31  ;;  %v1897_v39 = vmul.f32 (!%p2418_p9), %v1685_v27, %v1685_v27 }
 0x1e9   : > { %v1918_v41 = vadd.f32 %v1917_v32, %v1893_v20  ;;  %v1939_v42 = vadd.f32 %v1938_v33, %v1894_v21  ;;  %v1898_v44 = vmul.f32 %v1686_v28, %v1686_v28  ;;  %v2456_v61 = vpack.c.bf16 %v1694_v58, %v1693_v57 }
 0x1ea   : > { %v1841_v43 = vadd.f32 %v1840_v34, %v1684_v22  ;;  %v1821_v47 = vadd.f32 %v1820_v38, %v1685_v27  ;;  %v2457_v6 = vpack.c.bf16 %v1696_v3, %v1695_v2  ;;  %v1904_v10 = vmul.f32 %v1692_v52, %v1692_v52 }
 0x1eb   : > { %v1919_v53 = vadd.f32 %v1918_v41, %v1895_v30  ;;  %v1940_v54 = vadd.f32 %v1939_v42, %v1896_v35  ;;  %1809 = vst [vmem:[%s3241_s28 + $0x60] sm:$0xff] %v2456_v61  ;;  %v1905_v14 = vmul.f32 %v1693_v57, %v1693_v57  ;;  %v1906_v15 = vmul.f32 %v1694_v58, %v1694_v58 }
 0x1ec   : > { %v1842_v55 = vadd.f32 %v1841_v43, %v1686_v28  ;;  %v1822_v59 = vadd.f32 %v1821_v47, %v1687_v36  ;;  %v1697_v11 = vld [vmem:[#allocation2 + $0xe0] sm:$0xff]  ;;  %1810 = vst [vmem:[%s3241_s28 + $0x68] sm:$0xff] %v2457_v6  ;;  %v1907_v24 = vmul.f32 %v1695_v2, %v1695_v2  ;;  %v1908_v28 = vmul.f32 %v1696_v3, %v1696_v3 }
 0x1ed   : > { %v1920_v62 = vadd.f32 %v1919_v53, %v1897_v39  ;;  %v1941_v63 = vadd.f32 %v1940_v54, %v1898_v44  ;;  %v1698_v12 = vld [vmem:[#allocation2 + $0xe8] sm:$0xff]  ;;  %v1909_v30 = vmul.f32 %v1697_v11, %v1697_v11  ;;  %v2850_v54 = vmov 1966171168  }
 0x1ee   : > { %v1843_v0 = vadd.f32 %v1842_v55, %v1688_v37  ;;  %v1823_v4 = vadd.f32 %v1822_v59, %v1689_v45  ;;  %v2458_v16 = vpack.c.bf16 %v1698_v12, %v1697_v11  ;;  %v1699_v17 = vld [vmem:[#allocation2 + $0xf0] sm:$0xff]  ;;  %v1910_v34 = vmul.f32 %v1698_v12, %v1698_v12 }
 0x1ef   : > { %v1921_v7 = vadd.f32 %v1920_v62, %v1899_v48  ;;  %v1942_v8 = vadd.f32 %v1941_v63, %v1900_v49  ;;  %v1700_v18 = vld [vmem:[#allocation2 + $0xf8] sm:$0xff]  ;;  %v1911_v36 = vmul.f32 %v1699_v17, %v1699_v17  ;;  %v1860_v55 = vunpack.c.l.s4 %v2850_v54 }
 0x1f0   : > { %v1844_v9 = vadd.f32 %v1843_v0, %v1690_v46  ;;  %v1824_v13 = vadd.f32 %v1823_v4, %v1691_v51  ;;  %v2459_v22 = vpack.c.bf16 %v1700_v18, %v1699_v17  ;;  %1811 = vst [vmem:[%s3241_s28 + $0x70] sm:$0xff] %v2458_v16  ;;  %v1912_v40 = vmul.f32 %v1700_v18, %v1700_v18  ;;  %v1813_v16 = vld [vmem:[#allocation3] sm:$0x3] }
 0x1f1   : > { %v1922_v19 = vadd.f32 %v1921_v7, %v1901_v60  ;;  %v1943_v20 = vadd.f32 %v1942_v8, %v1902_v1  ;;  %v1863_v61 = vshrl.u32 %v1862_v50, 7  ;;  %v1861_v1 = vunpack.c.0.s8 %v1860_v55 }
 0x1f2   : > { %v1845_v21 = vadd.f32 %v1844_v9, %v1692_v52  ;;  %v1825_v23 = vadd.f32 %v1824_v13, %v1693_v57  ;;  %1812 = vst [vmem:[%s3241_s28 + $0x78] sm:$0xff] %v2459_v22 }
 0x1f3   : > { %v1923_v25 = vadd.f32 %v1922_v19, %v1903_v5  ;;  %v1944_v26 = vadd.f32 %v1943_v20, %v1904_v10  ;;  %v1864_v10 = vsub.s32 %v1861_v1, %v1863_v61  ;;  %v1880_v19 = vld [vmem:[#allocation4] sm:$0x3] }
 0x1f4   : > { %v1846_v27 = vadd.f32 %v1845_v21, %v1694_v58  ;;  %v1826_v29 = vadd.f32 %v1825_v23, %v1695_v2 }
 0x1f5   : > { %v1924_v31 = vadd.f32 %v1923_v25, %v1905_v14  ;;  %v1945_v32 = vadd.f32 %v1944_v26, %v1906_v15 }
 0x1f6   : > { %v1847_v33 = vadd.f32 %v1846_v27, %v1696_v3  ;;  %v1827_v35 = vadd.f32 %v1826_v29, %v1697_v11 }
 0x1f7   : > { %v1925_v37 = vadd.f32 %v1924_v31, %v1907_v24  ;;  %v1946_v38 = vadd.f32 %v1945_v32, %v1908_v28 }
 0x1f8   : > { %v1848_v39 = vadd.f32 %v1847_v33, %v1698_v12  ;;  %v1828_v41 = vadd.f32 %v1827_v35, %v1699_v17 }
 0x1f9   : > { %v1926_v42 = vadd.f32 %v1925_v37, %v1909_v30  ;;  %v1947_v43 = vadd.f32 %v1946_v38, %v1910_v34 }
 0x1fa   : > { %v1849_v44 = vadd.f32 %v1848_v39, %v1700_v18  ;;  %v1829_v45 = vrot.slane %v1828_v41, 4 }
 0x1fb   : > { %v1927_v47 = vadd.f32 %v1926_v42, %v1911_v36  ;;  %v1948_v48 = vadd.f32 %v1947_v43, %v1912_v40 }
 0x1fc   : > { %v1850_v46 = vrot.slane %v1849_v44, 4  ;;  %v1830_v49 = vadd.f32 %v1829_v45, %v1828_v41 }
 0x1fd   : > { %v1928_v52 = vrot.slane %v1927_v47, 4  ;;  %v1949_v53 = vrot.slane %v1948_v48, 4 }
 0x1fe   : > { %v1851_v51 = vadd.f32 %v1850_v46, %v1849_v44  ;;  %v1831_v56 = vrot.slane %v1830_v49, 2 }
 0x1ff   : > { %v1929_v58 = vadd.f32 %v1928_v52, %v1927_v47  ;;  %v1950_v59 = vadd.f32 %v1949_v53, %v1948_v48 }
 0x200   : > { %v1852_v57 = vrot.slane %v1851_v51, 2  ;;  %v1832_v60 = vadd.f32 %v1831_v56, %v1830_v49 }
 0x201   : > { %v1930_v63 = vrot.slane %v1929_v58, 2  ;;  %v1951_v0 = vrot.slane %v1950_v59, 2 }
 0x202   : > { %v1853_v62 = vadd.f32 %v1852_v57, %v1851_v51  ;;  %v1833_v2 = vrot.slane %v1832_v60, 1 }
 0x203   : > { %v1931_v4 = vadd.f32 %v1930_v63, %v1929_v58  ;;  %v1952_v5 = vadd.f32 %v1951_v0, %v1950_v59 }
 0x204   : > { %v1854_v3 = vrot.slane %v1853_v62, 1  ;;  %v1834_v6 = vadd.f32 %v1833_v2, %v1832_v60 }
 0x205   : > { %v1932_v8 = vrot.slane %v1931_v4, 1  ;;  %v1953_v9 = vrot.slane %v1952_v5, 1 }
 0x206   : > { %v1855_v7 = vadd.f32 %v1854_v3, %v1853_v62 }
 0x207   : > { %v1933_v12 = vadd.f32 %v1932_v8, %v1931_v4  ;;  %v1954_v13 = vadd.f32 %v1953_v9, %v1952_v5 }
 0x208   : > { %v1858_v11 = vcombine.low %v1834_v6, %v1855_v7 }
 0x209   : > { %v1957_v15 = vcombine.low %v1933_v12, %v1954_v13 }
 0x20a   : > { %v1865_v14 = vrot.slane %v1858_v11, %v1864_v10 }
 0x20b   : > { %v1964_v18 = vrot.slane %v1957_v15, %v1864_v10 }
 0x20c   : > { %v1872_v17 = vrot.slane %v1865_v14, %v1864_v10 }
 0x20d   : > { %v1971_v21 = vrot.slane %v1964_v18, %v1864_v10 }
 0x20e   : > { %v1874_v20 = vadd.f32 %v1872_v17, %v1813_v16 }
 0x20f   : > { %v1973_v22 = vadd.f32 %v1971_v21, %v1880_v19 }
 0x210   : > { %1879 = vst.msk [vmem:[#allocation3] sm:$0x3] %vm1877_vm1, %v1874_v20 }
 0x211   : > { %1974 = vst.msk [vmem:[#allocation4] sm:$0x3] %vm1877_vm1, %v1973_v22 }
 0x212 PF: > { %1978 = sbr.rel (!%p1665_p8) target bundleno = 538 (0x21a), region = 109  ;;  %v1980_v24 = vlaneseq (%p1665_p8) }
 0x214   : > { %vm1982_vm2 = vcmp.lt.s32.totalorder (%p1665_p8), %v1980_v24, 256 }
 0x217   : > { %v1979_v23 = vld [vmem:[#allocation3] sm:$0x3] (%p1665_p8) }
 0x218   : > { %v1985_v25 = vld [vmem:[#allocation4] sm:$0x3] (%p1665_p8)  ;;  %1984 = vst.msk [vmem:[%s709_s17] sm:$0x3] (%p1665_p8), %vm1982_vm2, %v1979_v23 }
 0x219   : > { %1986 = vst.msk [vmem:[%s718_s1] sm:$0x3] %vm1982_vm2, %v1985_v25 }
 0x21a PF: > { %2009 = sbr.rel (!%p2993_p13) target bundleno = 554 (0x22a), region = 113  ;;  %s2438_s23 = sshll.u32 (%p2993_p13), %s2830_s25, 6  ;;  %v2075_v26 = vld [vmem:[%s3241_s28] sm:$0xff] (%p2993_p13)  ;;  %v2077_v27 = vld [vmem:[%s3241_s28 + $0x8] sm:$0xff] (%p2993_p13)  ;;  %v2079_v28 = vld [vmem:[%s3241_s28 + $0x10] sm:$0xff] (%p2993_p13) }
 0x21b   : > { %s2015_s1 = sadd.s32 (%p2993_p13), %s2438_s23, %s3220_s7  ;;  %v2081_v29 = vld [vmem:[%s3241_s28 + $0x18] sm:$0xff] (%p2993_p13)  ;;  %v2083_v30 = vld [vmem:[%s3241_s28 + $0x20] sm:$0xff] (%p2993_p13)  ;;  %v2085_v31 = vld [vmem:[%s3241_s28 + $0x28] sm:$0xff] (%p2993_p13)  ;;  %s3469_s15 = sld [smem:[#allocation14_spill]] (%p2993_p13) }
 0x21c   : > { %s2439_s4 = sshll.u32 (%p2993_p13), %s2015_s1, 2  ;;  %v2087_v32 = vld [vmem:[%s3241_s28 + $0x30] sm:$0xff] (%p2993_p13)  ;;  %v2089_v33 = vld [vmem:[%s3241_s28 + $0x38] sm:$0xff] (%p2993_p13)  ;;  %v2091_v34 = vld [vmem:[%s3241_s28 + $0x40] sm:$0xff] (%p2993_p13) }
 0x21d   : > { %v2093_v35 = vld [vmem:[%s3241_s28 + $0x48] sm:$0xff] (%p2993_p13)  ;;  %v2095_v36 = vld [vmem:[%s3241_s28 + $0x50] sm:$0xff] (%p2993_p13)  ;;  %v2097_v37 = vld [vmem:[%s3241_s28 + $0x58] sm:$0xff] (%p2993_p13) }
 0x21e   : > { %v2099_v38 = vld [vmem:[%s3241_s28 + $0x60] sm:$0xff] (%p2993_p13)  ;;  %v2101_v39 = vld [vmem:[%s3241_s28 + $0x68] sm:$0xff] (%p2993_p13)  ;;  %v2103_v40 = vld [vmem:[%s3241_s28 + $0x70] sm:$0xff] (%p2993_p13) }
 0x21f   : > { %v2105_v41 = vld [vmem:[%s3241_s28 + $0x78] sm:$0xff] (%p2993_p13) }
 0x221   : > { %s2017_s22 = scalar_lea.vmem %s3469_s15, %s2439_s4 }
 0x222   : > { %2076 = vst [vmem:[%s2017_s22] sm:$0xff] %v2075_v26  ;;  %2078 = vst [vmem:[%s2017_s22 + $0x10] sm:$0xff] %v2077_v27 }
 0x223   : > { %2080 = vst [vmem:[%s2017_s22 + $0x20] sm:$0xff] %v2079_v28  ;;  %2082 = vst [vmem:[%s2017_s22 + $0x30] sm:$0xff] %v2081_v29 }
 0x224   : > { %2084 = vst [vmem:[%s2017_s22 + $0x40] sm:$0xff] %v2083_v30  ;;  %2086 = vst [vmem:[%s2017_s22 + $0x50] sm:$0xff] %v2085_v31 }
 0x225   : > { %2088 = vst [vmem:[%s2017_s22 + $0x60] sm:$0xff] %v2087_v32  ;;  %2090 = vst [vmem:[%s2017_s22 + $0x70] sm:$0xff] %v2089_v33 }
 0x226   : > { %2092 = vst [vmem:[%s2017_s22 + $0x80] sm:$0xff] %v2091_v34  ;;  %2094 = vst [vmem:[%s2017_s22 + $0x90] sm:$0xff] %v2093_v35 }
 0x227   : > { %2096 = vst [vmem:[%s2017_s22 + $0xa0] sm:$0xff] %v2095_v36  ;;  %2098 = vst [vmem:[%s2017_s22 + $0xb0] sm:$0xff] %v2097_v37 }
 0x228   : > { %2100 = vst [vmem:[%s2017_s22 + $0xc0] sm:$0xff] %v2099_v38  ;;  %2102 = vst [vmem:[%s2017_s22 + $0xd0] sm:$0xff] %v2101_v39 }
 0x229   : > { %2104 = vst [vmem:[%s2017_s22 + $0xe0] sm:$0xff] %v2103_v40  ;;  %2106 = vst [vmem:[%s2017_s22 + $0xf0] sm:$0xff] %v2105_v41 }
 0x22a PF: > { %s16_s29 = sadd.s32 1, %s2846_s29   ;;  %s3471_s7 = sld [smem:[#allocation8_spill]] }
 0x22b   : > { %p3396_p10 = scmp.ge.s32.totalorder %s16_s29, 34   ;;  %s3472_s17 = sld [smem:[#allocation9_spill]] }
 0x22c   : > { %s3473_s28 = sld [smem:[#allocation10_spill]]  ;;  %s3474_s12 = sld [smem:[#allocation11_spill]] }
 0x22d   : > { %s3476_s18 = smov %s2802_s19  ;;  %s3477_s19 = smov %s2991_s14 }
 0x22e   : > { %s3478_s20 = smov %s2810_s21  ;;  %s3479_s21 = smov %s2978_s16 }
 0x22f   : > { %s3480_s22 = smov %s2818_s2  ;;  %s3481_s2 = smov %s2988_s5 }
 0x230   : > { %s3482_s23 = smov %s2834_s26  ;;  %s3483_s24 = smov %s2838_s27 }
 0x231   : > { %s3484_s25 = smov %s3471_s7  ;;  %s3485_s26 = smov %s3472_s17 }
 0x232   : > { %s3486_s27 = smov %s3473_s28  ;;  %s3487_s28 = smov %s3474_s12 }
 0x233   :  { %15 = sbr.rel (!%p3396_p10) target bundleno = 13 (0xd), region = 217 }

// kernel: discriminator_forward.15
= control target key start
LH: loop header
LB: loop body
LE: loop exit
PB: predicated region body
PF: predicated region fallthrough
CT: control target
= control target key end

     0   :  { %s813_s12 = smov 0   ;;  %s1895_s0 = inlined_call_operand.vmem [shape: bf16[2,13,13,512], index: 0, kind: input, shape index: {}]   ;;  %s1896_s1 = inlined_call_operand.vmem [shape: f32[13,13,512], index: 1, kind: input, shape index: {}]   ;;  %s1897_s2 = inlined_call_operand.vmem [shape: f32[1,128], index: 2, kind: input, shape index: {}]   ;;  %s1898_s3 = inlined_call_operand.vmem [shape: f32[2,1,128], index: 3, kind: output, shape index: {}]  }
   0x1 LB: > { %s766_s13 = sadd.s32 4294967295, %s791_s12   ;;  %p770_p0 = scmp.ge.s32.totalorder %s791_s12, 1  ;;  %s791_s12 = sphi %s813_s12, %s13_s12  }
   0x2   : > { %p137_p1 = scmp.lt.s32.totalorder %s791_s12, 3 }
   0x4   : > { %p138_p2 = pnand %p770_p0, %p137_p1 }
   0x6   : > { %141 = sbr.rel (%p138_p2) target bundleno = 349 (0x15d), region = 32 }
   0xd   : > { %p159_p3 = scmp.lt.s32.totalorder %s766_s13, 1  ;;  %v323_v26 = vld [vmem:[%s1896_s1] sm:$0xff]  ;;  %v324_v33 = vld [vmem:[%s1896_s1 + $0x8] sm:$0xff]  ;;  %v325_v16 = vld [vmem:[%s1896_s1 + $0x10] sm:$0xff]  ;;  %vm531_vm0 = vcmask 1044480  }
   0xe   : > { %v326_v15 = vld [vmem:[%s1896_s1 + $0x18] sm:$0xff]  ;;  %v327_v14 = vld [vmem:[%s1896_s1 + $0x20] sm:$0x1f]  ;;  %v328_v21 = vld [vmem:[%s1896_s1 + $0x28] sm:$0x1f] }
   0xf   : > { %s2098_s13 = smov (!%p159_p3, %s766_s13), 1  ;;  %v329_v9 = vld [vmem:[%s1896_s1 + $0x30] sm:$0x1f]  ;;  %v330_v8 = vld [vmem:[%s1896_s1 + $0x38] sm:$0x1f]  ;;  %v332_v20 = vld [vmem:[%s1896_s1 + $0x48] sm:$0xff] }
  0x10   : > { %s774_s14 = smul.u32 416, %s2098_s13  ;;  %v338_v17 = vld [vmem:[%s1896_s1 + $0x78] sm:$0x1f]  ;;  %s166_s5 = scalar_lea.vmem %s1898_s3, %s2098_s13 }
  0x11   : > { %v342_v10 = vld [vmem:[%s1896_s1 + $0x98] sm:$0xff] }
  0x12   : > { %s827_s17 = scalar_lea.vmem %s1895_s0, %s774_s14 }
  0x13   : > { %v830_v0 = vld [vmem:[%s827_s17] sm:$0xff]  ;;  %v833_v1 = vld [vmem:[%s827_s17 + $0x8] sm:$0xff]  ;;  %v836_v2 = vld [vmem:[%s827_s17 + $0x10] sm:$0x77] }
  0x14   : > { %v839_v3 = vld [vmem:[%s827_s17 + $0x18] sm:$0x77]  ;;  %v842_v4 = vld [vmem:[%s827_s17 + $0x20] sm:$0xff]  ;;  %v845_v5 = vld [vmem:[%s827_s17 + $0x28] sm:$0xff]  ;;  %v1960_v11 = vunpack.c.h.bf16 %v830_v0 }
  0x15   : > { %v848_v6 = vld [vmem:[%s827_s17 + $0x30] sm:$0x77]  ;;  %v851_v7 = vld [vmem:[%s827_s17 + $0x38] sm:$0x77]  ;;  %v858_v12 = vld [vmem:[%s827_s17 + $0x40] sm:$0xff] }
  0x16   : > { %v861_v13 = vld [vmem:[%s827_s17 + $0x48] sm:$0xff]  ;;  %v868_v18 = vld [vmem:[%s827_s17 + $0x50] sm:$0x77]  ;;  %v871_v19 = vld [vmem:[%s827_s17 + $0x58] sm:$0x77] }
  0x17   : > { %v878_v24 = vld [vmem:[%s827_s17 + $0x60] sm:$0xff]  ;;  %v881_v25 = vld [vmem:[%s827_s17 + $0x68] sm:$0xff]  ;;  %v888_v30 = vld [vmem:[%s827_s17 + $0x70] sm:$0x77] }
  0x18   : > { %v891_v31 = vld [vmem:[%s827_s17 + $0x78] sm:$0x77]  ;;  %v898_v36 = vld [vmem:[%s827_s17 + $0x80] sm:$0xff]  ;;  %v901_v37 = vld [vmem:[%s827_s17 + $0x88] sm:$0xff] }
  0x19   : > { %v908_v42 = vld [vmem:[%s827_s17 + $0x90] sm:$0x77]  ;;  %v911_v43 = vld [vmem:[%s827_s17 + $0x98] sm:$0x77]  ;;  %v918_v48 = vld [vmem:[%s827_s17 + $0xa0] sm:$0xff] }
  0x1a   : > { %v921_v49 = vld [vmem:[%s827_s17 + $0xa8] sm:$0xff]  ;;  %v928_v54 = vld [vmem:[%s827_s17 + $0xb0] sm:$0x77]  ;;  %v931_v55 = vld [vmem:[%s827_s17 + $0xb8] sm:$0x77] }
  0x1b   : > { %v938_v60 = vld [vmem:[%s827_s17 + $0xc0] sm:$0xff]  ;;  %v941_v61 = vld [vmem:[%s827_s17 + $0xc8] sm:$0xff]  ;;  %v948_v57 = vld [vmem:[%s827_s17 + $0xd0] sm:$0x77] }
  0x1c   : > { %v951_v52 = vld [vmem:[%s827_s17 + $0xd8] sm:$0x77]  ;;  %v958_v63 = vld [vmem:[%s827_s17 + $0xe0] sm:$0xff]  ;;  %v961_v50 = vld [vmem:[%s827_s17 + $0xe8] sm:$0xff] }
  0x1d   : > { %v968_v58 = vld [vmem:[%s827_s17 + $0xf0] sm:$0x77]  ;;  %v971_v46 = vld [vmem:[%s827_s17 + $0xf8] sm:$0x77]  ;;  %v978_v56 = vld [vmem:[%s827_s17 + $0x100] sm:$0xff] }
  0x1e   : > { %1939 = vst [vmem:[#allocation2_spill] sm:$0xff] %v978_v56  ;;  %v981_v44 = vld [vmem:[%s827_s17 + $0x108] sm:$0xff]  ;;  %v988_v62 = vld [vmem:[%s827_s17 + $0x110] sm:$0x77]  ;;  %v991_v40 = vld [vmem:[%s827_s17 + $0x118] sm:$0x77] }
  0x1f   : > { %1940 = vst [vmem:[#allocation3_spill] sm:$0xff] %v981_v44  ;;  %1941 = vst [vmem:[#allocation4_spill] sm:$0xff] %v988_v62  ;;  %v998_v59 = vld [vmem:[%s827_s17 + $0x120] sm:$0xff]  ;;  %v1001_v38 = vld [vmem:[%s827_s17 + $0x128] sm:$0xff] }
  0x20   : > { %1942 = vst [vmem:[#allocation5_spill] sm:$0xff] %v991_v40  ;;  %1943 = vst [vmem:[#allocation6_spill] sm:$0xff] %v998_v59  ;;  %v1008_v53 = vld [vmem:[%s827_s17 + $0x130] sm:$0x77]  ;;  %v1011_v34 = vld [vmem:[%s827_s17 + $0x138] sm:$0x77]  ;;  %v1964_v59 = vunpack.c.h.bf16 %v836_v2 }
  0x21   : > { %1944 = vst [vmem:[#allocation7_spill] sm:$0xff] %v1001_v38  ;;  %1945 = vst [vmem:[#allocation8_spill] sm:$0xff] %v1008_v53  ;;  %v1018_v51 = vld [vmem:[%s827_s17 + $0x140] sm:$0xff]  ;;  %v1021_v32 = vld [vmem:[%s827_s17 + $0x148] sm:$0xff]  ;;  %v1961_v38 = vunpack.c.l.bf16 %v833_v1 }
  0x22   : > { %1946 = vst [vmem:[#allocation9_spill] sm:$0xff] %v1011_v34  ;;  %1947 = vst [vmem:[#allocation10_spill] sm:$0xff] %v1018_v51  ;;  %v1028_v47 = vld [vmem:[%s827_s17 + $0x150] sm:$0x77]  ;;  %v1031_v28 = vld [vmem:[%s827_s17 + $0x158] sm:$0x77]  ;;  %v1173_v40 = vmul.f32 %v328_v21, %v1964_v59  ;;  %v1967_v21 = vunpack.c.l.bf16 %v842_v4 }
  0x23   : > { %1948 = vst [vmem:[#allocation11_spill] sm:$0xff] %v1021_v32  ;;  %1949 = vst [vmem:[#allocation12_spill] sm:$0xff] %v1028_v47  ;;  %v1038_v45 = vld [vmem:[%s827_s17 + $0x160] sm:$0xff]  ;;  %v1041_v39 = vld [vmem:[%s827_s17 + $0x168] sm:$0xff] }
  0x24   : > { %1950 = vst [vmem:[#allocation13_spill] sm:$0xff] %v1031_v28  ;;  %1951 = vst [vmem:[#allocation14_spill] sm:$0xff] %v1038_v45  ;;  %v1048_v41 = vld [vmem:[%s827_s17 + $0x170] sm:$0x77]  ;;  %v1051_v27 = vld [vmem:[%s827_s17 + $0x178] sm:$0x77] }
  0x25   : > { %1952 = vst [vmem:[#allocation15_spill] sm:$0xff] %v1041_v39  ;;  %1953 = vst [vmem:[#allocation16_spill] sm:$0xff] %v1048_v41  ;;  %v1064_v23 = vld [vmem:[%s827_s17 + $0x180] sm:$0xff]  ;;  %v1067_v29 = vld [vmem:[%s827_s17 + $0x188] sm:$0xff] }
  0x26   : > { %1954 = vst [vmem:[#allocation17_spill] sm:$0xff] %v1051_v27  ;;  %1955 = vst [vmem:[#allocation18_spill] sm:$0xff] %v1064_v23  ;;  %v1070_v35 = vld [vmem:[%s827_s17 + $0x190] sm:$0x77]  ;;  %v1089_v22 = vld [vmem:[%s827_s17 + $0x198] sm:$0x77]  ;;  %v1959_v23 = vunpack.c.l.bf16 %v830_v0  ;;  %v1962_v0 = vunpack.c.h.bf16 %v833_v1 }
  0x27   : > { %1956 = vst [vmem:[#allocation19_spill] sm:$0xff] %v1067_v29  ;;  %1957 = vst [vmem:[#allocation20_spill] sm:$0xff] %v1070_v35  ;;  %v331_v28 = vld [vmem:[%s1896_s1 + $0x40] sm:$0xff]  ;;  %v333_v45 = vld [vmem:[%s1896_s1 + $0x50] sm:$0xff]  ;;  %v1150_v35 = vmul.f32 %v324_v33, %v1960_v11 }
  0x28   : > { %1958 = vst [vmem:[#allocation21_spill] sm:$0xff] %v1089_v22  ;;  %v334_v47 = vld [vmem:[%s1896_s1 + $0x58] sm:$0xff]  ;;  %v335_v32 = vld [vmem:[%s1896_s1 + $0x60] sm:$0x1f]  ;;  %v336_v27 = vld [vmem:[%s1896_s1 + $0x68] sm:$0x1f]  ;;  %v1146_v34 = vmul.f32 %v323_v26, %v1959_v23  ;;  %v1163_v23 = vmul.f32 %v325_v16, %v1961_v38  ;;  %v1167_v11 = vmul.f32 %v326_v15, %v1962_v0  ;;  %v1963_v26 = vunpack.c.l.bf16 %v836_v2 }
  0x29   : > { %v337_v41 = vld [vmem:[%s1896_s1 + $0x70] sm:$0x1f]  ;;  %v339_v51 = vld [vmem:[%s1896_s1 + $0x80] sm:$0xff]  ;;  %v340_v39 = vld [vmem:[%s1896_s1 + $0x88] sm:$0xff]  ;;  %v1965_v15 = vunpack.c.l.bf16 %v839_v3  ;;  %v1966_v2 = vunpack.c.h.bf16 %v839_v3  ;;  %v1194_v59 = vmul.f32 %v331_v28, %v1967_v21  ;;  %v1968_v0 = vunpack.c.h.bf16 %v842_v4 }
  0x2a   : > { %v341_v29 = vld [vmem:[%s1896_s1 + $0x90] sm:$0xff]  ;;  %v343_v22 = vld [vmem:[%s1896_s1 + $0xa0] sm:$0x1f]  ;;  %v344_v53 = vld [vmem:[%s1896_s1 + $0xa8] sm:$0x1f]  ;;  %v431_v33 = vmul.f32 %v327_v14, %v1963_v26  ;;  %v1970_v4 = vunpack.c.h.bf16 %v845_v5  ;;  %v1973_v21 = vunpack.c.h.bf16 %v848_v6 }
  0x2b   : > { %v345_v62 = vld [vmem:[%s1896_s1 + $0xb0] sm:$0x1f]  ;;  %v346_v16 = vld [vmem:[%s1896_s1 + $0xb8] sm:$0x1f]  ;;  %v347_v1 = vld [vmem:[%s1896_s1 + $0xc0] sm:$0xff]  ;;  %v1186_v38 = vmul.f32 %v329_v9, %v1965_v15  ;;  %v1190_v14 = vmul.f32 %v330_v8, %v1966_v2  ;;  %v1198_v26 = vmul.f32 %v332_v20, %v1968_v0  ;;  %v1969_v8 = vunpack.c.l.bf16 %v845_v5 }
  0x2c   : > { %v348_v44 = vld [vmem:[%s1896_s1 + $0xc8] sm:$0xff]  ;;  %v349_v9 = vld [vmem:[%s1896_s1 + $0xd0] sm:$0xff]  ;;  %v350_v3 = vld [vmem:[%s1896_s1 + $0xd8] sm:$0xff]  ;;  %v1215_v20 = vmul.f32 %v334_v47, %v1970_v4  ;;  %v1972_v15 = vunpack.c.l.bf16 %v848_v6  ;;  %v1221_v0 = vmul.f32 %v336_v27, %v1973_v21  ;;  %v1974_v47 = vunpack.c.l.bf16 %v851_v7 }
  0x2d   : > { %v1211_v28 = vmul.f32 %v333_v45, %v1969_v8  ;;  %v351_v56 = vld [vmem:[%s1896_s1 + $0xe0] sm:$0x1f]  ;;  %v352_v45 = vld [vmem:[%s1896_s1 + $0xe8] sm:$0x1f]  ;;  %v353_v5 = vld [vmem:[%s1896_s1 + $0xf0] sm:$0x1f]  ;;  %v1975_v6 = vunpack.c.h.bf16 %v851_v7 }
  0x2e   : > { %1971 = vst [vmem:[#allocation22_spill] sm:$0xff] %v1215_v20  ;;  %v439_v2 = vmul.f32 %v335_v32, %v1972_v15  ;;  %v1234_v8 = vmul.f32 %v337_v41, %v1974_v47  ;;  %v1977_v32 = vunpack.c.l.bf16 %v858_v12  ;;  %v1978_v15 = vunpack.c.h.bf16 %v858_v12  ;;  %v354_v20 = vld [vmem:[%s1896_s1 + $0xf8] sm:$0x1f]  ;;  %v355_v41 = vld [vmem:[%s1896_s1 + $0x100] sm:$0xff]  ;;  %v356_v7 = vld [vmem:[%s1896_s1 + $0x108] sm:$0xff] }
  0x2f   : > { %v1238_v27 = vmul.f32 %v338_v17, %v1975_v6  ;;  %v1979_v17 = vunpack.c.l.bf16 %v861_v13  ;;  %v1980_v12 = vunpack.c.h.bf16 %v861_v13  ;;  %v1982_v47 = vunpack.c.l.bf16 %v868_v18 }
  0x30   : > { %v1242_v4 = vmul.f32 %v339_v51, %v1977_v32  ;;  %v1246_v21 = vmul.f32 %v340_v39, %v1978_v15  ;;  %v1983_v32 = vunpack.c.h.bf16 %v868_v18  ;;  %v1984_v13 = vunpack.c.l.bf16 %v871_v19 }
  0x31   : > { %1976 = vst [vmem:[#allocation23_spill] sm:$0xff] %v1238_v27  ;;  %v1259_v51 = vmul.f32 %v341_v29, %v1979_v17  ;;  %v1263_v39 = vmul.f32 %v342_v10, %v1980_v12  ;;  %v1267_v6 = vmul.f32 %v343_v22, %v1982_v47  ;;  %v357_v27 = vld [vmem:[%s1896_s1 + $0x110] sm:$0xff]  ;;  %v358_v29 = vld [vmem:[%s1896_s1 + $0x118] sm:$0xff]  ;;  %v359_v10 = vld [vmem:[%s1896_s1 + $0x120] sm:$0x1f]  ;;  %v1985_v18 = vunpack.c.h.bf16 %v871_v19 }
  0x32   : > { %v1271_v15 = vmul.f32 %v344_v53, %v1983_v32  ;;  %v1284_v22 = vmul.f32 %v345_v62, %v1984_v13  ;;  %v1987_v17 = vunpack.c.l.bf16 %v878_v24  ;;  %v1988_v47 = vunpack.c.h.bf16 %v878_v24  ;;  %v361_v62 = vld [vmem:[%s1896_s1 + $0x130] sm:$0x1f]  ;;  %v362_v19 = vld [vmem:[%s1896_s1 + $0x138] sm:$0x1f] }
  0x33   : > { %1981 = vst [vmem:[#allocation24_spill] sm:$0xff] %v1263_v39  ;;  %v1288_v53 = vmul.f32 %v346_v16, %v1985_v18  ;;  %v360_v39 = vld [vmem:[%s1896_s1 + $0x128] sm:$0x1f]  ;;  %v1989_v16 = vunpack.c.l.bf16 %v881_v25  ;;  %v1990_v24 = vunpack.c.h.bf16 %v881_v25  ;;  %v1992_v13 = vunpack.c.l.bf16 %v888_v30  ;;  %v365_v25 = vld [vmem:[%s1896_s1 + $0x150] sm:$0xff] }
  0x34   : > { %v1292_v12 = vmul.f32 %v347_v1, %v1987_v17  ;;  %v1296_v32 = vmul.f32 %v348_v44, %v1988_v47  ;;  %v1993_v17 = vunpack.c.h.bf16 %v888_v30  ;;  %v1995_v30 = vunpack.c.h.bf16 %v891_v31 }
  0x35   : > { %1986 = vst [vmem:[#allocation25_spill] sm:$0xff] %v1288_v53  ;;  %v1309_v1 = vmul.f32 %v349_v9, %v1989_v16  ;;  %v1313_v44 = vmul.f32 %v350_v3, %v1990_v24  ;;  %v1317_v18 = vmul.f32 %v351_v56, %v1992_v13  ;;  %v363_v53 = vld [vmem:[%s1896_s1 + $0x140] sm:$0xff]  ;;  %v364_v9 = vld [vmem:[%s1896_s1 + $0x148] sm:$0xff]  ;;  %v1994_v3 = vunpack.c.l.bf16 %v891_v31 }
  0x36   : > { %v1321_v47 = vmul.f32 %v352_v45, %v1993_v17  ;;  %v1338_v45 = vmul.f32 %v354_v20, %v1995_v30  ;;  %v1996_v16 = vunpack.c.l.bf16 %v898_v36  ;;  %v1997_v13 = vunpack.c.h.bf16 %v898_v36 }
  0x37   : > { %1991 = vst [vmem:[#allocation26_spill] sm:$0xff] %v1313_v44  ;;  %v1334_v56 = vmul.f32 %v353_v5, %v1994_v3  ;;  %v366_v44 = vld [vmem:[%s1896_s1 + $0x158] sm:$0xff]  ;;  %v367_v5 = vld [vmem:[%s1896_s1 + $0x160] sm:$0x1f]  ;;  %v1998_v31 = vunpack.c.l.bf16 %v901_v37  ;;  %v1999_v3 = vunpack.c.h.bf16 %v901_v37  ;;  %v2001_v36 = vunpack.c.l.bf16 %v908_v42 }
  0x38   : > { %v1342_v24 = vmul.f32 %v355_v41, %v1996_v16  ;;  %v1346_v17 = vmul.f32 %v356_v7, %v1997_v13  ;;  %v532_v30 = vsel %vm531_vm0, %v431_v33, 0.0  ;;  %v368_v16 = vld [vmem:[%s1896_s1 + $0x168] sm:$0x1f]  ;;  %v369_v13 = vld [vmem:[%s1896_s1 + $0x170] sm:$0x1f]  ;;  %v2004_v33 = vunpack.c.h.bf16 %v911_v43 }
  0x39   : > { %v1356_v20 = vmul.f32 %v357_v27, %v1998_v31  ;;  %v1360_v41 = vmul.f32 %v358_v29, %v1999_v3  ;;  %v1364_v7 = vmul.f32 %v359_v10, %v2001_v36  ;;  %v370_v37 = vld [vmem:[%s1896_s1 + $0x178] sm:$0x1f]  ;;  %v2002_v27 = vunpack.c.h.bf16 %v908_v42  ;;  %v372_v42 = vld [vmem:[%s1896_s1 + $0x188] sm:$0xff] }
  0x3a   : > { %v2003_v10 = vunpack.c.l.bf16 %v911_v43  ;;  %v1386_v3 = vmul.f32 %v362_v19, %v2004_v33  ;;  %v533_v36 = vadd.f32 %v532_v30, %v1146_v34  ;;  %v2007_v43 = vunpack.c.l.bf16 %v921_v49  ;;  %v373_v30 = vld [vmem:[%s1896_s1 + $0x190] sm:$0xff]  ;;  %v374_v33 = vld [vmem:[%s1896_s1 + $0x198] sm:$0xff] }
  0x3b   : > { %2000 = vst [vmem:[#allocation27_spill] sm:$0xff] %v1360_v41  ;;  %v1378_v29 = vmul.f32 %v360_v39, %v2002_v27  ;;  %v371_v41 = vld [vmem:[%s1896_s1 + $0x180] sm:$0xff]  ;;  %v2005_v39 = vunpack.c.l.bf16 %v918_v48  ;;  %v535_v34 = vsel %vm531_vm0, %v439_v2, 0.0  ;;  %v576_v2 = vsel %vm531_vm0, %v1173_v40, 0.0 }
  0x3c   : > { %v1382_v31 = vmul.f32 %v361_v62, %v2003_v10  ;;  %v2006_v62 = vunpack.c.h.bf16 %v918_v48  ;;  %v1405_v19 = vmul.f32 %v365_v25, %v2007_v43  ;;  %v2010_v48 = vunpack.c.l.bf16 %v928_v54  ;;  %v376_v43 = vld [vmem:[%s1896_s1 + $0x1a8] sm:$0x1f] }
  0x3d   : > { %v1397_v27 = vmul.f32 %v363_v53, %v2005_v39  ;;  %v2008_v53 = vunpack.c.h.bf16 %v921_v49  ;;  %v534_v25 = vadd.f32 %v533_v36, %v1194_v59  ;;  %v377_v49 = vld [vmem:[%s1896_s1 + $0x1b0] sm:$0x1f]  ;;  %v2012_v59 = vunpack.c.l.bf16 %v931_v55 }
  0x3e   : > { %v1401_v10 = vmul.f32 %v364_v9, %v2006_v62  ;;  %v1420_v9 = vmul.f32 %v367_v5, %v2010_v48  ;;  %v375_v62 = vld [vmem:[%s1896_s1 + $0x1a0] sm:$0x1f]  ;;  %v2013_v40 = vunpack.c.h.bf16 %v931_v55  ;;  %v577_v48 = vadd.f32 %v576_v2, %v1150_v35 }
  0x3f   : > { %v1416_v39 = vmul.f32 %v366_v44, %v2008_v53  ;;  %v2011_v44 = vunpack.c.h.bf16 %v928_v54  ;;  %v1440_v36 = vmul.f32 %v369_v13, %v2012_v59  ;;  %v379_v54 = vld [vmem:[%s1896_s1 + $0x1c0] sm:$0xff]  ;;  %v2016_v13 = vunpack.c.h.bf16 %v938_v60 }
  0x40   : > { %v1444_v53 = vmul.f32 %v370_v37, %v2013_v40  ;;  %v536_v55 = vadd.f32 %v535_v34, %v534_v25  ;;  %v579_v35 = vsel %vm531_vm0, %v1221_v0, 0.0  ;;  %v380_v37 = vld [vmem:[%s1896_s1 + $0x1c8] sm:$0xff]  ;;  %v2017_v2 = vunpack.c.l.bf16 %v941_v61  ;;  %v381_v0 = vld [vmem:[%s1896_s1 + $0x1d0] sm:$0xff] }
  0x41   : > { %2009 = vst [vmem:[#allocation28_spill] sm:$0xff] %v1416_v39  ;;  %v1436_v5 = vmul.f32 %v368_v16, %v2011_v44  ;;  %v378_v39 = vld [vmem:[%s1896_s1 + $0x1b8] sm:$0x1f]  ;;  %v2015_v16 = vunpack.c.l.bf16 %v938_v60  ;;  %v1459_v59 = vmul.f32 %v372_v42, %v2016_v13  ;;  %v538_v60 = vsel %vm531_vm0, %v1267_v6, 0.0 }
  0x42   : > { %2014 = vst [vmem:[#allocation29_spill] sm:$0xff] %v1444_v53  ;;  %v1468_v40 = vmul.f32 %v373_v30, %v2017_v2  ;;  %v2018_v53 = vunpack.c.h.bf16 %v941_v61  ;;  %v578_v42 = vadd.f32 %v577_v48, %v1198_v26  ;;  %v2019_v34 = vunpack.c.l.bf16 %v948_v57  ;;  %v382_v26 = vld [vmem:[%s1896_s1 + $0x1d8] sm:$0xff] }
  0x43   : > { %v1455_v44 = vmul.f32 %v371_v41, %v2015_v16  ;;  %v2020_v30 = vunpack.c.h.bf16 %v948_v57  ;;  %v2021_v61 = vunpack.c.l.bf16 %v951_v52  ;;  %v537_v6 = vadd.f32 %v536_v55, %v1242_v4  ;;  %v384_v57 = vld [vmem:[%s1896_s1 + $0x1e8] sm:$0x1f]  ;;  %v385_v55 = vld [vmem:[%s1896_s1 + $0x1f0] sm:$0x1f]  ;;  %v386_v2 = vld [vmem:[%s1896_s1 + $0x1f8] sm:$0x1f] }
  0x44   : > { %v1472_v41 = vmul.f32 %v374_v33, %v2018_v53  ;;  %v1482_v25 = vmul.f32 %v375_v62, %v2019_v34  ;;  %v383_v53 = vld [vmem:[%s1896_s1 + $0x1e0] sm:$0x1f]  ;;  %v2022_v62 = vunpack.c.h.bf16 %v951_v52  ;;  %v580_v4 = vadd.f32 %v579_v35, %v578_v42 }
  0x45   : > { %v1486_v16 = vmul.f32 %v376_v43, %v2020_v30  ;;  %v1490_v33 = vmul.f32 %v377_v49, %v2021_v61  ;;  %v2023_v49 = vunpack.c.l.bf16 %v958_v63  ;;  %v620_v13 = vsel %vm531_vm0, %v1186_v38, 0.0 }
  0x46   : > { %v1504_v43 = vmul.f32 %v378_v39, %v2022_v62  ;;  %v2024_v52 = vunpack.c.h.bf16 %v958_v63  ;;  %v539_v34 = vadd.f32 %v538_v60, %v537_v6  ;;  %v621_v35 = vadd.f32 %v620_v13, %v1163_v23 }
  0x47   : > { %v1508_v48 = vmul.f32 %v379_v54, %v2023_v49  ;;  %v582_v54 = vsel %vm531_vm0, %v1271_v15, 0.0  ;;  %v2025_v38 = vunpack.c.l.bf16 %v961_v50  ;;  %v541_v30 = vsel %vm531_vm0, %v1317_v18, 0.0  ;;  %v387_v18 = vld [vmem:[%s1896_s1 + $0x200] sm:$0xff] }
  0x48   : > { %v1520_v39 = vmul.f32 %v380_v37, %v2024_v52  ;;  %v581_v61 = vadd.f32 %v580_v4, %v1246_v21  ;;  %v623_v63 = vsel %vm531_vm0, %v1234_v8, 0.0  ;;  %v2026_v37 = vunpack.c.h.bf16 %v961_v50 }
  0x49   : > { %v1527_v42 = vmul.f32 %v381_v0, %v2025_v38  ;;  %v2027_v15 = vunpack.c.l.bf16 %v968_v58  ;;  %v540_v23 = vadd.f32 %v539_v34, %v1292_v12  ;;  %v622_v0 = vadd.f32 %v621_v35, %v1211_v28  ;;  %v388_v28 = vld [vmem:[%s1896_s1 + $0x208] sm:$0xff]  ;;  %v389_v12 = vld [vmem:[%s1896_s1 + $0x210] sm:$0xff] }
  0x4a   : > { %v1536_v60 = vmul.f32 %v382_v26, %v2026_v37  ;;  %v2028_v21 = vunpack.c.h.bf16 %v968_v58  ;;  %v2029_v50 = vunpack.c.l.bf16 %v971_v46  ;;  %v2030_v26 = vunpack.c.h.bf16 %v971_v46  ;;  %v390_v46 = vld [vmem:[%s1896_s1 + $0x218] sm:$0xff] }
  0x4b   : > { %v1540_v6 = vmul.f32 %v383_v53, %v2027_v15  ;;  %v583_v49 = vadd.f32 %v582_v54, %v581_v61  ;;  %v542_v58 = vadd.f32 %v541_v30, %v540_v23  ;;  %v624_v4 = vadd.f32 %v623_v63, %v622_v0  ;;  %v2031_v54 = vld [vmem:[#allocation2_spill] sm:$0xff]  ;;  %v2033_v30 = vld [vmem:[#allocation23_spill] sm:$0xff]  ;;  %v393_v0 = vld [vmem:[%s1896_s1 + $0x230] sm:$0x1f] }
  0x4c   : > { %v1549_v62 = vmul.f32 %v384_v57, %v2028_v21  ;;  %v1553_v8 = vmul.f32 %v385_v55, %v2029_v50  ;;  %v1557_v53 = vmul.f32 %v386_v2, %v2030_v26  ;;  %v585_v57 = vsel %vm531_vm0, %v1321_v47, 0.0  ;;  %v2037_v23 = vld [vmem:[#allocation22_spill] sm:$0xff] }
  0x4d   : > { %v664_v13 = vsel %vm531_vm0, %v1190_v14, 0.0  ;;  %v544_v55 = vsel %vm531_vm0, %v1364_v7, 0.0  ;;  %v584_v2 = vadd.f32 %v583_v49, %v1296_v32  ;;  %v626_v52 = vsel %vm531_vm0, %v1284_v22, 0.0  ;;  %v391_v32 = vld [vmem:[%s1896_s1 + $0x220] sm:$0x1f] }
  0x4e   : > { %v665_v34 = vadd.f32 %v664_v13, %v1167_v11  ;;  %v2032_v47 = vunpack.c.l.bf16 %v2031_v54  ;;  %v543_v14 = vadd.f32 %v542_v58, %v1342_v24  ;;  %v625_v38 = vadd.f32 %v624_v4, %v1259_v51  ;;  %v2035_v11 = vld [vmem:[#allocation3_spill] sm:$0xff]  ;;  %v2039_v13 = vld [vmem:[#allocation4_spill] sm:$0xff] }
  0x4f   : > { %v667_v61 = vsel %vm531_vm0, %v2033_v30, 0.0  ;;  %v2034_v7 = vunpack.c.h.bf16 %v2031_v54  ;;  %v2036_v63 = vunpack.c.l.bf16 %v2035_v11  ;;  %v586_v15 = vadd.f32 %v585_v57, %v584_v2  ;;  %v392_v51 = vld [vmem:[%s1896_s1 + $0x228] sm:$0x1f]  ;;  %v2045_v30 = vld [vmem:[#allocation24_spill] sm:$0xff] }
  0x50   : > { %v1580_v35 = vmul.f32 %v387_v18, %v2032_v47  ;;  %v666_v24 = vadd.f32 %v665_v34, %v2037_v23  ;;  %v2038_v18 = vunpack.c.h.bf16 %v2035_v11  ;;  %v545_v50 = vadd.f32 %v544_v55, %v543_v14  ;;  %v398_v23 = vld [vmem:[%s1896_s1 + $0x258] sm:$0xff] }
  0x51   : > { %v1591_v22 = vmul.f32 %v388_v28, %v2034_v7  ;;  %v1595_v37 = vmul.f32 %v389_v12, %v2036_v63  ;;  %v588_v26 = vsel %vm531_vm0, %v1378_v29, 0.0  ;;  %v627_v49 = vadd.f32 %v626_v52, %v625_v38  ;;  %v394_v28 = vld [vmem:[%s1896_s1 + $0x238] sm:$0x1f] }
  0x52   : > { %v1606_v21 = vmul.f32 %v390_v46, %v2038_v18  ;;  %v547_v12 = vsel %vm531_vm0, %v1420_v9, 0.0  ;;  %v587_v58 = vadd.f32 %v586_v15, %v1346_v17  ;;  %v629_v57 = vsel %vm531_vm0, %v1334_v56, 0.0  ;;  %v2041_v52 = vld [vmem:[#allocation25_spill] sm:$0xff]  ;;  %v395_v9 = vld [vmem:[%s1896_s1 + $0x240] sm:$0xff] }
  0x53   : > { %v668_v4 = vadd.f32 %v667_v61, %v666_v24  ;;  %v2040_v46 = vunpack.c.l.bf16 %v2039_v13  ;;  %v546_v2 = vadd.f32 %v545_v50, %v1397_v27  ;;  %v628_v29 = vadd.f32 %v627_v49, %v1309_v1  ;;  %v2043_v56 = vld [vmem:[#allocation5_spill] sm:$0xff]  ;;  %v396_v1 = vld [vmem:[%s1896_s1 + $0x248] sm:$0xff]  ;;  %v397_v61 = vld [vmem:[%s1896_s1 + $0x250] sm:$0xff] }
  0x54   : > { %v670_v34 = vsel %vm531_vm0, %v2041_v52, 0.0  ;;  %v2042_v17 = vunpack.c.h.bf16 %v2039_v13  ;;  %v2044_v47 = vunpack.c.l.bf16 %v2043_v56  ;;  %v589_v38 = vadd.f32 %v588_v26, %v587_v58  ;;  %v2047_v50 = vld [vmem:[#allocation6_spill] sm:$0xff] }
  0x55   : > { %v495_v55 = vmul.f32 %v391_v32, %v2040_v46  ;;  %v669_v27 = vadd.f32 %v668_v4, %v2045_v30  ;;  %v2046_v32 = vunpack.c.h.bf16 %v2043_v56  ;;  %v548_v11 = vadd.f32 %v547_v12, %v546_v2  ;;  %v2052_v46 = vld [vmem:[#allocation26_spill] sm:$0xff] }
  0x56   : > { %v1629_v54 = vmul.f32 %v392_v51, %v2042_v17  ;;  %v1633_v14 = vmul.f32 %v393_v0, %v2044_v47  ;;  %v591_v63 = vsel %vm531_vm0, %v1436_v5, 0.0  ;;  %v630_v15 = vadd.f32 %v629_v57, %v628_v29  ;;  %v402_v17 = vld [vmem:[%s1896_s1 + $0x278] sm:$0x1f] }
  0x57   : > { %v1644_v7 = vmul.f32 %v394_v28, %v2046_v32  ;;  %v550_v24 = vsel %vm531_vm0, %v1482_v25, 0.0  ;;  %v590_v51 = vadd.f32 %v589_v38, %v1401_v10  ;;  %v632_v0 = vsel %vm531_vm0, %v1382_v31, 0.0  ;;  %v399_v25 = vld [vmem:[%s1896_s1 + $0x260] sm:$0x1f]  ;;  %v2050_v31 = vld [vmem:[#allocation7_spill] sm:$0xff] }
  0x58   : > { %v671_v18 = vadd.f32 %v670_v34, %v669_v27  ;;  %v2048_v26 = vunpack.c.l.bf16 %v2047_v50  ;;  %v549_v28 = vadd.f32 %v548_v11, %v1455_v44  ;;  %v631_v5 = vadd.f32 %v630_v15, %v1356_v20  ;;  %v400_v20 = vld [vmem:[%s1896_s1 + $0x268] sm:$0x1f]  ;;  %v2054_v27 = vld [vmem:[#allocation8_spill] sm:$0xff]  ;;  %v2057_v15 = vld [vmem:[#allocation9_spill] sm:$0xff] }
  0x59   : > { %v673_v12 = vsel %vm531_vm0, %v1338_v45, 0.0  ;;  %v2049_v10 = vunpack.c.h.bf16 %v2047_v50  ;;  %v2051_v57 = vunpack.c.l.bf16 %v2050_v31  ;;  %v592_v13 = vadd.f32 %v591_v63, %v590_v51  ;;  %v401_v45 = vld [vmem:[%s1896_s1 + $0x270] sm:$0x1f]  ;;  %v2059_v51 = vld [vmem:[#allocation27_spill] sm:$0xff] }
  0x5a   : > { %v499_v49 = vmul.f32 %v395_v9, %v2048_v26  ;;  %v672_v44 = vadd.f32 %v671_v18, %v2052_v46  ;;  %v2053_v2 = vunpack.c.h.bf16 %v2050_v31  ;;  %v551_v52 = vadd.f32 %v550_v24, %v549_v28 }
  0x5b   : > { %v1667_v58 = vmul.f32 %v396_v1, %v2049_v10  ;;  %v1671_v4 = vmul.f32 %v397_v61, %v2051_v57  ;;  %v594_v34 = vsel %vm531_vm0, %v1486_v16, 0.0  ;;  %v633_v9 = vadd.f32 %v632_v0, %v631_v5  ;;  %v407_v5 = vld [vmem:[%s1896_s1 + $0x2a0] sm:$0x1f] }
  0x5c   : > { %v1682_v29 = vmul.f32 %v398_v23, %v2053_v2  ;;  %v553_v56 = vsel %vm531_vm0, %v1540_v6, 0.0  ;;  %v593_v47 = vadd.f32 %v592_v13, %v1459_v59  ;;  %v635_v38 = vsel %vm531_vm0, %v1440_v36, 0.0  ;;  %v403_v6 = vld [vmem:[%s1896_s1 + $0x280] sm:$0xff] }
  0x5d   : > { %v674_v30 = vadd.f32 %v673_v12, %v672_v44  ;;  %v2055_v1 = vunpack.c.l.bf16 %v2054_v27  ;;  %v552_v32 = vadd.f32 %v551_v52, %v1508_v48  ;;  %v634_v16 = vadd.f32 %v633_v9, %v1405_v19  ;;  %v404_v19 = vld [vmem:[%s1896_s1 + $0x288] sm:$0xff]  ;;  %v2061_v57 = vld [vmem:[#allocation10_spill] sm:$0xff] }
  0x5e   : > { %v676_v11 = vsel %vm531_vm0, %v1386_v3, 0.0  ;;  %v2056_v59 = vunpack.c.h.bf16 %v2054_v27  ;;  %v2058_v36 = vunpack.c.l.bf16 %v2057_v15  ;;  %v595_v24 = vadd.f32 %v594_v34, %v593_v47  ;;  %v405_v3 = vld [vmem:[%s1896_s1 + $0x290] sm:$0xff]  ;;  %v2065_v52 = vld [vmem:[#allocation11_spill] sm:$0xff] }
  0x5f   : > { %v503_v61 = vmul.f32 %v399_v25, %v2055_v1  ;;  %v675_v0 = vadd.f32 %v674_v30, %v2059_v51  ;;  %v2060_v48 = vunpack.c.h.bf16 %v2057_v15  ;;  %v554_v50 = vadd.f32 %v553_v56, %v552_v32  ;;  %v2068_v47 = vld [vmem:[#allocation12_spill] sm:$0xff] }
  0x60   : > { %v504_v63 = vmul.f32 %v400_v20, %v2056_v59  ;;  %v1707_v23 = vmul.f32 %v401_v45, %v2058_v36  ;;  %v597_v26 = vsel %vm531_vm0, %v1549_v62, 0.0  ;;  %v636_v28 = vadd.f32 %v635_v38, %v634_v16  ;;  %v2063_v20 = vld [vmem:[#allocation29_spill] sm:$0xff]  ;;  %v415_v16 = vld [vmem:[%s1896_s1 + $0x2e0] sm:$0x1f] }
  0x61   : > { %v1718_v18 = vmul.f32 %v402_v17, %v2060_v48  ;;  %v556_v12 = vsel %vm531_vm0, %v495_v55, 0.0  ;;  %v596_v25 = vadd.f32 %v595_v24, %v1520_v39  ;;  %v638_v10 = vsel %vm531_vm0, %v1490_v33, 0.0  ;;  %v408_v55 = vld [vmem:[%s1896_s1 + $0x2a8] sm:$0x1f]  ;;  %v2067_v17 = vld [vmem:[#allocation28_spill] sm:$0xff] }
  0x62   : > { %v677_v31 = vadd.f32 %v676_v11, %v675_v0  ;;  %v2062_v13 = vunpack.c.l.bf16 %v2061_v57  ;;  %v555_v44 = vadd.f32 %v554_v50, %v1580_v35  ;;  %v637_v62 = vadd.f32 %v636_v28, %v1468_v40  ;;  %v409_v40 = vld [vmem:[%s1896_s1 + $0x2b0] sm:$0x1f]  ;;  %v410_v35 = vld [vmem:[%s1896_s1 + $0x2b8] sm:$0x1f] }
  0x63   : > { %v679_v45 = vsel %vm531_vm0, %v2063_v20, 0.0  ;;  %v2064_v39 = vunpack.c.h.bf16 %v2061_v57  ;;  %v2066_v33 = vunpack.c.l.bf16 %v2065_v52  ;;  %v598_v9 = vadd.f32 %v597_v26, %v596_v25 }
  0x64   : > { %v507_v46 = vmul.f32 %v403_v6, %v2062_v13  ;;  %v678_v56 = vadd.f32 %v677_v31, %v2067_v17  ;;  %v2069_v38 = vunpack.c.l.bf16 %v2068_v47  ;;  %v557_v27 = vadd.f32 %v556_v12, %v555_v44  ;;  %v423_v31 = vld [vmem:[%s1896_s1 + $0x320] sm:$0x1f] }
  0x65   : > { %v508_v2 = vmul.f32 %v404_v19, %v2064_v39  ;;  %v1742_v34 = vmul.f32 %v405_v3, %v2066_v33  ;;  %v600_v1 = vsel %vm531_vm0, %v1629_v54, 0.0  ;;  %v639_v32 = vadd.f32 %v638_v10, %v637_v62  ;;  %v411_v19 = vld [vmem:[%s1896_s1 + $0x2c0] sm:$0xff] }
  0x66   : > { %v511_v30 = vmul.f32 %v407_v5, %v2069_v38  ;;  %v559_v11 = vsel %vm531_vm0, %v503_v61, 0.0  ;;  %v599_v6 = vadd.f32 %v598_v9, %v1591_v22  ;;  %v641_v59 = vsel %vm531_vm0, %v1553_v8, 0.0  ;;  %v2071_v61 = vld [vmem:[#allocation13_spill] sm:$0xff]  ;;  %v2076_v62 = vld [vmem:[#allocation14_spill] sm:$0xff] }
  0x67   : > { %v680_v15 = vadd.f32 %v679_v45, %v678_v56  ;;  %v2070_v36 = vunpack.c.h.bf16 %v2068_v47  ;;  %v558_v51 = vadd.f32 %v557_v27, %v499_v49  ;;  %v640_v0 = vadd.f32 %v639_v32, %v1527_v42  ;;  %v412_v42 = vld [vmem:[%s1896_s1 + $0x2c8] sm:$0xff]  ;;  %v2074_v49 = vld [vmem:[#allocation16_spill] sm:$0xff]  ;;  %v419_v33 = vld [vmem:[%s1896_s1 + $0x300] sm:$0xff] }
  0x68   : > { %v682_v54 = vsel %vm531_vm0, %v1504_v43, 0.0  ;;  %v2072_v3 = vunpack.c.l.bf16 %v2071_v61  ;;  %v2073_v48 = vunpack.c.h.bf16 %v2071_v61  ;;  %v601_v50 = vadd.f32 %v600_v1, %v599_v6  ;;  %v416_v43 = vld [vmem:[%s1896_s1 + $0x2e8] sm:$0x1f]  ;;  %v2082_v6 = vld [vmem:[#allocation18_spill] sm:$0xff] }
  0x69   : > { %v512_v24 = vmul.f32 %v408_v55, %v2070_v36  ;;  %v681_v26 = vadd.f32 %v680_v15, %v1472_v41  ;;  %v2075_v28 = vunpack.c.l.bf16 %v2074_v49  ;;  %v560_v12 = vadd.f32 %v559_v11, %v558_v51  ;;  %v424_v1 = vld [vmem:[%s1896_s1 + $0x328] sm:$0x1f] }
  0x6a   : > { %v513_v22 = vmul.f32 %v409_v40, %v2072_v3  ;;  %v1774_v8 = vmul.f32 %v410_v35, %v2073_v48  ;;  %v603_v25 = vsel %vm531_vm0, %v504_v63, 0.0  ;;  %v642_v10 = vadd.f32 %v641_v59, %v640_v0  ;;  %v413_v0 = vld [vmem:[%s1896_s1 + $0x2d0] sm:$0xff] }
  0x6b   : > { %v519_v5 = vmul.f32 %v415_v16, %v2075_v28  ;;  %v562_v41 = vsel %vm531_vm0, %v511_v30, 0.0  ;;  %v602_v57 = vadd.f32 %v601_v50, %v1667_v58  ;;  %v644_v13 = vsel %vm531_vm0, %v1633_v14, 0.0 }
  0x6c   : > { %v683_v44 = vadd.f32 %v682_v54, %v681_v26  ;;  %v2077_v20 = vunpack.c.l.bf16 %v2076_v62  ;;  %v561_v55 = vadd.f32 %v560_v12, %v507_v46  ;;  %v643_v39 = vadd.f32 %v642_v10, %v1595_v37  ;;  %v417_v37 = vld [vmem:[%s1896_s1 + $0x2f0] sm:$0x1f]  ;;  %v2084_v54 = vld [vmem:[#allocation17_spill] sm:$0xff]  ;;  %v2088_v10 = vld [vmem:[#allocation15_spill] sm:$0xff] }
  0x6d   : > { %v685_v63 = vsel %vm531_vm0, %v1557_v53, 0.0  ;;  %v2078_v9 = vunpack.c.h.bf16 %v2076_v62  ;;  %v2079_v17 = vunpack.c.h.bf16 %v2074_v49  ;;  %v604_v56 = vadd.f32 %v603_v25, %v602_v57  ;;  %v420_v53 = vld [vmem:[%s1896_s1 + $0x308] sm:$0xff]  ;;  %v2080_v46 = vld [vmem:[#allocation20_spill] sm:$0xff]  ;;  %v418_v49 = vld [vmem:[%s1896_s1 + $0x2f8] sm:$0x1f] }
  0x6e   : > { %v515_v45 = vmul.f32 %v411_v19, %v2077_v20  ;;  %v684_v40 = vadd.f32 %v683_v44, %v1536_v60  ;;  %v2081_v35 = vunpack.c.l.bf16 %v2080_v46  ;;  %v563_v38 = vadd.f32 %v562_v41, %v561_v55  ;;  %v425_v25 = vld [vmem:[%s1896_s1 + $0x330] sm:$0x1f]  ;;  %v2090_v62 = vld [vmem:[#allocation21_spill] sm:$0xff] }
  0x6f   : > { %v516_v58 = vmul.f32 %v412_v42, %v2078_v9  ;;  %v520_v14 = vmul.f32 %v416_v43, %v2079_v17  ;;  %v606_v30 = vsel %vm531_vm0, %v512_v24, 0.0  ;;  %v645_v27 = vadd.f32 %v644_v13, %v643_v39 }
  0x70   : > { %v527_v47 = vmul.f32 %v423_v31, %v2081_v35  ;;  %v565_v60 = vsel %vm531_vm0, %v519_v5, 0.0  ;;  %v605_v32 = vadd.f32 %v604_v56, %v508_v2  ;;  %v647_v16 = vsel %vm531_vm0, %v1707_v23, 0.0 }
  0x71   : > { %v686_v11 = vadd.f32 %v685_v63, %v684_v40  ;;  %v2083_v59 = vunpack.c.l.bf16 %v2082_v6  ;;  %v564_v36 = vadd.f32 %v563_v38, %v515_v45  ;;  %v646_v51 = vadd.f32 %v645_v27, %v1671_v4  ;;  %v406_v4 = vld [vmem:[%s1896_s1 + $0x298] sm:$0xff] }
  0x72   : > { %v688_v24 = vsel %vm531_vm0, %v1644_v7, 0.0  ;;  %v2085_v19 = vunpack.c.l.bf16 %v2084_v54  ;;  %v2086_v61 = vunpack.c.h.bf16 %v2082_v6  ;;  %v607_v3 = vadd.f32 %v606_v30, %v605_v32  ;;  %v426_v27 = vld [vmem:[%s1896_s1 + $0x338] sm:$0x1f] }
  0x73   : > { %v523_v15 = vmul.f32 %v419_v33, %v2083_v59  ;;  %v687_v48 = vadd.f32 %v686_v11, %v1606_v21  ;;  %v2087_v50 = vunpack.c.h.bf16 %v2080_v46  ;;  %v566_v26 = vadd.f32 %v565_v60, %v564_v36  ;;  %v414_v33 = vld [vmem:[%s1896_s1 + $0x2d8] sm:$0xff] }
  0x74   : > { %v521_v2 = vmul.f32 %v417_v37, %v2085_v19  ;;  %v524_v23 = vmul.f32 %v420_v53, %v2086_v61  ;;  %v609_v42 = vsel %vm531_vm0, %v520_v14, 0.0  ;;  %v648_v43 = vadd.f32 %v647_v16, %v646_v51  ;;  %v2094_v53 = vld [vmem:[#allocation19_spill] sm:$0xff]  ;;  %v422_v11 = vld [vmem:[%s1896_s1 + $0x318] sm:$0xff] }
  0x75   : > { %v528_v7 = vmul.f32 %v424_v1, %v2087_v50  ;;  %v568_v28 = vsel %vm531_vm0, %v527_v47, 0.0  ;;  %v608_v5 = vadd.f32 %v607_v3, %v516_v58  ;;  %v650_v21 = vsel %vm531_vm0, %v513_v22, 0.0  ;;  %v421_v22 = vld [vmem:[%s1896_s1 + $0x310] sm:$0xff] }
  0x76   : > { %v689_v12 = vadd.f32 %v688_v24, %v687_v48  ;;  %v2089_v31 = vunpack.c.l.bf16 %v2088_v10  ;;  %v567_v57 = vadd.f32 %v566_v26, %v523_v15  ;;  %v649_v13 = vadd.f32 %v648_v43, %v1742_v34 }
  0x77   : > { %v691_v44 = vsel %vm531_vm0, %v1718_v18, 0.0  ;;  %v322_v20 = vunpack.c.h.bf16 %v2090_v62  ;;  %v2091_v45 = vunpack.c.h.bf16 %v2065_v52  ;;  %v610_v39 = vadd.f32 %v609_v42, %v608_v5 }
  0x78   : > { %v517_v41 = vmul.f32 %v413_v0, %v2089_v31  ;;  %v690_v63 = vadd.f32 %v689_v12, %v1682_v29  ;;  %v2092_v34 = vunpack.c.h.bf16 %v2084_v54  ;;  %v569_v18 = vadd.f32 %v568_v28, %v567_v57 }
  0x79   : > { %v510_v55 = vmul.f32 %v406_v4, %v2091_v45  ;;  %v612_v58 = vsel %vm531_vm0, %v528_v7, 0.0  ;;  %v651_v17 = vadd.f32 %v650_v21, %v649_v13  ;;  %v2093_v14 = vunpack.c.l.bf16 %v2090_v62 }
  0x7a   : > { %v522_v9 = vmul.f32 %v418_v49, %v2092_v34  ;;  %v611_v40 = vadd.f32 %v610_v39, %v524_v23  ;;  %v653_v52 = vsel %vm531_vm0, %v521_v2, 0.0  ;;  %v692_v37 = vadd.f32 %v691_v44, %v690_v63 }
  0x7b   : > { %v529_v56 = vmul.f32 %v425_v25, %v2093_v14  ;;  %v2095_v29 = vunpack.c.l.bf16 %v2094_v53  ;;  %v570_v35 = vrot.slane %v569_v18, 4  ;;  %v652_v47 = vadd.f32 %v651_v17, %v517_v41 }
  0x7c   : > { %v694_v38 = vsel %vm531_vm0, %v1774_v8, 0.0  ;;  %v318_v30 = vunpack.c.h.bf16 %v2094_v53  ;;  %v2096_v1 = vunpack.c.h.bf16 %v2088_v10  ;;  %v613_v32 = vadd.f32 %v612_v58, %v611_v40 }
  0x7d   : > { %v525_v46 = vmul.f32 %v421_v22, %v2095_v29  ;;  %v693_v16 = vadd.f32 %v692_v37, %v510_v55  ;;  %v571_v6 = vadd.f32 %v570_v35, %v569_v18  ;;  %v654_v59 = vadd.f32 %v653_v52, %v652_v47 }
  0x7e   : > { %v518_v60 = vmul.f32 %v414_v33, %v2096_v1  ;;  %v614_v15 = vrot.slane %v613_v32, 4  ;;  %v656_v8 = vsel %vm531_vm0, %v529_v56, 0.0  ;;  %v530_v51 = vmul.f32 %v426_v27, %v322_v20  ;;  %v715_v33 = vld [vmem:[%s1897_s2] sm:$0x1] }
  0x7f   : > { %v695_v36 = vadd.f32 %v694_v38, %v693_v16  ;;  %v572_v24 = vrot.slane %v571_v6, 2  ;;  %v655_v0 = vadd.f32 %v654_v59, %v525_v46  ;;  %v697_v54 = vsel %vm531_vm0, %v522_v9, 0.0 }
  0x80   : > { %v526_v19 = vmul.f32 %v422_v11, %v318_v30  ;;  %v615_v2 = vadd.f32 %v614_v15, %v613_v32  ;;  %v700_v7 = vsel %vm531_vm0, %v530_v51, 0.0 }
  0x81   : > { %v696_v61 = vadd.f32 %v695_v36, %v518_v60  ;;  %v573_v23 = vadd.f32 %v572_v24, %v571_v6  ;;  %v657_v3 = vadd.f32 %v656_v8, %v655_v0 }
  0x82   : > { %v616_v48 = vrot.slane %v615_v2, 2 }
  0x83   : > { %v698_v4 = vadd.f32 %v697_v54, %v696_v61  ;;  %v658_v50 = vrot.slane %v657_v3, 4  ;;  %v574_v26 = vrot.slane %v573_v23, 1 }
  0x84   : > { %v617_v42 = vadd.f32 %v616_v48, %v615_v2 }
  0x85   : > { %v699_v43 = vadd.f32 %v698_v4, %v526_v19  ;;  %v659_v49 = vadd.f32 %v658_v50, %v657_v3  ;;  %v575_v12 = vadd.f32 %v574_v26, %v573_v23 }
  0x86   : > { %v618_v28 = vrot.slane %v617_v42, 1 }
  0x87   : > { %v701_v5 = vadd.f32 %v700_v7, %v699_v43  ;;  %v660_v21 = vrot.slane %v659_v49, 2 }
  0x88   : > { %v619_v25 = vadd.f32 %v618_v28, %v617_v42 }
  0x89   : > { %v702_v10 = vrot.slane %v701_v5, 4  ;;  %v661_v31 = vadd.f32 %v660_v21, %v659_v49 }
  0x8a   : > { %v708_v44 = vadd.f32 %v619_v25, %v575_v12 }
  0x8b   : > { %v703_v41 = vadd.f32 %v702_v10, %v701_v5  ;;  %v662_v57 = vrot.slane %v661_v31, 1 }
  0x8d   : > { %v704_v13 = vrot.slane %v703_v41, 2  ;;  %v663_v62 = vadd.f32 %v662_v57, %v661_v31 }
  0x8f   : > { %v705_v20 = vadd.f32 %v704_v13, %v703_v41  ;;  %v709_v45 = vadd.f32 %v708_v44, %v663_v62 }
  0x91   : > { %v706_v22 = vrot.slane %v705_v20, 1 }
  0x93   : > { %v707_v55 = vadd.f32 %v706_v22, %v705_v20 }
  0x95   : > { %v710_v39 = vadd.f32 %v709_v45, %v707_v55 }
  0x97   : > { %711 = vadd.xlane.f32.xlu0 %v710_v39 }
 0x124   : > { %v712_v63 = vpop.xlane.xlu0 %711 }
 0x125   : > { %775 = vpush %v712_v63 }
 0x156   : > { %s776_s26 = spop %775 }
 0x157   : > { %s714_s27 = smul.f32 0.01, %s776_s26 }
 0x159   : > { %v716_v34 = vstv %s714_s27 }
 0x15a   : > { %v717_v9 = vadd.f32 %v716_v34, %v715_v33 }
 0x15c   : > { %718 = vst [vmem:[%s166_s5] sm:$0x1] %v717_v9 }
 0x15d PF: > { %s13_s12 = sadd.s32 1, %s791_s12  }
 0x15e   : > { %p10_p4 = scmp.ge.s32.totalorder %s13_s12, 4  }
 0x160   :  { %12 = sbr.rel (!%p10_p4) target bundleno = 1 (0x1), region = 62 }

</bundles_post_ra>
